<compile_context>
chip_gen: v7x
topology: tpu7x:2x2x1
jax: 0.10.0
libtpu: 0.0.40
codegen_flags: <defaults>
</compile_context>

<pallas_src>
import numpy as np

import jax
import jax.numpy as jnp
from jax.experimental import pallas as pl
from jax.experimental.pallas import tpu as pltpu


# ---------------------------------------------------------------------------
# Fused kernel: entire ChessQ forward for one batch tile.
# ---------------------------------------------------------------------------
def _chessq_kernel(board_ref, add_ref,
                   a1_ref, b1_ref,        # (768, 1152) = [conv1 | fc2 | 0], bias (1, 1152)
                   wz_ref,                # (128, 128)  fc_additional1, packed into cols 64:128
                   a2_ref, b2_ref,        # (1024, 2048) conv2, bias (1, 2048)
                   wfc1_ref, bfc1_ref,    # (2048, 256), (1, 256)
                   wc1_ref, bc1_ref,      # (384, 128),  (1, 128)
                   wc2_ref, bc2_ref,      # (1, 128),    (1, 1)
                   out_ref):
    f32 = jnp.float32
    bf16 = jnp.bfloat16

    board = board_ref[...]                                  # (T, 768) bf16

    # conv1 + fc2 fused: (T,768) @ (768, 1024+128); bias already contains
    # [conv1 bias (per-channel, repeated 64x) | fc2 bias | fc_additional1 bias].
    h1all = jnp.dot(board, a1_ref[...], preferred_element_type=f32) + b1_ref[...]

    # fc_additional1 contribution lands in the lane-aligned 128-wide tail
    # (cols 64:128 of the tail; cols 0:64 of wz are zero so y is untouched).
    tail = h1all[:, 1024:] + jnp.dot(add_ref[...], wz_ref[...],
                                     preferred_element_type=f32)
    h1 = jnp.maximum(h1all[:, :1024], 0.0).astype(bf16)     # (T, 1024) conv1 out
    yz = jnp.maximum(tail, 0.0).astype(bf16)                # (T, 128) = [y | z]

    # conv2 (+ReLU): (T,1024) @ (1024,2048)
    h2 = jnp.dot(h1, a2_ref[...], preferred_element_type=f32)
    h2 = jnp.maximum(h2 + b2_ref[...], 0.0).astype(bf16)    # (T, 2048) == NCHW flatten

    # fc1 (+ReLU): (T,2048) @ (2048,256)
    x = jnp.dot(h2, wfc1_ref[...], preferred_element_type=f32)
    x = jnp.maximum(x + bfc1_ref[...], 0.0).astype(bf16)    # (T, 256)

    # fc_combined1 (+ReLU): concat([x, y, z]) @ W as one (T,384)@(384,128) matmul
    xyz = jnp.concatenate([x, yz], axis=-1)                 # (T, 384), lane-aligned concat
    c = jnp.dot(xyz, wc1_ref[...], preferred_element_type=f32)
    c = jnp.maximum(c + bc1_ref[...], 0.0)                  # (T, 128) f32

    # fc_combined2 (N=1): VPU multiply + lane reduction instead of a 1-wide MXU pass.
    logit = jnp.sum(c * wc2_ref[...], axis=-1, keepdims=True) + bc2_ref[...]
    out_ref[...] = logit.astype(out_ref.dtype)              # (T, 1)


# ---------------------------------------------------------------------------
# Parameter construction / preparation.
# ---------------------------------------------------------------------------
def init_params(key):
    """Deterministic PyTorch-style uniform(-1/sqrt(fan_in), ..) init (raw layout)."""
    def lin(k, fan_in, fan_out):
        kw, kb = jax.random.split(k)
        lim = 1.0 / jnp.sqrt(jnp.float32(fan_in))
        w = jax.random.uniform(kw, (fan_in, fan_out), jnp.float32, -lim, lim)
        b = jax.random.uniform(kb, (fan_out,), jnp.float32, -lim, lim)
        return w, b

    def conv(k, cin, cout):
        kw, kb = jax.random.split(k)
        fan_in = cin * 9
        lim = 1.0 / jnp.sqrt(jnp.float32(fan_in))
        w = jax.random.uniform(kw, (cout, cin, 3, 3), jnp.float32, -lim, lim)
        b = jax.random.uniform(kb, (cout,), jnp.float32, -lim, lim)
        return w, b

    keys = jax.random.split(key, 7)
    return {
        "conv1": conv(keys[0], 12, 16),
        "conv2": conv(keys[1], 16, 32),
        "fc1": lin(keys[2], 32 * 8 * 8, 256),
        # TODO(synk): the original module declares fc2 = Linear(8*8, 64) but applies
        # it to the 768-wide flattened board (a shape bug that errors in PyTorch);
        # we size it as Linear(12*8*8, 64) so the forward runs.
        "fc2": lin(keys[3], 12 * 8 * 8, 64),
        "fc_additional1": lin(keys[4], 71, 64),
        "fc_combined1": lin(keys[5], 256 + 64 + 64, 128),
        "fc_combined2": lin(keys[6], 128, 1),
    }


def _conv3x3_as_dense(w_np, b_np, H=8, W=8):
    """3x3 conv (padding=1) as a dense matrix on NCHW-flattened activations.

    w_np: (O, C, 3, 3) PyTorch layout. Returns A: (C*H*W, O*H*W), bias: (O*H*W,).
    """
    O, C, _, _ = w_np.shape
    A = np.zeros((C, H, W, O, H, W), np.float32)
    for ki in range(3):
        for kj in range(3):
            ho_lo, ho_hi = max(0, 1 - ki), min(H, H + 1 - ki)
            wo_lo, wo_hi = max(0, 1 - kj), min(W, W + 1 - kj)
            tap = np.asarray(w_np[:, :, ki, kj], np.float32).T  # (C, O)
            for ho in range(ho_lo, ho_hi):
                hi = ho + ki - 1
                for wo in range(wo_lo, wo_hi):
                    wi = wo + kj - 1
                    A[:, hi, wi, :, ho, wo] += tap
    A = A.reshape(C * H * W, O * H * W)
    bias = np.repeat(np.asarray(b_np, np.float32), H * W)       # index co*64+h*8+w
    return A, bias


def prepare_params(raw):
    """One-time transform of raw params into the fused-kernel layout (bf16 weights)."""
    def bf(a):
        return jnp.asarray(np.asarray(a, np.float32), jnp.bfloat16)

    def row(a):
        return jnp.asarray(np.asarray(a, np.float32).reshape(1, -1), jnp.float32)

    a1, b1 = _conv3x3_as_dense(np.asarray(raw["conv1"][0]), np.asarray(raw["conv1"][1]))
    a2, b2 = _conv3x3_as_dense(np.asarray(raw["conv2"][0]), np.asarray(raw["conv2"][1]))

    wfc1, bfc1 = raw["fc1"]
    wfc2, bfc2 = raw["fc2"]
    wadd, badd = raw["fc_additional1"]
    wc1, bc1 = raw["fc_combined1"]
    wc2, bc2 = raw["fc_combined2"]

    # Fuse conv1 + fc2 into one (768, 1152) weight (slice at the lane-aligned
    # 1024 boundary).  Tail cols 0:64 = fc2 (y), cols 64:128 reserved for z.
    a1ext = np.zeros((768, 1152), np.float32)
    a1ext[:, :1024] = a1
    a1ext[:, 1024:1088] = np.asarray(wfc2, np.float32)
    b1ext = np.zeros((1152,), np.float32)
    b1ext[:1024] = b1
    b1ext[1024:1088] = np.asarray(bfc2, np.float32)
    b1ext[1088:] = np.asarray(badd, np.float32)

    # fc_additional1 with K=71 zero-padded to 128, placed in cols 64:128 so it
    # only touches the z half of the 128-wide tail.
    wz = np.zeros((128, 128), np.float32)
    wz[:71, 64:] = np.asarray(wadd, np.float32)

    return {
        "a1": bf(a1ext), "b1": row(b1ext),
        "wz": bf(wz),
        "a2": bf(a2), "b2": row(b2),
        "wfc1": bf(wfc1), "bfc1": row(bfc1),
        "wc1": bf(wc1), "bc1": row(bc1),
        "wc2": jnp.asarray(np.asarray(wc2, np.float32).reshape(1, 128)),  # VPU side: f32
        "bc2": jnp.asarray(np.asarray(bc2, np.float32).reshape(1, 1)),
    }


_PARAM_ORDER = ["a1", "b1", "wz", "a2", "b2", "wfc1", "bfc1",
                "wc1", "bc1", "wc2", "bc2"]


def _round_up(x, m):
    return (x + m - 1) // m * m


def _weight_spec(shape):
    """Constant-index weight BlockSpec; single-buffered (no dead second copy)."""
    try:
        return pl.BlockSpec(shape, lambda i: (0, 0), pipeline_mode=pl.Buffered(1))
    except (TypeError, AttributeError):
        # Older JAX without pipeline_mode support: fall back to the default.
        return pl.BlockSpec(shape, lambda i: (0, 0))


# ---------------------------------------------------------------------------
# Forward pass (single pallas_call, batch-tiled grid).
# ---------------------------------------------------------------------------
def chessq_forward(params, board_tensor, additional_info, action=None, *, tile_b=512):
    # `action` is accepted (matching the PyTorch forward signature) but unused.
    B = board_tensor.shape[0]
    board_flat = board_tensor.reshape(B, 12 * 8 * 8).astype(jnp.bfloat16)  # NCHW flatten
    add = additional_info.astype(jnp.float32)
    add_pad = jnp.pad(add, ((0, 0), (0, 128 - add.shape[1]))).astype(jnp.bfloat16)

    # Batch tile: big enough to amortize the ~0.35us/step grid overhead, but
    # producing >=2 grid steps whenever possible so "parallel" can shard the
    # batch across v7x's two TensorCores.  tb is a multiple of 8 or == B
    # (the (8,128) block constraint).
    if B <= 8:
        tb = B
    else:
        tb = min(int(tile_b), _round_up(pl.cdiv(B, 2), 8))
        tb = max(8, (tb // 8) * 8)
    grid = (pl.cdiv(B, tb),)

    weights = [params[name] for name in _PARAM_ORDER]
    in_specs = ([pl.BlockSpec((tb, 768), lambda i: (i, 0)),
                 pl.BlockSpec((tb, 128), lambda i: (i, 0))]
                + [_weight_spec(w.shape) for w in weights])
    out_specs = pl.BlockSpec((tb, 1), lambda i: (i, 0))

    return pl.pallas_call(
        _chessq_kernel,
        out_shape=jax.ShapeDtypeStruct((B, 1), jnp.float32),
        grid=grid,
        in_specs=in_specs,
        out_specs=out_specs,
        compiler_params=pltpu.CompilerParams(
            dimension_semantics=("parallel",),          # megacore-shard the batch tiles
            vmem_limit_bytes=48 * 1024 * 1024,          # fits v7x 64 MiB with headroom
        ),
    )(board_flat, add_pad, *weights)


# ---------------------------------------------------------------------------
# Pure-JAX fp32 reference (mirrors the PyTorch module, fc2 sized 768->64).
# ---------------------------------------------------------------------------
def chessq_forward_reference(raw, board, add):
    w1, b1 = raw["conv1"]
    w2, b2 = raw["conv2"]
    dn = ("NCHW", "OIHW", "NCHW")
    x = jax.lax.conv_general_dilated(board, w1, (1, 1), ((1, 1), (1, 1)),
                                     dimension_numbers=dn)
    x = jax.nn.relu(x + b1[None, :, None, None])
    x = jax.lax.conv_general_dilated(x, w2, (1, 1), ((1, 1), (1, 1)),
                                     dimension_numbers=dn)
    x = jax.nn.relu(x + b2[None, :, None, None])
    B = board.shape[0]
    x = jax.nn.relu(x.reshape(B, -1) @ raw["fc1"][0] + raw["fc1"][1])
    y = jax.nn.relu(board.reshape(B, -1) @ raw["fc2"][0] + raw["fc2"][1])
    z = jax.nn.relu(add @ raw["fc_additional1"][0] + raw["fc_additional1"][1])
    comb = jnp.concatenate([x, y, z], axis=1)
    comb = jax.nn.relu(comb @ raw["fc_combined1"][0] + raw["fc_combined1"][1])
    return comb @ raw["fc_combined2"][0] + raw["fc_combined2"][1]


if __name__ == "__main__":
    key = jax.random.PRNGKey(0)
    kp, kb, ka = jax.random.split(key, 3)
    raw_params = init_params(kp)
    params = prepare_params(raw_params)

    fwd = jax.jit(chessq_forward)

    # --- Small smoke test (B=2, single grid step) ---------------------------
    B = 2
    board = jax.random.normal(kb, (B, 12, 8, 8), jnp.float32)
    add_info = jax.random.normal(ka, (B, 71), jnp.float32)
    action = jnp.zeros((B,), jnp.int32)   # unused by the forward, as in PyTorch

    logit = fwd(params, board, add_info, action)
    jax.block_until_ready(logit)
    assert logit.shape == (B, 1) and logit.dtype == jnp.float32

    ref = chessq_forward_reference(raw_params, board, add_info)
    np.testing.assert_allclose(np.asarray(logit), np.asarray(ref),
                               rtol=5e-2, atol=5e-2)

    # --- Ragged, multi-tile batch (>=2 grid steps + partial last tile) ------
    B2 = 20
    board2 = jax.random.normal(jax.random.fold_in(kb, 1), (B2, 12, 8, 8), jnp.float32)
    add2 = jax.random.normal(jax.random.fold_in(ka, 1), (B2, 71), jnp.float32)
    logit2 = fwd(params, board2, add2, jnp.zeros((B2,), jnp.int32))
    jax.block_until_ready(logit2)
    assert logit2.shape == (B2, 1)

    ref2 = chessq_forward_reference(raw_params, board2, add2)
    np.testing.assert_allclose(np.asarray(logit2), np.asarray(ref2),
                               rtol=5e-2, atol=5e-2)

    print("KERNEL_OK")
</pallas_src>

<mosaic_0001>
module attributes {stable_mosaic.version = 11 : i64} {
  func.func @_chessq_kernel(%arg0: i32, %arg1: memref<2x768xbf16, #tpu.memory_space<vmem>>, %arg2: memref<2x128xbf16, #tpu.memory_space<vmem>>, %arg3: memref<768x1152xbf16, #tpu.memory_space<vmem>>, %arg4: memref<1x1152xf32, #tpu.memory_space<vmem>>, %arg5: memref<128x128xbf16, #tpu.memory_space<vmem>>, %arg6: memref<1024x2048xbf16, #tpu.memory_space<vmem>>, %arg7: memref<1x2048xf32, #tpu.memory_space<vmem>>, %arg8: memref<2048x256xbf16, #tpu.memory_space<vmem>>, %arg9: memref<1x256xf32, #tpu.memory_space<vmem>>, %arg10: memref<384x128xbf16, #tpu.memory_space<vmem>>, %arg11: memref<1x128xf32, #tpu.memory_space<vmem>>, %arg12: memref<1x128xf32, #tpu.memory_space<vmem>>, %arg13: memref<1x1xf32, #tpu.memory_space<vmem>>, %arg14: memref<2x1xf32, #tpu.memory_space<vmem>>) attributes {dimension_semantics = [#tpu.dimension_semantics<parallel>], iteration_bounds = array<i64: 1>, scalar_prefetch = 0 : i64, scratch_operands = 0 : i64, tpu.core_type = #tpu.core_type<tc>, window_params = [{transform_indices = @transform_0, window_bounds = array<i64: 2, 768>}, {transform_indices = @transform_1, window_bounds = array<i64: 2, 128>}, {pipeline_mode = #tpu.pipeline_mode<synchronous>, transform_indices = @transform_2, window_bounds = array<i64: 768, 1152>}, {pipeline_mode = #tpu.pipeline_mode<synchronous>, transform_indices = @transform_3, window_bounds = array<i64: 1, 1152>}, {pipeline_mode = #tpu.pipeline_mode<synchronous>, transform_indices = @transform_4, window_bounds = array<i64: 128, 128>}, {pipeline_mode = #tpu.pipeline_mode<synchronous>, transform_indices = @transform_5, window_bounds = array<i64: 1024, 2048>}, {pipeline_mode = #tpu.pipeline_mode<synchronous>, transform_indices = @transform_6, window_bounds = array<i64: 1, 2048>}, {pipeline_mode = #tpu.pipeline_mode<synchronous>, transform_indices = @transform_7, window_bounds = array<i64: 2048, 256>}, {pipeline_mode = #tpu.pipeline_mode<synchronous>, transform_indices = @transform_8, window_bounds = array<i64: 1, 256>}, {pipeline_mode = #tpu.pipeline_mode<synchronous>, transform_indices = @transform_9, window_bounds = array<i64: 384, 128>}, {pipeline_mode = #tpu.pipeline_mode<synchronous>, transform_indices = @transform_10, window_bounds = array<i64: 1, 128>}, {pipeline_mode = #tpu.pipeline_mode<synchronous>, transform_indices = @transform_11, window_bounds = array<i64: 1, 128>}, {pipeline_mode = #tpu.pipeline_mode<synchronous>, transform_indices = @transform_12, window_bounds = array<i64: 1, 1>}, {transform_indices = @transform_13, window_bounds = array<i64: 2, 1>}]} {
    %c0 = arith.constant 0 : index
    %c0_0 = arith.constant 0 : index
    %0 = vector.load %arg1[%c0, %c0_0] : memref<2x768xbf16, #tpu.memory_space<vmem>>, vector<2x768xbf16>
    %c0_1 = arith.constant 0 : index
    %c0_2 = arith.constant 0 : index
    %1 = vector.load %arg3[%c0_1, %c0_2] : memref<768x1152xbf16, #tpu.memory_space<vmem>>, vector<768x1152xbf16>
    %cst = arith.constant dense<0.000000e+00> : vector<2x1152xf32>
    %2 = tpu.matmul %0, %1, %cst {dimension_numbers = #tpu.dot_dimension_numbers<[1], [0], [0], [1], [0, 0, 1, 1], [], []>} : vector<2x768xbf16>, vector<768x1152xbf16>, vector<2x1152xf32> -> vector<2x1152xf32>
    %c0_3 = arith.constant 0 : index
    %c0_4 = arith.constant 0 : index
    %3 = vector.load %arg4[%c0_3, %c0_4] : memref<1x1152xf32, #tpu.memory_space<vmem>>, vector<1x1152xf32>
    %4 = vector.broadcast %3 : vector<1x1152xf32> to vector<2x1152xf32>
    %5 = arith.addf %2, %4 : vector<2x1152xf32>
    %6 = vector.extract_strided_slice %5 {offsets = [0, 1024], sizes = [2, 128], strides = [1, 1]} : vector<2x1152xf32> to vector<2x128xf32>
    %c0_5 = arith.constant 0 : index
    %c0_6 = arith.constant 0 : index
    %7 = vector.load %arg2[%c0_5, %c0_6] : memref<2x128xbf16, #tpu.memory_space<vmem>>, vector<2x128xbf16>
    %c0_7 = arith.constant 0 : index
    %c0_8 = arith.constant 0 : index
    %8 = vector.load %arg5[%c0_7, %c0_8] : memref<128x128xbf16, #tpu.memory_space<vmem>>, vector<128x128xbf16>
    %cst_9 = arith.constant dense<0.000000e+00> : vector<2x128xf32>
    %9 = tpu.matmul %7, %8, %cst_9 {dimension_numbers = #tpu.dot_dimension_numbers<[1], [0], [0], [1], [0, 0, 1, 1], [], []>} : vector<2x128xbf16>, vector<128x128xbf16>, vector<2x128xf32> -> vector<2x128xf32>
    %10 = arith.addf %6, %9 : vector<2x128xf32>
    %11 = vector.extract_strided_slice %5 {offsets = [0, 0], sizes = [2, 1024], strides = [1, 1]} : vector<2x1152xf32> to vector<2x1024xf32>
    %cst_10 = arith.constant 0.000000e+00 : f32
    %12 = vector.broadcast %cst_10 : f32 to vector<2x1024xf32>
    %13 = arith.maximumf %11, %12 : vector<2x1024xf32>
    %14 = arith.truncf %13 : vector<2x1024xf32> to vector<2x1024xbf16>
    %cst_11 = arith.constant 0.000000e+00 : f32
    %15 = vector.broadcast %cst_11 : f32 to vector<2x128xf32>
    %16 = arith.maximumf %10, %15 : vector<2x128xf32>
    %17 = arith.truncf %16 : vector<2x128xf32> to vector<2x128xbf16>
    %c0_12 = arith.constant 0 : index
    %c0_13 = arith.constant 0 : index
    %18 = vector.load %arg6[%c0_12, %c0_13] : memref<1024x2048xbf16, #tpu.memory_space<vmem>>, vector<1024x2048xbf16>
    %cst_14 = arith.constant dense<0.000000e+00> : vector<2x2048xf32>
    %19 = tpu.matmul %14, %18, %cst_14 {dimension_numbers = #tpu.dot_dimension_numbers<[1], [0], [0], [1], [0, 0, 1, 1], [], []>} : vector<2x1024xbf16>, vector<1024x2048xbf16>, vector<2x2048xf32> -> vector<2x2048xf32>
    %c0_15 = arith.constant 0 : index
    %c0_16 = arith.constant 0 : index
    %20 = vector.load %arg7[%c0_15, %c0_16] : memref<1x2048xf32, #tpu.memory_space<vmem>>, vector<1x2048xf32>
    %21 = vector.broadcast %20 : vector<1x2048xf32> to vector<2x2048xf32>
    %22 = arith.addf %19, %21 : vector<2x2048xf32>
    %cst_17 = arith.constant 0.000000e+00 : f32
    %23 = vector.broadcast %cst_17 : f32 to vector<2x2048xf32>
    %24 = arith.maximumf %22, %23 : vector<2x2048xf32>
    %25 = arith.truncf %24 : vector<2x2048xf32> to vector<2x2048xbf16>
    %c0_18 = arith.constant 0 : index
    %c0_19 = arith.constant 0 : index
    %26 = vector.load %arg8[%c0_18, %c0_19] : memref<2048x256xbf16, #tpu.memory_space<vmem>>, vector<2048x256xbf16>
    %cst_20 = arith.constant dense<0.000000e+00> : vector<2x256xf32>
    %27 = tpu.matmul %25, %26, %cst_20 {dimension_numbers = #tpu.dot_dimension_numbers<[1], [0], [0], [1], [0, 0, 1, 1], [], []>} : vector<2x2048xbf16>, vector<2048x256xbf16>, vector<2x256xf32> -> vector<2x256xf32>
    %c0_21 = arith.constant 0 : index
    %c0_22 = arith.constant 0 : index
    %28 = vector.load %arg9[%c0_21, %c0_22] : memref<1x256xf32, #tpu.memory_space<vmem>>, vector<1x256xf32>
    %29 = vector.broadcast %28 : vector<1x256xf32> to vector<2x256xf32>
    %30 = arith.addf %27, %29 : vector<2x256xf32>
    %cst_23 = arith.constant 0.000000e+00 : f32
    %31 = vector.broadcast %cst_23 : f32 to vector<2x256xf32>
    %32 = arith.maximumf %30, %31 : vector<2x256xf32>
    %33 = arith.truncf %32 : vector<2x256xf32> to vector<2x256xbf16>
    %34 = tpu.concatenate %33, %17 in 1 : vector<2x256xbf16>, vector<2x128xbf16> -> vector<2x384xbf16>
    %c0_24 = arith.constant 0 : index
    %c0_25 = arith.constant 0 : index
    %35 = vector.load %arg10[%c0_24, %c0_25] : memref<384x128xbf16, #tpu.memory_space<vmem>>, vector<384x128xbf16>
    %cst_26 = arith.constant dense<0.000000e+00> : vector<2x128xf32>
    %36 = tpu.matmul %34, %35, %cst_26 {dimension_numbers = #tpu.dot_dimension_numbers<[1], [0], [0], [1], [0, 0, 1, 1], [], []>} : vector<2x384xbf16>, vector<384x128xbf16>, vector<2x128xf32> -> vector<2x128xf32>
    %c0_27 = arith.constant 0 : index
    %c0_28 = arith.constant 0 : index
    %37 = vector.load %arg11[%c0_27, %c0_28] : memref<1x128xf32, #tpu.memory_space<vmem>>, vector<1x128xf32>
    %38 = vector.broadcast %37 : vector<1x128xf32> to vector<2x128xf32>
    %39 = arith.addf %36, %38 : vector<2x128xf32>
    %cst_29 = arith.constant 0.000000e+00 : f32
    %40 = vector.broadcast %cst_29 : f32 to vector<2x128xf32>
    %41 = arith.maximumf %39, %40 : vector<2x128xf32>
    %c0_30 = arith.constant 0 : index
    %c0_31 = arith.constant 0 : index
    %42 = vector.load %arg12[%c0_30, %c0_31] : memref<1x128xf32, #tpu.memory_space<vmem>>, vector<1x128xf32>
    %43 = vector.broadcast %42 : vector<1x128xf32> to vector<2x128xf32>
    %44 = arith.mulf %41, %43 : vector<2x128xf32>
    %cst_32 = arith.constant dense<0.000000e+00> : vector<2xf32>
    %45 = vector.multi_reduction <add>, %44, %cst_32 [1] : vector<2x128xf32> to vector<2xf32>
    %46 = vector.shape_cast %45 : vector<2xf32> to vector<2x1xf32>
    %c0_33 = arith.constant 0 : index
    %c0_34 = arith.constant 0 : index
    %47 = vector.load %arg13[%c0_33, %c0_34] : memref<1x1xf32, #tpu.memory_space<vmem>>, vector<1x1xf32>
    %48 = vector.broadcast %47 : vector<1x1xf32> to vector<2x1xf32>
    %49 = arith.addf %46, %48 : vector<2x1xf32>
    %c0_35 = arith.constant 0 : index
    %c0_36 = arith.constant 0 : index
    %50 = vector.load %arg14[%c0_35, %c0_36] : memref<2x1xf32, #tpu.memory_space<vmem>>, vector<2x1xf32>
    tpu.vector_store %arg14[%c0_35, %c0_36], %49 {strides = array<i32>} : memref<2x1xf32, #tpu.memory_space<vmem>>, vector<2x1xf32>,
    return
  }
  func.func @transform_0(%arg0: i32) -> (i32, i32) {
    %c0_i32 = arith.constant 0 : i32
    %c0_i32_0 = arith.constant 0 : i32
    return %arg0, %c0_i32 : i32, i32
  }
  func.func @transform_1(%arg0: i32) -> (i32, i32) {
    %c0_i32 = arith.constant 0 : i32
    %c0_i32_0 = arith.constant 0 : i32
    return %arg0, %c0_i32 : i32, i32
  }
  func.func @transform_2(%arg0: i32) -> (i32, i32) {
    %c0_i32 = arith.constant 0 : i32
    %c0_i32_0 = arith.constant 0 : i32
    %c0_i32_1 = arith.constant 0 : i32
    return %c0_i32, %c0_i32_0 : i32, i32
  }
  func.func @transform_3(%arg0: i32) -> (i32, i32) {
    %c0_i32 = arith.constant 0 : i32
    %c0_i32_0 = arith.constant 0 : i32
    %c0_i32_1 = arith.constant 0 : i32
    return %c0_i32, %c0_i32_0 : i32, i32
  }
  func.func @transform_4(%arg0: i32) -> (i32, i32) {
    %c0_i32 = arith.constant 0 : i32
    %c0_i32_0 = arith.constant 0 : i32
    %c0_i32_1 = arith.constant 0 : i32
    return %c0_i32, %c0_i32_0 : i32, i32
  }
  func.func @transform_5(%arg0: i32) -> (i32, i32) {
    %c0_i32 = arith.constant 0 : i32
    %c0_i32_0 = arith.constant 0 : i32
    %c0_i32_1 = arith.constant 0 : i32
    return %c0_i32, %c0_i32_0 : i32, i32
  }
  func.func @transform_6(%arg0: i32) -> (i32, i32) {
    %c0_i32 = arith.constant 0 : i32
    %c0_i32_0 = arith.constant 0 : i32
    %c0_i32_1 = arith.constant 0 : i32
    return %c0_i32, %c0_i32_0 : i32, i32
  }
  func.func @transform_7(%arg0: i32) -> (i32, i32) {
    %c0_i32 = arith.constant 0 : i32
    %c0_i32_0 = arith.constant 0 : i32
    %c0_i32_1 = arith.constant 0 : i32
    return %c0_i32, %c0_i32_0 : i32, i32
  }
  func.func @transform_8(%arg0: i32) -> (i32, i32) {
    %c0_i32 = arith.constant 0 : i32
    %c0_i32_0 = arith.constant 0 : i32
    %c0_i32_1 = arith.constant 0 : i32
    return %c0_i32, %c0_i32_0 : i32, i32
  }
  func.func @transform_9(%arg0: i32) -> (i32, i32) {
    %c0_i32 = arith.constant 0 : i32
    %c0_i32_0 = arith.constant 0 : i32
    %c0_i32_1 = arith.constant 0 : i32
    return %c0_i32, %c0_i32_0 : i32, i32
  }
  func.func @transform_10(%arg0: i32) -> (i32, i32) {
    %c0_i32 = arith.constant 0 : i32
    %c0_i32_0 = arith.constant 0 : i32
    %c0_i32_1 = arith.constant 0 : i32
    return %c0_i32, %c0_i32_0 : i32, i32
  }
  func.func @transform_11(%arg0: i32) -> (i32, i32) {
    %c0_i32 = arith.constant 0 : i32
    %c0_i32_0 = arith.constant 0 : i32
    %c0_i32_1 = arith.constant 0 : i32
    return %c0_i32, %c0_i32_0 : i32, i32
  }
  func.func @transform_12(%arg0: i32) -> (i32, i32) {
    %c0_i32 = arith.constant 0 : i32
    %c0_i32_0 = arith.constant 0 : i32
    %c0_i32_1 = arith.constant 0 : i32
    return %c0_i32, %c0_i32_0 : i32, i32
  }
  func.func @transform_13(%arg0: i32) -> (i32, i32) {
    %c0_i32 = arith.constant 0 : i32
    %c0_i32_0 = arith.constant 0 : i32
    return %arg0, %c0_i32 : i32, i32
  }
}

</mosaic_0001>

<bundles_post_ra>
// kernel: chessq_forward.1
= control target key start
LH: loop header
LB: loop body
LE: loop exit
PB: predicated region body
PF: predicated region fallthrough
CT: control target
= control target key end

     0   :  { %s17404_s0 = inlined_call_operand.vmem [shape: bf16[2,768], index: 0, kind: input, shape index: {}]   ;;  %s17405_s1 = inlined_call_operand.vmem [shape: bf16[2,128], index: 1, kind: input, shape index: {}]   ;;  %s17406_s2 = inlined_call_operand.hbm [shape: bf16[768,1152], index: 2, kind: input, shape index: {}]   ;;  %s17407_s3 = inlined_call_operand.hbm [shape: f32[1,1152], index: 3, kind: input, shape index: {}]   ;;  %s17408_s4 = inlined_call_operand.hbm [shape: bf16[128,128], index: 4, kind: input, shape index: {}]   ;;  %s17409_s5 = inlined_call_operand.hbm [shape: bf16[1024,2048], index: 5, kind: input, shape index: {}]   ;;  %s17410_s6 = inlined_call_operand.hbm [shape: f32[1,2048], index: 6, kind: input, shape index: {}]   ;;  %s17411_s7 = inlined_call_operand.hbm [shape: bf16[2048,256], index: 7, kind: input, shape index: {}]   ;;  %s17412_s8 = inlined_call_operand.hbm [shape: f32[1,256], index: 8, kind: input, shape index: {}]   ;;  %s17413_s9 = inlined_call_operand.hbm [shape: bf16[384,128], index: 9, kind: input, shape index: {}]   ;;  %s17414_s10 = inlined_call_operand.hbm [shape: f32[1,128], index: 10, kind: input, shape index: {}]   ;;  %s17415_s11 = inlined_call_operand.hbm [shape: f32[1,128], index: 11, kind: input, shape index: {}]   ;;  %s17416_s12 = inlined_call_operand.<no memory space> [shape: f32[1,1], index: 12, kind: input, shape index: {}]   ;;  %s17417_s13 = inlined_call_operand.vmem [shape: f32[2,1], index: 13, kind: output, shape index: {}]  }
   0x1   :  { %v18_v0 = vstv %s17416_s12 }
   0x2   :  { %19 = vst [vmem:[#allocation2] sm:$0x1] %v18_v0 }
   0x3   :  { %20 = vsyncpa [#allocation4], 0 }
   0x4   :  { %21 = vsyncpa [#allocation6], 0 }
   0x5   :  { %22 = vsyncpa [#allocation9], 0 }
   0x6   :  { %23 = vsyncpa [#allocation12], 0 }
   0x7   :  { %24 = vsyncpa [#allocation15], 0 }
   0x8   :  { %25 = vsyncpa [#allocation18], 0  ;;  %s16836_s27 = smov [#allocation5]   ;;  %s16837_s29 = smov [#allocation8]  }
   0x9   :  { %s48_s28 = sshll.u32 %s16836_s27, 4  ;;  %s69_s30 = sshll.u32 %s16837_s29, 4  ;;  %s49_s28 = int_to_ptr.vmem [resolvable:$true] %s48_s28  ;;  %s70_s30 = int_to_ptr.vmem [resolvable:$true] %s69_s30 }
   0xa   :  { %s16604_s16 = scalar_lea.hbm %s17407_s3, 144 }
   0xb   :  { %p16605_p0 = scmp.ne.s32.totalorder %s17407_s3, %s16604_s16  ;;  %p16608_p1 = scmp.lt.u32.totalorder %s16604_s16, %s17407_s3 }
   0xd   :  { %p16610_p2 = pnand %p16608_p1, %p16605_p0 }
   0xf   :  { %16613 = shalt.err (!%p16610_p2)
}
  0x10   :  { %s16614_s20 = scalar_lea.vmem %s49_s28, 144  ;;  %s16618_s21 = scalar_lea.vmem %s49_s28, 160 }
  0x11   :  { %p16615_p3 = scmp.ne.s32.totalorder %s49_s28, %s16614_s20  ;;  %p16619_p4 = scmp.lt.s32.totalorder %s49_s28, %s49_s28 }
  0x12   :  { %p16620_p5 = scmp.lt.s32.totalorder %s16618_s21, %s16614_s20 }
  0x14   :  { %p16621_p6 = por %p16620_p5, %p16619_p4 }
  0x16   :  { %p16622_p7 = pnand %p16621_p6, %p16615_p3 }
  0x18   :  { %16625 = shalt.err (!%p16622_p7)
}
  0x19   :  { %51 = dma.hbm_to_vmem [thread:$0]  %s17407_s3, 144, %s49_s28, [#allocation6]  }
  0x1a   :  { %s16626_s26 = scalar_lea.hbm %s17409_s5, 131072 }
  0x1b   :  { %p16627_p8 = scmp.ne.s32.totalorder %s17409_s5, %s16626_s26  ;;  %p16630_p9 = scmp.lt.u32.totalorder %s16626_s26, %s17409_s5 }
  0x1d   :  { %p16632_p10 = pnand %p16630_p9, %p16627_p8 }
  0x1f   :  { %16635 = shalt.err (!%p16632_p10)
}
  0x20   :  { %s16636_s16 = scalar_lea.vmem %s70_s30, 131072  ;;  %p16641_p12 = scmp.lt.s32.totalorder %s70_s30, %s70_s30 }
  0x21   :  { %p16637_p11 = scmp.ne.s32.totalorder %s70_s30, %s16636_s16  ;;  %p16642_p13 = scmp.lt.s32.totalorder %s16636_s16, %s16636_s16 }
  0x23   :  { %p16643_p0 = por %p16642_p13, %p16641_p12 }
  0x25   :  { %p16644_p1 = pnand %p16643_p0, %p16637_p11 }
  0x27   :  { %16647 = shalt.err (!%p16644_p1)
}
  0x28   :  { %s16838_s3 = smov 1024   ;;  %s16839_s28 = smov 64  }
  0x29   :  { %75 = dma.hbm_to_vmem [thread:$0]  %s17409_s5, 131072, %s70_s30, [#allocation9], %s16838_s3, %s16838_s3, %s16839_s28  }
  0x2a   :  { %s16840_s12 = smov [#allocation11]   ;;  %s16648_s22 = scalar_lea.hbm %s17411_s7, 32768 }
  0x2b   :  { %s91_s19 = sshll.u32 %s16840_s12, 4  ;;  %p16649_p2 = scmp.ne.s32.totalorder %s17411_s7, %s16648_s22  ;;  %s92_s19 = int_to_ptr.vmem [resolvable:$true] %s91_s19 }
  0x2c   :  { %p16652_p3 = scmp.lt.u32.totalorder %s16648_s22, %s17411_s7 }
  0x2e   :  { %p16654_p4 = pnand %p16652_p3, %p16649_p2 }
  0x30   :  { %16657 = shalt.err (!%p16654_p4)
}
  0x31   :  { %s16658_s27 = scalar_lea.vmem %s92_s19, 32768  ;;  %p16663_p6 = scmp.lt.s32.totalorder %s92_s19, %s92_s19 }
  0x32   :  { %p16659_p5 = scmp.ne.s32.totalorder %s92_s19, %s16658_s27  ;;  %p16664_p7 = scmp.lt.s32.totalorder %s16658_s27, %s16658_s27 }
  0x34   :  { %p16665_p8 = por %p16664_p7, %p16663_p6 }
  0x36   :  { %p16666_p9 = pnand %p16665_p8, %p16659_p5 }
  0x38   :  { %16669 = shalt.err (!%p16666_p9)
}
  0x39   :  { %s16841_s5 = smov 128   ;;  %s16842_s30 = smov 8  }
  0x3a   :  { %97 = dma.hbm_to_vmem [thread:$0]  %s17411_s7, 32768, %s92_s19, [#allocation12], %s16841_s5, %s16841_s5, %s16842_s30  }
  0x3b   :  { %s16843_s15 = smov [#allocation14]   ;;  %s16844_s3 = smov [#allocation3]  }
  0x3c   :  { %s113_s16 = sshll.u32 %s16843_s15, 4  ;;  %s35_s17 = sshll.u32 %s16844_s3, 4  ;;  %s114_s16 = int_to_ptr.vmem [resolvable:$true] %s113_s16  ;;  %s16966_s17 = int_to_ptr.vmem [resolvable:$true] %s35_s17 }
  0x3d   :  { %s16670_s20 = scalar_lea.hbm %s17413_s9, 3072 }
  0x3e   :  { %p16671_p10 = scmp.ne.s32.totalorder %s17413_s9, %s16670_s20  ;;  %p16674_p11 = scmp.lt.u32.totalorder %s16670_s20, %s17413_s9 }
  0x40   :  { %p16676_p12 = pnand %p16674_p11, %p16671_p10 }
  0x42   :  { %16679 = shalt.err (!%p16676_p12)
}
  0x43   :  { %s16680_s7 = scalar_lea.vmem %s114_s16, 3072  ;;  %p16685_p0 = scmp.lt.s32.totalorder %s114_s16, %s114_s16 }
  0x44   :  { %p16681_p13 = scmp.ne.s32.totalorder %s114_s16, %s16680_s7  ;;  %p16686_p1 = scmp.lt.s32.totalorder %s16680_s7, %s16680_s7 }
  0x46   :  { %p16687_p2 = por %p16686_p1, %p16685_p0 }
  0x48   :  { %p16688_p3 = pnand %p16687_p2, %p16681_p13 }
  0x4a   :  { %16691 = shalt.err (!%p16688_p3)
}
  0x4b   :  { %s16845_s19 = smov 4   ;;  %s16692_s30 = scalar_lea.hbm %s17406_s2, 55296 }
  0x4c   :  { %119 = dma.hbm_to_vmem [thread:$0]  %s17413_s9, 3072, %s114_s16, [#allocation15], %s16839_s28, %s16839_s28, %s16845_s19  }
  0x4d   :  { %p16693_p4 = scmp.ne.s32.totalorder %s17406_s2, %s16692_s30  ;;  %p16696_p5 = scmp.lt.u32.totalorder %s16692_s30, %s17406_s2 }
  0x4f   :  { %p16698_p6 = pnand %p16696_p5, %p16693_p4 }
  0x51   :  { %16701 = shalt.err (!%p16698_p6)
}
  0x52   :  { %s16702_s18 = scalar_lea.vmem %s16966_s17, 55296  ;;  %p16707_p8 = scmp.lt.s32.totalorder %s16966_s17, %s16966_s17 }
  0x53   :  { %p16703_p7 = scmp.ne.s32.totalorder %s16966_s17, %s16702_s18  ;;  %p16708_p9 = scmp.lt.s32.totalorder %s16702_s18, %s16702_s18 }
  0x55   :  { %p16709_p10 = por %p16708_p9, %p16707_p8 }
  0x57   :  { %p16710_p11 = pnand %p16709_p10, %p16703_p7 }
  0x59   :  { %16713 = shalt.err (!%p16710_p11)
}
  0x5a   :  { %s16846_s9 = smov 576   ;;  %s16847_s16 = smov 36  }
  0x5b   :  { %41 = dma.hbm_to_vmem [thread:$0]  %s17406_s2, 55296, %s16966_s17, [#allocation4], %s16846_s9, %s16846_s9, %s16847_s16  }
  0x5c   :  { %s16848_s21 = smov [#allocation7]   ;;  %s16849_s23 = smov [#allocation10]  }
  0x5d   :  { %s57_s22 = sshll.u32 %s16848_s21, 4  ;;  %s82_s24 = sshll.u32 %s16849_s23, 4  ;;  %s58_s22 = int_to_ptr.vmem [resolvable:$true] %s57_s22  ;;  %s83_s24 = int_to_ptr.vmem [resolvable:$true] %s82_s24 }
  0x5e   :  { %s16714_s26 = scalar_lea.hbm %s17408_s4, 1024 }
  0x5f   :  { %p16715_p12 = scmp.ne.s32.totalorder %s17408_s4, %s16714_s26  ;;  %p16718_p13 = scmp.lt.u32.totalorder %s16714_s26, %s17408_s4 }
  0x61   :  { %p16720_p0 = pnand %p16718_p13, %p16715_p12 }
  0x63   :  { %16723 = shalt.err (!%p16720_p0)
}
  0x64   :  { %s16724_s2 = scalar_lea.vmem %s58_s22, 1024  ;;  %p16729_p2 = scmp.lt.s32.totalorder %s58_s22, %s58_s22 }
  0x65   :  { %p16725_p1 = scmp.ne.s32.totalorder %s58_s22, %s16724_s2  ;;  %p16730_p3 = scmp.lt.s32.totalorder %s16724_s2, %s16724_s2 }
  0x67   :  { %p16731_p4 = por %p16730_p3, %p16729_p2 }
  0x69   :  { %p16732_p5 = pnand %p16731_p4, %p16725_p1 }
  0x6b   :  { %16735 = shalt.err (!%p16732_p5)
}
  0x6c   :  { %63 = dma.hbm_to_vmem [thread:$0]  %s17408_s4, 1024, %s58_s22, [#allocation6], %s16839_s28, %s16839_s28, %s16845_s19  }
  0x6d   :  { %s16736_s18 = scalar_lea.hbm %s17410_s6, 256 }
  0x6e   :  { %p16737_p6 = scmp.ne.s32.totalorder %s17410_s6, %s16736_s18  ;;  %p16740_p7 = scmp.lt.u32.totalorder %s16736_s18, %s17410_s6 }
  0x70   :  { %p16742_p8 = pnand %p16740_p7, %p16737_p6 }
  0x72   :  { %16745 = shalt.err (!%p16742_p8)
}
  0x73   :  { %s16746_s21 = scalar_lea.vmem %s83_s24, 256  ;;  %p16751_p10 = scmp.lt.s32.totalorder %s83_s24, %s83_s24 }
  0x74   :  { %p16747_p9 = scmp.ne.s32.totalorder %s83_s24, %s16746_s21  ;;  %p16752_p11 = scmp.lt.s32.totalorder %s16746_s21, %s16746_s21 }
  0x76   :  { %p16753_p12 = por %p16752_p11, %p16751_p10 }
  0x78   :  { %p16754_p13 = pnand %p16753_p12, %p16747_p9 }
  0x7a   :  { %16757 = shalt.err (!%p16754_p13)
}
  0x7b   :  { %85 = dma.hbm_to_vmem [thread:$0]  %s17410_s6, 256, %s83_s24, [#allocation9]  }
  0x7c   :  { %s16850_s19 = smov [#allocation13]   ;;  %s16851_s23 = smov [#allocation16]  }
  0x7d   :  { %s104_s22 = sshll.u32 %s16850_s19, 4  ;;  %s126_s7 = sshll.u32 %s16851_s23, 4  ;;  %s105_s22 = int_to_ptr.vmem [resolvable:$true] %s104_s22  ;;  %s127_s7 = int_to_ptr.vmem [resolvable:$true] %s126_s7 }
  0x7e   :  { %s16758_s27 = scalar_lea.hbm %s17412_s8, 32 }
  0x7f   :  { %p16759_p0 = scmp.ne.s32.totalorder %s17412_s8, %s16758_s27  ;;  %p16762_p1 = scmp.lt.u32.totalorder %s16758_s27, %s17412_s8 }
  0x81   :  { %p16764_p2 = pnand %p16762_p1, %p16759_p0 }
  0x83   :  { %16767 = shalt.err (!%p16764_p2)
}
  0x84   :  { %s16768_s6 = scalar_lea.vmem %s105_s22, 32  ;;  %p16773_p4 = scmp.lt.s32.totalorder %s105_s22, %s105_s22 }
  0x85   :  { %p16769_p3 = scmp.ne.s32.totalorder %s105_s22, %s16768_s6  ;;  %p16774_p5 = scmp.lt.s32.totalorder %s16768_s6, %s16768_s6 }
  0x87   :  { %p16775_p6 = por %p16774_p5, %p16773_p4 }
  0x89   :  { %p16776_p7 = pnand %p16775_p6, %p16769_p3 }
  0x8b   :  { %16779 = shalt.err (!%p16776_p7)
}
  0x8c   :  { %107 = dma.hbm_to_vmem [thread:$0]  %s17412_s8, 32, %s105_s22, [#allocation12]  }
  0x8d   :  { %s16780_s3 = scalar_lea.hbm %s17414_s10, 16 }
  0x8e   :  { %p16781_p8 = scmp.ne.s32.totalorder %s17414_s10, %s16780_s3  ;;  %p16784_p9 = scmp.lt.u32.totalorder %s16780_s3, %s17414_s10 }
  0x90   :  { %p16786_p10 = pnand %p16784_p9, %p16781_p8 }
  0x92   :  { %16789 = shalt.err (!%p16786_p10)
}
  0x93   :  { %s16790_s20 = scalar_lea.vmem %s127_s7, 16  ;;  %s16794_s21 = scalar_lea.vmem %s127_s7, 32 }
  0x94   :  { %p16791_p11 = scmp.ne.s32.totalorder %s127_s7, %s16790_s20  ;;  %p16795_p12 = scmp.lt.s32.totalorder %s127_s7, %s127_s7 }
  0x95   :  { %p16796_p13 = scmp.lt.s32.totalorder %s16794_s21, %s16790_s20 }
  0x97   :  { %p16797_p0 = por %p16796_p13, %p16795_p12 }
  0x99   :  { %p16798_p1 = pnand %p16797_p0, %p16791_p11 }
  0x9b   :  { %16801 = shalt.err (!%p16798_p1)
}
  0x9c   :  { %129 = dma.hbm_to_vmem [thread:$0]  %s17414_s10, 16, %s127_s7, [#allocation15]  }
  0x9d   :  { %s16852_s28 = smov [#allocation17]   ;;  %s16802_s25 = scalar_lea.hbm %s17415_s11, 16 }
  0x9e   :  { %s136_s19 = sshll.u32 %s16852_s28, 4  ;;  %p16803_p2 = scmp.ne.s32.totalorder %s17415_s11, %s16802_s25  ;;  %s137_s19 = int_to_ptr.vmem [resolvable:$true] %s136_s19 }
  0x9f   :  { %p16806_p3 = scmp.lt.u32.totalorder %s16802_s25, %s17415_s11 }
  0xa1   :  { %p16808_p4 = pnand %p16806_p3, %p16803_p2 }
  0xa3   :  { %16811 = shalt.err (!%p16808_p4)
}
  0xa4   :  { %s16812_s29 = scalar_lea.vmem %s137_s19, 16  ;;  %s16816_s10 = scalar_lea.vmem %s137_s19, 32 }
  0xa5   :  { %p16813_p5 = scmp.ne.s32.totalorder %s137_s19, %s16812_s29  ;;  %p16817_p6 = scmp.lt.s32.totalorder %s137_s19, %s137_s19 }
  0xa6   :  { %p16818_p7 = scmp.lt.s32.totalorder %s16816_s10, %s16812_s29 }
  0xa8   :  { %p16819_p8 = por %p16818_p7, %p16817_p6 }
  0xaa   :  { %p16820_p9 = pnand %p16819_p8, %p16813_p5 }
  0xac   :  { %16823 = shalt.err (!%p16820_p9)
}
  0xad   :  { %139 = dma.hbm_to_vmem [thread:$0]  %s17415_s11, 16, %s137_s19, [#allocation18]  }
  0xae   :  { %16824 = dma.done.wait [#allocation4], 55296  }
  0xaf   :  { %16825 = vsyncadd [#allocation4], 4294912000 }
  0xb0   :  { %16826 = dma.done.wait [#allocation6], 1168  }
  0xb1   :  { %16827 = vsyncadd [#allocation6], 4294966128 }
  0xb2   :  { %16828 = dma.done.wait [#allocation9], 131328  }
  0xb3   :  { %16829 = vsyncadd [#allocation9], 4294835968 }
  0xb4   :  { %16830 = dma.done.wait [#allocation12], 32800  }
  0xb5   :  { %16831 = vsyncadd [#allocation12], 4294934496 }
  0xb6   :  { %16832 = dma.done.wait [#allocation15], 3088  }
  0xb7   :  { %16833 = vsyncadd [#allocation15], 4294964208 }
  0xb8   :  { %16834 = dma.done.wait [#allocation18], 16  }
  0xb9   :  { %16835 = vsyncadd [#allocation18], 4294967280  ;;  %v15561_v1 = vld [vmem:[#allocation3 + $0x4] ss:$36 sps:$4 sm:$0xff]   ;;  %v15564_v3 = vld [vmem:[#allocation3 + $0x4c] ss:$36 sps:$4 sm:$0xff]   ;;  %v658_v8 = vlaneseq }
  0xba   :  { %v15563_v2 = vld [vmem:[#allocation3] ss:$36 sps:$4 sm:$0xff]   ;;  %2965 = vmatprep.subr.bf16.mxu1 %v15561_v1  ;;  %v15566_v4 = vld [vmem:[#allocation3 + $0x48] ss:$36 sps:$4 sm:$0xff]   ;;  %v15567_v5 = vld [vmem:[#allocation3 + $0x94] ss:$36 sps:$4 sm:$0xff]  }
  0xbb   :  { %2966 = vmatpush1.bf16.msra.mxu1 %v15563_v2  ;;  %v15569_v6 = vld [vmem:[#allocation3 + $0x90] ss:$36 sps:$4 sm:$0xff]   ;;  %v15570_v7 = vld [vmem:[#allocation3 + $0xdc] ss:$36 sps:$4 sm:$0xff]   ;;  %v16853_v9 = vmov 1966171168  }
  0xbc   :  { %2967 = vmatprep.subr.bf16.mxu1 %v15564_v3  ;;  %v706_v10 = vunpack.c.l.s4 %v16853_v9  ;;  %v15572_v11 = vld [vmem:[#allocation3 + $0xd8] ss:$36 sps:$4 sm:$0xff]   ;;  %v15573_v12 = vld [vmem:[#allocation3 + $0x124] ss:$36 sps:$4 sm:$0xff]   ;;  %v17063_v13 = vshrl.u32 %v658_v8, 7  ;;  %vm16855_vm0 = vmmov 0  }
  0xbd   :  { %v15575_v15 = vld [vmem:[#allocation3 + $0x120] ss:$36 sps:$4 sm:$0xff]   ;;  %v15576_v16 = vld [vmem:[#allocation3 + $0x16c] ss:$36 sps:$4 sm:$0xff]   ;;  %v15579_v19 = vld [vmem:[#allocation3 + $0x1b4] ss:$36 sps:$4 sm:$0xff]  }
  0xbe   :  { %v707_v14 = vunpack.c.0.s8 %v706_v10  ;;  %v15578_v18 = vld [vmem:[#allocation3 + $0x168] ss:$36 sps:$4 sm:$0xff]   ;;  %v17071_v20 = vld [vmem:[%s17404_s0] sm:$0x3f]  ;;  %v15581_v22 = vld [vmem:[#allocation3 + $0x1b0] ss:$36 sps:$4 sm:$0xff]  }
  0xbf   :  { %2968 = vmatpush1.bf16.msra.mxu1 %v15566_v4  ;;  %v15582_v23 = vld [vmem:[#allocation3 + $0x1fc] ss:$36 sps:$4 sm:$0xff]   ;;  %v15585_v27 = vld [vmem:[#allocation3 + $0x244] ss:$36 sps:$4 sm:$0xff]   ;;  %v15588_v29 = vld [vmem:[#allocation3 + $0x28c] ss:$36 sps:$4 sm:$0xff]   ;;  %v704_v51 = vcombine.high %v17071_v20, %v17071_v20 }
  0xc0   :  { %2969 = vmatprep.subr.bf16.mxu1 %v15567_v5  ;;  %v17066_v17 = vsub.s32 %v707_v14, %v17063_v13  ;;  %v15584_v26 = vld [vmem:[#allocation3 + $0x1f8] ss:$36 sps:$4 sm:$0xff]   ;;  %v15587_v28 = vld [vmem:[#allocation3 + $0x240] ss:$36 sps:$4 sm:$0xff]   ;;  %v15590_v30 = vld [vmem:[#allocation3 + $0x288] ss:$36 sps:$4 sm:$0xff]  }
  0xc1   :  { %v15591_v31 = vld [vmem:[#allocation3 + $0x2d4] ss:$36 sps:$4 sm:$0xff]   ;;  %v15594_v33 = vld [vmem:[#allocation3 + $0x31c] ss:$36 sps:$4 sm:$0xff]   ;;  %v15597_v35 = vld [vmem:[#allocation3 + $0x364] ss:$36 sps:$4 sm:$0xff]  }
  0xc2   :  { %v17075_v21 = vrot.slane %v17071_v20, %v17066_v17  ;;  %v15593_v32 = vld [vmem:[#allocation3 + $0x2d0] ss:$36 sps:$4 sm:$0xff]   ;;  %v15596_v34 = vld [vmem:[#allocation3 + $0x318] ss:$36 sps:$4 sm:$0xff]   ;;  %v15599_v40 = vld [vmem:[#allocation3 + $0x360] ss:$36 sps:$4 sm:$0xff]   ;;  %v718_v55 = vrot.slane %v704_v51, %v17066_v17 }
  0xc3   :  { %2970 = vmatpush1.bf16.msra.mxu1 %v15569_v6  ;;  %v15657_v36 = vld [vmem:[#allocation3 + $0x14] ss:$36 sps:$4 sm:$0xff]   ;;  %v15663_v38 = vld [vmem:[#allocation3 + $0x5c] ss:$36 sps:$4 sm:$0xff]   ;;  %v15600_v41 = vld [vmem:[#allocation3 + $0x3ac] ss:$36 sps:$4 sm:$0xff]  }
  0xc4   :  { %2971 = vmatprep.subr.bf16.mxu1 %v15570_v7  ;;  %v719_v24 = vcombine.high %v17075_v21, %v17075_v21  ;;  %v15659_v37 = vld [vmem:[#allocation3 + $0x10] ss:$36 sps:$4 sm:$0xff]   ;;  %3211 = vmatprep.subr.bf16.mxu0 %v15657_v36  ;;  %v15665_v39 = vld [vmem:[#allocation3 + $0x58] ss:$36 sps:$4 sm:$0xff]   ;;  %v15669_v42 = vld [vmem:[#allocation3 + $0xa4] ss:$36 sps:$4 sm:$0xff]   ;;  %v720_v57 = vcombine.high %v718_v55, %v718_v55  ;;  %v17089_v59 = vrot.slane %v17075_v21, %v17066_v17 }
  0xc5   :  { %3212 = vmatpush1.bf16.msra.mxu0 %v15659_v37  ;;  %v15602_v43 = vld [vmem:[#allocation3 + $0x3a8] ss:$36 sps:$4 sm:$0xff]   ;;  %v15671_v44 = vld [vmem:[#allocation3 + $0xa0] ss:$36 sps:$4 sm:$0xff]   ;;  %v15603_v46 = vld [vmem:[#allocation3 + $0x3f4] ss:$36 sps:$4 sm:$0xff]   ;;  %v17099_v0 = vrot.slane %v718_v55, %v17066_v17 }
  0xc6   :  { %v17080_v25 = vrot.slane %v719_v24, %v17066_v17  ;;  %3213 = vmatprep.subr.bf16.mxu0 %v15663_v38  ;;  %v15675_v45 = vld [vmem:[#allocation3 + $0xec] ss:$36 sps:$4 sm:$0xff]   ;;  %v15681_v49 = vld [vmem:[#allocation3 + $0x134] ss:$36 sps:$4 sm:$0xff]   ;;  %v15606_v50 = vld [vmem:[#allocation3 + $0x43c] ss:$36 sps:$4 sm:$0xff]   ;;  %v17096_v63 = vrot.slane %v720_v57, %v17066_v17 }
  0xc7   :  { %2972 = vmatpush1.bf16.msra.mxu1 %v15572_v11  ;;  %v15605_v47 = vld [vmem:[#allocation3 + $0x3f0] ss:$36 sps:$4 sm:$0xff]   ;;  %v15677_v48 = vld [vmem:[#allocation3 + $0xe8] ss:$36 sps:$4 sm:$0xff]   ;;  %v15608_v52 = vld [vmem:[#allocation3 + $0x438] ss:$36 sps:$4 sm:$0xff]  }
  0xc8   :  { %2973 = vmatprep.subr.bf16.mxu1 %v15573_v12  ;;  %2997 = vmatprep.mubr.bf16.mxu1 %v17080_v25  ;;  %v15683_v53 = vld [vmem:[#allocation3 + $0x130] ss:$36 sps:$4 sm:$0xff]   ;;  %v15687_v54 = vld [vmem:[#allocation3 + $0x17c] ss:$36 sps:$4 sm:$0xff]   ;;  %v15611_v56 = vld [vmem:[#allocation3 + $0x484] ss:$36 sps:$4 sm:$0xff]   ;;  %v17093_v62 = vcombine.high %v17080_v25, %v17080_v25 }
  0xc9   :  { %3243 = vmatprep.mubr.bf16.mxu0 %v17080_v25  ;;  %3214 = vmatpush1.bf16.msra.mxu0 %v15665_v39  ;;  %v15609_v58 = vld [vmem:[#allocation3 + $0x480] ss:$36 sps:$4 sm:$0xff]   ;;  %v15689_v60 = vld [vmem:[#allocation3 + $0x178] ss:$36 sps:$4 sm:$0xff]   ;;  %v15614_v61 = vld [vmem:[#allocation3 + $0x4cc] ss:$36 sps:$4 sm:$0xff]  }
  0xca   :  { %3215 = vmatprep.subr.bf16.mxu0 %v15669_v42  ;;  %v15693_v1 = vld [vmem:[#allocation3 + $0x1c4] ss:$36 sps:$4 sm:$0xff]   ;;  %v15699_v4 = vld [vmem:[#allocation3 + $0x20c] ss:$36 sps:$4 sm:$0xff]   ;;  %v15617_v5 = vld [vmem:[#allocation3 + $0x514] ss:$36 sps:$4 sm:$0xff]  }
  0xcb   :  { %2974 = vmatpush1.bf16.msra.mxu1 %v15575_v15  ;;  %v15612_v2 = vld [vmem:[#allocation3 + $0x4c8] ss:$36 sps:$4 sm:$0xff]   ;;  %v15695_v3 = vld [vmem:[#allocation3 + $0x1c0] ss:$36 sps:$4 sm:$0xff]   ;;  %v15615_v6 = vld [vmem:[#allocation3 + $0x510] ss:$36 sps:$4 sm:$0xff]  }
  0xcc   :  { %2975 = vmatprep.subr.bf16.mxu1 %v15576_v16  ;;  %v15701_v7 = vld [vmem:[#allocation3 + $0x208] ss:$36 sps:$4 sm:$0xff]   ;;  %v15705_v8 = vld [vmem:[#allocation3 + $0x254] ss:$36 sps:$4 sm:$0xff]   ;;  %v15620_v9 = vld [vmem:[#allocation3 + $0x55c] ss:$36 sps:$4 sm:$0xff]  }
  0xcd   :  { %3216 = vmatpush1.bf16.msra.mxu0 %v15671_v44  ;;  %v15618_v10 = vld [vmem:[#allocation3 + $0x558] ss:$36 sps:$4 sm:$0xff]   ;;  %v15707_v11 = vld [vmem:[#allocation3 + $0x250] ss:$36 sps:$4 sm:$0xff]   ;;  %v15623_v14 = vld [vmem:[#allocation3 + $0x5a4] ss:$36 sps:$4 sm:$0xff]  }
  0xce   :  { %3217 = vmatprep.subr.bf16.mxu0 %v15675_v45  ;;  %v15711_v12 = vld [vmem:[#allocation3 + $0x29c] ss:$36 sps:$4 sm:$0xff]   ;;  %v15717_v17 = vld [vmem:[#allocation3 + $0x2e4] ss:$36 sps:$4 sm:$0xff]   ;;  %v15723_v21 = vld [vmem:[#allocation3 + $0x32c] ss:$36 sps:$4 sm:$0xff]  }
  0xcf   :  { %2976 = vmatpush1.bf16.msra.mxu1 %v15578_v18  ;;  %v15621_v15 = vld [vmem:[#allocation3 + $0x5a0] ss:$36 sps:$4 sm:$0xff]   ;;  %v15713_v16 = vld [vmem:[#allocation3 + $0x298] ss:$36 sps:$4 sm:$0xff]   ;;  %v15626_v18 = vld [vmem:[#allocation3 + $0x5ec] ss:$36 sps:$4 sm:$0xff]  }
  0xd0   :  { %2977 = vmatprep.subr.bf16.mxu1 %v15579_v19  ;;  %v15624_v19 = vld [vmem:[#allocation3 + $0x5e8] ss:$36 sps:$4 sm:$0xff]   ;;  %v15719_v20 = vld [vmem:[#allocation3 + $0x2e0] ss:$36 sps:$4 sm:$0xff]   ;;  %v15641_v39 = vld [vmem:[#allocation3 + $0x754] ss:$36 sps:$4 sm:$0xff]  }
  0xd1   :  { %3218 = vmatpush1.bf16.msra.mxu0 %v15677_v48  ;;  %v15725_v24 = vld [vmem:[#allocation3 + $0x328] ss:$36 sps:$4 sm:$0xff]   ;;  %v15743_v37 = vld [vmem:[#allocation3 + $0x400] ss:$36 sps:$4 sm:$0xff]   ;;  %v15755_v42 = vld [vmem:[#allocation3 + $0x494] ss:$36 sps:$4 sm:$0xff]  }
  0xd2   :  { %3219 = vmatprep.subr.bf16.mxu0 %v15681_v49  ;;  %v15636_v36 = vld [vmem:[#allocation3 + $0x708] ss:$36 sps:$4 sm:$0xff]   ;;  %v15642_v44 = vld [vmem:[#allocation3 + $0x798] ss:$36 sps:$4 sm:$0xff]   ;;  %v15753_v45 = vld [vmem:[#allocation3 + $0x490] ss:$36 sps:$4 sm:$0xff]  }
  0xd3   :  { %2978 = vmatpush1.bf16.msra.mxu1 %v15581_v22  ;;  %v15629_v22 = vld [vmem:[#allocation3 + $0x634] ss:$36 sps:$4 sm:$0xff]   ;;  %v15747_v38 = vld [vmem:[#allocation3 + $0x44c] ss:$36 sps:$4 sm:$0xff]   ;;  %v15645_v48 = vld [vmem:[#allocation3 + $0x7e0] ss:$36 sps:$4 sm:$0xff]  }
  0xd4   :  { %2979 = vmatprep.subr.bf16.mxu1 %v15582_v23  ;;  %v15627_v23 = vld [vmem:[#allocation3 + $0x630] ss:$36 sps:$4 sm:$0xff]   ;;  %v15760_v49 = vld [vmem:[#allocation3 + $0x4d8] ss:$36 sps:$4 sm:$0xff]   ;;  %v15772_v57 = vld [vmem:[#allocation3 + $0x568] ss:$36 sps:$4 sm:$0xff]  }
  0xd5   :  { %3220 = vmatpush1.bf16.msra.mxu0 %v15683_v53  ;;  %v15650_v51 = vld [vmem:[#allocation3 + $0x82c] ss:$36 sps:$4 sm:$0xff]   ;;  %v15766_v53 = vld [vmem:[#allocation3 + $0x520] ss:$36 sps:$4 sm:$0xff]   ;;  %v15653_v55 = vld [vmem:[#allocation3 + $0x874] ss:$36 sps:$4 sm:$0xff]  }
  0xd6   :  { %3221 = vmatprep.subr.bf16.mxu0 %v15687_v54  ;;  %v15774_v54 = vld [vmem:[#allocation3 + $0x56c] ss:$36 sps:$4 sm:$0xff]   ;;  %vm13441_vm1 = vcmask 1041408   ;;  %vm13453_vm2 = vcmask 1024  }
  0xd7   :  { %2980 = vmatpush1.bf16.msra.mxu1 %v15584_v26  ;;  %v15729_v26 = vld [vmem:[#allocation3 + $0x374] ss:$36 sps:$4 sm:$0xff]  }
  0xd8   :  { %2981 = vmatprep.subr.bf16.mxu1 %v15585_v27  ;;  %v15632_v27 = vld [vmem:[#allocation3 + $0x67c] ss:$36 sps:$4 sm:$0xff]  }
  0xd9   :  { %3222 = vmatpush1.bf16.msra.mxu0 %v15689_v60  ;;  %v15656_v60 = vld [vmem:[#allocation3 + $0x8bc] ss:$36 sps:$4 sm:$0xff]  }
  0xda   :  { %3223 = vmatprep.subr.bf16.mxu0 %v15693_v1  ;;  %v15778_v1 = vld [vmem:[#allocation3 + $0x5b0] ss:$36 sps:$4 sm:$0xff]  }
  0xdb   :  { %2982 = vmatpush1.bf16.msra.mxu1 %v15587_v28  ;;  %v15630_v28 = vld [vmem:[#allocation3 + $0x678] ss:$36 sps:$4 sm:$0xff]  }
  0xdc   :  { %2983 = vmatprep.subr.bf16.mxu1 %v15588_v29  ;;  %v15731_v29 = vld [vmem:[#allocation3 + $0x370] ss:$36 sps:$4 sm:$0xff]  }
  0xdd   :  { %3224 = vmatpush1.bf16.msra.mxu0 %v15695_v3  ;;  %v15662_v3 = vld [vmem:[#allocation3 + $0x904] ss:$36 sps:$4 sm:$0xff]  }
  0xde   :  { %3225 = vmatprep.subr.bf16.mxu0 %v15699_v4  ;;  %v15660_v4 = vld [vmem:[#allocation3 + $0x900] ss:$36 sps:$4 sm:$0xff]  }
  0xdf   :  { %2984 = vmatpush1.bf16.msra.mxu1 %v15590_v30  ;;  %v15735_v30 = vld [vmem:[#allocation3 + $0x3bc] ss:$36 sps:$4 sm:$0xff]  }
  0xe0   :  { %2985 = vmatprep.subr.bf16.mxu1 %v15591_v31  ;;  %v15635_v31 = vld [vmem:[#allocation3 + $0x6c4] ss:$36 sps:$4 sm:$0xff]  }
  0xe1   :  { %3226 = vmatpush1.bf16.msra.mxu0 %v15701_v7  ;;  %v15668_v7 = vld [vmem:[#allocation3 + $0x94c] ss:$36 sps:$4 sm:$0xff]  }
  0xe2   :  { %3227 = vmatprep.subr.bf16.mxu0 %v15705_v8  ;;  %v15792_v8 = vld [vmem:[#allocation3 + $0x644] ss:$36 sps:$4 sm:$0xff]  }
  0xe3   :  { %2986 = vmatpush1.bf16.msra.mxu1 %v15593_v32  ;;  %v15633_v32 = vld [vmem:[#allocation3 + $0x6c0] ss:$36 sps:$4 sm:$0xff]  }
  0xe4   :  { %2987 = vmatprep.subr.bf16.mxu1 %v15594_v33  ;;  %v15737_v33 = vld [vmem:[#allocation3 + $0x3b8] ss:$36 sps:$4 sm:$0xff]  }
  0xe5   :  { %3228 = vmatpush1.bf16.msra.mxu0 %v15707_v11  ;;  %v15798_v11 = vld [vmem:[#allocation3 + $0x68c] ss:$36 sps:$4 sm:$0xff]  }
  0xe6   :  { %3229 = vmatprep.subr.bf16.mxu0 %v15711_v12  ;;  %v15674_v12 = vld [vmem:[#allocation3 + $0x994] ss:$36 sps:$4 sm:$0xff]  }
  0xe7   :  { %2988 = vmatpush1.bf16.msra.mxu1 %v15596_v34  ;;  %v15741_v34 = vld [vmem:[#allocation3 + $0x404] ss:$36 sps:$4 sm:$0xff]  }
  0xe8   :  { %2989 = vmatprep.subr.bf16.mxu1 %v15597_v35  ;;  %v15638_v35 = vld [vmem:[#allocation3 + $0x70c] ss:$36 sps:$4 sm:$0xff]  }
  0xe9   :  { %3230 = vmatpush1.bf16.msra.mxu0 %v15713_v16  ;;  %v15804_v16 = vld [vmem:[#allocation3 + $0x6d4] ss:$36 sps:$4 sm:$0xff]  }
  0xea   :  { %3231 = vmatprep.subr.bf16.mxu0 %v15717_v17  ;;  %v15680_v17 = vld [vmem:[#allocation3 + $0x9dc] ss:$36 sps:$4 sm:$0xff]  }
  0xeb   :  { %2990 = vmatpush1.bf16.msra.mxu1 %v15599_v40  ;;  %v15639_v40 = vld [vmem:[#allocation3 + $0x750] ss:$36 sps:$4 sm:$0xff]  }
  0xec   :  { %2991 = vmatprep.subr.bf16.mxu1 %v15600_v41  ;;  %v15749_v41 = vld [vmem:[#allocation3 + $0x448] ss:$36 sps:$4 sm:$0xff]  }
  0xed   :  { %3232 = vmatpush1.bf16.msra.mxu0 %v15719_v20  ;;  %v15810_v20 = vld [vmem:[#allocation3 + $0x71c] ss:$36 sps:$4 sm:$0xff]  }
  0xee   :  { %3233 = vmatprep.subr.bf16.mxu0 %v15723_v21  ;;  %v15686_v21 = vld [vmem:[#allocation3 + $0xa24] ss:$36 sps:$4 sm:$0xff]  }
  0xef   :  { %2992 = vmatpush1.bf16.msra.mxu1 %v15602_v43  ;;  %v15644_v43 = vld [vmem:[#allocation3 + $0x79c] ss:$36 sps:$4 sm:$0xff]  }
  0xf0   :  { %2993 = vmatprep.subr.bf16.mxu1 %v15603_v46  ;;  %v15762_v46 = vld [vmem:[#allocation3 + $0x4dc] ss:$36 sps:$4 sm:$0xff]  }
  0xf1   :  { %3234 = vmatpush1.bf16.msra.mxu0 %v15725_v24  ;;  %v15816_v24 = vld [vmem:[#allocation3 + $0x764] ss:$36 sps:$4 sm:$0xff]  }
  0xf2   :  { %3235 = vmatprep.subr.bf16.mxu0 %v15729_v26  ;;  %v15692_v26 = vld [vmem:[#allocation3 + $0xa6c] ss:$36 sps:$4 sm:$0xff]  }
  0xf3   :  { %2994 = vmatpush1.bf16.msra.mxu1 %v15605_v47  ;;  %v15647_v47 = vld [vmem:[#allocation3 + $0x7e4] ss:$36 sps:$4 sm:$0xff]  }
  0xf4   :  { %2995 = vmatprep.subr.bf16.mxu1 %v15606_v50  ;;  %v15768_v50 = vld [vmem:[#allocation3 + $0x524] ss:$36 sps:$4 sm:$0xff]  }
  0xf5   :  { %3236 = vmatpush1.bf16.msra.mxu0 %v15731_v29  ;;  %v15822_v29 = vld [vmem:[#allocation3 + $0x7ac] ss:$36 sps:$4 sm:$0xff]  }
  0xf6   :  { %3237 = vmatprep.subr.bf16.mxu0 %v15735_v30  ;;  %v15698_v30 = vld [vmem:[#allocation3 + $0xab4] ss:$36 sps:$4 sm:$0xff]  }
  0xf7   :  { %2996 = vmatpush1.bf16.msra.mxu1 %v15608_v52  ;;  %v15648_v52 = vld [vmem:[#allocation3 + $0x828] ss:$36 sps:$4 sm:$0xff]  }
  0xf8   :  { %3006 = vmatprep.subr.bf16.mxu1 %v15611_v56  ;;  %v15651_v56 = vld [vmem:[#allocation3 + $0x870] ss:$36 sps:$4 sm:$0xff]  }
  0xf9   :  { %3238 = vmatpush1.bf16.msra.mxu0 %v15737_v33  ;;  %v15828_v33 = vld [vmem:[#allocation3 + $0x7f4] ss:$36 sps:$4 sm:$0xff]  }
  0xfa   :  { %2998 = vmatmul.mubr.bf16.vlgmr.msra.gmra.mrb[0].mxu1 %v17089_v59  ;;  %3239 = vmatprep.subr.bf16.mxu0 %v15741_v34  ;;  %v15704_v34 = vld [vmem:[#allocation3 + $0xafc] ss:$36 sps:$4 sm:$0xff]  }
  0xfb   :  { %3007 = vmatpush1.bf16.msra.mxu1 %v15609_v58  ;;  %3038 = vmatprep.mubr.bf16.mxu1 %v17093_v62  ;;  %v15780_v58 = vld [vmem:[#allocation3 + $0x5b4] ss:$36 sps:$4 sm:$0xff]  }
  0xfc   :  { %3008 = vmatprep.subr.bf16.mxu1 %v15614_v61  ;;  %v15654_v61 = vld [vmem:[#allocation3 + $0x8b8] ss:$36 sps:$4 sm:$0xff]  }
  0xfd   :  { %3240 = vmatpush1.bf16.msra.mxu0 %v15743_v37  ;;  %v15834_v37 = vld [vmem:[#allocation3 + $0x83c] ss:$36 sps:$4 sm:$0xff]  }
  0xfe   :  { %3241 = vmatprep.subr.bf16.mxu0 %v15747_v38  ;;  %v15710_v38 = vld [vmem:[#allocation3 + $0xb44] ss:$36 sps:$4 sm:$0xff]  }
  0xff   :  { %3009 = vmatpush1.bf16.msra.mxu1 %v15612_v2  ;;  %v15786_v2 = vld [vmem:[#allocation3 + $0x5fc] ss:$36 sps:$4 sm:$0xff]  }
 0x100   :  { %3010 = vmatprep.subr.bf16.mxu1 %v15617_v5  ;;  %v17107_v5 = vcombine.high %v17089_v59, %v17089_v59 }
 0x101   :  { %3242 = vmatpush1.bf16.msra.mxu0 %v15749_v41  ;;  %v15840_v41 = vld [vmem:[#allocation3 + $0x884] ss:$36 sps:$4 sm:$0xff]  }
 0x102   :  { %3252 = vmatprep.subr.bf16.mxu0 %v15755_v42  ;;  %v15716_v42 = vld [vmem:[#allocation3 + $0xb8c] ss:$36 sps:$4 sm:$0xff]  }
 0x103   :  { %3011 = vmatpush1.bf16.msra.mxu1 %v15615_v6  ;;  %v15784_v6 = vld [vmem:[#allocation3 + $0x5f8] ss:$36 sps:$4 sm:$0xff]  }
 0x104   :  { %3012 = vmatprep.subr.bf16.mxu1 %v15620_v9  ;;  %3244 = vmatmul.mubr.bf16.vlgmr.msra.gmra.mrb[0].mxu0 %v17089_v59  ;;  %v15666_v9 = vld [vmem:[#allocation3 + $0x948] ss:$36 sps:$4 sm:$0xff]  }
 0x105   :  { %3253 = vmatpush1.bf16.msra.mxu0 %v15753_v45  ;;  %3284 = vmatprep.mubr.bf16.mxu0 %v17093_v62  ;;  %v15846_v45 = vld [vmem:[#allocation3 + $0x8cc] ss:$36 sps:$4 sm:$0xff]  }
 0x106   :  { %3254 = vmatprep.subr.bf16.mxu0 %v15762_v46  ;;  %v15722_v46 = vld [vmem:[#allocation3 + $0xbd4] ss:$36 sps:$4 sm:$0xff]  }
 0x107   :  { %3013 = vmatpush1.bf16.msra.mxu1 %v15618_v10  ;;  %v15790_v10 = vld [vmem:[#allocation3 + $0x640] ss:$36 sps:$4 sm:$0xff]  }
 0x108   :  { %3014 = vmatprep.subr.bf16.mxu1 %v15623_v14  ;;  %v15672_v14 = vld [vmem:[#allocation3 + $0x990] ss:$36 sps:$4 sm:$0xff]  }
 0x109   :  { %3255 = vmatpush1.bf16.msra.mxu0 %v15760_v49  ;;  %v15852_v49 = vld [vmem:[#allocation3 + $0x914] ss:$36 sps:$4 sm:$0xff]  }
 0x10a   :  { %3256 = vmatprep.subr.bf16.mxu0 %v15768_v50  ;;  %v15728_v50 = vld [vmem:[#allocation3 + $0xc1c] ss:$36 sps:$4 sm:$0xff]  }
 0x10b   :  { %3015 = vmatpush1.bf16.msra.mxu1 %v15621_v15  ;;  %v15796_v15 = vld [vmem:[#allocation3 + $0x688] ss:$36 sps:$4 sm:$0xff]  }
 0x10c   :  { %3016 = vmatprep.subr.bf16.mxu1 %v15626_v18  ;;  %v15802_v18 = vld [vmem:[#allocation3 + $0x6d0] ss:$36 sps:$4 sm:$0xff]  }
 0x10d   :  { %3257 = vmatpush1.bf16.msra.mxu0 %v15766_v53  ;;  %v15858_v53 = vld [vmem:[#allocation3 + $0x95c] ss:$36 sps:$4 sm:$0xff]  }
 0x10e   :  { %3258 = vmatprep.subr.bf16.mxu0 %v15774_v54  ;;  %v15734_v54 = vld [vmem:[#allocation3 + $0xc64] ss:$36 sps:$4 sm:$0xff]  }
 0x10f   :  { %3017 = vmatpush1.bf16.msra.mxu1 %v15624_v19  ;;  %v15678_v19 = vld [vmem:[#allocation3 + $0x9d8] ss:$36 sps:$4 sm:$0xff]  }
 0x110   :  { %3018 = vmatprep.subr.bf16.mxu1 %v15629_v22  ;;  %v15808_v22 = vld [vmem:[#allocation3 + $0x718] ss:$36 sps:$4 sm:$0xff]  }
 0x111   :  { %3259 = vmatpush1.bf16.msra.mxu0 %v15772_v57  ;;  %v15864_v57 = vld [vmem:[#allocation3 + $0x9a4] ss:$36 sps:$4 sm:$0xff]  }
 0x112   :  { %3260 = vmatprep.subr.bf16.mxu0 %v15780_v58  ;;  %v15740_v58 = vld [vmem:[#allocation3 + $0xcac] ss:$36 sps:$4 sm:$0xff]  }
 0x113   :  { %3019 = vmatpush1.bf16.msra.mxu1 %v15627_v23  ;;  %v15684_v23 = vld [vmem:[#allocation3 + $0xa20] ss:$36 sps:$4 sm:$0xff]  }
 0x114   :  { %3020 = vmatprep.subr.bf16.mxu1 %v15632_v27  ;;  %v15814_v27 = vld [vmem:[#allocation3 + $0x760] ss:$36 sps:$4 sm:$0xff]  }
 0x115   :  { %3261 = vmatpush1.bf16.msra.mxu0 %v15778_v1  ;;  %v15870_v1 = vld [vmem:[#allocation3 + $0x9ec] ss:$36 sps:$4 sm:$0xff]  }
 0x116   :  { %3262 = vmatprep.subr.bf16.mxu0 %v15786_v2  ;;  %v15746_v2 = vld [vmem:[#allocation3 + $0xcf4] ss:$36 sps:$4 sm:$0xff]  }
 0x117   :  { %3021 = vmatpush1.bf16.msra.mxu1 %v15630_v28  ;;  %v15690_v28 = vld [vmem:[#allocation3 + $0xa68] ss:$36 sps:$4 sm:$0xff]  }
 0x118   :  { %3022 = vmatprep.subr.bf16.mxu1 %v15635_v31  ;;  %v15820_v31 = vld [vmem:[#allocation3 + $0x7a8] ss:$36 sps:$4 sm:$0xff]  }
 0x119   :  { %3263 = vmatpush1.bf16.msra.mxu0 %v15784_v6  ;;  %v15876_v6 = vld [vmem:[#allocation3 + $0xa34] ss:$36 sps:$4 sm:$0xff]  }
 0x11a   :  { %3264 = vmatprep.subr.bf16.mxu0 %v15792_v8  ;;  %v15874_v8 = vld [vmem:[#allocation3 + $0xa30] ss:$36 sps:$4 sm:$0xff]  }
 0x11b   :  { %3023 = vmatpush1.bf16.msra.mxu1 %v15633_v32  ;;  %v15696_v32 = vld [vmem:[#allocation3 + $0xab0] ss:$36 sps:$4 sm:$0xff]  }
 0x11c   :  { %3024 = vmatprep.subr.bf16.mxu1 %v15638_v35  ;;  %v15826_v35 = vld [vmem:[#allocation3 + $0x7f0] ss:$36 sps:$4 sm:$0xff]  }
 0x11d   :  { %3265 = vmatpush1.bf16.msra.mxu0 %v15790_v10  ;;  %v15882_v10 = vld [vmem:[#allocation3 + $0xa7c] ss:$36 sps:$4 sm:$0xff]  }
 0x11e   :  { %3266 = vmatprep.subr.bf16.mxu0 %v15798_v11  ;;  %v15759_v11 = vld [vmem:[#allocation3 + $0xc] ss:$36 sps:$4 sm:$0xff]  }
 0x11f   :  { %3025 = vmatpush1.bf16.msra.mxu1 %v15636_v36  ;;  %v15702_v36 = vld [vmem:[#allocation3 + $0xaf8] ss:$36 sps:$4 sm:$0xff]  }
 0x120   :  { %3026 = vmatprep.subr.bf16.mxu1 %v15641_v39  ;;  %v15832_v39 = vld [vmem:[#allocation3 + $0x838] ss:$36 sps:$4 sm:$0xff]  }
 0x121   :  { %3267 = vmatpush1.bf16.msra.mxu0 %v15796_v15  ;;  %v15765_v15 = vld [vmem:[#allocation3 + $0x54] ss:$36 sps:$4 sm:$0xff]  }
 0x122   :  { %3268 = vmatprep.subr.bf16.mxu0 %v15804_v16  ;;  %v15888_v16 = vld [vmem:[#allocation3 + $0xac4] ss:$36 sps:$4 sm:$0xff]  }
 0x123   :  { %3027 = vmatpush1.bf16.msra.mxu1 %v15639_v40  ;;  %v15708_v40 = vld [vmem:[#allocation3 + $0xb40] ss:$36 sps:$4 sm:$0xff]  }
 0x124   :  { %3028 = vmatprep.subr.bf16.mxu1 %v15644_v43  ;;  %v15838_v43 = vld [vmem:[#allocation3 + $0x880] ss:$36 sps:$4 sm:$0xff]  }
 0x125   :  { %3269 = vmatpush1.bf16.msra.mxu0 %v15802_v18  ;;  %v15763_v18 = vld [vmem:[#allocation3 + $0x50] ss:$36 sps:$4 sm:$0xff]  }
 0x126   :  { %3270 = vmatprep.subr.bf16.mxu0 %v15810_v20  ;;  %v15771_v20 = vld [vmem:[#allocation3 + $0x9c] ss:$36 sps:$4 sm:$0xff]  }
 0x127   :  { %3029 = vmatpush1.bf16.msra.mxu1 %v15642_v44  ;;  %v15714_v44 = vld [vmem:[#allocation3 + $0xb88] ss:$36 sps:$4 sm:$0xff]  }
 0x128   :  { %3030 = vmatprep.subr.bf16.mxu1 %v15647_v47  ;;  %v15844_v47 = vld [vmem:[#allocation3 + $0x8c8] ss:$36 sps:$4 sm:$0xff]  }
 0x129   :  { %3271 = vmatpush1.bf16.msra.mxu0 %v15808_v22  ;;  %v15769_v22 = vld [vmem:[#allocation3 + $0x98] ss:$36 sps:$4 sm:$0xff]  }
 0x12a   :  { %3272 = vmatprep.subr.bf16.mxu0 %v15816_v24  ;;  %v15777_v24 = vld [vmem:[#allocation3 + $0xe4] ss:$36 sps:$4 sm:$0xff]  }
 0x12b   :  { %3031 = vmatpush1.bf16.msra.mxu1 %v15645_v48  ;;  %v15720_v48 = vld [vmem:[#allocation3 + $0xbd0] ss:$36 sps:$4 sm:$0xff]  }
 0x12c   :  { %3032 = vmatprep.subr.bf16.mxu1 %v15650_v51  ;;  %v15850_v51 = vld [vmem:[#allocation3 + $0x910] ss:$36 sps:$4 sm:$0xff]  }
 0x12d   :  { %3273 = vmatpush1.bf16.msra.mxu0 %v15814_v27  ;;  %v15775_v27 = vld [vmem:[#allocation3 + $0xe0] ss:$36 sps:$4 sm:$0xff]  }
 0x12e   :  { %3274 = vmatprep.subr.bf16.mxu0 %v15822_v29  ;;  %v15783_v29 = vld [vmem:[#allocation3 + $0x12c] ss:$36 sps:$4 sm:$0xff]  }
 0x12f   :  { %3033 = vmatpush1.bf16.msra.mxu1 %v15648_v52  ;;  %v15726_v52 = vld [vmem:[#allocation3 + $0xc18] ss:$36 sps:$4 sm:$0xff]  }
 0x130   :  { %3034 = vmatprep.subr.bf16.mxu1 %v15653_v55  ;;  %v15856_v55 = vld [vmem:[#allocation3 + $0x958] ss:$36 sps:$4 sm:$0xff]  }
 0x131   :  { %3275 = vmatpush1.bf16.msra.mxu0 %v15820_v31  ;;  %v15781_v31 = vld [vmem:[#allocation3 + $0x128] ss:$36 sps:$4 sm:$0xff]  }
 0x132   :  { %3276 = vmatprep.subr.bf16.mxu0 %v15828_v33  ;;  %v15789_v33 = vld [vmem:[#allocation3 + $0x174] ss:$36 sps:$4 sm:$0xff]  }
 0x133   :  { %3035 = vmatpush1.bf16.msra.mxu1 %v15651_v56  ;;  %v15732_v56 = vld [vmem:[#allocation3 + $0xc60] ss:$36 sps:$4 sm:$0xff]  }
 0x134   :  { %3036 = vmatprep.subr.bf16.mxu1 %v15656_v60  ;;  %v15862_v60 = vld [vmem:[#allocation3 + $0x9a0] ss:$36 sps:$4 sm:$0xff]  }
 0x135   :  { %3277 = vmatpush1.bf16.msra.mxu0 %v15826_v35  ;;  %v15787_v35 = vld [vmem:[#allocation3 + $0x170] ss:$36 sps:$4 sm:$0xff]  }
 0x136   :  { %3278 = vmatprep.subr.bf16.mxu0 %v15834_v37  ;;  %v15795_v37 = vld [vmem:[#allocation3 + $0x1bc] ss:$36 sps:$4 sm:$0xff]  }
 0x137   :  { %3037 = vmatpush1.bf16.msra.mxu1 %v15654_v61  ;;  %v15738_v61 = vld [vmem:[#allocation3 + $0xca8] ss:$36 sps:$4 sm:$0xff]  }
 0x138   :  { %3047 = vmatprep.subr.bf16.mxu1 %v15662_v3  ;;  %v15868_v3 = vld [vmem:[#allocation3 + $0x9e8] ss:$36 sps:$4 sm:$0xff]  }
 0x139   :  { %3279 = vmatpush1.bf16.msra.mxu0 %v15832_v39  ;;  %v15793_v39 = vld [vmem:[#allocation3 + $0x1b8] ss:$36 sps:$4 sm:$0xff]  }
 0x13a   :  { %3039 = vmatmul.mubr.bf16.vlgmr.msra.gmra.mrb[0].mxu1 %v17107_v5  ;;  %3280 = vmatprep.subr.bf16.mxu0 %v15840_v41  ;;  %v15801_v41 = vld [vmem:[#allocation3 + $0x204] ss:$36 sps:$4 sm:$0xff]  }
 0x13b   :  { %3048 = vmatpush1.bf16.msra.mxu1 %v15660_v4  ;;  %3079 = vmatprep.mubr.bf16.mxu1 %v17096_v63  ;;  %v15744_v4 = vld [vmem:[#allocation3 + $0xcf0] ss:$36 sps:$4 sm:$0xff]  }
 0x13c   :  { %3049 = vmatprep.subr.bf16.mxu1 %v15668_v7  ;;  %v15752_v7 = vld [vmem:[#allocation3 + $0xd3c] ss:$36 sps:$4 sm:$0xff]  }
 0x13d   :  { %3281 = vmatpush1.bf16.msra.mxu0 %v15838_v43  ;;  %v15799_v43 = vld [vmem:[#allocation3 + $0x200] ss:$36 sps:$4 sm:$0xff]  }
 0x13e   :  { %3282 = vmatprep.subr.bf16.mxu0 %v15846_v45  ;;  %v15930_v45 = vld [vmem:[#allocation3 + $0xcbc] ss:$36 sps:$4 sm:$0xff]  }
 0x13f   :  { %3050 = vmatpush1.bf16.msra.mxu1 %v15666_v9  ;;  %v15750_v9 = vld [vmem:[#allocation3 + $0xd38] ss:$36 sps:$4 sm:$0xff]  }
 0x140   :  { %3051 = vmatprep.subr.bf16.mxu1 %v15674_v12  ;;  %v15880_v12 = vld [vmem:[#allocation3 + $0xa78] ss:$36 sps:$4 sm:$0xff]  }
 0x141   :  { %3283 = vmatpush1.bf16.msra.mxu0 %v15844_v47  ;;  %v15805_v47 = vld [vmem:[#allocation3 + $0x248] ss:$36 sps:$4 sm:$0xff]  }
 0x142   :  { %3293 = vmatprep.subr.bf16.mxu0 %v15852_v49  ;;  %v15936_v49 = vld [vmem:[#allocation3 + $0xd04] ss:$36 sps:$4 sm:$0xff]  }
 0x143   :  { %3052 = vmatpush1.bf16.msra.mxu1 %v15672_v14  ;;  %v15757_v14 = vld [vmem:[#allocation3 + $0x8] ss:$36 sps:$4 sm:$0xff]  }
 0x144   :  { %3053 = vmatprep.subr.bf16.mxu1 %v15680_v17  ;;  %3285 = vmatmul.mubr.bf16.vlgmr.msra.gmra.mrb[0].mxu0 %v17107_v5  ;;  %v15886_v17 = vld [vmem:[#allocation3 + $0xac0] ss:$36 sps:$4 sm:$0xff]  }
 0x145   :  { %3294 = vmatpush1.bf16.msra.mxu0 %v15850_v51  ;;  %3325 = vmatprep.mubr.bf16.mxu0 %v17096_v63  ;;  %v15811_v51 = vld [vmem:[#allocation3 + $0x290] ss:$36 sps:$4 sm:$0xff]  }
 0x146   :  { %3295 = vmatprep.subr.bf16.mxu0 %v15858_v53  ;;  %v15942_v53 = vld [vmem:[#allocation3 + $0xd4c] ss:$36 sps:$4 sm:$0xff]  }
 0x147   :  { %3054 = vmatpush1.bf16.msra.mxu1 %v15678_v19  ;;  %v15894_v19 = vld [vmem:[#allocation3 + $0xb0c] ss:$36 sps:$4 sm:$0xff]  }
 0x148   :  { %3055 = vmatprep.subr.bf16.mxu1 %v15686_v21  ;;  %v15892_v21 = vld [vmem:[#allocation3 + $0xb08] ss:$36 sps:$4 sm:$0xff]  }
 0x149   :  { %3296 = vmatpush1.bf16.msra.mxu0 %v15856_v55  ;;  %v15817_v55 = vld [vmem:[#allocation3 + $0x2d8] ss:$36 sps:$4 sm:$0xff]  }
 0x14a   :  { %3297 = vmatprep.subr.bf16.mxu0 %v15864_v57  ;;  %v15946_v57 = vld [vmem:[#allocation3 + $0xb60] ss:$36 sps:$4 sm:$0xff]  }
 0x14b   :  { %3056 = vmatpush1.bf16.msra.mxu1 %v15684_v23  ;;  %v15900_v23 = vld [vmem:[#allocation3 + $0xb54] ss:$36 sps:$4 sm:$0xff]  }
 0x14c   :  { %3057 = vmatprep.subr.bf16.mxu1 %v15692_v26  ;;  %v15898_v26 = vld [vmem:[#allocation3 + $0xb50] ss:$36 sps:$4 sm:$0xff]  }
 0x14d   :  { %3298 = vmatpush1.bf16.msra.mxu0 %v15862_v60  ;;  %v15823_v60 = vld [vmem:[#allocation3 + $0x320] ss:$36 sps:$4 sm:$0xff]  }
 0x14e   :  { %3299 = vmatprep.subr.bf16.mxu0 %v15870_v1  ;;  %v15951_v1 = vld [vmem:[#allocation3 + $0xba8] ss:$36 sps:$4 sm:$0xff]  }
 0x14f   :  { %3058 = vmatpush1.bf16.msra.mxu1 %v15690_v28  ;;  %v15906_v28 = vld [vmem:[#allocation3 + $0xb9c] ss:$36 sps:$4 sm:$0xff]  }
 0x150   :  { %3059 = vmatprep.subr.bf16.mxu1 %v15698_v30  ;;  %v15904_v30 = vld [vmem:[#allocation3 + $0xb98] ss:$36 sps:$4 sm:$0xff]  }
 0x151   :  { %3300 = vmatpush1.bf16.msra.mxu0 %v15868_v3  ;;  %v15829_v3 = vld [vmem:[#allocation3 + $0x368] ss:$36 sps:$4 sm:$0xff]  }
 0x152   :  { %3301 = vmatprep.subr.bf16.mxu0 %v15876_v6  ;;  %v15956_v6 = vld [vmem:[#allocation3 + $0xbf0] ss:$36 sps:$4 sm:$0xff]  }
 0x153   :  { %3060 = vmatpush1.bf16.msra.mxu1 %v15696_v32  ;;  %v15912_v32 = vld [vmem:[#allocation3 + $0xbe4] ss:$36 sps:$4 sm:$0xff]  }
 0x154   :  { %3061 = vmatprep.subr.bf16.mxu1 %v15704_v34  ;;  %v15910_v34 = vld [vmem:[#allocation3 + $0xbe0] ss:$36 sps:$4 sm:$0xff]  }
 0x155   :  { %3302 = vmatpush1.bf16.msra.mxu0 %v15874_v8  ;;  %v15835_v8 = vld [vmem:[#allocation3 + $0x3b0] ss:$36 sps:$4 sm:$0xff]  }
 0x156   :  { %3303 = vmatprep.subr.bf16.mxu0 %v15882_v10  ;;  %v15961_v10 = vld [vmem:[#allocation3 + $0xc38] ss:$36 sps:$4 sm:$0xff]  }
 0x157   :  { %3062 = vmatpush1.bf16.msra.mxu1 %v15702_v36  ;;  %v15918_v36 = vld [vmem:[#allocation3 + $0xc2c] ss:$36 sps:$4 sm:$0xff]  }
 0x158   :  { %3063 = vmatprep.subr.bf16.mxu1 %v15710_v38  ;;  %v15916_v38 = vld [vmem:[#allocation3 + $0xc28] ss:$36 sps:$4 sm:$0xff]  }
 0x159   :  { %3304 = vmatpush1.bf16.msra.mxu0 %v15880_v12  ;;  %v15841_v12 = vld [vmem:[#allocation3 + $0x3f8] ss:$36 sps:$4 sm:$0xff]  }
 0x15a   :  { %3305 = vmatprep.subr.bf16.mxu0 %v15888_v16  ;;  %v15967_v16 = vld [vmem:[#allocation3 + $0xa40] ss:$36 sps:$4 sm:$0xff]  }
 0x15b   :  { %3064 = vmatpush1.bf16.msra.mxu1 %v15708_v40  ;;  %v15924_v40 = vld [vmem:[#allocation3 + $0xc74] ss:$36 sps:$4 sm:$0xff]  }
 0x15c   :  { %3065 = vmatprep.subr.bf16.mxu1 %v15716_v42  ;;  %v15922_v42 = vld [vmem:[#allocation3 + $0xc70] ss:$36 sps:$4 sm:$0xff]  }
 0x15d   :  { %3306 = vmatpush1.bf16.msra.mxu0 %v15886_v17  ;;  %v15847_v17 = vld [vmem:[#allocation3 + $0x440] ss:$36 sps:$4 sm:$0xff]  }
 0x15e   :  { %3307 = vmatprep.subr.bf16.mxu0 %v15894_v19  ;;  %v15971_v19 = vld [vmem:[#allocation3 + $0xcc8] ss:$36 sps:$4 sm:$0xff]  }
 0x15f   :  { %3066 = vmatpush1.bf16.msra.mxu1 %v15714_v44  ;;  %v15807_v44 = vld [vmem:[#allocation3 + $0x24c] ss:$36 sps:$4 sm:$0xff]  }
 0x160   :  { %3067 = vmatprep.subr.bf16.mxu1 %v15722_v46  ;;  %v15928_v46 = vld [vmem:[#allocation3 + $0xcb8] ss:$36 sps:$4 sm:$0xff]  }
 0x161   :  { %3308 = vmatpush1.bf16.msra.mxu0 %v15892_v21  ;;  %v15853_v21 = vld [vmem:[#allocation3 + $0x488] ss:$36 sps:$4 sm:$0xff]  }
 0x162   :  { %3309 = vmatprep.subr.bf16.mxu0 %v15900_v23  ;;  %v15976_v23 = vld [vmem:[#allocation3 + $0xd10] ss:$36 sps:$4 sm:$0xff]  }
 0x163   :  { %3068 = vmatpush1.bf16.msra.mxu1 %v15720_v48  ;;  %v15813_v48 = vld [vmem:[#allocation3 + $0x294] ss:$36 sps:$4 sm:$0xff]  }
 0x164   :  { %3069 = vmatprep.subr.bf16.mxu1 %v15728_v50  ;;  %v15934_v50 = vld [vmem:[#allocation3 + $0xd00] ss:$36 sps:$4 sm:$0xff]  }
 0x165   :  { %3310 = vmatpush1.bf16.msra.mxu0 %v15898_v26  ;;  %v15977_v26 = vld [vmem:[#allocation3 + $0xad0] ss:$36 sps:$4 sm:$0xff]  }
 0x166   :  { %3311 = vmatprep.subr.bf16.mxu0 %v15906_v28  ;;  %v15981_v28 = vld [vmem:[#allocation3 + $0xd58] ss:$36 sps:$4 sm:$0xff]  }
 0x167   :  { %3070 = vmatpush1.bf16.msra.mxu1 %v15726_v52  ;;  %v15819_v52 = vld [vmem:[#allocation3 + $0x2dc] ss:$36 sps:$4 sm:$0xff]  }
 0x168   :  { %3071 = vmatprep.subr.bf16.mxu1 %v15734_v54  ;;  %v15940_v54 = vld [vmem:[#allocation3 + $0xd48] ss:$36 sps:$4 sm:$0xff]  }
 0x169   :  { %3312 = vmatpush1.bf16.msra.mxu0 %v15904_v30  ;;  %v15982_v30 = vld [vmem:[#allocation3 + $0xb18] ss:$36 sps:$4 sm:$0xff]  }
 0x16a   :  { %3313 = vmatprep.subr.bf16.mxu0 %v15912_v32  ;;  %v15865_v32 = vld [vmem:[#allocation3 + $0x518] ss:$36 sps:$4 sm:$0xff]  }
 0x16b   :  { %3072 = vmatpush1.bf16.msra.mxu1 %v15732_v56  ;;  %v15825_v56 = vld [vmem:[#allocation3 + $0x324] ss:$36 sps:$4 sm:$0xff]  }
 0x16c   :  { %3073 = vmatprep.subr.bf16.mxu1 %v15740_v58  ;;  %v15947_v58 = vld [vmem:[#allocation3 + $0x920] ss:$36 sps:$4 sm:$0xff]  }
 0x16d   :  { %3314 = vmatpush1.bf16.msra.mxu0 %v15910_v34 }
 0x16e   :  { %3315 = vmatprep.subr.bf16.mxu0 %v15918_v36  ;;  %v3725_v36 = vld [vmem:[#allocation8 + $0xc0] sm:$0xff] }
 0x16f   :  { %3074 = vmatpush1.bf16.msra.mxu1 %v15738_v61  ;;  %v15831_v61 = vld [vmem:[#allocation3 + $0x36c] ss:$36 sps:$4 sm:$0xff]  }
 0x170   :  { %3075 = vmatprep.subr.bf16.mxu1 %v15746_v2  ;;  %v15952_v2 = vld [vmem:[#allocation3 + $0x968] ss:$36 sps:$4 sm:$0xff]  }
 0x171   :  { %3316 = vmatpush1.bf16.msra.mxu0 %v15916_v38  ;;  %v15871_v38 = vld [vmem:[#allocation3 + $0x560] ss:$36 sps:$4 sm:$0xff]  }
 0x172   :  { %3317 = vmatprep.subr.bf16.mxu0 %v15924_v40 }
 0x173   :  { %3076 = vmatpush1.bf16.msra.mxu1 %v15744_v4  ;;  %v15837_v4 = vld [vmem:[#allocation3 + $0x3b4] ss:$36 sps:$4 sm:$0xff]  }
 0x174   :  { %3077 = vmatprep.subr.bf16.mxu1 %v15752_v7  ;;  %v15957_v7 = vld [vmem:[#allocation3 + $0x9b0] ss:$36 sps:$4 sm:$0xff]  }
 0x175   :  { %3318 = vmatpush1.bf16.msra.mxu0 %v15922_v42  ;;  %v3741_v42 = vld [vmem:[#allocation8 + $0x140] sm:$0xff] }
 0x176   :  { %3319 = vmatprep.subr.bf16.mxu0 %v15930_v45  ;;  %v15885_v45 = vld [vmem:[#allocation3 + $0x5f4] ss:$36 sps:$4 sm:$0xff]  }
 0x177   :  { %3078 = vmatpush1.bf16.msra.mxu1 %v15750_v9  ;;  %v15843_v9 = vld [vmem:[#allocation3 + $0x3fc] ss:$36 sps:$4 sm:$0xff]  }
 0x178   :  { %3088 = vmatprep.subr.bf16.mxu1 %v15759_v11  ;;  %v15962_v11 = vld [vmem:[#allocation3 + $0x9f8] ss:$36 sps:$4 sm:$0xff]  }
 0x179   :  { %3320 = vmatpush1.bf16.msra.mxu0 %v15928_v46 }
 0x17a   :  { %3080 = vmatmul.mubr.bf16.vlgmr.msra.gmra.mrb[0].mxu1 %v17099_v0  ;;  %3321 = vmatprep.subr.bf16.mxu0 %v15936_v49 }
 0x17b   :  { %3089 = vmatpush1.bf16.msra.mxu1 %v15757_v14  ;;  %3120 = vmatprep.mubr.bf16.mxu1 %v17080_v25  ;;  %v15849_v14 = vld [vmem:[#allocation3 + $0x444] ss:$36 sps:$4 sm:$0xff]  }
 0x17c   :  { %3090 = vmatprep.subr.bf16.mxu1 %v15765_v15  ;;  %v15966_v15 = vld [vmem:[#allocation3 + $0xc80] ss:$36 sps:$4 sm:$0xff]  }
 0x17d   :  { %3322 = vmatpush1.bf16.msra.mxu0 %v15934_v50  ;;  %v15883_v50 = vld [vmem:[#allocation3 + $0x5f0] ss:$36 sps:$4 sm:$0xff]  }
 0x17e   :  { %3323 = vmatprep.subr.bf16.mxu0 %v15942_v53  ;;  %v3765_v53 = vld [vmem:[#allocation8 + $0x200] sm:$0xff] }
 0x17f   :  { %3091 = vmatpush1.bf16.msra.mxu1 %v15763_v18  ;;  %v15855_v18 = vld [vmem:[#allocation3 + $0x48c] ss:$36 sps:$4 sm:$0xff]  }
 0x180   :  { %3092 = vmatprep.subr.bf16.mxu1 %v15771_v20  ;;  %v15972_v20 = vld [vmem:[#allocation3 + $0xa88] ss:$36 sps:$4 sm:$0xff]  }
 0x181   :  { %3324 = vmatpush1.bf16.msra.mxu0 %v15940_v54  ;;  %v3773_v54 = vld [vmem:[#allocation8 + $0x240] sm:$0xff] }
 0x182   :  { %15257 = vmatprep.subr.bf16.mxu0 %v15946_v57  ;;  %v15897_v57 = vld [vmem:[#allocation3 + $0x684] ss:$36 sps:$4 sm:$0xff]  }
 0x183   :  { %3093 = vmatpush1.bf16.msra.mxu1 %v15769_v22  ;;  %v15861_v22 = vld [vmem:[#allocation3 + $0x4d4] ss:$36 sps:$4 sm:$0xff]  }
 0x184   :  { %3094 = vmatprep.subr.bf16.mxu1 %v15777_v24  ;;  %3326 = vmatmul.mubr.bf16.vlgmr.msra.gmra.mrb[0].mxu0 %v17099_v0  ;;  %v15859_v24 = vld [vmem:[#allocation3 + $0x4d0] ss:$36 sps:$4 sm:$0xff]  }
 0x185   :  { %15258 = vmatpush3.bf16.msra.mxu0 %v15947_v58  ;;  %3569 = vmatprep.mubr.bf16.mxu0 %v17096_v63  ;;  %v13971_v58 = vcombine.high %v3765_v53, %v3773_v54 }
 0x186   :  { %15259 = vmatprep.subr.bf16.mxu0 %v15951_v1  ;;  %v15895_v1 = vld [vmem:[#allocation3 + $0x680] ss:$36 sps:$4 sm:$0xff]  }
 0x187   :  { %3095 = vmatpush1.bf16.msra.mxu1 %v15775_v27  ;;  %v15867_v27 = vld [vmem:[#allocation3 + $0x51c] ss:$36 sps:$4 sm:$0xff]  }
 0x188   :  { %3096 = vmatprep.subr.bf16.mxu1 %v15783_v29  ;;  %v3701_v29 = vld [vmem:[#allocation8] sm:$0xff] }
 0x189   :  { %15260 = vmatpush3.bf16.msra.mxu0 %v15952_v2  ;;  %v15903_v2 = vld [vmem:[#allocation3 + $0x6cc] ss:$36 sps:$4 sm:$0xff]  }
 0x18a   :  { %15261 = vmatprep.subr.bf16.mxu0 %v15956_v6 }
 0x18b   :  { %3097 = vmatpush1.bf16.msra.mxu1 %v15781_v31  ;;  %v3709_v31 = vld [vmem:[#allocation8 + $0x40] sm:$0xff] }
 0x18c   :  { %3098 = vmatprep.subr.bf16.mxu1 %v15789_v33  ;;  %v15873_v33 = vld [vmem:[#allocation3 + $0x564] ss:$36 sps:$4 sm:$0xff]   ;;  %v13907_v34 = vcombine.high %v3701_v29, %v3709_v31 }
 0x18d   :  { %15262 = vmatpush3.bf16.msra.mxu0 %v15957_v7  ;;  %v3805_v7 = vld [vmem:[#allocation8 + $0x340] sm:$0xff] }
 0x18e   :  { %15263 = vmatprep.subr.bf16.mxu0 %v15961_v10 }
 0x18f   :  { %3099 = vmatpush1.bf16.msra.mxu1 %v15787_v35  ;;  %v3717_v35 = vld [vmem:[#allocation8 + $0x80] sm:$0xff] }
 0x190   :  { %3100 = vmatprep.subr.bf16.mxu1 %v15795_v37  ;;  %v13906_v37 = vcombine.low %v3701_v29, %v3709_v31  ;;  %v13923_v40 = vcombine.high %v3717_v35, %v3725_v36  ;;  %v15927_v29 = vld [vmem:[#allocation3 + $0x7ec] ss:$36 sps:$4 sm:$0xff]  }
 0x191   :  { %15264 = vmatpush3.bf16.msra.mxu0 %v15962_v11 }
 0x192   :  { %15265 = vmatprep.subr.bf16.mxu0 %v15966_v15  ;;  %v15907_v15 = vld [vmem:[#allocation3 + $0x710] ss:$36 sps:$4 sm:$0xff]  }
 0x193   :  { %3101 = vmatpush1.bf16.msra.mxu1 %v15793_v39  ;;  %v15879_v39 = vld [vmem:[#allocation3 + $0x5ac] ss:$36 sps:$4 sm:$0xff]  }
 0x194   :  { %3102 = vmatprep.subr.bf16.mxu1 %v15801_v41  ;;  %v3733_v41 = vld [vmem:[#allocation8 + $0x100] sm:$0xff] }
 0x195   :  { %15266 = vmatpush3.bf16.msra.mxu0 %v15967_v16  ;;  %v13939_v46 = vcombine.high %v3733_v41, %v3741_v42  ;;  %v13938_v49 = vcombine.low %v3733_v41, %v3741_v42  ;;  %v15915_v16 = vld [vmem:[#allocation3 + $0x75c] ss:$36 sps:$4 sm:$0xff]  }
 0x196   :  { %15267 = vmatprep.subr.bf16.mxu0 %v15971_v19  ;;  %v3829_v19 = vld [vmem:[#allocation8 + $0x400] sm:$0xff]  ;;  %v15939_v41 = vld [vmem:[#allocation3 + $0x87c] ss:$36 sps:$4 sm:$0xff]  }
 0x197   :  { %3103 = vmatpush1.bf16.msra.mxu1 %v15799_v43  ;;  %v13922_v43 = vcombine.low %v3717_v35, %v3725_v36  ;;  %v15933_v35 = vld [vmem:[#allocation3 + $0x834] ss:$36 sps:$4 sm:$0xff]  }
 0x198   :  { %3104 = vmatprep.subr.bf16.mxu1 %v15807_v44  ;;  %v15877_v44 = vld [vmem:[#allocation3 + $0x5a8] ss:$36 sps:$4 sm:$0xff]  }
 0x199   :  { %15268 = vmatpush3.bf16.msra.mxu0 %v15972_v20  ;;  %v3837_v20 = vld [vmem:[#allocation8 + $0x440] sm:$0xff] }
 0x19a   :  { %15269 = vmatprep.subr.bf16.mxu0 %v15976_v23 }
 0x19b   :  { %3105 = vmatpush1.bf16.msra.mxu1 %v15805_v47  ;;  %v3749_v47 = vld [vmem:[#allocation8 + $0x180] sm:$0xff] }
 0x19c   :  { %3106 = vmatprep.subr.bf16.mxu1 %v15813_v48  ;;  %v3757_v48 = vld [vmem:[#allocation8 + $0x1c0] sm:$0xff] }
 0x19d   :  { %15270 = vmatpush3.bf16.msra.mxu0 %v15977_v26  ;;  %v3845_v26 = vld [vmem:[#allocation8 + $0x480] sm:$0xff] }
 0x19e   :  { %15271 = vmatprep.subr.bf16.mxu0 %v15981_v28  ;;  %v15919_v28 = vld [vmem:[#allocation3 + $0x7a0] ss:$36 sps:$4 sm:$0xff]  }
 0x19f   :  { %3107 = vmatpush1.bf16.msra.mxu1 %v15811_v51  ;;  %v15891_v51 = vld [vmem:[#allocation3 + $0x63c] ss:$36 sps:$4 sm:$0xff]  }
 0x1a0   :  { %3108 = vmatprep.subr.bf16.mxu1 %v15819_v52  ;;  %v13955_v52 = vcombine.high %v3749_v47, %v3757_v48 }
 0x1a1   :  { %15272 = vmatpush3.bf16.msra.mxu0 %v15982_v30  ;;  %v14034_v30 = vcombine.low %v3829_v19, %v3837_v20 }
 0x1a2   :  { %9929 = vmatprep.subr.bf16.mxu0 %v13907_v34  ;;  %v15925_v34 = vld [vmem:[#allocation3 + $0x7e8] ss:$36 sps:$4 sm:$0xff]  }
 0x1a3   :  { %3109 = vmatpush1.bf16.msra.mxu1 %v15817_v55  ;;  %v15889_v55 = vld [vmem:[#allocation3 + $0x638] ss:$36 sps:$4 sm:$0xff]  }
 0x1a4   :  { %3110 = vmatprep.subr.bf16.mxu1 %v15825_v56  ;;  %3570 = vmatmul.mubr.bf16.vlgmr.msra.gmra.mrb[4].mxu0 %v17099_v0  ;;  %v13954_v56 = vcombine.low %v3749_v47, %v3757_v48  ;;  %v15945_v47 = vld [vmem:[#allocation3 + $0x8c4] ss:$36 sps:$4 sm:$0xff]  }
 0x1a5   :  { %9930 = vmatpush1.bf16.msra.mxu0 %v13906_v37 }
 0x1a6   :  { %9931 = vmatprep.subr.bf16.mxu0 %v13923_v40  ;;  %v15931_v40 = vld [vmem:[#allocation3 + $0x830] ss:$36 sps:$4 sm:$0xff]  }
 0x1a7   :  { %3111 = vmatpush1.bf16.msra.mxu1 %v15823_v60  ;;  %v3781_v60 = vld [vmem:[#allocation8 + $0x280] sm:$0xff] }
 0x1a8   :  { %3112 = vmatprep.subr.bf16.mxu1 %v15831_v61  ;;  %v3789_v61 = vld [vmem:[#allocation8 + $0x2c0] sm:$0xff] }
 0x1a9   :  { %9932 = vmatpush1.bf16.msra.mxu0 %v13922_v43  ;;  %v13987_v6 = vcombine.high %v3781_v60, %v3789_v61  ;;  %v13986_v10 = vcombine.low %v3781_v60, %v3789_v61  ;;  %v15955_v60 = vld [vmem:[#allocation3 + $0x954] ss:$36 sps:$4 sm:$0xff]  }
 0x1aa   :  { %9933 = vmatprep.subr.bf16.mxu0 %v13939_v46  ;;  %v15937_v46 = vld [vmem:[#allocation3 + $0x878] ss:$36 sps:$4 sm:$0xff]  }
 0x1ab   :  { %3113 = vmatpush1.bf16.msra.mxu1 %v15829_v3  ;;  %v13970_v3 = vcombine.low %v3765_v53, %v3773_v54  ;;  %v15950_v53 = vld [vmem:[#allocation3 + $0x90c] ss:$36 sps:$4 sm:$0xff]  }
 0x1ac   :  { %3114 = vmatprep.subr.bf16.mxu1 %v15837_v4  ;;  %v3797_v4 = vld [vmem:[#allocation8 + $0x300] sm:$0xff] }
 0x1ad   :  { %9934 = vmatpush1.bf16.msra.mxu0 %v13938_v49  ;;  %v14003_v11 = vcombine.high %v3797_v4, %v3805_v7 }
 0x1ae   :  { %9935 = vmatprep.subr.bf16.mxu0 %v13955_v52  ;;  %v15943_v52 = vld [vmem:[#allocation3 + $0x8c0] ss:$36 sps:$4 sm:$0xff]  }
 0x1af   :  { %3115 = vmatpush1.bf16.msra.mxu1 %v15835_v8  ;;  %v15901_v8 = vld [vmem:[#allocation3 + $0x6c8] ss:$36 sps:$4 sm:$0xff]  }
 0x1b0   :  { %3116 = vmatprep.subr.bf16.mxu1 %v15843_v9  ;;  %v15909_v9 = vld [vmem:[#allocation3 + $0x714] ss:$36 sps:$4 sm:$0xff]  }
 0x1b1   :  { %9936 = vmatpush1.bf16.msra.mxu0 %v13954_v56  ;;  %v3925_v56 = vld [vmem:[#allocation8 + $0x700] sm:$0xff] }
 0x1b2   :  { %9937 = vmatprep.subr.bf16.mxu0 %v13971_v58  ;;  %v15948_v58 = vld [vmem:[#allocation3 + $0x908] ss:$36 sps:$4 sm:$0xff]  }
 0x1b3   :  { %3117 = vmatpush1.bf16.msra.mxu1 %v15841_v12  ;;  %v3813_v12 = vld [vmem:[#allocation8 + $0x380] sm:$0xff] }
 0x1b4   :  { %3118 = vmatprep.subr.bf16.mxu1 %v15849_v14  ;;  %v3821_v14 = vld [vmem:[#allocation8 + $0x3c0] sm:$0xff] }
 0x1b5   :  { %9938 = vmatpush1.bf16.msra.mxu0 %v13970_v3  ;;  %v14018_v23 = vcombine.low %v3813_v12, %v3821_v14 }
 0x1b6   :  { %9939 = vmatprep.subr.bf16.mxu0 %v13987_v6  ;;  %v15953_v6 = vld [vmem:[#allocation3 + $0x950] ss:$36 sps:$4 sm:$0xff]  }
 0x1b7   :  { %3119 = vmatpush1.bf16.msra.mxu1 %v15847_v17  ;;  %v14002_v17 = vcombine.low %v3797_v4, %v3805_v7  ;;  %v15960_v7 = vld [vmem:[#allocation3 + $0x99c] ss:$36 sps:$4 sm:$0xff]  }
 0x1b8   :  { %3129 = vmatprep.subr.bf16.mxu1 %v15855_v18  ;;  %v14019_v18 = vcombine.high %v3813_v12, %v3821_v14  ;;  %v15963_v12 = vld [vmem:[#allocation3 + $0x9e0] ss:$36 sps:$4 sm:$0xff]   ;;  %v15970_v14 = vld [vmem:[#allocation3 + $0xa2c] ss:$36 sps:$4 sm:$0xff]  }
 0x1b9   :  { %9940 = vmatpush1.bf16.msra.mxu0 %v13986_v10  ;;  %v15958_v10 = vld [vmem:[#allocation3 + $0x998] ss:$36 sps:$4 sm:$0xff]  }
 0x1ba   :  { %3121 = vmatmul.mubr.bf16.vlgmr.msra.gmra.mrb[4].mxu1 %v17089_v59  ;;  %9941 = vmatprep.subr.bf16.mxu0 %v14003_v11  ;;  %v15965_v11 = vld [vmem:[#allocation3 + $0x9e4] ss:$36 sps:$4 sm:$0xff]  }
 0x1bb   :  { %3130 = vmatpush1.bf16.msra.mxu1 %v15853_v21  ;;  %3161 = vmatprep.mubr.bf16.mxu1 %v17093_v62  ;;  %v15913_v21 = vld [vmem:[#allocation3 + $0x758] ss:$36 sps:$4 sm:$0xff]  }
 0x1bc   :  { %3131 = vmatprep.subr.bf16.mxu1 %v15861_v22  ;;  %v15921_v22 = vld [vmem:[#allocation3 + $0x7a4] ss:$36 sps:$4 sm:$0xff]  }
 0x1bd   :  { %9942 = vmatpush1.bf16.msra.mxu0 %v14002_v17  ;;  %v15973_v17 = vld [vmem:[#allocation3 + $0xa70] ss:$36 sps:$4 sm:$0xff]  }
 0x1be   :  { %9943 = vmatprep.subr.bf16.mxu0 %v14019_v18  ;;  %v15980_v18 = vld [vmem:[#allocation3 + $0xabc] ss:$36 sps:$4 sm:$0xff]  }
 0x1bf   :  { %3132 = vmatpush1.bf16.msra.mxu1 %v15859_v24  ;;  %v14035_v24 = vcombine.high %v3829_v19, %v3837_v20  ;;  %v15978_v19 = vld [vmem:[#allocation3 + $0xab8] ss:$36 sps:$4 sm:$0xff]   ;;  %v15985_v20 = vld [vmem:[#allocation3 + $0xb04] ss:$36 sps:$4 sm:$0xff]  }
 0x1c0   :  { %3133 = vmatprep.subr.bf16.mxu1 %v15867_v27  ;;  %v3853_v27 = vld [vmem:[#allocation8 + $0x4c0] sm:$0xff] }
 0x1c1   :  { %9944 = vmatpush1.bf16.msra.mxu0 %v14018_v23  ;;  %v14051_v31 = vcombine.high %v3845_v26, %v3853_v27  ;;  %v14050_v36 = vcombine.low %v3845_v26, %v3853_v27  ;;  %v15986_v23 = vld [vmem:[#allocation3 + $0xb48] ss:$36 sps:$4 sm:$0xff]   ;;  %v15989_v26 = vld [vmem:[#allocation3 + $0xb90] ss:$36 sps:$4 sm:$0xff]   ;;  %v15994_v27 = vld [vmem:[#allocation3 + $0xbdc] ss:$36 sps:$4 sm:$0xff]  }
 0x1c2   :  { %9945 = vmatprep.subr.bf16.mxu0 %v14035_v24  ;;  %v15991_v24 = vld [vmem:[#allocation3 + $0xb94] ss:$36 sps:$4 sm:$0xff]  }
 0x1c3   :  { %3134 = vmatpush1.bf16.msra.mxu1 %v15865_v32  ;;  %v3861_v32 = vld [vmem:[#allocation8 + $0x500] sm:$0xff] }
 0x1c4   :  { %3135 = vmatprep.subr.bf16.mxu1 %v15873_v33  ;;  %v3869_v33 = vld [vmem:[#allocation8 + $0x540] sm:$0xff] }
 0x1c5   :  { %9946 = vmatpush1.bf16.msra.mxu0 %v14034_v30  ;;  %v14067_v37 = vcombine.high %v3861_v32, %v3869_v33  ;;  %v14066_v42 = vcombine.low %v3861_v32, %v3869_v33  ;;  %v15995_v30 = vld [vmem:[#allocation3 + $0xc20] ss:$36 sps:$4 sm:$0xff]   ;;  %v15998_v32 = vld [vmem:[#allocation3 + $0xc68] ss:$36 sps:$4 sm:$0xff]   ;;  %v16003_v33 = vld [vmem:[#allocation3 + $0xcb4] ss:$36 sps:$4 sm:$0xff]  }
 0x1c6   :  { %9947 = vmatprep.subr.bf16.mxu0 %v14051_v31  ;;  %v16000_v31 = vld [vmem:[#allocation3 + $0xc6c] ss:$36 sps:$4 sm:$0xff]  }
 0x1c7   :  { %3136 = vmatpush1.bf16.msra.mxu1 %v15871_v38  ;;  %v3877_v38 = vld [vmem:[#allocation8 + $0x580] sm:$0xff] }
 0x1c8   :  { %3137 = vmatprep.subr.bf16.mxu1 %v15879_v39  ;;  %v3885_v39 = vld [vmem:[#allocation8 + $0x5c0] sm:$0xff] }
 0x1c9   :  { %9948 = vmatpush1.bf16.msra.mxu0 %v14050_v36  ;;  %v14083_v43 = vcombine.high %v3877_v38, %v3885_v39  ;;  %v14082_v48 = vcombine.low %v3877_v38, %v3885_v39  ;;  %v16004_v36 = vld [vmem:[#allocation3 + $0xcf8] ss:$36 sps:$4 sm:$0xff]   ;;  %v16007_v38 = vld [vmem:[#allocation3 + $0xd40] ss:$36 sps:$4 sm:$0xff]  }
 0x1ca   :  { %9949 = vmatprep.subr.bf16.mxu0 %v14067_v37  ;;  %v16009_v37 = vld [vmem:[#allocation3 + $0xd44] ss:$36 sps:$4 sm:$0xff]   ;;  %v16012_v39 = vld [vmem:[#allocation3 + $0x1c] ss:$36 sps:$4 sm:$0xff]  }
 0x1cb   :  { %3138 = vmatpush1.bf16.msra.mxu1 %v15877_v44  ;;  %v3893_v44 = vld [vmem:[#allocation8 + $0x600] sm:$0xff] }
 0x1cc   :  { %3139 = vmatprep.subr.bf16.mxu1 %v15885_v45  ;;  %v3901_v45 = vld [vmem:[#allocation8 + $0x640] sm:$0xff] }
 0x1cd   :  { %9950 = vmatpush1.bf16.msra.mxu0 %v14066_v42  ;;  %v14099_v49 = vcombine.high %v3893_v44, %v3901_v45  ;;  %v14098_v54 = vcombine.low %v3893_v44, %v3901_v45  ;;  %v16013_v42 = vld [vmem:[#allocation3 + $0x60] ss:$36 sps:$4 sm:$0xff]   ;;  %v16016_v44 = vld [vmem:[#allocation3 + $0xa8] ss:$36 sps:$4 sm:$0xff]   ;;  %v16021_v45 = vld [vmem:[#allocation3 + $0xf4] ss:$36 sps:$4 sm:$0xff]  }
 0x1ce   :  { %9951 = vmatprep.subr.bf16.mxu0 %v14083_v43  ;;  %v16018_v43 = vld [vmem:[#allocation3 + $0xac] ss:$36 sps:$4 sm:$0xff]  }
 0x1cf   :  { %3140 = vmatpush1.bf16.msra.mxu1 %v15883_v50  ;;  %v3909_v50 = vld [vmem:[#allocation8 + $0x680] sm:$0xff] }
 0x1d0   :  { %3141 = vmatprep.subr.bf16.mxu1 %v15891_v51  ;;  %v3917_v51 = vld [vmem:[#allocation8 + $0x6c0] sm:$0xff] }
 0x1d1   :  { %9952 = vmatpush1.bf16.msra.mxu0 %v14082_v48  ;;  %v14114_v61 = vcombine.low %v3909_v50, %v3917_v51  ;;  %v17125_v48 = vsub.s32 0, %v17063_v13 }
 0x1d2   :  { %9953 = vmatprep.subr.bf16.mxu0 %v14099_v49  ;;  %v16022_v49 = vld [vmem:[#allocation3 + $0x138] ss:$36 sps:$4 sm:$0xff]  }
 0x1d3   :  { %3142 = vmatpush1.bf16.msra.mxu1 %v15889_v55  ;;  %v14115_v55 = vcombine.high %v3909_v50, %v3917_v51  ;;  %v17127_v50 = vld [vmem:[#allocation5] sm:$0xff]  ;;  %v17130_v51 = vsub.s32 1, %v17063_v13 }
 0x1d4   :  { %3143 = vmatprep.subr.bf16.mxu1 %v15897_v57  ;;  %v3933_v57 = vld [vmem:[#allocation8 + $0x740] sm:$0xff] }
 0x1d5   :  { %9954 = vmatpush1.bf16.msra.mxu0 %v14098_v54  ;;  %v14131_v3 = vcombine.high %v3925_v56, %v3933_v57  ;;  %v14130_v4 = vcombine.low %v3925_v56, %v3933_v57  ;;  %v665_v54 = vrot.slane %v17127_v50, %v17130_v51  ;;  %v16030_v56 = vld [vmem:[#allocation3 + $0x1cc] ss:$36 sps:$4 sm:$0xff]  }
 0x1d6   :  { %9955 = vmatprep.subr.bf16.mxu0 %v14115_v55  ;;  %v16025_v55 = vld [vmem:[#allocation3 + $0x180] ss:$36 sps:$4 sm:$0xff]  }
 0x1d7   :  { %3144 = vmatpush1.bf16.msra.mxu1 %v15895_v1  ;;  %v3941_v1 = vld [vmem:[#allocation8 + $0x780] sm:$0xff] }
 0x1d8   :  { %3145 = vmatprep.subr.bf16.mxu1 %v15903_v2  ;;  %v3949_v2 = vld [vmem:[#allocation8 + $0x7c0] sm:$0xff] }
 0x1d9   :  { %9956 = vmatpush1.bf16.msra.mxu0 %v14114_v61 }
 0x1da   :  { %9957 = vmatprep.subr.bf16.mxu0 %v14131_v3 }
 0x1db   :  { %3146 = vmatpush1.bf16.msra.mxu1 %v15901_v8  ;;  %v14147_v8 = vcombine.high %v3941_v1, %v3949_v2 }
 0x1dc   :  { %3147 = vmatprep.subr.bf16.mxu1 %v15909_v9  ;;  %v14146_v9 = vcombine.low %v3941_v1, %v3949_v2  ;;  %v16028_v2 = vld [vmem:[#allocation3 + $0x1c8] ss:$36 sps:$4 sm:$0xff]  }
 0x1dd   :  { %9958 = vmatpush1.bf16.msra.mxu0 %v14130_v4 }
 0x1de   :  { %9959 = vmatprep.subr.bf16.mxu0 %v14147_v8  ;;  %v3957_v8 = vld [vmem:[#allocation8 + $0x800] sm:$0xff] }
 0x1df   :  { %3148 = vmatpush1.bf16.msra.mxu1 %v15907_v15  ;;  %v15968_v15 = vld [vmem:[#allocation3 + $0xa28] ss:$36 sps:$4 sm:$0xff]  }
 0x1e0   :  { %3149 = vmatprep.subr.bf16.mxu1 %v15915_v16  ;;  %v15975_v16 = vld [vmem:[#allocation3 + $0xa74] ss:$36 sps:$4 sm:$0xff]  }
 0x1e1   :  { %9960 = vmatpush1.bf16.msra.mxu0 %v14146_v9  ;;  %v3965_v9 = vld [vmem:[#allocation8 + $0x840] sm:$0xff] }
 0x1e3   :  { %3150 = vmatpush1.bf16.msra.mxu1 %v15913_v21  ;;  %v15983_v21 = vld [vmem:[#allocation3 + $0xb00] ss:$36 sps:$4 sm:$0xff]  }
 0x1e4   :  { %3151 = vmatprep.subr.bf16.mxu1 %v15921_v22  ;;  %v15988_v22 = vld [vmem:[#allocation3 + $0xb4c] ss:$36 sps:$4 sm:$0xff]  }
 0x1e7   :  { %3152 = vmatpush1.bf16.msra.mxu1 %v15919_v28  ;;  %v15992_v28 = vld [vmem:[#allocation3 + $0xbd8] ss:$36 sps:$4 sm:$0xff]  }
 0x1e8   :  { %3153 = vmatprep.subr.bf16.mxu1 %v15927_v29  ;;  %v15997_v29 = vld [vmem:[#allocation3 + $0xc24] ss:$36 sps:$4 sm:$0xff]  }
 0x1eb   :  { %3154 = vmatpush1.bf16.msra.mxu1 %v15925_v34  ;;  %v16001_v34 = vld [vmem:[#allocation3 + $0xcb0] ss:$36 sps:$4 sm:$0xff]  }
 0x1ec   :  { %3155 = vmatprep.subr.bf16.mxu1 %v15933_v35  ;;  %v16006_v35 = vld [vmem:[#allocation3 + $0xcfc] ss:$36 sps:$4 sm:$0xff]  }
 0x1ef   :  { %3156 = vmatpush1.bf16.msra.mxu1 %v15931_v40  ;;  %v16010_v40 = vld [vmem:[#allocation3 + $0x18] ss:$36 sps:$4 sm:$0xff]  }
 0x1f0   :  { %3157 = vmatprep.subr.bf16.mxu1 %v15939_v41  ;;  %v16015_v41 = vld [vmem:[#allocation3 + $0x64] ss:$36 sps:$4 sm:$0xff]  }
 0x1f3   :  { %3158 = vmatpush1.bf16.msra.mxu1 %v15937_v46  ;;  %v16019_v46 = vld [vmem:[#allocation3 + $0xf0] ss:$36 sps:$4 sm:$0xff]  }
 0x1f4   :  { %3159 = vmatprep.subr.bf16.mxu1 %v15945_v47  ;;  %v16024_v47 = vld [vmem:[#allocation3 + $0x13c] ss:$36 sps:$4 sm:$0xff]  }
 0x1f7   :  { %3160 = vmatpush1.bf16.msra.mxu1 %v15943_v52  ;;  %v16027_v52 = vld [vmem:[#allocation3 + $0x184] ss:$36 sps:$4 sm:$0xff]  }
 0x1f8   :  { %3170 = vmatprep.subr.bf16.mxu1 %v15950_v53  ;;  %v661_v53 = vrot.slane %v17127_v50, %v17125_v48 }
 0x1fa   :  { %3162 = vmatmul.mubr.bf16.vlgmr.msra.gmra.mrb[4].mxu1 %v17107_v5 }
 0x1fb   :  { %3171 = vmatpush1.bf16.msra.mxu1 %v15948_v58  ;;  %3202 = vmatprep.mubr.bf16.mxu1 %v17096_v63 }
 0x1fc   :  { %3172 = vmatprep.subr.bf16.mxu1 %v15955_v60 }
 0x1ff   :  { %3173 = vmatpush1.bf16.msra.mxu1 %v15953_v6  ;;  %v16033_v6 = vld [vmem:[#allocation3 + $0x214] ss:$36 sps:$4 sm:$0xff]  }
 0x200   :  { %3174 = vmatprep.subr.bf16.mxu1 %v15960_v7 }
 0x203   :  { %3175 = vmatpush1.bf16.msra.mxu1 %v15958_v10 }
 0x204   :  { %3176 = vmatprep.subr.bf16.mxu1 %v15965_v11  ;;  %v16031_v11 = vld [vmem:[#allocation3 + $0x210] ss:$36 sps:$4 sm:$0xff]  }
 0x207   :  { %3177 = vmatpush1.bf16.msra.mxu1 %v15963_v12  ;;  %v14162_v12 = vcombine.low %v3957_v8, %v3965_v9 }
 0x208   :  { %3178 = vmatprep.subr.bf16.mxu1 %v15970_v14  ;;  %v14163_v14 = vcombine.high %v3957_v8, %v3965_v9  ;;  %v16060_v9 = vld [vmem:[#allocation3 + $0x49c] ss:$36 sps:$4 sm:$0xff]  }
 0x20a   :  { %9970 = vmatprep.subr.bf16.mxu0 %v14163_v14  ;;  %v16058_v14 = vld [vmem:[#allocation3 + $0x498] ss:$36 sps:$4 sm:$0xff]  }
 0x20b   :  { %3179 = vmatpush1.bf16.msra.mxu1 %v15968_v15 }
 0x20c   :  { %3180 = vmatprep.subr.bf16.mxu1 %v15975_v16  ;;  %v16036_v16 = vld [vmem:[#allocation3 + $0x25c] ss:$36 sps:$4 sm:$0xff]  }
 0x20f   :  { %3181 = vmatpush1.bf16.msra.mxu1 %v15973_v17  ;;  %v3973_v17 = vld [vmem:[#allocation8 + $0x880] sm:$0xff] }
 0x210   :  { %3182 = vmatprep.subr.bf16.mxu1 %v15980_v18  ;;  %v3981_v18 = vld [vmem:[#allocation8 + $0x8c0] sm:$0xff] }
 0x213   :  { %3183 = vmatpush1.bf16.msra.mxu1 %v15978_v19  ;;  %v16034_v19 = vld [vmem:[#allocation3 + $0x258] ss:$36 sps:$4 sm:$0xff]  }
 0x214   :  { %3184 = vmatprep.subr.bf16.mxu1 %v15985_v20  ;;  %v14178_v20 = vcombine.low %v3973_v17, %v3981_v18 }
 0x217   :  { %3185 = vmatpush1.bf16.msra.mxu1 %v15983_v21  ;;  %v14179_v21 = vcombine.high %v3973_v17, %v3981_v18  ;;  %v16063_v17 = vld [vmem:[#allocation3 + $0x4e4] ss:$36 sps:$4 sm:$0xff]  }
 0x218   :  { %3186 = vmatprep.subr.bf16.mxu1 %v15988_v22  ;;  %v16039_v22 = vld [vmem:[#allocation3 + $0x2a4] ss:$36 sps:$4 sm:$0xff]  }
 0x21b   :  { %3187 = vmatpush1.bf16.msra.mxu1 %v15986_v23  ;;  %v3989_v23 = vld [vmem:[#allocation8 + $0x900] sm:$0xff] }
 0x21c   :  { %3188 = vmatprep.subr.bf16.mxu1 %v15991_v24  ;;  %v3997_v24 = vld [vmem:[#allocation8 + $0x940] sm:$0xff] }
 0x21f   :  { %3189 = vmatpush1.bf16.msra.mxu1 %v15989_v26  ;;  %v16037_v26 = vld [vmem:[#allocation3 + $0x2a0] ss:$36 sps:$4 sm:$0xff]  }
 0x220   :  { %3190 = vmatprep.subr.bf16.mxu1 %v15994_v27  ;;  %v14194_v27 = vcombine.low %v3989_v23, %v3997_v24 }
 0x223   :  { %3191 = vmatpush1.bf16.msra.mxu1 %v15992_v28  ;;  %v14195_v28 = vcombine.high %v3989_v23, %v3997_v24  ;;  %v16066_v23 = vld [vmem:[#allocation3 + $0x52c] ss:$36 sps:$4 sm:$0xff]  }
 0x224   :  { %3192 = vmatprep.subr.bf16.mxu1 %v15997_v29  ;;  %v16042_v29 = vld [vmem:[#allocation3 + $0x2ec] ss:$36 sps:$4 sm:$0xff]  }
 0x227   :  { %3193 = vmatpush1.bf16.msra.mxu1 %v15995_v30  ;;  %v4005_v30 = vld [vmem:[#allocation8 + $0x980] sm:$0xff] }
 0x228   :  { %3194 = vmatprep.subr.bf16.mxu1 %v16000_v31  ;;  %v4013_v31 = vld [vmem:[#allocation8 + $0x9c0] sm:$0xff] }
 0x22b   :  { %3195 = vmatpush1.bf16.msra.mxu1 %v15998_v32  ;;  %v16040_v32 = vld [vmem:[#allocation3 + $0x2e8] ss:$36 sps:$4 sm:$0xff]  }
 0x22c   :  { %3196 = vmatprep.subr.bf16.mxu1 %v16003_v33  ;;  %v14210_v33 = vcombine.low %v4005_v30, %v4013_v31 }
 0x22f   :  { %3197 = vmatpush1.bf16.msra.mxu1 %v16001_v34  ;;  %v14211_v34 = vcombine.high %v4005_v30, %v4013_v31  ;;  %v16069_v30 = vld [vmem:[#allocation3 + $0x574] ss:$36 sps:$4 sm:$0xff]  }
 0x230   :  { %3198 = vmatprep.subr.bf16.mxu1 %v16006_v35  ;;  %v16045_v35 = vld [vmem:[#allocation3 + $0x334] ss:$36 sps:$4 sm:$0xff]  }
 0x233   :  { %3199 = vmatpush1.bf16.msra.mxu1 %v16004_v36  ;;  %v4021_v36 = vld [vmem:[#allocation8 + $0xa00] sm:$0xff] }
 0x234   :  { %3200 = vmatprep.subr.bf16.mxu1 %v16009_v37  ;;  %v4029_v37 = vld [vmem:[#allocation8 + $0xa40] sm:$0xff] }
 0x237   :  { %3201 = vmatpush1.bf16.msra.mxu1 %v16007_v38  ;;  %v16043_v38 = vld [vmem:[#allocation3 + $0x330] ss:$36 sps:$4 sm:$0xff]  }
 0x238   :  { %3334 = vmatprep.subr.bf16.mxu1 %v16012_v39  ;;  %v14226_v39 = vcombine.low %v4021_v36, %v4029_v37 }
 0x23a   :  { %3203 = vmatmul.mubr.bf16.vlgmr.msra.gmra.mrb[4].mxu1 %v17099_v0 }
 0x23b   :  { %3335 = vmatpush1.bf16.msra.mxu1 %v16010_v40  ;;  %3366 = vmatprep.mubr.bf16.mxu1 %v17080_v25  ;;  %v14227_v40 = vcombine.high %v4021_v36, %v4029_v37  ;;  %v16072_v37 = vld [vmem:[#allocation3 + $0x5bc] ss:$36 sps:$4 sm:$0xff]  }
 0x23c   :  { %3336 = vmatprep.subr.bf16.mxu1 %v16015_v41  ;;  %v16048_v41 = vld [vmem:[#allocation3 + $0x37c] ss:$36 sps:$4 sm:$0xff]  }
 0x23f   :  { %3337 = vmatpush1.bf16.msra.mxu1 %v16013_v42  ;;  %v4037_v42 = vld [vmem:[#allocation8 + $0xa80] sm:$0xff] }
 0x240   :  { %3338 = vmatprep.subr.bf16.mxu1 %v16018_v43  ;;  %v4045_v43 = vld [vmem:[#allocation8 + $0xac0] sm:$0xff] }
 0x243   :  { %3339 = vmatpush1.bf16.msra.mxu1 %v16016_v44  ;;  %v16046_v44 = vld [vmem:[#allocation3 + $0x378] ss:$36 sps:$4 sm:$0xff]  }
 0x244   :  { %3340 = vmatprep.subr.bf16.mxu1 %v16021_v45  ;;  %v14242_v45 = vcombine.low %v4037_v42, %v4045_v43 }
 0x247   :  { %3341 = vmatpush1.bf16.msra.mxu1 %v16019_v46  ;;  %v14243_v46 = vcombine.high %v4037_v42, %v4045_v43  ;;  %v4165_v42 = vld [vmem:[#allocation8 + $0xe80] sm:$0xff] }
 0x248   :  { %3342 = vmatprep.subr.bf16.mxu1 %v16024_v47  ;;  %v16051_v47 = vld [vmem:[#allocation3 + $0x3c4] ss:$36 sps:$4 sm:$0xff]  }
 0x249   :  { %v4173_v43 = vld [vmem:[#allocation8 + $0xec0] sm:$0xff] }
 0x24b   :  { %3343 = vmatpush1.bf16.msra.mxu1 %v16022_v49  ;;  %v4053_v49 = vld [vmem:[#allocation8 + $0xb00] sm:$0xff] }
 0x24c   :  { %3344 = vmatprep.subr.bf16.mxu1 %v16027_v52  ;;  %v4061_v52 = vld [vmem:[#allocation8 + $0xb40] sm:$0xff] }
 0x24d   :  { %v3081_v57 = vpop.f32.mrb[0].mxu1 }
 0x24e   :  { %v15359_v58 = vadd.f32 %v3081_v57, %v661_v53  ;;  %v3083_v60 = vpop.f32.mrb[1].mxu1  ;;  %v16049_v53 = vld [vmem:[#allocation3 + $0x3c0] ss:$36 sps:$4 sm:$0xff]   ;;  %v4069_v57 = vld [vmem:[#allocation8 + $0xb80] sm:$0xff] }
 0x24f   :  { %v15360_v61 = vadd.f32 %v3083_v60, %v665_v54  ;;  %v3085_v1 = vpop.f32.mrb[2].mxu1  ;;  %3345 = vmatpush1.bf16.msra.mxu1 %v16025_v55  ;;  %v14258_v54 = vcombine.low %v4053_v49, %v4061_v52  ;;  %v14259_v55 = vcombine.high %v4053_v49, %v4061_v52  ;;  %v16052_v60 = vld [vmem:[#allocation3 + $0x408] ss:$36 sps:$4 sm:$0xff]  }
 0x250   :  { %v3683_v3 = vmax.f32 %v15359_v58, 0.0  ;;  %v3086_v4 = vpop.f32.mrb[3].mxu1  ;;  %3346 = vmatprep.subr.bf16.mxu1 %v16030_v56  ;;  %v16054_v56 = vld [vmem:[#allocation3 + $0x40c] ss:$36 sps:$4 sm:$0xff]  }
 0x251   :  { %v3684_v7 = vmax.f32 %v15360_v61, 0.0  ;;  %v4077_v58 = vld [vmem:[#allocation8 + $0xbc0] sm:$0xff] }
 0x252   :  { %v17138_v15 = vpack.c.bf16 %v3683_v3, %v3683_v3  ;;  %v14274_v61 = vcombine.low %v4069_v57, %v4077_v58  ;;  %v14275_v1 = vcombine.high %v4069_v57, %v4077_v58  ;;  %v4085_v3 = vld [vmem:[#allocation8 + $0xc00] sm:$0xff] }
 0x253   :  { %v17136_v10 = vpack.c.bf16 %v3684_v7, %v3684_v7  ;;  %3347 = vmatpush1.bf16.msra.mxu1 %v16028_v2  ;;  %v16057_v2 = vld [vmem:[#allocation3 + $0x454] ss:$36 sps:$4 sm:$0xff]   ;;  %v4093_v4 = vld [vmem:[#allocation8 + $0xc40] sm:$0xff] }
 0x254   :  { %3348 = vmatprep.subr.bf16.mxu1 %v16033_v6  ;;  %v16055_v6 = vld [vmem:[#allocation3 + $0x450] ss:$36 sps:$4 sm:$0xff]   ;;  %v14290_v7 = vcombine.low %v4085_v3, %v4093_v4  ;;  %v14291_v8 = vcombine.high %v4085_v3, %v4093_v4 }
 0x255   :  { %9961 = vmatprep.mubr.bf16.mxu0 %v17136_v10  ;;  %v4181_v49 = vld [vmem:[#allocation8 + $0xf00] sm:$0xff] }
 0x256   :  { %9962 = vmatmul.mubr.bf16.vlgmr.msra.gmra.mrb[8].mxu0 %v17138_v15  ;;  %v4189_v52 = vld [vmem:[#allocation8 + $0xf40] sm:$0xff] }
 0x257   :  { %3349 = vmatpush1.bf16.msra.mxu1 %v16031_v11  ;;  %9971 = vmatpush1.bf16.msra.mxu0 %v14162_v12  ;;  %v4101_v11 = vld [vmem:[#allocation8 + $0xc80] sm:$0xff]  ;;  %v17144_v36 = vpop.f32.mrb[0].mxu0 }
 0x258   :  { %3350 = vmatprep.subr.bf16.mxu1 %v16036_v16  ;;  %9972 = vmatprep.subr.bf16.mxu0 %v14179_v21  ;;  %v4109_v12 = vld [vmem:[#allocation8 + $0xcc0] sm:$0xff]  ;;  %v16061_v21 = vld [vmem:[#allocation3 + $0x4e0] ss:$36 sps:$4 sm:$0xff]  }
 0x259   :  { %v14307_v16 = vcombine.high %v4101_v11, %v4109_v12  ;;  %v14306_v18 = vcombine.low %v4101_v11, %v4109_v12  ;;  %v4197_v57 = vld [vmem:[#allocation8 + $0xf80] sm:$0xff]  ;;  %v16082_v11 = vld [vmem:[#allocation3 + $0x6d8] ss:$36 sps:$4 sm:$0xff]  }
 0x25a   :  { %v4205_v58 = vld [vmem:[#allocation8 + $0xfc0] sm:$0xff] }
 0x25b   :  { %3351 = vmatpush1.bf16.msra.mxu1 %v16034_v19  ;;  %9973 = vmatpush1.bf16.msra.mxu0 %v14178_v20  ;;  %v4117_v19 = vld [vmem:[#allocation8 + $0xd00] sm:$0xff] }
 0x25c   :  { %3352 = vmatprep.subr.bf16.mxu1 %v16039_v22  ;;  %9974 = vmatprep.subr.bf16.mxu0 %v14195_v28  ;;  %v4125_v20 = vld [vmem:[#allocation8 + $0xd40] sm:$0xff] }
 0x25d   :  { %v14323_v22 = vcombine.high %v4117_v19, %v4125_v20  ;;  %v14322_v24 = vcombine.low %v4117_v19, %v4125_v20  ;;  %v16064_v28 = vld [vmem:[#allocation3 + $0x528] ss:$36 sps:$4 sm:$0xff]   ;;  %v16091_v19 = vld [vmem:[#allocation3 + $0x7b0] ss:$36 sps:$4 sm:$0xff]   ;;  %v16096_v20 = vld [vmem:[#allocation3 + $0x7fc] ss:$36 sps:$4 sm:$0xff]  }
 0x25e   :  { %v17148_v3 = vld [vmem:[#allocation8 + $0x1000] sm:$0xff] }
 0x25f   :  { %3353 = vmatpush1.bf16.msra.mxu1 %v16037_v26  ;;  %9975 = vmatpush1.bf16.msra.mxu0 %v14194_v27  ;;  %v4133_v26 = vld [vmem:[#allocation8 + $0xd80] sm:$0xff] }
 0x260   :  { %3354 = vmatprep.subr.bf16.mxu1 %v16042_v29  ;;  %9976 = vmatprep.subr.bf16.mxu0 %v14211_v34  ;;  %v4141_v27 = vld [vmem:[#allocation8 + $0xdc0] sm:$0xff] }
 0x261   :  { %v14339_v29 = vcombine.high %v4133_v26, %v4141_v27  ;;  %v14338_v31 = vcombine.low %v4133_v26, %v4141_v27  ;;  %v16067_v34 = vld [vmem:[#allocation3 + $0x570] ss:$36 sps:$4 sm:$0xff]   ;;  %v16087_v12 = vld [vmem:[#allocation3 + $0x724] ss:$36 sps:$4 sm:$0xff]  }
 0x262   :  { %v17150_v4 = vld [vmem:[#allocation8 + $0x1040] sm:$0xff]  ;;  %v16105_v27 = vld [vmem:[#allocation3 + $0x8d4] ss:$36 sps:$4 sm:$0xff]  }
 0x263   :  { %3355 = vmatpush1.bf16.msra.mxu1 %v16040_v32  ;;  %9977 = vmatpush1.bf16.msra.mxu0 %v14210_v33  ;;  %v4149_v32 = vld [vmem:[#allocation8 + $0xe00] sm:$0xff] }
 0x264   :  { %3356 = vmatprep.subr.bf16.mxu1 %v16045_v35  ;;  %9978 = vmatprep.subr.bf16.mxu0 %v14227_v40  ;;  %v4157_v33 = vld [vmem:[#allocation8 + $0xe40] sm:$0xff] }
 0x265   :  { %v14355_v35 = vcombine.high %v4149_v32, %v4157_v33  ;;  %v16100_v26 = vld [vmem:[#allocation3 + $0x888] ss:$36 sps:$4 sm:$0xff]  }
 0x267   :  { %3357 = vmatpush1.bf16.msra.mxu1 %v16043_v38  ;;  %9979 = vmatpush1.bf16.msra.mxu0 %v14226_v39  ;;  %v14354_v38 = vcombine.low %v4149_v32, %v4157_v33  ;;  %v17146_v39 = vpop.f32.mrb[1].mxu0  ;;  %v16109_v32 = vld [vmem:[#allocation3 + $0x960] ss:$36 sps:$4 sm:$0xff]   ;;  %v16114_v33 = vld [vmem:[#allocation3 + $0x9ac] ss:$36 sps:$4 sm:$0xff]  }
 0x268   :  { %3358 = vmatprep.subr.bf16.mxu1 %v16048_v41  ;;  %9980 = vmatprep.subr.bf16.mxu0 %v14243_v46  ;;  %v3331_v40 = vpop.f32.mrb[2].mxu0  ;;  %v16075_v46 = vld [vmem:[#allocation3 + $0x604] ss:$36 sps:$4 sm:$0xff]  }
 0x269   :  { %v3332_v41 = vpop.f32.mrb[3].mxu0  ;;  %v16118_v40 = vld [vmem:[#allocation3 + $0xa38] ss:$36 sps:$4 sm:$0xff]  }
 0x26a   :  { %v16123_v41 = vld [vmem:[#allocation3 + $0xa84] ss:$36 sps:$4 sm:$0xff]  }
 0x26b   :  { %3359 = vmatpush1.bf16.msra.mxu1 %v16046_v44  ;;  %9981 = vmatpush1.bf16.msra.mxu0 %v14242_v45  ;;  %v16070_v44 = vld [vmem:[#allocation3 + $0x5b8] ss:$36 sps:$4 sm:$0xff]   ;;  %v14371_v45 = vcombine.high %v4165_v42, %v4173_v43 }
 0x26c   :  { %3360 = vmatprep.subr.bf16.mxu1 %v16051_v47  ;;  %9982 = vmatprep.subr.bf16.mxu0 %v14259_v55  ;;  %v14370_v47 = vcombine.low %v4165_v42, %v4173_v43  ;;  %v16078_v55 = vld [vmem:[#allocation3 + $0x64c] ss:$36 sps:$4 sm:$0xff]   ;;  %v16121_v42 = vld [vmem:[#allocation3 + $0xa80] ss:$36 sps:$4 sm:$0xff]  }
 0x26d   :  { %v16126_v43 = vld [vmem:[#allocation3 + $0xacc] ss:$36 sps:$4 sm:$0xff]  }
 0x26f   :  { %3361 = vmatpush1.bf16.msra.mxu1 %v16049_v53  ;;  %9983 = vmatpush1.bf16.msra.mxu0 %v14258_v54  ;;  %v16073_v53 = vld [vmem:[#allocation3 + $0x600] ss:$36 sps:$4 sm:$0xff]   ;;  %v14387_v54 = vcombine.high %v4181_v49, %v4189_v52 }
 0x270   :  { %3362 = vmatprep.subr.bf16.mxu1 %v16054_v56  ;;  %9984 = vmatprep.subr.bf16.mxu0 %v14275_v1  ;;  %v14386_v56 = vcombine.low %v4181_v49, %v4189_v52  ;;  %v16081_v1 = vld [vmem:[#allocation3 + $0x694] ss:$36 sps:$4 sm:$0xff]   ;;  %v16135_v49 = vld [vmem:[#allocation3 + $0xba4] ss:$36 sps:$4 sm:$0xff]  }
 0x271   :  { %v16133_v52 = vld [vmem:[#allocation3 + $0xba0] ss:$36 sps:$4 sm:$0xff]  }
 0x273   :  { %3363 = vmatpush1.bf16.msra.mxu1 %v16052_v60  ;;  %9985 = vmatpush1.bf16.msra.mxu0 %v14274_v61  ;;  %v16076_v60 = vld [vmem:[#allocation3 + $0x648] ss:$36 sps:$4 sm:$0xff]   ;;  %v14403_v61 = vcombine.high %v4197_v57, %v4205_v58 }
 0x274   :  { %3364 = vmatprep.subr.bf16.mxu1 %v16057_v2  ;;  %9986 = vmatprep.subr.bf16.mxu0 %v14291_v8  ;;  %v14402_v2 = vcombine.low %v4197_v57, %v4205_v58  ;;  %v16084_v8 = vld [vmem:[#allocation3 + $0x6dc] ss:$36 sps:$4 sm:$0xff]  }
 0x275   :  { %v16144_v57 = vld [vmem:[#allocation3 + $0xc7c] ss:$36 sps:$4 sm:$0xff]  }
 0x276   :  { %v16142_v58 = vld [vmem:[#allocation3 + $0xc78] ss:$36 sps:$4 sm:$0xff]  }
 0x277   :  { %3365 = vmatpush1.bf16.msra.mxu1 %v16055_v6  ;;  %9987 = vmatpush1.bf16.msra.mxu0 %v14290_v7  ;;  %v16079_v6 = vld [vmem:[#allocation3 + $0x690] ss:$36 sps:$4 sm:$0xff]   ;;  %v14419_v7 = vcombine.high %v17148_v3, %v17150_v4 }
 0x278   :  { %3375 = vmatprep.subr.bf16.mxu1 %v16060_v9  ;;  %9988 = vmatprep.subr.bf16.mxu0 %v14307_v16  ;;  %v14418_v9 = vcombine.low %v17148_v3, %v17150_v4  ;;  %v16090_v16 = vld [vmem:[#allocation3 + $0x76c] ss:$36 sps:$4 sm:$0xff]  }
 0x279   :  { %v16174_v4 = vld [vmem:[#allocation3 + $0x770] ss:$36 sps:$4 sm:$0xff]  }
 0x27a   :  { %3367 = vmatmul.mubr.bf16.vlgmr.msra.gmra.mrb[8].mxu1 %v17089_v59 }
 0x27b   :  { %3376 = vmatpush1.bf16.msra.mxu1 %v16058_v14  ;;  %3407 = vmatprep.mubr.bf16.mxu1 %v17093_v62  ;;  %v16085_v14 = vld [vmem:[#allocation3 + $0x720] ss:$36 sps:$4 sm:$0xff]  }
 0x27c   :  { %3377 = vmatprep.subr.bf16.mxu1 %v16063_v17  ;;  %9989 = vmatpush1.bf16.msra.mxu0 %v14306_v18  ;;  %v16088_v17 = vld [vmem:[#allocation3 + $0x768] ss:$36 sps:$4 sm:$0xff]   ;;  %v16093_v18 = vld [vmem:[#allocation3 + $0x7b4] ss:$36 sps:$4 sm:$0xff]  }
 0x27d   :  { %9990 = vmatprep.subr.bf16.mxu0 %v14323_v22  ;;  %v16099_v22 = vld [vmem:[#allocation3 + $0x844] ss:$36 sps:$4 sm:$0xff]  }
 0x27f   :  { %3378 = vmatpush1.bf16.msra.mxu1 %v16061_v21  ;;  %v16094_v21 = vld [vmem:[#allocation3 + $0x7f8] ss:$36 sps:$4 sm:$0xff]  }
 0x280   :  { %3379 = vmatprep.subr.bf16.mxu1 %v16066_v23  ;;  %9991 = vmatpush1.bf16.msra.mxu0 %v14322_v24  ;;  %v16097_v23 = vld [vmem:[#allocation3 + $0x840] ss:$36 sps:$4 sm:$0xff]   ;;  %v16102_v24 = vld [vmem:[#allocation3 + $0x88c] ss:$36 sps:$4 sm:$0xff]  }
 0x281   :  { %9992 = vmatprep.subr.bf16.mxu0 %v14339_v29  ;;  %v16108_v29 = vld [vmem:[#allocation3 + $0x91c] ss:$36 sps:$4 sm:$0xff]  }
 0x283   :  { %3380 = vmatpush1.bf16.msra.mxu1 %v16064_v28  ;;  %v16103_v28 = vld [vmem:[#allocation3 + $0x8d0] ss:$36 sps:$4 sm:$0xff]  }
 0x284   :  { %3381 = vmatprep.subr.bf16.mxu1 %v16069_v30  ;;  %9993 = vmatpush1.bf16.msra.mxu0 %v14338_v31  ;;  %v16106_v30 = vld [vmem:[#allocation3 + $0x918] ss:$36 sps:$4 sm:$0xff]   ;;  %v16111_v31 = vld [vmem:[#allocation3 + $0x964] ss:$36 sps:$4 sm:$0xff]  }
 0x285   :  { %9994 = vmatprep.subr.bf16.mxu0 %v14355_v35  ;;  %v16117_v35 = vld [vmem:[#allocation3 + $0x9f4] ss:$36 sps:$4 sm:$0xff]  }
 0x287   :  { %3382 = vmatpush1.bf16.msra.mxu1 %v16067_v34  ;;  %v16112_v34 = vld [vmem:[#allocation3 + $0x9a8] ss:$36 sps:$4 sm:$0xff]  }
 0x288   :  { %3383 = vmatprep.subr.bf16.mxu1 %v16072_v37  ;;  %9995 = vmatpush1.bf16.msra.mxu0 %v14354_v38  ;;  %v16115_v37 = vld [vmem:[#allocation3 + $0x9f0] ss:$36 sps:$4 sm:$0xff]   ;;  %v16120_v38 = vld [vmem:[#allocation3 + $0xa3c] ss:$36 sps:$4 sm:$0xff]  }
 0x289   :  { %9996 = vmatprep.subr.bf16.mxu0 %v14371_v45  ;;  %v16127_v45 = vld [vmem:[#allocation3 + $0xb10] ss:$36 sps:$4 sm:$0xff]  }
 0x28b   :  { %3384 = vmatpush1.bf16.msra.mxu1 %v16070_v44  ;;  %v16129_v44 = vld [vmem:[#allocation3 + $0xb14] ss:$36 sps:$4 sm:$0xff]  }
 0x28c   :  { %3385 = vmatprep.subr.bf16.mxu1 %v16075_v46  ;;  %9997 = vmatpush1.bf16.msra.mxu0 %v14370_v47  ;;  %v16132_v46 = vld [vmem:[#allocation3 + $0xb5c] ss:$36 sps:$4 sm:$0xff]  }
 0x28d   :  { %9998 = vmatprep.subr.bf16.mxu0 %v14387_v54  ;;  %v16130_v47 = vld [vmem:[#allocation3 + $0xb58] ss:$36 sps:$4 sm:$0xff]   ;;  %v16136_v54 = vld [vmem:[#allocation3 + $0xbe8] ss:$36 sps:$4 sm:$0xff]  }
 0x28f   :  { %3386 = vmatpush1.bf16.msra.mxu1 %v16073_v53  ;;  %v16138_v53 = vld [vmem:[#allocation3 + $0xbec] ss:$36 sps:$4 sm:$0xff]  }
 0x290   :  { %3387 = vmatprep.subr.bf16.mxu1 %v16078_v55  ;;  %9999 = vmatpush1.bf16.msra.mxu0 %v14386_v56  ;;  %v16141_v55 = vld [vmem:[#allocation3 + $0xc34] ss:$36 sps:$4 sm:$0xff]  }
 0x291   :  { %10000 = vmatprep.subr.bf16.mxu0 %v14403_v61  ;;  %v16139_v56 = vld [vmem:[#allocation3 + $0xc30] ss:$36 sps:$4 sm:$0xff]   ;;  %v16145_v61 = vld [vmem:[#allocation3 + $0xcc0] ss:$36 sps:$4 sm:$0xff]  }
 0x293   :  { %3388 = vmatpush1.bf16.msra.mxu1 %v16076_v60  ;;  %v16147_v60 = vld [vmem:[#allocation3 + $0xcc4] ss:$36 sps:$4 sm:$0xff]  }
 0x294   :  { %3389 = vmatprep.subr.bf16.mxu1 %v16081_v1  ;;  %10001 = vmatpush1.bf16.msra.mxu0 %v14402_v2  ;;  %v16150_v1 = vld [vmem:[#allocation3 + $0xd0c] ss:$36 sps:$4 sm:$0xff]  }
 0x295   :  { %10011 = vmatprep.subr.bf16.mxu0 %v14419_v7  ;;  %v16148_v2 = vld [vmem:[#allocation3 + $0xd08] ss:$36 sps:$4 sm:$0xff]   ;;  %v16151_v7 = vld [vmem:[#allocation3 + $0xd50] ss:$36 sps:$4 sm:$0xff]  }
 0x297   :  { %3390 = vmatpush1.bf16.msra.mxu1 %v16079_v6  ;;  %v16153_v6 = vld [vmem:[#allocation3 + $0xd54] ss:$36 sps:$4 sm:$0xff]  }
 0x298   :  { %3391 = vmatprep.subr.bf16.mxu1 %v16084_v8  ;;  %v16154_v8 = vld [vmem:[#allocation3 + $0x260] ss:$36 sps:$4 sm:$0xff]  }
 0x29b   :  { %3392 = vmatpush1.bf16.msra.mxu1 %v16082_v11  ;;  %v16155_v11 = vld [vmem:[#allocation3 + $0x20] ss:$36 sps:$4 sm:$0xff]  }
 0x29c   :  { %3393 = vmatprep.subr.bf16.mxu1 %v16087_v12  ;;  %v16156_v12 = vld [vmem:[#allocation3 + $0x2a8] ss:$36 sps:$4 sm:$0xff]  }
 0x29f   :  { %3394 = vmatpush1.bf16.msra.mxu1 %v16085_v14  ;;  %v16157_v14 = vld [vmem:[#allocation3 + $0x68] ss:$36 sps:$4 sm:$0xff]  }
 0x2a0   :  { %3395 = vmatprep.subr.bf16.mxu1 %v16090_v16  ;;  %v16158_v16 = vld [vmem:[#allocation3 + $0x2f0] ss:$36 sps:$4 sm:$0xff]  }
 0x2a3   :  { %3396 = vmatpush1.bf16.msra.mxu1 %v16088_v17  ;;  %v16159_v17 = vld [vmem:[#allocation3 + $0xb0] ss:$36 sps:$4 sm:$0xff]  }
 0x2a4   :  { %3397 = vmatprep.subr.bf16.mxu1 %v16093_v18  ;;  %v16160_v18 = vld [vmem:[#allocation3 + $0x338] ss:$36 sps:$4 sm:$0xff]  }
 0x2a7   :  { %3398 = vmatpush1.bf16.msra.mxu1 %v16091_v19  ;;  %v16161_v19 = vld [vmem:[#allocation3 + $0xf8] ss:$36 sps:$4 sm:$0xff]  }
 0x2a8   :  { %3399 = vmatprep.subr.bf16.mxu1 %v16096_v20  ;;  %v16162_v20 = vld [vmem:[#allocation3 + $0x380] ss:$36 sps:$4 sm:$0xff]  }
 0x2ab   :  { %3400 = vmatpush1.bf16.msra.mxu1 %v16094_v21  ;;  %v17161_v21 = vsub.s32 5, %v17063_v13 }
 0x2ac   :  { %3401 = vmatprep.subr.bf16.mxu1 %v16099_v22  ;;  %v17164_v22 = vsub.s32 2, %v17063_v13 }
 0x2af   :  { %3402 = vmatpush1.bf16.msra.mxu1 %v16097_v23  ;;  %v16164_v23 = vld [vmem:[#allocation3 + $0x3c8] ss:$36 sps:$4 sm:$0xff]  }
 0x2b0   :  { %3403 = vmatprep.subr.bf16.mxu1 %v16102_v24  ;;  %v681_v24 = vrot.slane %v17127_v50, %v17161_v21 }
 0x2b3   :  { %3404 = vmatpush1.bf16.msra.mxu1 %v16100_v26  ;;  %v669_v26 = vrot.slane %v17127_v50, %v17164_v22 }
 0x2b4   :  { %3405 = vmatprep.subr.bf16.mxu1 %v16105_v27 }
 0x2b7   :  { %3406 = vmatpush1.bf16.msra.mxu1 %v16103_v28  ;;  %v16165_v28 = vld [vmem:[#allocation3 + $0x188] ss:$36 sps:$4 sm:$0xff]  }
 0x2b8   :  { %3416 = vmatprep.subr.bf16.mxu1 %v16108_v29  ;;  %v16166_v29 = vld [vmem:[#allocation3 + $0x410] ss:$36 sps:$4 sm:$0xff]  }
 0x2ba   :  { %3408 = vmatmul.mubr.bf16.vlgmr.msra.gmra.mrb[8].mxu1 %v17107_v5 }
 0x2bb   :  { %3417 = vmatpush1.bf16.msra.mxu1 %v16106_v30  ;;  %3448 = vmatprep.mubr.bf16.mxu1 %v17096_v63  ;;  %v16124_v63 = vld [vmem:[#allocation3 + $0xac8] ss:$36 sps:$4 sm:$0xff]  }
 0x2bc   :  { %3418 = vmatprep.subr.bf16.mxu1 %v16111_v31  ;;  %v15364_v31 = vadd.f32 %v17146_v39, %v681_v24 }
 0x2bf   :  { %3419 = vmatpush1.bf16.msra.mxu1 %v16109_v32 }
 0x2c0   :  { %3420 = vmatprep.subr.bf16.mxu1 %v16114_v33 }
 0x2c3   :  { %3421 = vmatpush1.bf16.msra.mxu1 %v16112_v34 }
 0x2c4   :  { %3422 = vmatprep.subr.bf16.mxu1 %v16117_v35 }
 0x2c7   :  { %3423 = vmatpush1.bf16.msra.mxu1 %v16115_v37  ;;  %v16167_v37 = vld [vmem:[#allocation3 + $0x1d0] ss:$36 sps:$4 sm:$0xff]  }
 0x2c8   :  { %3424 = vmatprep.subr.bf16.mxu1 %v16120_v38 }
 0x2cb   :  { %3425 = vmatpush1.bf16.msra.mxu1 %v16118_v40 }
 0x2cc   :  { %3426 = vmatprep.subr.bf16.mxu1 %v16123_v41  ;;  %v16168_v41 = vld [vmem:[#allocation3 + $0x458] ss:$36 sps:$4 sm:$0xff]  }
 0x2cf   :  { %3427 = vmatpush1.bf16.msra.mxu1 %v16121_v42 }
 0x2d0   :  { %3428 = vmatprep.subr.bf16.mxu1 %v16126_v43  ;;  %v4229_v43 = vld [vmem:[#allocation8 + $0x1080] sm:$0xff] }
 0x2d3   :  { %3429 = vmatpush1.bf16.msra.mxu1 %v16124_v63  ;;  %v4237_v63 = vld [vmem:[#allocation8 + $0x10c0] sm:$0xff] }
 0x2d4   :  { %3430 = vmatprep.subr.bf16.mxu1 %v16129_v44  ;;  %v3688_v44 = vmax.f32 %v15364_v31, 0.0  ;;  %v14435_v39 = vcombine.high %v4229_v43, %v4237_v63  ;;  %v16180_v31 = vld [vmem:[#allocation3 + $0x848] ss:$36 sps:$4 sm:$0xff]  }
 0x2d7   :  { %3431 = vmatpush1.bf16.msra.mxu1 %v16127_v45 }
 0x2d8   :  { %3432 = vmatprep.subr.bf16.mxu1 %v16132_v46  ;;  %v16169_v46 = vld [vmem:[#allocation3 + $0x218] ss:$36 sps:$4 sm:$0xff]  }
 0x2db   :  { %3433 = vmatpush1.bf16.msra.mxu1 %v16130_v47 }
 0x2dc   :  { %3434 = vmatprep.subr.bf16.mxu1 %v16135_v49  ;;  %v16170_v49 = vld [vmem:[#allocation3 + $0x6e0] ss:$36 sps:$4 sm:$0xff]  }
 0x2df   :  { %3435 = vmatpush1.bf16.msra.mxu1 %v16133_v52  ;;  %v4245_v52 = vld [vmem:[#allocation8 + $0x1100] sm:$0xff] }
 0x2e0   :  { %3436 = vmatprep.subr.bf16.mxu1 %v16138_v53  ;;  %v4253_v53 = vld [vmem:[#allocation8 + $0x1140] sm:$0xff] }
 0x2e3   :  { %3437 = vmatpush1.bf16.msra.mxu1 %v16136_v54  ;;  %v17181_v54 = vpack.c.bf16 %v3688_v44, %v3688_v44  ;;  %v16184_v44 = vld [vmem:[#allocation3 + $0x8d8] ss:$36 sps:$4 sm:$0xff]  }
 0x2e4   :  { %3438 = vmatprep.subr.bf16.mxu1 %v16141_v55  ;;  %v14434_v55 = vcombine.low %v4229_v43, %v4237_v63  ;;  %v16183_v43 = vld [vmem:[#allocation3 + $0x650] ss:$36 sps:$4 sm:$0xff]  }
 0x2e7   :  { %3439 = vmatpush1.bf16.msra.mxu1 %v16139_v56  ;;  %v16171_v56 = vld [vmem:[#allocation3 + $0x4a0] ss:$36 sps:$4 sm:$0xff]  }
 0x2e8   :  { %3440 = vmatprep.subr.bf16.mxu1 %v16144_v57  ;;  %v14451_v57 = vcombine.high %v4245_v52, %v4253_v53 }
 0x2eb   :  { %3441 = vmatpush1.bf16.msra.mxu1 %v16142_v58  ;;  %v16172_v58 = vld [vmem:[#allocation3 + $0x728] ss:$36 sps:$4 sm:$0xff]  }
 0x2ec   :  { %3442 = vmatprep.subr.bf16.mxu1 %v16147_v60  ;;  %v4261_v60 = vld [vmem:[#allocation8 + $0x1180] sm:$0xff] }
 0x2ef   :  { %3443 = vmatpush1.bf16.msra.mxu1 %v16145_v61  ;;  %v4269_v61 = vld [vmem:[#allocation8 + $0x11c0] sm:$0xff] }
 0x2f0   :  { %3444 = vmatprep.subr.bf16.mxu1 %v16150_v1  ;;  %v14450_v1 = vcombine.low %v4245_v52, %v4253_v53  ;;  %v14467_v3 = vcombine.high %v4261_v60, %v4269_v61  ;;  %v16185_v52 = vld [vmem:[#allocation3 + $0x698] ss:$36 sps:$4 sm:$0xff]  }
 0x2f3   :  { %3445 = vmatpush1.bf16.msra.mxu1 %v16148_v2  ;;  %v16173_v2 = vld [vmem:[#allocation3 + $0x4e8] ss:$36 sps:$4 sm:$0xff]  }
 0x2f4   :  { %3446 = vmatprep.subr.bf16.mxu1 %v16153_v6  ;;  %v4285_v6 = vld [vmem:[#allocation8 + $0x1240] sm:$0xff] }
 0x2f7   :  { %3447 = vmatpush1.bf16.msra.mxu1 %v16151_v7  ;;  %v14466_v7 = vcombine.low %v4261_v60, %v4269_v61  ;;  %v16854_v60 = vmov 0.0  }
 0x2f8   :  { %15213 = vmatprep.subr.bf16.mxu1 %v16154_v8  ;;  %v16175_v8 = vld [vmem:[#allocation3 + $0x530] ss:$36 sps:$4 sm:$0xff]  }
 0x2fa   :  { %3449 = vmatmul.mubr.bf16.vlgmr.msra.gmra.mrb[8].mxu1 %v17099_v0  ;;  %v16163_v0 = vld [vmem:[#allocation3 + $0x140] ss:$36 sps:$4 sm:$0xff]  }
 0x2fb   :  { %15214 = vmatpush3.bf16.msra.mxu1 %v16155_v11  ;;  %3489 = vmatprep.mubr.bf16.mxu1 %v17080_v25  ;;  %v17167_v25 = vsub.s32 3, %v17063_v13 }
 0x2fc   :  { %15215 = vmatprep.subr.bf16.mxu1 %v16156_v12  ;;  %v4293_v12 = vld [vmem:[#allocation8 + $0x1280] sm:$0xff] }
 0x2fd   :  { %v673_v27 = vrot.slane %v17127_v50, %v17167_v25 }
 0x2ff   :  { %15216 = vmatpush3.bf16.msra.mxu1 %v16157_v14  ;;  %v4301_v14 = vld [vmem:[#allocation8 + $0x12c0] sm:$0xff] }
 0x300   :  { %15217 = vmatprep.subr.bf16.mxu1 %v16158_v16 }
 0x303   :  { %15218 = vmatpush3.bf16.msra.mxu1 %v16159_v17  ;;  %v16177_v17 = vld [vmem:[#allocation3 + $0x578] ss:$36 sps:$4 sm:$0xff]  }
 0x304   :  { %15219 = vmatprep.subr.bf16.mxu1 %v16160_v18  ;;  %v15273_v18 = vpop.f32.mrb[4].mxu0 }
 0x307   :  { %15220 = vmatpush3.bf16.msra.mxu1 %v16161_v19  ;;  %v14499_v19 = vcombine.high %v4293_v12, %v4301_v14 }
 0x308   :  { %15221 = vmatprep.subr.bf16.mxu1 %v16162_v20  ;;  %v16178_v20 = vld [vmem:[#allocation3 + $0x800] ss:$36 sps:$4 sm:$0xff]  }
 0x30b   :  { %15222 = vmatpush3.bf16.msra.mxu1 %v16163_v0  ;;  %v4309_v0 = vld [vmem:[#allocation8 + $0x1300] sm:$0xff] }
 0x30c   :  { %15223 = vmatprep.subr.bf16.mxu1 %v16164_v23  ;;  %v4317_v23 = vld [vmem:[#allocation8 + $0x1340] sm:$0xff] }
 0x30d   :  { %v3204_v30 = vpop.f32.mrb[4].mxu1 }
 0x30e   :  { %v15361_v32 = vadd.f32 %v3204_v30, %v669_v26  ;;  %v3206_v33 = vpop.f32.mrb[5].mxu1  ;;  %v14515_v30 = vcombine.high %v4309_v0, %v4317_v23 }
 0x30f   :  { %v15362_v34 = vadd.f32 %v3206_v33, %v673_v27  ;;  %v3208_v35 = vpop.f32.mrb[6].mxu1  ;;  %15224 = vmatpush3.bf16.msra.mxu1 %v16165_v28  ;;  %v14498_v28 = vcombine.low %v4293_v12, %v4301_v14  ;;  %v4333_v33 = vld [vmem:[#allocation8 + $0x13c0] sm:$0xff] }
 0x310   :  { %v3685_v38 = vmax.f32 %v15361_v32, 0.0  ;;  %v3209_v40 = vpop.f32.mrb[7].mxu1  ;;  %15225 = vmatprep.subr.bf16.mxu1 %v16166_v29  ;;  %v16179_v29 = vld [vmem:[#allocation3 + $0x5c0] ss:$36 sps:$4 sm:$0xff]   ;;  %v4325_v32 = vld [vmem:[#allocation8 + $0x1380] sm:$0xff] }
 0x311   :  { %v3686_v42 = vmax.f32 %v15362_v34, 0.0  ;;  %v14514_v34 = vcombine.low %v4309_v0, %v4317_v23  ;;  %v16181_v35 = vld [vmem:[#allocation3 + $0x608] ss:$36 sps:$4 sm:$0xff]  }
 0x312   :  { %v17178_v47 = vpack.c.bf16 %v3685_v38, %v3685_v38  ;;  %v16182_v38 = vld [vmem:[#allocation3 + $0x890] ss:$36 sps:$4 sm:$0xff]  }
 0x313   :  { %v17176_v45 = vpack.c.bf16 %v3686_v42, %v3686_v42  ;;  %15226 = vmatpush3.bf16.msra.mxu1 %v16167_v37  ;;  %v14531_v37 = vcombine.high %v4325_v32, %v4333_v33  ;;  %v4341_v40 = vld [vmem:[#allocation8 + $0x1400] sm:$0xff]  ;;  %v14530_v42 = vcombine.low %v4325_v32, %v4333_v33 }
 0x314   :  { %15227 = vmatprep.subr.bf16.mxu1 %v16168_v41  ;;  %v4349_v41 = vld [vmem:[#allocation8 + $0x1440] sm:$0xff] }
 0x315   :  { %10002 = vmatprep.mubr.bf16.mxu0 %v17176_v45  ;;  %v14547_v63 = vcombine.high %v4341_v40, %v4349_v41  ;;  %v4429_v12 = vld [vmem:[#allocation8 + $0x16c0] sm:$0xff] }
 0x316   :  { %10003 = vmatmul.mubr.bf16.vlgmr.msra.gmra.mrb[8].mxu0 %v17178_v47  ;;  %v16190_v0 = vld [vmem:[#allocation7 + $0x20] sm:$0xff]  }
 0x317   :  { %10012 = vmatpush1.bf16.msra.mxu0 %v14418_v9  ;;  %15228 = vmatpush3.bf16.msra.mxu1 %v16169_v46  ;;  %v4277_v9 = vld [vmem:[#allocation8 + $0x1200] sm:$0xff] }
 0x318   :  { %10043 = vmatprep.mubr.bf16.mxu0 %v17181_v54  ;;  %10013 = vmatprep.subr.bf16.mxu0 %v14435_v39  ;;  %v14483_v11 = vcombine.high %v4277_v9, %v4285_v6  ;;  %v14482_v16 = vcombine.low %v4277_v9, %v4285_v6  ;;  %v4357_v46 = vld [vmem:[#allocation8 + $0x1480] sm:$0xff] }
 0x319   :  { %15235 = vmatprep.subr.bf16.mxu1 %v16170_v49  ;;  %v4365_v39 = vld [vmem:[#allocation8 + $0x14c0] sm:$0xff]  ;;  %v14546_v49 = vcombine.low %v4341_v40, %v4349_v41  ;;  %v3710_v41 = vld [vmem:[#allocation8 + $0x48] sm:$0xff] }
 0x31a   :  { %3490 = vmatmul.mubr.bf16.vlgmr.msra.gmra.mrb[12].mxu1 %v17089_v59  ;;  %v16176_v59 = vld [vmem:[#allocation3 + $0x7b8] ss:$36 sps:$4 sm:$0xff]   ;;  %v14563_v53 = vcombine.high %v4357_v46, %v4365_v39  ;;  %v4405_v6 = vld [vmem:[#allocation8 + $0x1600] sm:$0xff] }
 0x31b   :  { %10014 = vmatpush1.bf16.msra.mxu0 %v14434_v55  ;;  %15236 = vmatpush3.bf16.msra.mxu1 %v16171_v56  ;;  %v4373_v55 = vld [vmem:[#allocation8 + $0x1500] sm:$0xff] }
 0x31c   :  { %10015 = vmatprep.subr.bf16.mxu0 %v14451_v57  ;;  %15237 = vmatprep.subr.bf16.mxu1 %v16172_v58  ;;  %v4381_v56 = vld [vmem:[#allocation8 + $0x1540] sm:$0xff]  ;;  %v14562_v57 = vcombine.low %v4357_v46, %v4365_v39  ;;  %v17210_v46 = vld [vmem:[#allocation8 + $0x50] sm:$0xff] }
 0x31d   :  { %3529 = vmatprep.mubr.bf16.mxu1 %v17093_v62  ;;  %v15274_v62 = vpop.f32.mrb[5].mxu0  ;;  %v16186_v58 = vld [vmem:[#allocation7] sm:$0xff]   ;;  %v14579_v61 = vcombine.high %v4373_v55, %v4381_v56 }
 0x31e   :  { %v17190_v24 = vadd.f32 %v15274_v62, %v15273_v18  ;;  %v15276_v26 = vpop.f32.mrb[6].mxu0  ;;  %v4469_v33 = vld [vmem:[#allocation8 + $0x1800] sm:$0xff] }
 0x31f   :  { %10016 = vmatpush1.bf16.msra.mxu0 %v14450_v1  ;;  %15238 = vmatpush3.bf16.msra.mxu1 %v16173_v2  ;;  %v15277_v27 = vpop.f32.mrb[7].mxu0  ;;  %v4389_v1 = vld [vmem:[#allocation8 + $0x1580] sm:$0xff] }
 0x320   :  { %10017 = vmatprep.subr.bf16.mxu0 %v14467_v3  ;;  %15239 = vmatprep.subr.bf16.mxu1 %v16174_v4  ;;  %v4397_v2 = vld [vmem:[#allocation8 + $0x15c0] sm:$0xff]  ;;  %v14578_v3 = vcombine.low %v4373_v55, %v4381_v56  ;;  %v16187_v4 = vld [vmem:[#allocation7 + $0x8] sm:$0xff]  }
 0x321   :  { %v14595_v9 = vcombine.high %v4389_v1, %v4397_v2  ;;  %v4453_v27 = vld [vmem:[#allocation8 + $0x1780] sm:$0xff]  ;;  %v3726_v55 = vld [vmem:[#allocation8 + $0xc8] sm:$0xff] }
 0x323   :  { %10018 = vmatpush1.bf16.msra.mxu0 %v14466_v7  ;;  %15240 = vmatpush3.bf16.msra.mxu1 %v16175_v8  ;;  %v4413_v7 = vld [vmem:[#allocation8 + $0x1640] sm:$0xff]  ;;  %v14594_v8 = vcombine.low %v4389_v1, %v4397_v2 }
 0x324   :  { %10019 = vmatprep.subr.bf16.mxu0 %v14483_v11  ;;  %15241 = vmatprep.subr.bf16.mxu1 %v16176_v59  ;;  %v16188_v11 = vld [vmem:[#allocation7 + $0x10] sm:$0xff]   ;;  %v4421_v59 = vld [vmem:[#allocation8 + $0x1680] sm:$0xff]  ;;  %v14610_v14 = vcombine.low %v4405_v6, %v4413_v7 }
 0x325   :  { %v14627_v18 = vcombine.high %v4421_v59, %v4429_v12  ;;  %v14626_v62 = vcombine.low %v4421_v59, %v4429_v12  ;;  %v3750_v12 = vld [vmem:[#allocation8 + $0x188] sm:$0xff] }
 0x327   :  { %10020 = vmatpush1.bf16.msra.mxu0 %v14482_v16  ;;  %15242 = vmatpush3.bf16.msra.mxu1 %v16177_v17  ;;  %v16189_v16 = vld [vmem:[#allocation7 + $0x18] sm:$0xff]   ;;  %v17199_v17 = vsub.s32 4, %v17063_v13 }
 0x328   :  { %10021 = vmatprep.subr.bf16.mxu0 %v14499_v19  ;;  %15243 = vmatprep.subr.bf16.mxu1 %v16178_v20  ;;  %v4437_v19 = vld [vmem:[#allocation8 + $0x1700] sm:$0xff] }
 0x329   :  { %v4445_v20 = vld [vmem:[#allocation8 + $0x1740] sm:$0xff]  ;;  %v677_v23 = vrot.slane %v17127_v50, %v17199_v17 }
 0x32a   :  { %v14643_v26 = vcombine.high %v4437_v19, %v4445_v20 }
 0x32b   :  { %10022 = vmatpush1.bf16.msra.mxu0 %v14498_v28  ;;  %15244 = vmatpush3.bf16.msra.mxu1 %v16179_v29  ;;  %v4461_v28 = vld [vmem:[#allocation8 + $0x17c0] sm:$0xff]  ;;  %v14642_v29 = vcombine.low %v4437_v19, %v4445_v20 }
 0x32c   :  { %10023 = vmatprep.subr.bf16.mxu0 %v14515_v30  ;;  %15245 = vmatprep.subr.bf16.mxu1 %v16180_v31  ;;  %v16191_v30 = vld [vmem:[#allocation7 + $0x28] sm:$0xff]   ;;  %v15363_v31 = vadd.f32 %v17144_v36, %v677_v23  ;;  %v14659_v32 = vcombine.high %v4453_v27, %v4461_v28  ;;  %v14658_v50 = vcombine.low %v4453_v27, %v4461_v28  ;;  %v16193_v36 = vld [vmem:[#allocation7 + $0x38] sm:$0xff]   ;;  %v4541_v19 = vld [vmem:[#allocation8 + $0x1a40] sm:$0xff] }
 0x32d   :  { %v3766_v23 = vld [vmem:[#allocation8 + $0x208] sm:$0xff]  ;;  %v4549_v28 = vld [vmem:[#allocation8 + $0x1a80] sm:$0xff] }
 0x32f   :  { %10024 = vmatpush1.bf16.msra.mxu0 %v14514_v34  ;;  %15246 = vmatpush3.bf16.msra.mxu1 %v16181_v35  ;;  %v4477_v34 = vld [vmem:[#allocation8 + $0x1840] sm:$0xff]  ;;  %v16192_v35 = vld [vmem:[#allocation7 + $0x30] sm:$0xff]  }
 0x330   :  { %10025 = vmatprep.subr.bf16.mxu0 %v14531_v37  ;;  %15247 = vmatprep.subr.bf16.mxu1 %v16182_v38  ;;  %v3687_v37 = vmax.f32 %v15363_v31, 0.0  ;;  %v3702_v38 = vld [vmem:[#allocation8 + $0x8] sm:$0xff]  ;;  %v14675_v40 = vcombine.high %v4469_v33, %v4477_v34 }
 0x331   :  { %v13908_v1 = vcombine.low %v3702_v38, %v3710_v41 }
 0x332   :  { %v17212_v39 = vpack.c.bf16 %v3687_v37, %v3687_v37  ;;  %v4573_v37 = vld [vmem:[#allocation8 + $0x1b40] sm:$0xff] }
 0x333   :  { %10026 = vmatpush1.bf16.msra.mxu0 %v14530_v42  ;;  %15248 = vmatpush3.bf16.msra.mxu1 %v16183_v43  ;;  %v4485_v42 = vld [vmem:[#allocation8 + $0x1880] sm:$0xff] }
 0x334   :  { %10027 = vmatprep.subr.bf16.mxu0 %v14547_v63  ;;  %15249 = vmatprep.subr.bf16.mxu1 %v16184_v44  ;;  %v4493_v43 = vld [vmem:[#allocation8 + $0x18c0] sm:$0xff]  ;;  %v14674_v63 = vcombine.low %v4469_v33, %v4477_v34  ;;  %v17208_v44 = vld [vmem:[#allocation8 + $0x10] sm:$0xff]  ;;  %v3782_v33 = vld [vmem:[#allocation8 + $0x288] sm:$0xff] }
 0x335   :  { %v13910_v56 = vcombine.low %v17208_v44, %v17210_v46  ;;  %v3790_v34 = vld [vmem:[#allocation8 + $0x2c8] sm:$0xff] }
 0x337   :  { %10028 = vmatpush1.bf16.msra.mxu0 %v14546_v49  ;;  %15250 = vmatpush3.bf16.msra.mxu1 %v16185_v52  ;;  %v13909_v49 = vcombine.high %v3702_v38, %v3710_v41  ;;  %v14691_v52 = vcombine.high %v4485_v42, %v4493_v43 }
 0x338   :  { %10029 = vmatprep.subr.bf16.mxu0 %v14563_v53  ;;  %15319 = vmatprep.subr.bf16.mxu1 %v16854_v60  ;;  %v3718_v53 = vld [vmem:[#allocation8 + $0x88] sm:$0xff] }
 0x339   :  { %v13925_v2 = vcombine.high %v3718_v53, %v3726_v55 }
 0x33a   :  { %3530 = vmatmul.mubr.bf16.vlgmr.msra.gmra.mrb[16].mxu1 %v17107_v5  ;;  %v14611_v5 = vcombine.high %v4405_v6, %v4413_v7  ;;  %v4517_v7 = vld [vmem:[#allocation8 + $0x1980] sm:$0xff] }
 0x33b   :  { %10030 = vmatpush1.bf16.msra.mxu0 %v14562_v57  ;;  %15320 = vmatpush3.bf16.msra.mxu1 %v16186_v58  ;;  %v4501_v57 = vld [vmem:[#allocation8 + $0x1900] sm:$0xff] }
 0x33c   :  { %10031 = vmatprep.subr.bf16.mxu0 %v14579_v61  ;;  %15321 = vmatprep.subr.bf16.mxu1 %v16854_v60  ;;  %v4509_v58 = vld [vmem:[#allocation8 + $0x1940] sm:$0xff]  ;;  %v3577_v61 = vld [vmem:[%s17405_s1] sm:$0x1] }
 0x33d   :  { %15335 = vmatprep.mubr.msk.bf16.mxu1 %vm16855_vm0, %v16854_v60  ;;  %v14707_v6 = vcombine.high %v4501_v57, %v4509_v58  ;;  %v14706_v59 = vcombine.low %v4501_v57, %v4509_v58  ;;  %v3814_v57 = vld [vmem:[#allocation8 + $0x388] sm:$0xff] }
 0x33e   :  { %v3822_v58 = vld [vmem:[#allocation8 + $0x3c8] sm:$0xff] }
 0x33f   :  { %10032 = vmatpush1.bf16.msra.mxu0 %v14578_v3  ;;  %15322 = vmatpush3.bf16.msra.mxu1 %v16187_v4  ;;  %v14690_v3 = vcombine.low %v4485_v42, %v4493_v43  ;;  %v3734_v4 = vld [vmem:[#allocation8 + $0x108] sm:$0xff] }
 0x340   :  { %10033 = vmatprep.subr.bf16.mxu0 %v14595_v9  ;;  %15323 = vmatprep.subr.bf16.mxu1 %v16854_v60  ;;  %v3742_v9 = vld [vmem:[#allocation8 + $0x148] sm:$0xff] }
 0x341   :  { %v13940_v20 = vcombine.low %v3734_v4, %v3742_v9  ;;  %v3798_v42 = vld [vmem:[#allocation8 + $0x308] sm:$0xff] }
 0x342   :  { %v3806_v43 = vld [vmem:[#allocation8 + $0x348] sm:$0xff] }
 0x343   :  { %10034 = vmatpush1.bf16.msra.mxu0 %v14594_v8  ;;  %15324 = vmatpush3.bf16.msra.mxu1 %v16188_v11  ;;  %v4525_v8 = vld [vmem:[#allocation8 + $0x19c0] sm:$0xff]  ;;  %v13924_v11 = vcombine.low %v3718_v53, %v3726_v55  ;;  %v14005_v53 = vcombine.high %v3798_v42, %v3806_v43 }
 0x344   :  { %10035 = vmatprep.subr.bf16.mxu0 %v14611_v5  ;;  %15325 = vmatprep.subr.bf16.mxu1 %v16854_v60  ;;  %v13941_v5 = vcombine.high %v3734_v4, %v3742_v9  ;;  %v14021_v4 = vcombine.high %v3814_v57, %v3822_v58 }
 0x347   :  { %10036 = vmatpush1.bf16.msra.mxu0 %v14610_v14  ;;  %15326 = vmatpush3.bf16.msra.mxu1 %v16189_v16  ;;  %v3758_v14 = vld [vmem:[#allocation8 + $0x1c8] sm:$0xff]  ;;  %v14723_v16 = vcombine.high %v4517_v7, %v4525_v8 }
 0x348   :  { %10037 = vmatprep.subr.bf16.mxu0 %v14627_v18  ;;  %15327 = vmatprep.subr.bf16.mxu1 %v16854_v60  ;;  %v4533_v18 = vld [vmem:[#allocation8 + $0x1a00] sm:$0xff] }
 0x349   :  { %v14739_v27 = vcombine.high %v4533_v18, %v4541_v19 }
 0x34b   :  { %10038 = vmatpush1.bf16.msra.mxu0 %v14626_v62  ;;  %15328 = vmatpush3.bf16.msra.mxu1 %v16190_v0  ;;  %v13957_v62 = vcombine.high %v3750_v12, %v3758_v14  ;;  %v14722_v0 = vcombine.low %v4517_v7, %v4525_v8  ;;  %v3838_v7 = vld [vmem:[#allocation8 + $0x448] sm:$0xff] }
 0x34c   :  { %10039 = vmatprep.subr.bf16.mxu0 %v14643_v26  ;;  %15329 = vmatprep.subr.bf16.mxu1 %v16854_v60  ;;  %v3774_v26 = vld [vmem:[#allocation8 + $0x248] sm:$0xff] }
 0x34d   :  { %v13973_v31 = vcombine.high %v3766_v23, %v3774_v26  ;;  %v13972_v38 = vcombine.low %v3766_v23, %v3774_v26 }
 0x34f   :  { %10040 = vmatpush1.bf16.msra.mxu0 %v14642_v29  ;;  %15330 = vmatpush3.bf16.msra.mxu1 %v16191_v30  ;;  %v4557_v29 = vld [vmem:[#allocation8 + $0x1ac0] sm:$0xff]  ;;  %v13956_v30 = vcombine.low %v3750_v12, %v3758_v14 }
 0x350   :  { %10041 = vmatprep.subr.bf16.mxu0 %v14659_v32  ;;  %15331 = vmatprep.subr.bf16.mxu1 %v16854_v60  ;;  %v14738_v32 = vcombine.low %v4533_v18, %v4541_v19  ;;  %v14754_v41 = vcombine.low %v4549_v28, %v4557_v29  ;;  %v3854_v18 = vld [vmem:[#allocation8 + $0x4c8] sm:$0xff] }
 0x353   :  { %10042 = vmatpush1.bf16.msra.mxu0 %v14658_v50  ;;  %15332 = vmatpush3.bf16.msra.mxu1 %v16192_v35  ;;  %v14755_v50 = vcombine.high %v4549_v28, %v4557_v29  ;;  %v4565_v35 = vld [vmem:[#allocation8 + $0x1b00] sm:$0xff]  ;;  %v3870_v28 = vld [vmem:[#allocation8 + $0x548] sm:$0xff] }
 0x354   :  { %15333 = vmatprep.subr.bf16.mxu1 %v16854_v60  ;;  %10052 = vmatprep.subr.bf16.mxu0 %v14675_v40  ;;  %v13989_v40 = vcombine.high %v3782_v33, %v3790_v34  ;;  %v14770_v55 = vcombine.low %v4565_v35, %v4573_v37 }
 0x356   :  { %10044 = vmatmul.mubr.bf16.vlgmr.msra.gmra.mrb[8].mxu0 %v17212_v39 }
 0x357   :  { %15334 = vmatpush3.bf16.msra.mxu1 %v16193_v36  ;;  %10053 = vmatpush1.bf16.msra.mxu0 %v14674_v63  ;;  %v14771_v36 = vcombine.high %v4565_v35, %v4573_v37  ;;  %v4581_v63 = vld [vmem:[#allocation8 + $0x1b80] sm:$0xff]  ;;  %v3886_v35 = vld [vmem:[#allocation8 + $0x5c8] sm:$0xff] }
 0x358   :  { %10093 = vmatprep.subr.bf16.mxu1 %v13909_v49  ;;  %10054 = vmatprep.subr.bf16.mxu0 %v14691_v52  ;;  %v4589_v49 = vld [vmem:[#allocation8 + $0x1bc0] sm:$0xff]  ;;  %v13988_v52 = vcombine.low %v3782_v33, %v3790_v34 }
 0x359   :  { %v14786_v9 = vcombine.low %v4581_v63, %v4589_v49 }
 0x35a   :  { %15336 = vmatmul.mubr.bf16.vlgmr.msra.gmra.mrb[20].mxu1 %v3577_v61  ;;  %v14787_v61 = vcombine.high %v4581_v63, %v4589_v49  ;;  %v3902_v63 = vld [vmem:[#allocation8 + $0x648] sm:$0xff] }
 0x35b   :  { %10094 = vmatpush1.bf16.msra.mxu1 %v13908_v1  ;;  %10125 = vmatprep.mubr.bf16.mxu1 %v17136_v10  ;;  %v4597_v1 = vld [vmem:[#allocation8 + $0x1c00] sm:$0xff] }
 0x35c   :  { %10095 = vmatprep.subr.bf16.mxu1 %v13925_v2  ;;  %10055 = vmatpush1.bf16.msra.mxu0 %v14690_v3  ;;  %v4605_v2 = vld [vmem:[#allocation8 + $0x1c40] sm:$0xff]  ;;  %v14004_v3 = vcombine.low %v3798_v42, %v3806_v43 }
 0x35d   :  { %10056 = vmatprep.subr.bf16.mxu0 %v14707_v6  ;;  %v3830_v6 = vld [vmem:[#allocation8 + $0x408] sm:$0xff]  ;;  %v14803_v8 = vcombine.high %v4597_v1, %v4605_v2  ;;  %v14802_v14 = vcombine.low %v4597_v1, %v4605_v2 }
 0x35e   :  { %v14037_v12 = vcombine.high %v3830_v6, %v3838_v7  ;;  %v3918_v1 = vld [vmem:[#allocation8 + $0x6c8] sm:$0xff] }
 0x35f   :  { %10096 = vmatpush1.bf16.msra.mxu1 %v13924_v11  ;;  %v4613_v11 = vld [vmem:[#allocation8 + $0x1c80] sm:$0xff] }
 0x360   :  { %10097 = vmatprep.subr.bf16.mxu1 %v13941_v5  ;;  %10057 = vmatpush1.bf16.msra.mxu0 %v14706_v59  ;;  %v4621_v5 = vld [vmem:[#allocation8 + $0x1cc0] sm:$0xff]  ;;  %v14020_v59 = vcombine.low %v3814_v57, %v3822_v58 }
 0x361   :  { %10058 = vmatprep.subr.bf16.mxu0 %v14723_v16  ;;  %v3846_v16 = vld [vmem:[#allocation8 + $0x488] sm:$0xff]  ;;  %v14819_v19 = vcombine.high %v4613_v11, %v4621_v5  ;;  %v14818_v26 = vcombine.low %v4613_v11, %v4621_v5 }
 0x362   :  { %v14053_v23 = vcombine.high %v3846_v16, %v3854_v18  ;;  %v3934_v11 = vld [vmem:[#allocation8 + $0x748] sm:$0xff] }
 0x363   :  { %10098 = vmatpush1.bf16.msra.mxu1 %v13940_v20  ;;  %v4629_v20 = vld [vmem:[#allocation8 + $0x1d00] sm:$0xff] }
 0x364   :  { %10099 = vmatprep.subr.bf16.mxu1 %v13957_v62  ;;  %10059 = vmatpush1.bf16.msra.mxu0 %v14722_v0  ;;  %v4637_v62 = vld [vmem:[#allocation8 + $0x1d40] sm:$0xff]  ;;  %v14036_v0 = vcombine.low %v3830_v6, %v3838_v7 }
 0x365   :  { %10060 = vmatprep.subr.bf16.mxu0 %v14739_v27  ;;  %v3862_v27 = vld [vmem:[#allocation8 + $0x508] sm:$0xff]  ;;  %v14835_v29 = vcombine.high %v4629_v20, %v4637_v62  ;;  %v14834_v34 = vcombine.low %v4629_v20, %v4637_v62 }
 0x366   :  { %v14069_v33 = vcombine.high %v3862_v27, %v3870_v28  ;;  %v3950_v20 = vld [vmem:[#allocation8 + $0x7c8] sm:$0xff] }
 0x367   :  { %10100 = vmatpush1.bf16.msra.mxu1 %v13956_v30  ;;  %v4645_v30 = vld [vmem:[#allocation8 + $0x1d80] sm:$0xff] }
 0x368   :  { %10101 = vmatprep.subr.bf16.mxu1 %v13973_v31  ;;  %10061 = vmatpush1.bf16.msra.mxu0 %v14738_v32  ;;  %v4653_v31 = vld [vmem:[#allocation8 + $0x1dc0] sm:$0xff]  ;;  %v14052_v32 = vcombine.low %v3846_v16, %v3854_v18 }
 0x369   :  { %10062 = vmatprep.subr.bf16.mxu0 %v14755_v50  ;;  %v3878_v50 = vld [vmem:[#allocation8 + $0x588] sm:$0xff]  ;;  %v14851_v37 = vcombine.high %v4645_v30, %v4653_v31  ;;  %v14850_v43 = vcombine.low %v4645_v30, %v4653_v31 }
 0x36a   :  { %v14085_v42 = vcombine.high %v3878_v50, %v3886_v35 }
 0x36b   :  { %10102 = vmatpush1.bf16.msra.mxu1 %v13972_v38  ;;  %v4661_v38 = vld [vmem:[#allocation8 + $0x1e00] sm:$0xff] }
 0x36c   :  { %10103 = vmatprep.subr.bf16.mxu1 %v13989_v40  ;;  %10063 = vmatpush1.bf16.msra.mxu0 %v14754_v41  ;;  %v4669_v40 = vld [vmem:[#allocation8 + $0x1e40] sm:$0xff]  ;;  %v14068_v41 = vcombine.low %v3862_v27, %v3870_v28  ;;  %v3958_v27 = vld [vmem:[#allocation8 + $0x808] sm:$0xff] }
 0x36d   :  { %10064 = vmatprep.subr.bf16.mxu0 %v14771_v36  ;;  %v3894_v36 = vld [vmem:[#allocation8 + $0x608] sm:$0xff]  ;;  %v14867_v49 = vcombine.high %v4661_v38, %v4669_v40  ;;  %v14866_v58 = vcombine.low %v4661_v38, %v4669_v40 }
 0x36e   :  { %v14101_v57 = vcombine.high %v3894_v36, %v3902_v63  ;;  %v3966_v28 = vld [vmem:[#allocation8 + $0x848] sm:$0xff] }
 0x36f   :  { %10104 = vmatpush1.bf16.msra.mxu1 %v13988_v52  ;;  %v4677_v52 = vld [vmem:[#allocation8 + $0x1e80] sm:$0xff]  ;;  %v14165_v31 = vcombine.high %v3958_v27, %v3966_v28 }
 0x370   :  { %10105 = vmatprep.subr.bf16.mxu1 %v14005_v53  ;;  %10065 = vmatpush1.bf16.msra.mxu0 %v14770_v55  ;;  %v4685_v53 = vld [vmem:[#allocation8 + $0x1ec0] sm:$0xff]  ;;  %v14084_v55 = vcombine.low %v3878_v50, %v3886_v35  ;;  %v3990_v35 = vld [vmem:[#allocation8 + $0x908] sm:$0xff] }
 0x371   :  { %10066 = vmatprep.subr.bf16.mxu0 %v14787_v61  ;;  %v3910_v61 = vld [vmem:[#allocation8 + $0x688] sm:$0xff]  ;;  %v14883_v2 = vcombine.high %v4677_v52, %v4685_v53  ;;  %v14882_v7 = vcombine.low %v4677_v52, %v4685_v53 }
 0x372   :  { %v14117_v6 = vcombine.high %v3910_v61, %v3918_v1 }
 0x373   :  { %10106 = vmatpush1.bf16.msra.mxu1 %v14004_v3  ;;  %v4693_v3 = vld [vmem:[#allocation8 + $0x1f00] sm:$0xff] }
 0x374   :  { %10107 = vmatprep.subr.bf16.mxu1 %v14021_v4  ;;  %10067 = vmatpush1.bf16.msra.mxu0 %v14786_v9  ;;  %v4701_v4 = vld [vmem:[#allocation8 + $0x1f40] sm:$0xff]  ;;  %v14100_v9 = vcombine.low %v3894_v36, %v3902_v63  ;;  %v4022_v63 = vld [vmem:[#allocation8 + $0xa08] sm:$0xff] }
 0x375   :  { %10068 = vmatprep.subr.bf16.mxu0 %v14803_v8  ;;  %v3926_v8 = vld [vmem:[#allocation8 + $0x708] sm:$0xff]  ;;  %v14899_v5 = vcombine.high %v4693_v3, %v4701_v4  ;;  %v14898_v18 = vcombine.low %v4693_v3, %v4701_v4 }
 0x376   :  { %v14133_v16 = vcombine.high %v3926_v8, %v3934_v11 }
 0x377   :  { %10108 = vmatpush1.bf16.msra.mxu1 %v14020_v59  ;;  %v4709_v59 = vld [vmem:[#allocation8 + $0x1f80] sm:$0xff] }
 0x378   :  { %10109 = vmatprep.subr.bf16.mxu1 %v14037_v12  ;;  %10069 = vmatpush1.bf16.msra.mxu0 %v14802_v14  ;;  %v4717_v12 = vld [vmem:[#allocation8 + $0x1fc0] sm:$0xff]  ;;  %v14116_v14 = vcombine.low %v3910_v61, %v3918_v1  ;;  %v4054_v1 = vld [vmem:[#allocation8 + $0xb08] sm:$0xff] }
 0x379   :  { %10070 = vmatprep.subr.bf16.mxu0 %v14819_v19  ;;  %v3942_v19 = vld [vmem:[#allocation8 + $0x788] sm:$0xff]  ;;  %v14915_v62 = vcombine.high %v4709_v59, %v4717_v12 }
 0x37a   :  { %v14148_v30 = vcombine.low %v3942_v19, %v3950_v20 }
 0x37b   :  { %10110 = vmatpush1.bf16.msra.mxu1 %v14036_v0  ;;  %v14132_v0 = vcombine.low %v3926_v8, %v3934_v11  ;;  %v4086_v11 = vld [vmem:[#allocation8 + $0xc08] sm:$0xff] }
 0x37c   :  { %10111 = vmatprep.subr.bf16.mxu1 %v14053_v23  ;;  %10071 = vmatpush1.bf16.msra.mxu0 %v14818_v26  ;;  %v14149_v23 = vcombine.high %v3942_v19, %v3950_v20  ;;  %v14914_v26 = vcombine.low %v4709_v59, %v4717_v12  ;;  %v4118_v20 = vld [vmem:[#allocation8 + $0xd08] sm:$0xff] }
 0x37d   :  { %10072 = vmatprep.subr.bf16.mxu0 %v14835_v29  ;;  %v13911_v29 = vcombine.high %v17208_v44, %v17210_v46 }
 0x37f   :  { %10112 = vmatpush1.bf16.msra.mxu1 %v14052_v32  ;;  %v3974_v32 = vld [vmem:[#allocation8 + $0x888] sm:$0xff] }
 0x380   :  { %10113 = vmatprep.subr.bf16.mxu1 %v14069_v33  ;;  %10073 = vmatpush1.bf16.msra.mxu0 %v14834_v34  ;;  %v3982_v33 = vld [vmem:[#allocation8 + $0x8c8] sm:$0xff]  ;;  %v14164_v34 = vcombine.low %v3958_v27, %v3966_v28 }
 0x381   :  { %10074 = vmatprep.subr.bf16.mxu0 %v14851_v37  ;;  %v14181_v50 = vcombine.high %v3974_v32, %v3982_v33  ;;  %v3998_v37 = vld [vmem:[#allocation8 + $0x948] sm:$0xff]  ;;  %v14180_v38 = vcombine.low %v3974_v32, %v3982_v33 }
 0x382   :  { %v14197_v40 = vcombine.high %v3990_v35, %v3998_v37  ;;  %v4142_v27 = vld [vmem:[#allocation8 + $0xdc8] sm:$0xff] }
 0x383   :  { %10114 = vmatpush1.bf16.msra.mxu1 %v14068_v41  ;;  %v4006_v41 = vld [vmem:[#allocation8 + $0x988] sm:$0xff] }
 0x384   :  { %10115 = vmatprep.subr.bf16.mxu1 %v14085_v42  ;;  %10075 = vmatpush1.bf16.msra.mxu0 %v14850_v43  ;;  %v4014_v42 = vld [vmem:[#allocation8 + $0x9c8] sm:$0xff]  ;;  %v14196_v43 = vcombine.low %v3990_v35, %v3998_v37  ;;  %v17227_v35 = vsub.s32 6, %v17063_v13 }
 0x385   :  { %10076 = vmatprep.subr.bf16.mxu0 %v14867_v49  ;;  %v14213_v36 = vcombine.high %v4006_v41, %v4014_v42  ;;  %v4030_v49 = vld [vmem:[#allocation8 + $0xa48] sm:$0xff]  ;;  %v14212_v52 = vcombine.low %v4006_v41, %v4014_v42 }
 0x386   :  { %v14229_v53 = vcombine.high %v4022_v63, %v4030_v49  ;;  %v4182_v41 = vld [vmem:[#allocation8 + $0xf08] sm:$0xff] }
 0x387   :  { %10116 = vmatpush1.bf16.msra.mxu1 %v14084_v55  ;;  %v4038_v55 = vld [vmem:[#allocation8 + $0xa88] sm:$0xff] }
 0x388   :  { %10117 = vmatprep.subr.bf16.mxu1 %v14101_v57  ;;  %10077 = vmatpush1.bf16.msra.mxu0 %v14866_v58  ;;  %v4046_v57 = vld [vmem:[#allocation8 + $0xac8] sm:$0xff]  ;;  %v14228_v58 = vcombine.low %v4022_v63, %v4030_v49 }
 0x389   :  { %10078 = vmatprep.subr.bf16.mxu0 %v14883_v2  ;;  %v14245_v61 = vcombine.high %v4038_v55, %v4046_v57  ;;  %v4062_v2 = vld [vmem:[#allocation8 + $0xb48] sm:$0xff]  ;;  %v14244_v3 = vcombine.low %v4038_v55, %v4046_v57 }
 0x38a   :  { %v14261_v4 = vcombine.high %v4054_v1, %v4062_v2  ;;  %v4190_v42 = vld [vmem:[#allocation8 + $0xf48] sm:$0xff] }
 0x38b   :  { %10118 = vmatpush1.bf16.msra.mxu1 %v14100_v9  ;;  %v4070_v9 = vld [vmem:[#allocation8 + $0xb88] sm:$0xff] }
 0x38c   :  { %10119 = vmatprep.subr.bf16.mxu1 %v14117_v6  ;;  %10079 = vmatpush1.bf16.msra.mxu0 %v14882_v7  ;;  %v4078_v6 = vld [vmem:[#allocation8 + $0xbc8] sm:$0xff]  ;;  %v14260_v7 = vcombine.low %v4054_v1, %v4062_v2  ;;  %v14388_v2 = vcombine.low %v4182_v41, %v4190_v42 }
 0x38d   :  { %10080 = vmatprep.subr.bf16.mxu0 %v14899_v5  ;;  %v14277_v8 = vcombine.high %v4070_v9, %v4078_v6  ;;  %v4094_v5 = vld [vmem:[#allocation8 + $0xc48] sm:$0xff]  ;;  %v14276_v59 = vcombine.low %v4070_v9, %v4078_v6 }
 0x38e   :  { %v14293_v12 = vcombine.high %v4086_v11, %v4094_v5  ;;  %v4198_v55 = vld [vmem:[#allocation8 + $0xf88] sm:$0xff] }
 0x38f   :  { %10120 = vmatpush1.bf16.msra.mxu1 %v14116_v14  ;;  %v4102_v14 = vld [vmem:[#allocation8 + $0xc88] sm:$0xff] }
 0x390   :  { %10121 = vmatprep.subr.bf16.mxu1 %v14133_v16  ;;  %10081 = vmatpush1.bf16.msra.mxu0 %v14898_v18  ;;  %v4110_v16 = vld [vmem:[#allocation8 + $0xcc8] sm:$0xff]  ;;  %v14292_v18 = vcombine.low %v4086_v11, %v4094_v5 }
 0x391   :  { %10082 = vmatprep.subr.bf16.mxu0 %v14915_v62  ;;  %v14309_v19 = vcombine.high %v4102_v14, %v4110_v16  ;;  %v4126_v62 = vld [vmem:[#allocation8 + $0xd48] sm:$0xff] }
 0x392   :  { %v14324_v28 = vcombine.low %v4118_v20, %v4126_v62  ;;  %v4206_v57 = vld [vmem:[#allocation8 + $0xfc8] sm:$0xff] }
 0x393   :  { %10122 = vmatpush1.bf16.msra.mxu1 %v14132_v0  ;;  %v14308_v0 = vcombine.low %v4102_v14, %v4110_v16  ;;  %v14405_v9 = vcombine.high %v4198_v55, %v4206_v57  ;;  %v4214_v11 = vld [vmem:[#allocation8 + $0x1008] sm:$0xff] }
 0x394   :  { %10123 = vmatprep.subr.bf16.mxu1 %v14149_v23  ;;  %10083 = vmatpush1.bf16.msra.mxu0 %v14914_v26  ;;  %v14325_v23 = vcombine.high %v4118_v20, %v4126_v62  ;;  %v4134_v26 = vld [vmem:[#allocation8 + $0xd88] sm:$0xff]  ;;  %v3743_v20 = vld [vmem:[#allocation8 + $0x150] sm:$0xff] }
 0x395   :  { %10257 = vmatprep.subr.bf16.mxu0 %v13911_v29  ;;  %v14341_v29 = vcombine.high %v4134_v26, %v4142_v27  ;;  %v14340_v32 = vcombine.low %v4134_v26, %v4142_v27  ;;  %v4222_v5 = vld [vmem:[#allocation8 + $0x1048] sm:$0xff] }
 0x396   :  { %v4230_v62 = vld [vmem:[#allocation8 + $0x1088] sm:$0xff]  ;;  %v14420_v26 = vcombine.low %v4214_v11, %v4222_v5 }
 0x397   :  { %10124 = vmatpush1.bf16.msra.mxu1 %v14148_v30  ;;  %v4150_v30 = vld [vmem:[#allocation8 + $0xe08] sm:$0xff] }
 0x398   :  { %10134 = vmatprep.subr.bf16.mxu1 %v14165_v31  ;;  %v4158_v31 = vld [vmem:[#allocation8 + $0xe48] sm:$0xff] }
 0x399   :  { %v14357_v33 = vcombine.high %v4150_v30, %v4158_v31  ;;  %v14356_v37 = vcombine.low %v4150_v30, %v4158_v31  ;;  %v3759_v30 = vld [vmem:[#allocation8 + $0x1d0] sm:$0xff]  ;;  %v4246_v31 = vld [vmem:[#allocation8 + $0x1108] sm:$0xff] }
 0x39a   :  { %10126 = vmatmul.mubr.bf16.vlgmr.msra.gmra.mrb[24].mxu1 %v17138_v15 }
 0x39b   :  { %10135 = vmatpush1.bf16.msra.mxu1 %v14164_v34  ;;  %10166 = vmatprep.mubr.bf16.mxu1 %v17176_v45  ;;  %v4166_v34 = vld [vmem:[#allocation8 + $0xe88] sm:$0xff] }
 0x39c   :  { %10136 = vmatprep.subr.bf16.mxu1 %v14181_v50  ;;  %v4174_v50 = vld [vmem:[#allocation8 + $0xec8] sm:$0xff] }
 0x39d   :  { %v14372_v49 = vcombine.low %v4166_v34, %v4174_v50 }
 0x39f   :  { %10137 = vmatpush1.bf16.msra.mxu1 %v14180_v38  ;;  %v17230_v38 = vsub.s32 7, %v17063_v13 }
 0x3a0   :  { %10138 = vmatprep.subr.bf16.mxu1 %v14197_v40  ;;  %v14373_v40 = vcombine.high %v4166_v34, %v4174_v50  ;;  %v3767_v34 = vld [vmem:[#allocation8 + $0x210] sm:$0xff] }
 0x3a1   :  { %v3775_v50 = vld [vmem:[#allocation8 + $0x250] sm:$0xff] }
 0x3a3   :  { %10139 = vmatpush1.bf16.msra.mxu1 %v14196_v43  ;;  %v16602_v43 = vld [vmem:[#allocation5] sm:$0xff] }
 0x3a4   :  { %10140 = vmatprep.subr.bf16.mxu1 %v14213_v36  ;;  %v685_v36 = vrot.slane %v16602_v43, %v17227_v35  ;;  %v689_v63 = vrot.slane %v16602_v43, %v17230_v38  ;;  %v13975_v43 = vcombine.high %v3767_v34, %v3775_v50 }
 0x3a7   :  { %10141 = vmatpush1.bf16.msra.mxu1 %v14212_v52  ;;  %v14389_v52 = vcombine.high %v4182_v41, %v4190_v42 }
 0x3a8   :  { %10142 = vmatprep.subr.bf16.mxu1 %v14229_v53 }
 0x3ab   :  { %10143 = vmatpush1.bf16.msra.mxu1 %v14228_v58 }
 0x3ac   :  { %10144 = vmatprep.subr.bf16.mxu1 %v14245_v61 }
 0x3af   :  { %10145 = vmatpush1.bf16.msra.mxu1 %v14244_v3 }
 0x3b0   :  { %10146 = vmatprep.subr.bf16.mxu1 %v14261_v4 }
 0x3b3   :  { %10147 = vmatpush1.bf16.msra.mxu1 %v14260_v7  ;;  %v3719_v7 = vld [vmem:[#allocation8 + $0x90] sm:$0xff] }
 0x3b4   :  { %10148 = vmatprep.subr.bf16.mxu1 %v14277_v8  ;;  %v3727_v8 = vld [vmem:[#allocation8 + $0xd0] sm:$0xff] }
 0x3b5   :  { %v13927_v16 = vcombine.high %v3719_v7, %v3727_v8 }
 0x3b7   :  { %10149 = vmatpush1.bf16.msra.mxu1 %v14276_v59 }
 0x3b8   :  { %10150 = vmatprep.subr.bf16.mxu1 %v14293_v12  ;;  %v14404_v12 = vcombine.low %v4198_v55, %v4206_v57  ;;  %v13974_v55 = vcombine.low %v3767_v34, %v3775_v50  ;;  %v3855_v34 = vld [vmem:[#allocation8 + $0x4d0] sm:$0xff]  ;;  %v4342_v50 = vld [vmem:[#allocation8 + $0x1408] sm:$0xff] }
 0x3bb   :  { %10151 = vmatpush1.bf16.msra.mxu1 %v14292_v18  ;;  %v14421_v18 = vcombine.high %v4214_v11, %v4222_v5  ;;  %v3823_v11 = vld [vmem:[#allocation8 + $0x3d0] sm:$0xff]  ;;  %v4310_v5 = vld [vmem:[#allocation8 + $0x1308] sm:$0xff] }
 0x3bc   :  { %10152 = vmatprep.subr.bf16.mxu1 %v14309_v19  ;;  %v3735_v19 = vld [vmem:[#allocation8 + $0x110] sm:$0xff] }
 0x3bd   :  { %v13943_v27 = vcombine.high %v3735_v19, %v3743_v20 }
 0x3bf   :  { %10153 = vmatpush1.bf16.msra.mxu1 %v14308_v0  ;;  %v4238_v0 = vld [vmem:[#allocation8 + $0x10c8] sm:$0xff] }
 0x3c0   :  { %10154 = vmatprep.subr.bf16.mxu1 %v14325_v23  ;;  %v13926_v23 = vcombine.low %v3719_v7, %v3727_v8  ;;  %v14436_v44 = vcombine.low %v4230_v62, %v4238_v0  ;;  %v3815_v8 = vld [vmem:[#allocation8 + $0x390] sm:$0xff] }
 0x3c3   :  { %10155 = vmatpush1.bf16.msra.mxu1 %v14324_v28  ;;  %v3751_v28 = vld [vmem:[#allocation8 + $0x190] sm:$0xff] }
 0x3c4   :  { %10156 = vmatprep.subr.bf16.mxu1 %v14341_v29  ;;  %v14437_v29 = vcombine.high %v4230_v62, %v4238_v0  ;;  %v13959_v46 = vcombine.high %v3751_v28, %v3759_v30  ;;  %v13958_v41 = vcombine.low %v3751_v28, %v3759_v30  ;;  %v3831_v62 = vld [vmem:[#allocation8 + $0x410] sm:$0xff] }
 0x3c5   :  { %v3839_v0 = vld [vmem:[#allocation8 + $0x450] sm:$0xff] }
 0x3c7   :  { %10157 = vmatpush1.bf16.msra.mxu1 %v14340_v32  ;;  %v4254_v32 = vld [vmem:[#allocation8 + $0x1148] sm:$0xff] }
 0x3c8   :  { %10158 = vmatprep.subr.bf16.mxu1 %v14357_v33  ;;  %v13942_v33 = vcombine.low %v3735_v19, %v3743_v20  ;;  %v14452_v42 = vcombine.low %v4246_v31, %v4254_v32  ;;  %v14023_v19 = vcombine.high %v3815_v8, %v3823_v11 }
 0x3cb   :  { %10159 = vmatpush1.bf16.msra.mxu1 %v14356_v37  ;;  %v4262_v37 = vld [vmem:[#allocation8 + $0x1188] sm:$0xff] }
 0x3cc   :  { %10160 = vmatprep.subr.bf16.mxu1 %v14373_v40  ;;  %v4270_v40 = vld [vmem:[#allocation8 + $0x11c8] sm:$0xff] }
 0x3cd   :  { %v3450_v53 = vpop.f32.mrb[8].mxu1  ;;  %v14468_v57 = vcombine.low %v4262_v37, %v4270_v40 }
 0x3ce   :  { %v15365_v58 = vadd.f32 %v3450_v53, %v685_v36  ;;  %v3452_v61 = vpop.f32.mrb[9].mxu1  ;;  %v14469_v36 = vcombine.high %v4262_v37, %v4270_v40  ;;  %v4286_v53 = vld [vmem:[#allocation8 + $0x1248] sm:$0xff]  ;;  %v14038_v40 = vcombine.low %v3831_v62, %v3839_v0 }
 0x3cf   :  { %v15366_v13 = vadd.f32 %v3452_v61, %v689_v63  ;;  %v3454_v1 = vpop.f32.mrb[10].mxu1  ;;  %10161 = vmatpush1.bf16.msra.mxu1 %v14372_v49  ;;  %v3783_v63 = vld [vmem:[#allocation8 + $0x290] sm:$0xff]  ;;  %v4350_v37 = vld [vmem:[#allocation8 + $0x1448] sm:$0xff] }
 0x3d0   :  { %v3689_v3 = vmax.f32 %v15365_v58, 0.0  ;;  %v3455_v4 = vpop.f32.mrb[11].mxu1  ;;  %10162 = vmatprep.subr.bf16.mxu1 %v14389_v52  ;;  %v3791_v49 = vld [vmem:[#allocation8 + $0x2d0] sm:$0xff]  ;;  %v4278_v52 = vld [vmem:[#allocation8 + $0x1208] sm:$0xff] }
 0x3d1   :  { %v3690_v6 = vmax.f32 %v15366_v13, 0.0  ;;  %v13991_v58 = vcombine.high %v3783_v63, %v3791_v49  ;;  %v14485_v61 = vcombine.high %v4278_v52, %v4286_v53  ;;  %v3799_v13 = vld [vmem:[#allocation8 + $0x310] sm:$0xff]  ;;  %v13990_v4 = vcombine.low %v3783_v63, %v3791_v49  ;;  %v4358_v49 = vld [vmem:[#allocation8 + $0x1488] sm:$0xff] }
 0x3d2   :  { %v17236_v14 = vpack.c.bf16 %v3689_v3, %v3689_v3  ;;  %v3807_v1 = vld [vmem:[#allocation8 + $0x350] sm:$0xff]  ;;  %v4302_v3 = vld [vmem:[#allocation8 + $0x12c8] sm:$0xff] }
 0x3d3   :  { %v17234_v59 = vpack.c.bf16 %v3690_v6, %v3690_v6  ;;  %10163 = vmatpush1.bf16.msra.mxu1 %v14388_v2  ;;  %v4294_v2 = vld [vmem:[#allocation8 + $0x1288] sm:$0xff]  ;;  %v14007_v6 = vcombine.high %v3799_v13, %v3807_v1  ;;  %v3871_v63 = vld [vmem:[#allocation8 + $0x550] sm:$0xff] }
 0x3d4   :  { %10164 = vmatprep.subr.bf16.mxu1 %v14405_v9  ;;  %v14484_v9 = vcombine.low %v4278_v52, %v4286_v53  ;;  %v14501_v7 = vcombine.high %v4294_v2, %v4302_v3  ;;  %v4366_v52 = vld [vmem:[#allocation8 + $0x14c8] sm:$0xff] }
 0x3d5   :  { %10084 = vmatprep.mubr.bf16.mxu0 %v17234_v59 }
 0x3d6   :  { %10085 = vmatmul.mubr.bf16.vlgmr.msra.gmra.mrb[8].mxu0 %v17236_v14 }
 0x3d7   :  { %10258 = vmatpush1.bf16.msra.mxu0 %v13910_v56  ;;  %10165 = vmatpush1.bf16.msra.mxu1 %v14404_v12  ;;  %v14453_v56 = vcombine.high %v4246_v31, %v4254_v32  ;;  %v4318_v12 = vld [vmem:[#allocation8 + $0x1348] sm:$0xff] }
 0x3d8   :  { %10289 = vmatprep.mubr.bf16.mxu0 %v17136_v10  ;;  %10259 = vmatprep.subr.bf16.mxu0 %v13927_v16  ;;  %v14006_v16 = vcombine.low %v3799_v13, %v3807_v1  ;;  %v14517_v20 = vcombine.high %v4310_v5, %v4318_v12  ;;  %v14516_v30 = vcombine.low %v4310_v5, %v4318_v12  ;;  %v3887_v13 = vld [vmem:[#allocation8 + $0x5d0] sm:$0xff]  ;;  %v4374_v1 = vld [vmem:[#allocation8 + $0x1508] sm:$0xff] }
 0x3d9   :  { %10175 = vmatprep.subr.bf16.mxu1 %v14421_v18  ;;  %v14500_v18 = vcombine.low %v4294_v2, %v4302_v3  ;;  %v4382_v2 = vld [vmem:[#allocation8 + $0x1548] sm:$0xff] }
 0x3da   :  { %10167 = vmatmul.mubr.bf16.vlgmr.msra.gmra.mrb[24].mxu1 %v17178_v47  ;;  %v4398_v5 = vld [vmem:[#allocation8 + $0x15c8] sm:$0xff] }
 0x3db   :  { %10260 = vmatpush1.bf16.msra.mxu0 %v13926_v23  ;;  %10176 = vmatpush1.bf16.msra.mxu1 %v14420_v26  ;;  %v4326_v23 = vld [vmem:[#allocation8 + $0x1388] sm:$0xff] }
 0x3dc   :  { %10207 = vmatprep.mubr.bf16.mxu1 %v17181_v54  ;;  %10261 = vmatprep.subr.bf16.mxu0 %v13943_v27  ;;  %v4334_v26 = vld [vmem:[#allocation8 + $0x13c8] sm:$0xff] }
 0x3dd   :  { %10177 = vmatprep.subr.bf16.mxu1 %v14437_v29  ;;  %v14022_v29 = vcombine.low %v3815_v8, %v3823_v11  ;;  %v3903_v8 = vld [vmem:[#allocation8 + $0x650] sm:$0xff]  ;;  %v4390_v11 = vld [vmem:[#allocation8 + $0x1588] sm:$0xff] }
 0x3df   :  { %10262 = vmatpush1.bf16.msra.mxu0 %v13942_v33  ;;  %10178 = vmatpush1.bf16.msra.mxu1 %v14436_v44  ;;  %v14039_v33 = vcombine.high %v3831_v62, %v3839_v0  ;;  %v14533_v44 = vcombine.high %v4326_v23, %v4334_v26  ;;  %v3919_v62 = vld [vmem:[#allocation8 + $0x6d0] sm:$0xff]  ;;  %v4406_v0 = vld [vmem:[#allocation8 + $0x1608] sm:$0xff] }
 0x3e0   :  { %10263 = vmatprep.subr.bf16.mxu0 %v13959_v46  ;;  %10179 = vmatprep.subr.bf16.mxu1 %v14453_v56  ;;  %v3847_v46 = vld [vmem:[#allocation8 + $0x490] sm:$0xff] }
 0x3e1   :  { %v14054_v53 = vcombine.low %v3847_v46, %v3855_v34 }
 0x3e3   :  { %10264 = vmatpush1.bf16.msra.mxu0 %v13958_v41  ;;  %10180 = vmatpush1.bf16.msra.mxu1 %v14452_v42  ;;  %v14532_v41 = vcombine.low %v4326_v23, %v4334_v26  ;;  %v14055_v42 = vcombine.high %v3847_v46, %v3855_v34  ;;  %v4414_v23 = vld [vmem:[#allocation8 + $0x1648] sm:$0xff] }
 0x3e4   :  { %10265 = vmatprep.subr.bf16.mxu0 %v13975_v43  ;;  %10181 = vmatprep.subr.bf16.mxu1 %v14469_v36  ;;  %v14549_v43 = vcombine.high %v4342_v50, %v4350_v37  ;;  %v3863_v36 = vld [vmem:[#allocation8 + $0x510] sm:$0xff] }
 0x3e5   :  { %v14070_v3 = vcombine.low %v3863_v36, %v3871_v63 }
 0x3e7   :  { %10266 = vmatpush1.bf16.msra.mxu0 %v13974_v55  ;;  %10182 = vmatpush1.bf16.msra.mxu1 %v14468_v57  ;;  %v14548_v55 = vcombine.low %v4342_v50, %v4350_v37  ;;  %v14071_v57 = vcombine.high %v3863_v36, %v3871_v63  ;;  %v3943_v37 = vld [vmem:[#allocation8 + $0x790] sm:$0xff] }
 0x3e8   :  { %10267 = vmatprep.subr.bf16.mxu0 %v13991_v58  ;;  %10183 = vmatprep.subr.bf16.mxu1 %v14485_v61  ;;  %v14565_v58 = vcombine.high %v4358_v49, %v4366_v52  ;;  %v3879_v61 = vld [vmem:[#allocation8 + $0x590] sm:$0xff] }
 0x3e9   :  { %v14086_v12 = vcombine.low %v3879_v61, %v3887_v13 }
 0x3eb   :  { %10268 = vmatpush1.bf16.msra.mxu0 %v13990_v4  ;;  %10184 = vmatpush1.bf16.msra.mxu1 %v14484_v9  ;;  %v14564_v4 = vcombine.low %v4358_v49, %v4366_v52  ;;  %v14087_v9 = vcombine.high %v3879_v61, %v3887_v13  ;;  %v4454_v61 = vld [vmem:[#allocation8 + $0x1788] sm:$0xff] }
 0x3ec   :  { %10269 = vmatprep.subr.bf16.mxu0 %v14007_v6  ;;  %10185 = vmatprep.subr.bf16.mxu1 %v14501_v7  ;;  %v14581_v6 = vcombine.high %v4374_v1, %v4382_v2  ;;  %v3895_v7 = vld [vmem:[#allocation8 + $0x610] sm:$0xff]  ;;  %v4462_v13 = vld [vmem:[#allocation8 + $0x17c8] sm:$0xff] }
 0x3ed   :  { %v15229_v27 = vpop.f32.mrb[12].mxu1  ;;  %v14102_v26 = vcombine.low %v3895_v7, %v3903_v8 }
 0x3ee   :  { %v15230_v28 = vpop.f32.mrb[13].mxu1 }
 0x3ef   :  { %10270 = vmatpush1.bf16.msra.mxu0 %v14006_v16  ;;  %10186 = vmatpush1.bf16.msra.mxu1 %v14500_v18  ;;  %v17246_v31 = vadd.f32 %v15230_v28, %v15229_v27  ;;  %v15232_v32 = vpop.f32.mrb[14].mxu1  ;;  %v14580_v16 = vcombine.low %v4374_v1, %v4382_v2  ;;  %v14103_v18 = vcombine.high %v3895_v7, %v3903_v8 }
 0x3f0   :  { %10271 = vmatprep.subr.bf16.mxu0 %v14023_v19  ;;  %10187 = vmatprep.subr.bf16.mxu1 %v14517_v20  ;;  %v15233_v56 = vpop.f32.mrb[15].mxu1  ;;  %v14597_v19 = vcombine.high %v4390_v11, %v4398_v5  ;;  %v3911_v20 = vld [vmem:[#allocation8 + $0x690] sm:$0xff]  ;;  %v14596_v27 = vcombine.low %v4390_v11, %v4398_v5  ;;  %v14661_v7 = vcombine.high %v4454_v61, %v4462_v13 }
 0x3f1   :  { %v14119_v28 = vcombine.high %v3911_v20, %v3919_v62  ;;  %v3935_v32 = vld [vmem:[#allocation8 + $0x750] sm:$0xff]  ;;  %v14118_v46 = vcombine.low %v3911_v20, %v3919_v62  ;;  %v14612_v56 = vcombine.low %v4406_v0, %v4414_v23  ;;  %v14660_v20 = vcombine.low %v4454_v61, %v4462_v13  ;;  %v4542_v61 = vld [vmem:[#allocation8 + $0x1a48] sm:$0xff] }
 0x3f2   :  { %v3975_v5 = vld [vmem:[#allocation8 + $0x890] sm:$0xff] }
 0x3f3   :  { %10272 = vmatpush1.bf16.msra.mxu0 %v14022_v29  ;;  %10188 = vmatpush1.bf16.msra.mxu1 %v14516_v30  ;;  %v14613_v29 = vcombine.high %v4406_v0, %v4414_v23  ;;  %v3927_v30 = vld [vmem:[#allocation8 + $0x710] sm:$0xff] }
 0x3f4   :  { %10273 = vmatprep.subr.bf16.mxu0 %v14039_v33  ;;  %10189 = vmatprep.subr.bf16.mxu1 %v14533_v44  ;;  %v4422_v33 = vld [vmem:[#allocation8 + $0x1688] sm:$0xff]  ;;  %v14135_v34 = vcombine.high %v3927_v30, %v3935_v32  ;;  %v14134_v36 = vcombine.low %v3927_v30, %v3935_v32  ;;  %v3991_v23 = vld [vmem:[#allocation8 + $0x910] sm:$0xff] }
 0x3f5   :  { %v4430_v44 = vld [vmem:[#allocation8 + $0x16c8] sm:$0xff] }
 0x3f6   :  { %v14629_v50 = vcombine.high %v4422_v33, %v4430_v44  ;;  %v14628_v63 = vcombine.low %v4422_v33, %v4430_v44  ;;  %v4007_v33 = vld [vmem:[#allocation8 + $0x990] sm:$0xff] }
 0x3f7   :  { %10274 = vmatpush1.bf16.msra.mxu0 %v14038_v40  ;;  %10190 = vmatpush1.bf16.msra.mxu1 %v14532_v41  ;;  %v3951_v40 = vld [vmem:[#allocation8 + $0x7d0] sm:$0xff]  ;;  %v4438_v41 = vld [vmem:[#allocation8 + $0x1708] sm:$0xff] }
 0x3f8   :  { %10275 = vmatprep.subr.bf16.mxu0 %v14055_v42  ;;  %10191 = vmatprep.subr.bf16.mxu1 %v14549_v43  ;;  %v4446_v42 = vld [vmem:[#allocation8 + $0x1748] sm:$0xff]  ;;  %v13465_v43 = vld [vmem:[#allocation5 + $0x8] ss:$0 sm:$0xff]  ;;  %v14151_v49 = vcombine.high %v3943_v37, %v3951_v40  ;;  %v4015_v44 = vld [vmem:[#allocation8 + $0x9d0] sm:$0xff] }
 0x3f9   :  { %v14645_v52 = vcombine.high %v4438_v41, %v4446_v42 }
 0x3fb   :  { %10276 = vmatpush1.bf16.msra.mxu0 %v14054_v53  ;;  %10192 = vmatpush1.bf16.msra.mxu1 %v14548_v55  ;;  %v3959_v53 = vld [vmem:[#allocation8 + $0x810] sm:$0xff]  ;;  %v3492_v55 = vadd.f32 %v17246_v31, %v13465_v43  ;;  %v4470_v31 = vld [vmem:[#allocation8 + $0x1808] sm:$0xff] }
 0x3fc   :  { %10277 = vmatprep.subr.bf16.mxu0 %v14071_v57  ;;  %10193 = vmatprep.subr.bf16.mxu1 %v14565_v58  ;;  %v3967_v58 = vld [vmem:[#allocation8 + $0x850] sm:$0xff]  ;;  %v4518_v43 = vld [vmem:[#allocation8 + $0x1988] sm:$0xff] }
 0x3ff   :  { %10278 = vmatpush1.bf16.msra.mxu0 %v14070_v3  ;;  %10194 = vmatpush1.bf16.msra.mxu1 %v14564_v4  ;;  %v14150_v3 = vcombine.low %v3943_v37, %v3951_v40  ;;  %v14644_v4 = vcombine.low %v4438_v41, %v4446_v42  ;;  %v14215_v37 = vcombine.high %v4007_v33, %v4015_v44  ;;  %v4023_v41 = vld [vmem:[#allocation8 + $0xa10] sm:$0xff] }
 0x400   :  { %10279 = vmatprep.subr.bf16.mxu0 %v14087_v9  ;;  %10195 = vmatprep.subr.bf16.mxu1 %v14581_v6  ;;  %v14167_v6 = vcombine.high %v3959_v53, %v3967_v58  ;;  %v4031_v42 = vld [vmem:[#allocation8 + $0xa50] sm:$0xff] }
 0x401   :  { %v14230_v13 = vcombine.low %v4023_v41, %v4031_v42 }
 0x403   :  { %10280 = vmatpush1.bf16.msra.mxu0 %v14086_v12  ;;  %10196 = vmatpush1.bf16.msra.mxu1 %v14580_v16  ;;  %v3983_v12 = vld [vmem:[#allocation8 + $0x8d0] sm:$0xff]  ;;  %v4478_v16 = vld [vmem:[#allocation8 + $0x1848] sm:$0xff] }
 0x404   :  { %10281 = vmatprep.subr.bf16.mxu0 %v14103_v18  ;;  %10197 = vmatprep.subr.bf16.mxu1 %v14597_v19  ;;  %v14166_v18 = vcombine.low %v3959_v53, %v3967_v58  ;;  %v14183_v62 = vcombine.high %v3975_v5, %v3983_v12  ;;  %v14677_v0 = vcombine.high %v4470_v31, %v4478_v16  ;;  %v4534_v58 = vld [vmem:[#allocation8 + $0x1a08] sm:$0xff] }
 0x405   :  { %v14676_v30 = vcombine.low %v4470_v31, %v4478_v16  ;;  %v4071_v31 = vld [vmem:[#allocation8 + $0xb90] sm:$0xff] }
 0x406   :  { %v4079_v16 = vld [vmem:[#allocation8 + $0xbd0] sm:$0xff] }
 0x407   :  { %10282 = vmatpush1.bf16.msra.mxu0 %v14102_v26  ;;  %10198 = vmatpush1.bf16.msra.mxu1 %v14596_v27  ;;  %v3999_v26 = vld [vmem:[#allocation8 + $0x950] sm:$0xff]  ;;  %v4486_v27 = vld [vmem:[#allocation8 + $0x1888] sm:$0xff] }
 0x408   :  { %10283 = vmatprep.subr.bf16.mxu0 %v14119_v28  ;;  %10199 = vmatprep.subr.bf16.mxu1 %v14613_v29  ;;  %v4494_v28 = vld [vmem:[#allocation8 + $0x18c8] sm:$0xff]  ;;  %v14182_v29 = vcombine.low %v3975_v5, %v3983_v12 }
 0x409   :  { %v14693_v32 = vcombine.high %v4486_v27, %v4494_v28 }
 0x40b   :  { %10284 = vmatpush1.bf16.msra.mxu0 %v14118_v46  ;;  %10200 = vmatpush1.bf16.msra.mxu1 %v14612_v56  ;;  %v4502_v46 = vld [vmem:[#allocation8 + $0x1908] sm:$0xff] }
 0x40c   :  { %10285 = vmatprep.subr.bf16.mxu0 %v14135_v34  ;;  %10201 = vmatprep.subr.bf16.mxu1 %v14629_v50  ;;  %v4510_v56 = vld [vmem:[#allocation8 + $0x1948] sm:$0xff]  ;;  %v14198_v34 = vcombine.low %v3991_v23, %v3999_v26  ;;  %v14692_v50 = vcombine.low %v4486_v27, %v4494_v28  ;;  %v4087_v28 = vld [vmem:[#allocation8 + $0xc10] sm:$0xff] }
 0x40d   :  { %v15251_v57 = vpop.f32.mrb[16].mxu1  ;;  %v14709_v40 = vcombine.high %v4502_v46, %v4510_v56 }
 0x40e   :  { %v15252_v1 = vpop.f32.mrb[17].mxu1 }
 0x40f   :  { %v15253_v2 = vadd.f32 %v15252_v1, %v15251_v57  ;;  %10286 = vmatpush1.bf16.msra.mxu0 %v14134_v36  ;;  %10202 = vmatpush1.bf16.msra.mxu1 %v14628_v63  ;;  %v15254_v9 = vpop.f32.mrb[18].mxu1  ;;  %v4526_v36 = vld [vmem:[#allocation8 + $0x19c8] sm:$0xff]  ;;  %v14214_v63 = vcombine.low %v4007_v33, %v4015_v44  ;;  %v4047_v57 = vld [vmem:[#allocation8 + $0xad0] sm:$0xff]  ;;  %v14278_v44 = vcombine.low %v4071_v31, %v4079_v16 }
 0x410   :  { %10287 = vmatprep.subr.bf16.mxu0 %v14151_v49  ;;  %10203 = vmatprep.subr.bf16.mxu1 %v14645_v52  ;;  %v15255_v8 = vpop.f32.mrb[19].mxu1  ;;  %v14708_v49 = vcombine.low %v4502_v46, %v4510_v56  ;;  %v14231_v52 = vcombine.high %v4023_v41, %v4031_v42  ;;  %v14725_v53 = vcombine.high %v4518_v43, %v4526_v36  ;;  %v4063_v9 = vld [vmem:[#allocation8 + $0xb50] sm:$0xff]  ;;  %v4598_v42 = vld [vmem:[#allocation8 + $0x1c08] sm:$0xff] }
 0x411   :  { %v3532_v11 = vadd.f32 %v15253_v2, %v3492_v55  ;;  %v4039_v55 = vld [vmem:[#allocation8 + $0xa90] sm:$0xff]  ;;  %v14724_v1 = vcombine.low %v4518_v43, %v4526_v36  ;;  %v4606_v43 = vld [vmem:[#allocation8 + $0x1c48] sm:$0xff] }
 0x412   :  { %v14247_v2 = vcombine.high %v4039_v55, %v4047_v57  ;;  %v14246_v8 = vcombine.low %v4039_v55, %v4047_v57  ;;  %v4111_v41 = vld [vmem:[#allocation8 + $0xcd0] sm:$0xff]  ;;  %v4614_v55 = vld [vmem:[#allocation8 + $0x1c88] sm:$0xff] }
 0x413   :  { %10288 = vmatpush1.bf16.msra.mxu0 %v14150_v3  ;;  %10204 = vmatpush1.bf16.msra.mxu1 %v14644_v4  ;;  %v17250_v19 = vadd.f32 %v17190_v24, %v3532_v11  ;;  %v14199_v24 = vcombine.high %v3991_v23, %v3999_v26  ;;  %v14741_v3 = vcombine.high %v4534_v58, %v4542_v61  ;;  %v4055_v4 = vld [vmem:[#allocation8 + $0xb10] sm:$0xff]  ;;  %v4622_v57 = vld [vmem:[#allocation8 + $0x1cc8] sm:$0xff] }
 0x414   :  { %10298 = vmatprep.subr.bf16.mxu0 %v14167_v6  ;;  %10205 = vmatprep.subr.bf16.mxu1 %v14661_v7  ;;  %v4550_v6 = vld [vmem:[#allocation8 + $0x1a88] sm:$0xff]  ;;  %v14740_v11 = vcombine.low %v4534_v58, %v4542_v61  ;;  %v14263_v5 = vcombine.high %v4055_v4, %v4063_v9  ;;  %v14279_v23 = vcombine.high %v4071_v31, %v4079_v16 }
 0x415   :  { %v4558_v7 = vld [vmem:[#allocation8 + $0x1ac8] sm:$0xff]  ;;  %v14804_v61 = vcombine.low %v4598_v42, %v4606_v43 }
 0x416   :  { %10290 = vmatmul.mubr.bf16.vlgmr.msra.gmra.mrb[12].mxu0 %v17138_v15  ;;  %v14757_v12 = vcombine.high %v4550_v6, %v4558_v7  ;;  %v4646_v31 = vld [vmem:[#allocation8 + $0x1d88] sm:$0xff] }
 0x417   :  { %10299 = vmatpush1.bf16.msra.mxu0 %v14166_v18  ;;  %10330 = vmatprep.mubr.bf16.mxu0 %v17176_v45  ;;  %v4566_v18 = vld [vmem:[#allocation8 + $0x1b08] sm:$0xff] }
 0x418   :  { %10206 = vmatpush1.bf16.msra.mxu1 %v14660_v20  ;;  %10300 = vmatprep.subr.bf16.mxu0 %v14183_v62  ;;  %v4574_v20 = vld [vmem:[#allocation8 + $0x1b48] sm:$0xff]  ;;  %v14262_v62 = vcombine.low %v4055_v4, %v4063_v9 }
 0x419   :  { %10216 = vmatprep.subr.bf16.mxu1 %v14677_v0  ;;  %v14756_v0 = vcombine.low %v4550_v6, %v4558_v7  ;;  %v14773_v27 = vcombine.high %v4566_v18, %v4574_v20  ;;  %v14772_v56 = vcombine.low %v4566_v18, %v4574_v20  ;;  %v4630_v4 = vld [vmem:[#allocation8 + $0x1d08] sm:$0xff]  ;;  %v14820_v7 = vcombine.low %v4614_v55, %v4622_v57 }
 0x41a   :  { %v4638_v9 = vld [vmem:[#allocation8 + $0x1d48] sm:$0xff] }
 0x41b   :  { %10208 = vmatmul.mubr.bf16.vlgmr.msra.gmra.mrb[24].mxu1 %v17212_v39  ;;  %10301 = vmatpush1.bf16.msra.mxu0 %v14182_v29  ;;  %v4095_v29 = vld [vmem:[#allocation8 + $0xc50] sm:$0xff]  ;;  %v4654_v16 = vld [vmem:[#allocation8 + $0x1dc8] sm:$0xff]  ;;  %v14836_v20 = vcombine.low %v4630_v4, %v4638_v9 }
 0x41c   :  { %10217 = vmatpush1.bf16.msra.mxu1 %v14676_v30  ;;  %10248 = vmatprep.mubr.bf16.mxu1 %v17234_v59 }
 0x41d   :  { %10302 = vmatprep.subr.bf16.mxu0 %v14199_v24  ;;  %10218 = vmatprep.subr.bf16.mxu1 %v14693_v32  ;;  %v4582_v24 = vld [vmem:[#allocation8 + $0x1b88] sm:$0xff] }
 0x41e   :  { %v4590_v32 = vld [vmem:[#allocation8 + $0x1bc8] sm:$0xff] }
 0x41f   :  { %10303 = vmatpush1.bf16.msra.mxu0 %v14198_v34  ;;  %v14295_v34 = vcombine.high %v4087_v28, %v4095_v29  ;;  %v14788_v36 = vcombine.low %v4582_v24, %v4590_v32 }
 0x420   :  { %10219 = vmatpush1.bf16.msra.mxu1 %v14692_v50  ;;  %10304 = vmatprep.subr.bf16.mxu0 %v14215_v37  ;;  %v14789_v37 = vcombine.high %v4582_v24, %v4590_v32  ;;  %v14852_v24 = vcombine.low %v4646_v31, %v4654_v16 }
 0x421   :  { %10220 = vmatprep.subr.bf16.mxu1 %v14709_v40  ;;  %v4103_v40 = vld [vmem:[#allocation8 + $0xc90] sm:$0xff] }
 0x422   :  { %v14310_v58 = vcombine.low %v4103_v40, %v4111_v41 }
 0x423   :  { %10305 = vmatpush1.bf16.msra.mxu0 %v14214_v63  ;;  %v14311_v63 = vcombine.high %v4103_v40, %v4111_v41 }
 0x424   :  { %10221 = vmatpush1.bf16.msra.mxu1 %v14708_v49  ;;  %10306 = vmatprep.subr.bf16.mxu0 %v14231_v52  ;;  %v14805_v49 = vcombine.high %v4598_v42, %v4606_v43  ;;  %v4119_v52 = vld [vmem:[#allocation8 + $0xd10] sm:$0xff] }
 0x425   :  { %10222 = vmatprep.subr.bf16.mxu1 %v14725_v53  ;;  %v4127_v53 = vld [vmem:[#allocation8 + $0xd50] sm:$0xff] }
 0x426   :  { %v14326_v6 = vcombine.low %v4119_v52, %v4127_v53  ;;  %v4199_v42 = vld [vmem:[#allocation8 + $0xf90] sm:$0xff] }
 0x427   :  { %10307 = vmatpush1.bf16.msra.mxu0 %v14230_v13  ;;  %v14327_v13 = vcombine.high %v4119_v52, %v4127_v53  ;;  %v4207_v43 = vld [vmem:[#allocation8 + $0xfd0] sm:$0xff] }
 0x428   :  { %10223 = vmatpush1.bf16.msra.mxu1 %v14724_v1  ;;  %10308 = vmatprep.subr.bf16.mxu0 %v14247_v2  ;;  %v14821_v1 = vcombine.high %v4614_v55, %v4622_v57  ;;  %v4135_v2 = vld [vmem:[#allocation8 + $0xd90] sm:$0xff]  ;;  %v14407_v52 = vcombine.high %v4199_v42, %v4207_v43 }
 0x429   :  { %10224 = vmatprep.subr.bf16.mxu1 %v14741_v3  ;;  %v4143_v3 = vld [vmem:[#allocation8 + $0xdd0] sm:$0xff] }
 0x42a   :  { %v14342_v18 = vcombine.low %v4135_v2, %v4143_v3  ;;  %v4215_v55 = vld [vmem:[#allocation8 + $0x1010] sm:$0xff] }
 0x42b   :  { %10309 = vmatpush1.bf16.msra.mxu0 %v14246_v8  ;;  %v14343_v8 = vcombine.high %v4135_v2, %v4143_v3  ;;  %v4223_v57 = vld [vmem:[#allocation8 + $0x1050] sm:$0xff] }
 0x42c   :  { %10225 = vmatpush1.bf16.msra.mxu1 %v14740_v11  ;;  %10310 = vmatprep.subr.bf16.mxu0 %v14263_v5  ;;  %v14837_v11 = vcombine.high %v4630_v4, %v4638_v9  ;;  %v4151_v5 = vld [vmem:[#allocation8 + $0xe10] sm:$0xff]  ;;  %v14423_v2 = vcombine.high %v4215_v55, %v4223_v57 }
 0x42d   :  { %v3676_v26 = vpop.f32.mrb[20].mxu1  ;;  %10226 = vmatprep.subr.bf16.mxu1 %v14757_v12  ;;  %v4159_v12 = vld [vmem:[#allocation8 + $0xe50] sm:$0xff] }
 0x42e   :  { %v17257_v30 = vadd.f32 %v3676_v26, %v17250_v19  ;;  %v15337_v33 = vpop.f32.mrb[21].mxu1  ;;  %v14294_v19 = vcombine.low %v4087_v28, %v4095_v29  ;;  %v4175_v26 = vld [vmem:[#allocation8 + $0xed0] sm:$0xff]  ;;  %v4670_v28 = vld [vmem:[#allocation8 + $0x1e48] sm:$0xff]  ;;  %v14358_v29 = vcombine.low %v4151_v5, %v4159_v12 }
 0x42f   :  { %10311 = vmatpush1.bf16.msra.mxu0 %v14262_v62  ;;  %v3679_v46 = vpop.f32.mrb[22].mxu1  ;;  %v14359_v62 = vcombine.high %v4151_v5, %v4159_v12  ;;  %v4231_v4 = vld [vmem:[#allocation8 + $0x1090] sm:$0xff] }
 0x430   :  { %10227 = vmatpush1.bf16.msra.mxu1 %v14756_v0  ;;  %10312 = vmatprep.subr.bf16.mxu0 %v14279_v23  ;;  %v15338_v50 = vpop.f32.mrb[23].mxu1  ;;  %v14853_v0 = vcombine.high %v4646_v31, %v4654_v16  ;;  %v4167_v23 = vld [vmem:[#allocation8 + $0xe90] sm:$0xff] }
 0x431   :  { %10228 = vmatprep.subr.bf16.mxu1 %v14773_v27  ;;  %v4662_v27 = vld [vmem:[#allocation8 + $0x1e08] sm:$0xff]  ;;  %v14375_v32 = vcombine.high %v4167_v23, %v4175_v26  ;;  %v4191_v46 = vld [vmem:[#allocation8 + $0xf50] sm:$0xff]  ;;  %v14374_v50 = vcombine.low %v4167_v23, %v4175_v26 }
 0x432   :  { %v14869_v33 = vcombine.high %v4662_v27, %v4670_v28  ;;  %v4239_v9 = vld [vmem:[#allocation8 + $0x10d0] sm:$0xff] }
 0x433   :  { %10313 = vmatpush1.bf16.msra.mxu0 %v14278_v44  ;;  %v4183_v44 = vld [vmem:[#allocation8 + $0xf10] sm:$0xff]  ;;  %v14439_v5 = vcombine.high %v4231_v4, %v4239_v9 }
 0x434   :  { %10229 = vmatpush1.bf16.msra.mxu1 %v14772_v56  ;;  %10314 = vmatprep.subr.bf16.mxu0 %v14295_v34  ;;  %v4678_v56 = vld [vmem:[#allocation8 + $0x1e88] sm:$0xff]  ;;  %v14391_v40 = vcombine.high %v4183_v44, %v4191_v46  ;;  %v4247_v31 = vld [vmem:[#allocation8 + $0x1110] sm:$0xff] }
 0x435   :  { %10230 = vmatprep.subr.bf16.mxu1 %v14789_v37  ;;  %v4686_v34 = vld [vmem:[#allocation8 + $0x1ec8] sm:$0xff]  ;;  %v14868_v37 = vcombine.low %v4662_v27, %v4670_v28  ;;  %v4255_v16 = vld [vmem:[#allocation8 + $0x1150] sm:$0xff] }
 0x436   :  { %v14885_v41 = vcombine.high %v4678_v56, %v4686_v34  ;;  %v14455_v23 = vcombine.high %v4247_v31, %v4255_v16  ;;  %v4263_v27 = vld [vmem:[#allocation8 + $0x1190] sm:$0xff] }
 0x437   :  { %10315 = vmatpush1.bf16.msra.mxu0 %v14294_v19  ;;  %v4694_v19 = vld [vmem:[#allocation8 + $0x1f08] sm:$0xff]  ;;  %v4271_v28 = vld [vmem:[#allocation8 + $0x11d0] sm:$0xff] }
 0x438   :  { %10231 = vmatpush1.bf16.msra.mxu1 %v14788_v36  ;;  %10316 = vmatprep.subr.bf16.mxu0 %v14311_v63  ;;  %v4702_v36 = vld [vmem:[#allocation8 + $0x1f48] sm:$0xff]  ;;  %v14390_v63 = vcombine.low %v4183_v44, %v4191_v46  ;;  %v14471_v44 = vcombine.high %v4263_v27, %v4271_v28 }
 0x439   :  { %10232 = vmatprep.subr.bf16.mxu1 %v14805_v49  ;;  %v14884_v49 = vcombine.low %v4678_v56, %v4686_v34  ;;  %v14901_v53 = vcombine.high %v4694_v19, %v4702_v36  ;;  %v4279_v56 = vld [vmem:[#allocation8 + $0x1210] sm:$0xff] }
 0x43a   :  { %v4287_v34 = vld [vmem:[#allocation8 + $0x1250] sm:$0xff] }
 0x43b   :  { %10317 = vmatpush1.bf16.msra.mxu0 %v14310_v58  ;;  %v4710_v58 = vld [vmem:[#allocation8 + $0x1f88] sm:$0xff] }
 0x43c   :  { %10233 = vmatpush1.bf16.msra.mxu1 %v14804_v61  ;;  %10318 = vmatprep.subr.bf16.mxu0 %v14327_v13  ;;  %v4718_v61 = vld [vmem:[#allocation8 + $0x1fc8] sm:$0xff]  ;;  %v14406_v13 = vcombine.low %v4199_v42, %v4207_v43  ;;  %v14487_v42 = vcombine.high %v4279_v56, %v4287_v34 }
 0x43d   :  { %10234 = vmatprep.subr.bf16.mxu1 %v14821_v1  ;;  %v14900_v1 = vcombine.low %v4694_v19, %v4702_v36  ;;  %v14917_v3 = vcombine.high %v4710_v58, %v4718_v61  ;;  %v4295_v19 = vld [vmem:[#allocation8 + $0x1290] sm:$0xff] }
 0x43e   :  { %v4303_v36 = vld [vmem:[#allocation8 + $0x12d0] sm:$0xff] }
 0x43f   :  { %10319 = vmatpush1.bf16.msra.mxu0 %v14326_v6  ;;  %v3704_v6 = vld [vmem:[#allocation8 + $0x18] sm:$0xff] }
 0x440   :  { %10235 = vmatpush1.bf16.msra.mxu1 %v14820_v7  ;;  %10320 = vmatprep.subr.bf16.mxu0 %v14343_v8  ;;  %v3712_v7 = vld [vmem:[#allocation8 + $0x58] sm:$0xff]  ;;  %v14422_v8 = vcombine.low %v4215_v55, %v4223_v57  ;;  %v14503_v55 = vcombine.high %v4295_v19, %v4303_v36 }
 0x441   :  { %10236 = vmatprep.subr.bf16.mxu1 %v14837_v11  ;;  %v14916_v11 = vcombine.low %v4710_v58, %v4718_v61  ;;  %v13913_v12 = vcombine.high %v3704_v6, %v3712_v7  ;;  %v4311_v58 = vld [vmem:[#allocation8 + $0x1310] sm:$0xff] }
 0x442   :  { %v4319_v61 = vld [vmem:[#allocation8 + $0x1350] sm:$0xff] }
 0x443   :  { %10321 = vmatpush1.bf16.msra.mxu0 %v14342_v18  ;;  %v3720_v18 = vld [vmem:[#allocation8 + $0x98] sm:$0xff] }
 0x444   :  { %10237 = vmatpush1.bf16.msra.mxu1 %v14836_v20  ;;  %10322 = vmatprep.subr.bf16.mxu0 %v14359_v62  ;;  %v3728_v20 = vld [vmem:[#allocation8 + $0xd8] sm:$0xff]  ;;  %v14438_v62 = vcombine.low %v4231_v4, %v4239_v9  ;;  %v14519_v4 = vcombine.high %v4311_v58, %v4319_v61 }
 0x445   :  { %10238 = vmatprep.subr.bf16.mxu1 %v14853_v0  ;;  %v13912_v0 = vcombine.low %v3704_v6, %v3712_v7  ;;  %v13929_v26 = vcombine.high %v3720_v18, %v3728_v20  ;;  %v4327_v6 = vld [vmem:[#allocation8 + $0x1390] sm:$0xff] }
 0x446   :  { %v4335_v7 = vld [vmem:[#allocation8 + $0x13d0] sm:$0xff] }
 0x447   :  { %10323 = vmatpush1.bf16.msra.mxu0 %v14358_v29  ;;  %v3736_v29 = vld [vmem:[#allocation8 + $0x118] sm:$0xff] }
 0x448   :  { %10239 = vmatpush1.bf16.msra.mxu1 %v14852_v24  ;;  %10324 = vmatprep.subr.bf16.mxu0 %v14375_v32  ;;  %v3744_v24 = vld [vmem:[#allocation8 + $0x158] sm:$0xff]  ;;  %v14454_v32 = vcombine.low %v4247_v31, %v4255_v16  ;;  %v14535_v31 = vcombine.high %v4327_v6, %v4335_v7 }
 0x449   :  { %10240 = vmatprep.subr.bf16.mxu1 %v14869_v33  ;;  %v13928_v33 = vcombine.low %v3720_v18, %v3728_v20  ;;  %v13945_v46 = vcombine.high %v3736_v29, %v3744_v24  ;;  %v4343_v18 = vld [vmem:[#allocation8 + $0x1410] sm:$0xff] }
 0x44a   :  { %v4351_v20 = vld [vmem:[#allocation8 + $0x1450] sm:$0xff] }
 0x44b   :  { %10325 = vmatpush1.bf16.msra.mxu0 %v14374_v50  ;;  %v3752_v50 = vld [vmem:[#allocation8 + $0x198] sm:$0xff] }
 0x44c   :  { %10241 = vmatpush1.bf16.msra.mxu1 %v14868_v37  ;;  %10326 = vmatprep.subr.bf16.mxu0 %v14391_v40  ;;  %v3760_v37 = vld [vmem:[#allocation8 + $0x1d8] sm:$0xff]  ;;  %v14470_v40 = vcombine.low %v4263_v27, %v4271_v28  ;;  %v14551_v27 = vcombine.high %v4343_v18, %v4351_v20 }
 0x44d   :  { %10242 = vmatprep.subr.bf16.mxu1 %v14885_v41  ;;  %v13944_v41 = vcombine.low %v3736_v29, %v3744_v24  ;;  %v13961_v43 = vcombine.high %v3752_v50, %v3760_v37  ;;  %v4359_v29 = vld [vmem:[#allocation8 + $0x1490] sm:$0xff] }
 0x44e   :  { %v4367_v24 = vld [vmem:[#allocation8 + $0x14d0] sm:$0xff] }
 0x44f   :  { %10327 = vmatpush1.bf16.msra.mxu0 %v14390_v63  ;;  %v3768_v63 = vld [vmem:[#allocation8 + $0x218] sm:$0xff] }
 0x450   :  { %10243 = vmatpush1.bf16.msra.mxu1 %v14884_v49  ;;  %10328 = vmatprep.subr.bf16.mxu0 %v14407_v52  ;;  %v3776_v49 = vld [vmem:[#allocation8 + $0x258] sm:$0xff]  ;;  %v14486_v52 = vcombine.low %v4279_v56, %v4287_v34  ;;  %v14567_v56 = vcombine.high %v4359_v29, %v4367_v24 }
 0x451   :  { %10244 = vmatprep.subr.bf16.mxu1 %v14901_v53  ;;  %v13960_v53 = vcombine.low %v3752_v50, %v3760_v37  ;;  %v13977_v57 = vcombine.high %v3768_v63, %v3776_v49  ;;  %v4375_v50 = vld [vmem:[#allocation8 + $0x1510] sm:$0xff] }
 0x452   :  { %v4383_v37 = vld [vmem:[#allocation8 + $0x1550] sm:$0xff] }
 0x453   :  { %10329 = vmatpush1.bf16.msra.mxu0 %v14406_v13  ;;  %v3784_v13 = vld [vmem:[#allocation8 + $0x298] sm:$0xff] }
 0x454   :  { %10245 = vmatpush1.bf16.msra.mxu1 %v14900_v1  ;;  %10339 = vmatprep.subr.bf16.mxu0 %v14423_v2  ;;  %v3792_v1 = vld [vmem:[#allocation8 + $0x2d8] sm:$0xff]  ;;  %v14502_v2 = vcombine.low %v4295_v19, %v4303_v36  ;;  %v14583_v19 = vcombine.high %v4375_v50, %v4383_v37 }
 0x455   :  { %10246 = vmatprep.subr.bf16.mxu1 %v14917_v3  ;;  %v13976_v3 = vcombine.low %v3768_v63, %v3776_v49  ;;  %v13993_v9 = vcombine.high %v3784_v13, %v3792_v1  ;;  %v4391_v63 = vld [vmem:[#allocation8 + $0x1590] sm:$0xff] }
 0x456   :  { %10331 = vmatmul.mubr.bf16.vlgmr.msra.gmra.mrb[12].mxu0 %v17178_v47  ;;  %v4399_v49 = vld [vmem:[#allocation8 + $0x15d0] sm:$0xff] }
 0x457   :  { %10340 = vmatpush1.bf16.msra.mxu0 %v14422_v8  ;;  %10371 = vmatprep.mubr.bf16.mxu0 %v17181_v54  ;;  %v3800_v8 = vld [vmem:[#allocation8 + $0x318] sm:$0xff] }
 0x458   :  { %10247 = vmatpush1.bf16.msra.mxu1 %v14916_v11  ;;  %10341 = vmatprep.subr.bf16.mxu0 %v14439_v5  ;;  %v3808_v11 = vld [vmem:[#allocation8 + $0x358] sm:$0xff]  ;;  %v14518_v5 = vcombine.low %v4311_v58, %v4319_v61  ;;  %v14599_v58 = vcombine.high %v4391_v63, %v4399_v49 }
 0x459   :  { %10421 = vmatprep.subr.bf16.mxu1 %v13913_v12  ;;  %v13992_v12 = vcombine.low %v3784_v13, %v3792_v1  ;;  %v14009_v16 = vcombine.high %v3800_v8, %v3808_v11  ;;  %v4407_v13 = vld [vmem:[#allocation8 + $0x1610] sm:$0xff] }
 0x45a   :  { %v4415_v1 = vld [vmem:[#allocation8 + $0x1650] sm:$0xff] }
 0x45b   :  { %10249 = vmatmul.mubr.bf16.vlgmr.msra.gmra.mrb[24].mxu1 %v17236_v14  ;;  %10342 = vmatpush1.bf16.msra.mxu0 %v14438_v62  ;;  %v3816_v62 = vld [vmem:[#allocation8 + $0x398] sm:$0xff] }
 0x45c   :  { %10422 = vmatpush1.bf16.msra.mxu1 %v13912_v0  ;;  %10453 = vmatprep.mubr.bf16.mxu1 %v17136_v10  ;;  %v3824_v0 = vld [vmem:[#allocation8 + $0x3d8] sm:$0xff] }
 0x45d   :  { %10343 = vmatprep.subr.bf16.mxu0 %v14455_v23  ;;  %10423 = vmatprep.subr.bf16.mxu1 %v13929_v26  ;;  %v14534_v23 = vcombine.low %v4327_v6, %v4335_v7  ;;  %v14008_v26 = vcombine.low %v3800_v8, %v3808_v11  ;;  %v14025_v28 = vcombine.high %v3816_v62, %v3824_v0  ;;  %v4423_v8 = vld [vmem:[#allocation8 + $0x1690] sm:$0xff] }
 0x45e   :  { %v14615_v6 = vcombine.high %v4407_v13, %v4415_v1  ;;  %v4431_v11 = vld [vmem:[#allocation8 + $0x16d0] sm:$0xff] }
 0x45f   :  { %10344 = vmatpush1.bf16.msra.mxu0 %v14454_v32  ;;  %v3832_v32 = vld [vmem:[#allocation8 + $0x418] sm:$0xff] }
 0x460   :  { %10424 = vmatpush1.bf16.msra.mxu1 %v13928_v33  ;;  %10345 = vmatprep.subr.bf16.mxu0 %v14471_v44  ;;  %v3840_v33 = vld [vmem:[#allocation8 + $0x458] sm:$0xff]  ;;  %v14550_v44 = vcombine.low %v4343_v18, %v4351_v20  ;;  %v14631_v18 = vcombine.high %v4423_v8, %v4431_v11 }
 0x461   :  { %10425 = vmatprep.subr.bf16.mxu1 %v13945_v46  ;;  %v14024_v46 = vcombine.low %v3816_v62, %v3824_v0  ;;  %v14041_v34 = vcombine.high %v3832_v32, %v3840_v33  ;;  %v4439_v62 = vld [vmem:[#allocation8 + $0x1710] sm:$0xff] }
 0x462   :  { %v4447_v0 = vld [vmem:[#allocation8 + $0x1750] sm:$0xff] }
 0x463   :  { %10346 = vmatpush1.bf16.msra.mxu0 %v14470_v40  ;;  %v3848_v40 = vld [vmem:[#allocation8 + $0x498] sm:$0xff] }
 0x464   :  { %10426 = vmatpush1.bf16.msra.mxu1 %v13944_v41  ;;  %10347 = vmatprep.subr.bf16.mxu0 %v14487_v42  ;;  %v3856_v41 = vld [vmem:[#allocation8 + $0x4d8] sm:$0xff]  ;;  %v14566_v42 = vcombine.low %v4359_v29, %v4367_v24  ;;  %v14647_v29 = vcombine.high %v4439_v62, %v4447_v0 }
 0x465   :  { %10427 = vmatprep.subr.bf16.mxu1 %v13961_v43  ;;  %v14040_v43 = vcombine.low %v3832_v32, %v3840_v33  ;;  %v14057_v36 = vcombine.high %v3848_v40, %v3856_v41  ;;  %v4455_v32 = vld [vmem:[#allocation8 + $0x1790] sm:$0xff] }
 0x466   :  { %v4463_v33 = vld [vmem:[#allocation8 + $0x17d0] sm:$0xff] }
 0x467   :  { %10348 = vmatpush1.bf16.msra.mxu0 %v14486_v52  ;;  %v3864_v52 = vld [vmem:[#allocation8 + $0x518] sm:$0xff] }
 0x468   :  { %10428 = vmatpush1.bf16.msra.mxu1 %v13960_v53  ;;  %10349 = vmatprep.subr.bf16.mxu0 %v14503_v55  ;;  %v3872_v53 = vld [vmem:[#allocation8 + $0x558] sm:$0xff]  ;;  %v14582_v55 = vcombine.low %v4375_v50, %v4383_v37  ;;  %v14663_v50 = vcombine.high %v4455_v32, %v4463_v33 }
 0x469   :  { %10429 = vmatprep.subr.bf16.mxu1 %v13977_v57  ;;  %v14056_v57 = vcombine.low %v3848_v40, %v3856_v41  ;;  %v14073_v61 = vcombine.high %v3864_v52, %v3872_v53  ;;  %v4471_v40 = vld [vmem:[#allocation8 + $0x1810] sm:$0xff] }
 0x46a   :  { %v4479_v41 = vld [vmem:[#allocation8 + $0x1850] sm:$0xff] }
 0x46b   :  { %10350 = vmatpush1.bf16.msra.mxu0 %v14502_v2  ;;  %v3880_v2 = vld [vmem:[#allocation8 + $0x598] sm:$0xff] }
 0x46c   :  { %10430 = vmatpush1.bf16.msra.mxu1 %v13976_v3  ;;  %10351 = vmatprep.subr.bf16.mxu0 %v14519_v4  ;;  %v3888_v3 = vld [vmem:[#allocation8 + $0x5d8] sm:$0xff]  ;;  %v14598_v4 = vcombine.low %v4391_v63, %v4399_v49  ;;  %v14679_v63 = vcombine.high %v4471_v40, %v4479_v41 }
 0x46d   :  { %10431 = vmatprep.subr.bf16.mxu1 %v13993_v9  ;;  %v14072_v9 = vcombine.low %v3864_v52, %v3872_v53  ;;  %v14089_v7 = vcombine.high %v3880_v2, %v3888_v3  ;;  %v4487_v52 = vld [vmem:[#allocation8 + $0x1890] sm:$0xff] }
 0x46e   :  { %v4495_v53 = vld [vmem:[#allocation8 + $0x18d0] sm:$0xff] }
 0x46f   :  { %10352 = vmatpush1.bf16.msra.mxu0 %v14518_v5  ;;  %v3896_v5 = vld [vmem:[#allocation8 + $0x618] sm:$0xff] }
 0x470   :  { %10432 = vmatpush1.bf16.msra.mxu1 %v13992_v12  ;;  %10353 = vmatprep.subr.bf16.mxu0 %v14535_v31  ;;  %v3904_v12 = vld [vmem:[#allocation8 + $0x658] sm:$0xff]  ;;  %v14614_v31 = vcombine.low %v4407_v13, %v4415_v1  ;;  %v14695_v13 = vcombine.high %v4487_v52, %v4495_v53 }
 0x471   :  { %10433 = vmatprep.subr.bf16.mxu1 %v14009_v16  ;;  %v14088_v16 = vcombine.low %v3880_v2, %v3888_v3  ;;  %v14105_v20 = vcombine.high %v3896_v5, %v3904_v12  ;;  %v4503_v2 = vld [vmem:[#allocation8 + $0x1910] sm:$0xff] }
 0x472   :  { %v4511_v3 = vld [vmem:[#allocation8 + $0x1950] sm:$0xff] }
 0x473   :  { %10354 = vmatpush1.bf16.msra.mxu0 %v14534_v23  ;;  %v3912_v23 = vld [vmem:[#allocation8 + $0x698] sm:$0xff] }
 0x474   :  { %10434 = vmatpush1.bf16.msra.mxu1 %v14008_v26  ;;  %10355 = vmatprep.subr.bf16.mxu0 %v14551_v27  ;;  %v3920_v26 = vld [vmem:[#allocation8 + $0x6d8] sm:$0xff]  ;;  %v14630_v27 = vcombine.low %v4423_v8, %v4431_v11  ;;  %v14711_v8 = vcombine.high %v4503_v2, %v4511_v3 }
 0x475   :  { %10435 = vmatprep.subr.bf16.mxu1 %v14025_v28  ;;  %v14104_v28 = vcombine.low %v3896_v5, %v3904_v12  ;;  %v14121_v24 = vcombine.high %v3912_v23, %v3920_v26  ;;  %v4519_v5 = vld [vmem:[#allocation8 + $0x1990] sm:$0xff] }
 0x476   :  { %v4527_v12 = vld [vmem:[#allocation8 + $0x19d0] sm:$0xff] }
 0x477   :  { %10356 = vmatpush1.bf16.msra.mxu0 %v14550_v44  ;;  %v3928_v44 = vld [vmem:[#allocation8 + $0x718] sm:$0xff] }
 0x478   :  { %10436 = vmatpush1.bf16.msra.mxu1 %v14024_v46  ;;  %10357 = vmatprep.subr.bf16.mxu0 %v14567_v56  ;;  %v3936_v46 = vld [vmem:[#allocation8 + $0x758] sm:$0xff]  ;;  %v14646_v56 = vcombine.low %v4439_v62, %v4447_v0  ;;  %v14727_v62 = vcombine.high %v4519_v5, %v4527_v12 }
 0x479   :  { %10437 = vmatprep.subr.bf16.mxu1 %v14041_v34  ;;  %v14120_v34 = vcombine.low %v3912_v23, %v3920_v26  ;;  %v14137_v37 = vcombine.high %v3928_v44, %v3936_v46  ;;  %v4535_v23 = vld [vmem:[#allocation8 + $0x1a10] sm:$0xff] }
 0x47a   :  { %v4543_v26 = vld [vmem:[#allocation8 + $0x1a50] sm:$0xff] }
 0x47b   :  { %10358 = vmatpush1.bf16.msra.mxu0 %v14566_v42  ;;  %v3944_v42 = vld [vmem:[#allocation8 + $0x798] sm:$0xff] }
 0x47c   :  { %10438 = vmatpush1.bf16.msra.mxu1 %v14040_v43  ;;  %10359 = vmatprep.subr.bf16.mxu0 %v14583_v19  ;;  %v3952_v43 = vld [vmem:[#allocation8 + $0x7d8] sm:$0xff]  ;;  %v14662_v19 = vcombine.low %v4455_v32, %v4463_v33  ;;  %v14743_v32 = vcombine.high %v4535_v23, %v4543_v26 }
 0x47d   :  { %10439 = vmatprep.subr.bf16.mxu1 %v14057_v36  ;;  %v14136_v36 = vcombine.low %v3928_v44, %v3936_v46  ;;  %v14153_v49 = vcombine.high %v3944_v42, %v3952_v43  ;;  %v4551_v44 = vld [vmem:[#allocation8 + $0x1a90] sm:$0xff] }
 0x47e   :  { %v4559_v46 = vld [vmem:[#allocation8 + $0x1ad0] sm:$0xff] }
 0x47f   :  { %10360 = vmatpush1.bf16.msra.mxu0 %v14582_v55  ;;  %v3960_v55 = vld [vmem:[#allocation8 + $0x818] sm:$0xff] }
 0x480   :  { %10440 = vmatpush1.bf16.msra.mxu1 %v14056_v57  ;;  %10361 = vmatprep.subr.bf16.mxu0 %v14599_v58  ;;  %v3968_v57 = vld [vmem:[#allocation8 + $0x858] sm:$0xff]  ;;  %v14678_v58 = vcombine.low %v4471_v40, %v4479_v41  ;;  %v14759_v40 = vcombine.high %v4551_v44, %v4559_v46 }
 0x481   :  { %10441 = vmatprep.subr.bf16.mxu1 %v14073_v61  ;;  %v14152_v61 = vcombine.low %v3944_v42, %v3952_v43  ;;  %v14169_v1 = vcombine.high %v3960_v55, %v3968_v57  ;;  %v4567_v42 = vld [vmem:[#allocation8 + $0x1b10] sm:$0xff] }
 0x482   :  { %v4575_v43 = vld [vmem:[#allocation8 + $0x1b50] sm:$0xff] }
 0x483   :  { %10362 = vmatpush1.bf16.msra.mxu0 %v14598_v4  ;;  %v3976_v4 = vld [vmem:[#allocation8 + $0x898] sm:$0xff] }
 0x484   :  { %10442 = vmatpush1.bf16.msra.mxu1 %v14072_v9  ;;  %10363 = vmatprep.subr.bf16.mxu0 %v14615_v6  ;;  %v3984_v9 = vld [vmem:[#allocation8 + $0x8d8] sm:$0xff]  ;;  %v14694_v6 = vcombine.low %v4487_v52, %v4495_v53  ;;  %v14775_v52 = vcombine.high %v4567_v42, %v4575_v43 }
 0x485   :  { %10443 = vmatprep.subr.bf16.mxu1 %v14089_v7  ;;  %v14168_v7 = vcombine.low %v3960_v55, %v3968_v57  ;;  %v14185_v11 = vcombine.high %v3976_v4, %v3984_v9  ;;  %v4583_v57 = vld [vmem:[#allocation8 + $0x1b90] sm:$0xff] }
 0x487   :  { %10364 = vmatpush1.bf16.msra.mxu0 %v14614_v31  ;;  %v3992_v31 = vld [vmem:[#allocation8 + $0x918] sm:$0xff] }
 0x488   :  { %10444 = vmatpush1.bf16.msra.mxu1 %v14088_v16  ;;  %10365 = vmatprep.subr.bf16.mxu0 %v14631_v18  ;;  %v4000_v16 = vld [vmem:[#allocation8 + $0x958] sm:$0xff]  ;;  %v14710_v18 = vcombine.low %v4503_v2, %v4511_v3  ;;  %v14774_v3 = vcombine.low %v4567_v42, %v4575_v43 }
 0x489   :  { %10445 = vmatprep.subr.bf16.mxu1 %v14105_v20  ;;  %v14184_v20 = vcombine.low %v3976_v4, %v3984_v9  ;;  %v14201_v0 = vcombine.high %v3992_v31, %v4000_v16  ;;  %v4120_v42 = vld [vmem:[#allocation8 + $0xd18] sm:$0xff] }
 0x48a   :  { %v4128_v43 = vld [vmem:[#allocation8 + $0xd58] sm:$0xff] }
 0x48b   :  { %10366 = vmatpush1.bf16.msra.mxu0 %v14630_v27  ;;  %v4008_v27 = vld [vmem:[#allocation8 + $0x998] sm:$0xff] }
 0x48c   :  { %10446 = vmatpush1.bf16.msra.mxu1 %v14104_v28  ;;  %10367 = vmatprep.subr.bf16.mxu0 %v14647_v29  ;;  %v4016_v28 = vld [vmem:[#allocation8 + $0x9d8] sm:$0xff]  ;;  %v14726_v29 = vcombine.low %v4519_v5, %v4527_v12 }
 0x48d   :  { %10447 = vmatprep.subr.bf16.mxu1 %v14121_v24  ;;  %v14200_v24 = vcombine.low %v3992_v31, %v4000_v16  ;;  %v14217_v33 = vcombine.high %v4008_v27, %v4016_v28  ;;  %v4072_v5 = vld [vmem:[#allocation8 + $0xb98] sm:$0xff] }
 0x48e   :  { %v4080_v12 = vld [vmem:[#allocation8 + $0xbd8] sm:$0xff] }
 0x48f   :  { %10368 = vmatpush1.bf16.msra.mxu0 %v14646_v56  ;;  %v4024_v56 = vld [vmem:[#allocation8 + $0xa18] sm:$0xff] }
 0x490   :  { %10448 = vmatpush1.bf16.msra.mxu1 %v14120_v34  ;;  %10369 = vmatprep.subr.bf16.mxu0 %v14663_v50  ;;  %v4032_v34 = vld [vmem:[#allocation8 + $0xa58] sm:$0xff]  ;;  %v14742_v50 = vcombine.low %v4535_v23, %v4543_v26 }
 0x491   :  { %10449 = vmatprep.subr.bf16.mxu1 %v14137_v37  ;;  %v14216_v37 = vcombine.low %v4008_v27, %v4016_v28  ;;  %v14233_v41 = vcombine.high %v4024_v56, %v4032_v34  ;;  %v4088_v23 = vld [vmem:[#allocation8 + $0xc18] sm:$0xff]  ;;  %v14280_v28 = vcombine.low %v4072_v5, %v4080_v12 }
 0x492   :  { %v4096_v26 = vld [vmem:[#allocation8 + $0xc58] sm:$0xff] }
 0x493   :  { %10370 = vmatpush1.bf16.msra.mxu0 %v14662_v19  ;;  %v4040_v19 = vld [vmem:[#allocation8 + $0xa98] sm:$0xff] }
 0x494   :  { %10450 = vmatpush1.bf16.msra.mxu1 %v14136_v36  ;;  %10380 = vmatprep.subr.bf16.mxu0 %v14679_v63  ;;  %v4048_v36 = vld [vmem:[#allocation8 + $0xad8] sm:$0xff]  ;;  %v14758_v63 = vcombine.low %v4551_v44, %v4559_v46 }
 0x495   :  { %10451 = vmatprep.subr.bf16.mxu1 %v14153_v49  ;;  %v14232_v49 = vcombine.low %v4024_v56, %v4032_v34  ;;  %v14249_v55 = vcombine.high %v4040_v19, %v4048_v36  ;;  %v14248_v9 = vcombine.low %v4040_v19, %v4048_v36  ;;  %v4104_v44 = vld [vmem:[#allocation8 + $0xc98] sm:$0xff]  ;;  %v14296_v34 = vcombine.low %v4088_v23, %v4096_v26 }
 0x496   :  { %10372 = vmatmul.mubr.bf16.vlgmr.msra.gmra.mrb[12].mxu0 %v17212_v39  ;;  %v4112_v46 = vld [vmem:[#allocation8 + $0xcd8] sm:$0xff] }
 0x497   :  { %10381 = vmatpush1.bf16.msra.mxu0 %v14678_v58  ;;  %10412 = vmatprep.mubr.bf16.mxu0 %v17234_v59  ;;  %v4591_v58 = vld [vmem:[#allocation8 + $0x1bd0] sm:$0xff]  ;;  %v14312_v36 = vcombine.low %v4104_v44, %v4112_v46 }
 0x498   :  { %10452 = vmatpush1.bf16.msra.mxu1 %v14152_v61  ;;  %10382 = vmatprep.subr.bf16.mxu0 %v14695_v13  ;;  %v4056_v13 = vld [vmem:[#allocation8 + $0xb18] sm:$0xff]  ;;  %v14790_v31 = vcombine.low %v4583_v57, %v4591_v58 }
 0x499   :  { %10462 = vmatprep.subr.bf16.mxu1 %v14169_v1  ;;  %v4064_v1 = vld [vmem:[#allocation8 + $0xb58] sm:$0xff] }
 0x49a   :  { %v14264_v16 = vcombine.low %v4056_v13, %v4064_v1 }
 0x49b   :  { %10383 = vmatpush1.bf16.msra.mxu0 %v14694_v6  ;;  %10454 = vmatmul.mubr.bf16.vlgmr.msra.gmra.mrb[28].mxu1 %v17138_v15  ;;  %v14791_v6 = vcombine.high %v4583_v57, %v4591_v58  ;;  %v4136_v57 = vld [vmem:[#allocation8 + $0xd98] sm:$0xff] }
 0x49c   :  { %10463 = vmatpush1.bf16.msra.mxu1 %v14168_v7  ;;  %10494 = vmatprep.mubr.bf16.mxu1 %v17176_v45  ;;  %v14265_v7 = vcombine.high %v4056_v13, %v4064_v1  ;;  %v4144_v58 = vld [vmem:[#allocation8 + $0xdd8] sm:$0xff]  ;;  %v14328_v1 = vcombine.low %v4120_v42, %v4128_v43 }
 0x49d   :  { %10384 = vmatprep.subr.bf16.mxu0 %v14711_v8  ;;  %10464 = vmatprep.subr.bf16.mxu1 %v14185_v11  ;;  %v4599_v8 = vld [vmem:[#allocation8 + $0x1c10] sm:$0xff] }
 0x49e   :  { %v4607_v11 = vld [vmem:[#allocation8 + $0x1c50] sm:$0xff] }
 0x49f   :  { %10385 = vmatpush1.bf16.msra.mxu0 %v14710_v18  ;;  %v14807_v18 = vcombine.high %v4599_v8, %v4607_v11  ;;  %v14806_v27 = vcombine.low %v4599_v8, %v4607_v11  ;;  %v14344_v11 = vcombine.low %v4136_v57, %v4144_v58 }
 0x4a0   :  { %10465 = vmatpush1.bf16.msra.mxu1 %v14184_v20  ;;  %10386 = vmatprep.subr.bf16.mxu0 %v14727_v62  ;;  %v14281_v20 = vcombine.high %v4072_v5, %v4080_v12  ;;  %v4615_v62 = vld [vmem:[#allocation8 + $0x1c90] sm:$0xff] }
 0x4a1   :  { %10466 = vmatprep.subr.bf16.mxu1 %v14201_v0  ;;  %v4623_v0 = vld [vmem:[#allocation8 + $0x1cd0] sm:$0xff] }
 0x4a2   :  { %v14822_v56 = vcombine.low %v4615_v62, %v4623_v0 }
 0x4a3   :  { %10387 = vmatpush1.bf16.msra.mxu0 %v14726_v29  ;;  %v14823_v29 = vcombine.high %v4615_v62, %v4623_v0 }
 0x4a4   :  { %10467 = vmatpush1.bf16.msra.mxu1 %v14200_v24  ;;  %10388 = vmatprep.subr.bf16.mxu0 %v14743_v32  ;;  %v14297_v24 = vcombine.high %v4088_v23, %v4096_v26  ;;  %v4631_v32 = vld [vmem:[#allocation8 + $0x1d10] sm:$0xff] }
 0x4a5   :  { %10468 = vmatprep.subr.bf16.mxu1 %v14217_v33  ;;  %v4639_v33 = vld [vmem:[#allocation8 + $0x1d50] sm:$0xff] }
 0x4a6   :  { %v14838_v19 = vcombine.low %v4631_v32, %v4639_v33 }
 0x4a7   :  { %10389 = vmatpush1.bf16.msra.mxu0 %v14742_v50  ;;  %v14839_v50 = vcombine.high %v4631_v32, %v4639_v33 }
 0x4a8   :  { %10469 = vmatpush1.bf16.msra.mxu1 %v14216_v37  ;;  %10390 = vmatprep.subr.bf16.mxu0 %v14759_v40  ;;  %v14313_v37 = vcombine.high %v4104_v44, %v4112_v46  ;;  %v4647_v40 = vld [vmem:[#allocation8 + $0x1d90] sm:$0xff] }
 0x4a9   :  { %v17267_v53 = vpop.f32.mrb[8].mxu0  ;;  %10470 = vmatprep.subr.bf16.mxu1 %v14233_v41  ;;  %v4655_v41 = vld [vmem:[#allocation8 + $0x1dd0] sm:$0xff] }
 0x4aa   :  { %v17269_v61 = vpop.f32.mrb[9].mxu0  ;;  %v14854_v13 = vcombine.low %v4647_v40, %v4655_v41 }
 0x4ab   :  { %10391 = vmatpush1.bf16.msra.mxu0 %v14758_v63  ;;  %v10090_v2 = vpop.f32.mrb[10].mxu0  ;;  %v14855_v63 = vcombine.high %v4647_v40, %v4655_v41 }
 0x4ac   :  { %10471 = vmatpush1.bf16.msra.mxu1 %v14232_v49  ;;  %v10091_v4 = vpop.f32.mrb[11].mxu0  ;;  %10392 = vmatprep.subr.bf16.mxu0 %v14775_v52  ;;  %v14329_v49 = vcombine.high %v4120_v42, %v4128_v43  ;;  %v4663_v52 = vld [vmem:[#allocation8 + $0x1e10] sm:$0xff] }
 0x4ad   :  { %10472 = vmatprep.subr.bf16.mxu1 %v14249_v55  ;;  %v4671_v55 = vld [vmem:[#allocation8 + $0x1e50] sm:$0xff] }
 0x4ae   :  { %v14871_v2 = vcombine.high %v4663_v52, %v4671_v55  ;;  %v4679_v4 = vld [vmem:[#allocation8 + $0x1e90] sm:$0xff]  ;;  %v14870_v8 = vcombine.low %v4663_v52, %v4671_v55 }
 0x4af   :  { %10393 = vmatpush1.bf16.msra.mxu0 %v14774_v3  ;;  %v14345_v3 = vcombine.high %v4136_v57, %v4144_v58 }
 0x4b0   :  { %10473 = vmatpush1.bf16.msra.mxu1 %v14248_v9  ;;  %10394 = vmatprep.subr.bf16.mxu0 %v14791_v6  ;;  %v4687_v9 = vld [vmem:[#allocation8 + $0x1ed0] sm:$0xff]  ;;  %v4152_v6 = vld [vmem:[#allocation8 + $0xe18] sm:$0xff] }
 0x4b1   :  { %10474 = vmatprep.subr.bf16.mxu1 %v14265_v7  ;;  %v4160_v7 = vld [vmem:[#allocation8 + $0xe58] sm:$0xff]  ;;  %v14887_v5 = vcombine.high %v4679_v4, %v4687_v9  ;;  %v14886_v62 = vcombine.low %v4679_v4, %v4687_v9 }
 0x4b2   :  { %v14361_v12 = vcombine.high %v4152_v6, %v4160_v7  ;;  %v14360_v0 = vcombine.low %v4152_v6, %v4160_v7 }
 0x4b3   :  { %10395 = vmatpush1.bf16.msra.mxu0 %v14790_v31  ;;  %v4695_v31 = vld [vmem:[#allocation8 + $0x1f10] sm:$0xff] }
 0x4b4   :  { %10475 = vmatpush1.bf16.msra.mxu1 %v14264_v16  ;;  %10396 = vmatprep.subr.bf16.mxu0 %v14807_v18  ;;  %v4703_v16 = vld [vmem:[#allocation8 + $0x1f50] sm:$0xff]  ;;  %v4168_v18 = vld [vmem:[#allocation8 + $0xe98] sm:$0xff] }
 0x4b5   :  { %10476 = vmatprep.subr.bf16.mxu1 %v14281_v20  ;;  %v4176_v20 = vld [vmem:[#allocation8 + $0xed8] sm:$0xff]  ;;  %v14903_v23 = vcombine.high %v4695_v31, %v4703_v16  ;;  %v14902_v32 = vcombine.low %v4695_v31, %v4703_v16 }
 0x4b6   :  { %v14377_v26 = vcombine.high %v4168_v18, %v4176_v20  ;;  %v14376_v33 = vcombine.low %v4168_v18, %v4176_v20 }
 0x4b7   :  { %10397 = vmatpush1.bf16.msra.mxu0 %v14806_v27  ;;  %v4711_v27 = vld [vmem:[#allocation8 + $0x1f90] sm:$0xff] }
 0x4b8   :  { %10477 = vmatpush1.bf16.msra.mxu1 %v14280_v28  ;;  %10398 = vmatprep.subr.bf16.mxu0 %v14823_v29  ;;  %v4719_v28 = vld [vmem:[#allocation8 + $0x1fd0] sm:$0xff]  ;;  %v4184_v29 = vld [vmem:[#allocation8 + $0xf18] sm:$0xff] }
 0x4b9   :  { %10478 = vmatprep.subr.bf16.mxu1 %v14297_v24  ;;  %v4192_v24 = vld [vmem:[#allocation8 + $0xf58] sm:$0xff]  ;;  %v14919_v44 = vcombine.high %v4711_v27, %v4719_v28  ;;  %v14918_v40 = vcombine.low %v4711_v27, %v4719_v28 }
 0x4ba   :  { %v14393_v46 = vcombine.high %v4184_v29, %v4192_v24  ;;  %v14392_v41 = vcombine.low %v4184_v29, %v4192_v24 }
 0x4bb   :  { %10399 = vmatpush1.bf16.msra.mxu0 %v14822_v56  ;;  %v3705_v56 = vld [vmem:[#allocation8 + $0x20] sm:$0xff] }
 0x4bc   :  { %10479 = vmatpush1.bf16.msra.mxu1 %v14296_v34  ;;  %10400 = vmatprep.subr.bf16.mxu0 %v14839_v50  ;;  %v3713_v34 = vld [vmem:[#allocation8 + $0x60] sm:$0xff]  ;;  %v4200_v50 = vld [vmem:[#allocation8 + $0xf98] sm:$0xff] }
 0x4bd   :  { %10480 = vmatprep.subr.bf16.mxu1 %v14313_v37  ;;  %v4208_v37 = vld [vmem:[#allocation8 + $0xfd8] sm:$0xff]  ;;  %v13915_v42 = vcombine.high %v3705_v56, %v3713_v34  ;;  %v13914_v52 = vcombine.low %v3705_v56, %v3713_v34 }
 0x4be   :  { %v14409_v43 = vcombine.high %v4200_v50, %v4208_v37  ;;  %v14408_v55 = vcombine.low %v4200_v50, %v4208_v37 }
 0x4bf   :  { %10401 = vmatpush1.bf16.msra.mxu0 %v14838_v19  ;;  %v3721_v19 = vld [vmem:[#allocation8 + $0xa0] sm:$0xff] }
 0x4c0   :  { %10481 = vmatpush1.bf16.msra.mxu1 %v14312_v36  ;;  %10402 = vmatprep.subr.bf16.mxu0 %v14855_v63  ;;  %v3729_v36 = vld [vmem:[#allocation8 + $0xe0] sm:$0xff]  ;;  %v4216_v63 = vld [vmem:[#allocation8 + $0x1018] sm:$0xff] }
 0x4c1   :  { %10482 = vmatprep.subr.bf16.mxu1 %v14329_v49  ;;  %v4224_v49 = vld [vmem:[#allocation8 + $0x1058] sm:$0xff]  ;;  %v13931_v57 = vcombine.high %v3721_v19, %v3729_v36  ;;  %v13930_v4 = vcombine.low %v3721_v19, %v3729_v36 }
 0x4c2   :  { %v14425_v58 = vcombine.high %v4216_v63, %v4224_v49  ;;  %v14424_v9 = vcombine.low %v4216_v63, %v4224_v49 }
 0x4c3   :  { %10403 = vmatpush1.bf16.msra.mxu0 %v14854_v13  ;;  %v3737_v13 = vld [vmem:[#allocation8 + $0x120] sm:$0xff] }
 0x4c4   :  { %10483 = vmatpush1.bf16.msra.mxu1 %v14328_v1  ;;  %10404 = vmatprep.subr.bf16.mxu0 %v14871_v2  ;;  %v3745_v1 = vld [vmem:[#allocation8 + $0x160] sm:$0xff]  ;;  %v4232_v2 = vld [vmem:[#allocation8 + $0x1098] sm:$0xff] }
 0x4c5   :  { %10484 = vmatprep.subr.bf16.mxu1 %v14345_v3  ;;  %v4240_v3 = vld [vmem:[#allocation8 + $0x10d8] sm:$0xff]  ;;  %v13947_v6 = vcombine.high %v3737_v13, %v3745_v1  ;;  %v13946_v31 = vcombine.low %v3737_v13, %v3745_v1 }
 0x4c6   :  { %v14441_v7 = vcombine.high %v4232_v2, %v4240_v3  ;;  %v14440_v16 = vcombine.low %v4232_v2, %v4240_v3 }
 0x4c7   :  { %10405 = vmatpush1.bf16.msra.mxu0 %v14870_v8  ;;  %v3753_v8 = vld [vmem:[#allocation8 + $0x1a0] sm:$0xff] }
 0x4c8   :  { %10485 = vmatpush1.bf16.msra.mxu1 %v14344_v11  ;;  %10406 = vmatprep.subr.bf16.mxu0 %v14887_v5  ;;  %v3761_v11 = vld [vmem:[#allocation8 + $0x1e0] sm:$0xff]  ;;  %v4248_v5 = vld [vmem:[#allocation8 + $0x1118] sm:$0xff] }
 0x4c9   :  { %10486 = vmatprep.subr.bf16.mxu1 %v14361_v12  ;;  %v4256_v12 = vld [vmem:[#allocation8 + $0x1158] sm:$0xff]  ;;  %v13963_v18 = vcombine.high %v3753_v8, %v3761_v11  ;;  %v13962_v27 = vcombine.low %v3753_v8, %v3761_v11 }
 0x4ca   :  { %v14457_v20 = vcombine.high %v4248_v5, %v4256_v12  ;;  %v14456_v28 = vcombine.low %v4248_v5, %v4256_v12 }
 0x4cb   :  { %10407 = vmatpush1.bf16.msra.mxu0 %v14886_v62  ;;  %v3769_v62 = vld [vmem:[#allocation8 + $0x220] sm:$0xff] }
 0x4cc   :  { %10487 = vmatpush1.bf16.msra.mxu1 %v14360_v0  ;;  %10408 = vmatprep.subr.bf16.mxu0 %v14903_v23  ;;  %v3777_v0 = vld [vmem:[#allocation8 + $0x260] sm:$0xff]  ;;  %v4264_v23 = vld [vmem:[#allocation8 + $0x1198] sm:$0xff] }
 0x4cd   :  { %10488 = vmatprep.subr.bf16.mxu1 %v14377_v26  ;;  %v4272_v26 = vld [vmem:[#allocation8 + $0x11d8] sm:$0xff]  ;;  %v13979_v29 = vcombine.high %v3769_v62, %v3777_v0  ;;  %v13978_v56 = vcombine.low %v3769_v62, %v3777_v0 }
 0x4ce   :  { %v14473_v24 = vcombine.high %v4264_v23, %v4272_v26  ;;  %v14472_v34 = vcombine.low %v4264_v23, %v4272_v26 }
 0x4cf   :  { %10409 = vmatpush1.bf16.msra.mxu0 %v14902_v32  ;;  %v3785_v32 = vld [vmem:[#allocation8 + $0x2a0] sm:$0xff] }
 0x4d0   :  { %10489 = vmatpush1.bf16.msra.mxu1 %v14376_v33  ;;  %10410 = vmatprep.subr.bf16.mxu0 %v14919_v44  ;;  %v3793_v33 = vld [vmem:[#allocation8 + $0x2e0] sm:$0xff]  ;;  %v4280_v44 = vld [vmem:[#allocation8 + $0x1218] sm:$0xff] }
 0x4d1   :  { %10490 = vmatprep.subr.bf16.mxu1 %v14393_v46  ;;  %v4288_v46 = vld [vmem:[#allocation8 + $0x1258] sm:$0xff]  ;;  %v13995_v50 = vcombine.high %v3785_v32, %v3793_v33  ;;  %v13994_v19 = vcombine.low %v3785_v32, %v3793_v33 }
 0x4d2   :  { %v14489_v37 = vcombine.high %v4280_v44, %v4288_v46  ;;  %v14488_v36 = vcombine.low %v4280_v44, %v4288_v46 }
 0x4d3   :  { %10411 = vmatpush1.bf16.msra.mxu0 %v14918_v40  ;;  %v3801_v40 = vld [vmem:[#allocation8 + $0x320] sm:$0xff] }
 0x4d4   :  { %10491 = vmatpush1.bf16.msra.mxu1 %v14392_v41  ;;  %10585 = vmatprep.subr.bf16.mxu0 %v13915_v42  ;;  %v3809_v41 = vld [vmem:[#allocation8 + $0x360] sm:$0xff]  ;;  %v4296_v42 = vld [vmem:[#allocation8 + $0x1298] sm:$0xff] }
 0x4d5   :  { %10492 = vmatprep.subr.bf16.mxu1 %v14409_v43  ;;  %v4304_v43 = vld [vmem:[#allocation8 + $0x12d8] sm:$0xff]  ;;  %v14011_v63 = vcombine.high %v3801_v40, %v3809_v41  ;;  %v14010_v13 = vcombine.low %v3801_v40, %v3809_v41 }
 0x4d6   :  { %10413 = vmatmul.mubr.bf16.vlgmr.msra.gmra.mrb[12].mxu0 %v17236_v14  ;;  %v14505_v49 = vcombine.high %v4296_v42, %v4304_v43  ;;  %v14504_v1 = vcombine.low %v4296_v42, %v4304_v43 }
 0x4d7   :  { %10586 = vmatpush1.bf16.msra.mxu0 %v13914_v52  ;;  %10617 = vmatprep.mubr.bf16.mxu0 %v17136_v10  ;;  %v3817_v52 = vld [vmem:[#allocation8 + $0x3a0] sm:$0xff] }
 0x4d8   :  { %10493 = vmatpush1.bf16.msra.mxu1 %v14408_v55  ;;  %10587 = vmatprep.subr.bf16.mxu0 %v13931_v57  ;;  %v3825_v55 = vld [vmem:[#allocation8 + $0x3e0] sm:$0xff]  ;;  %v4312_v57 = vld [vmem:[#allocation8 + $0x1318] sm:$0xff] }
 0x4d9   :  { %10503 = vmatprep.subr.bf16.mxu1 %v14425_v58  ;;  %v4320_v58 = vld [vmem:[#allocation8 + $0x1358] sm:$0xff]  ;;  %v14027_v2 = vcombine.high %v3817_v52, %v3825_v55  ;;  %v14026_v8 = vcombine.low %v3817_v52, %v3825_v55 }
 0x4da   :  { %v14521_v3 = vcombine.high %v4312_v57, %v4320_v58  ;;  %v14520_v11 = vcombine.low %v4312_v57, %v4320_v58 }
 0x4db   :  { %10495 = vmatmul.mubr.bf16.vlgmr.msra.gmra.mrb[28].mxu1 %v17178_v47  ;;  %10588 = vmatpush1.bf16.msra.mxu0 %v13930_v4  ;;  %v3833_v4 = vld [vmem:[#allocation8 + $0x420] sm:$0xff] }
 0x4dc   :  { %10504 = vmatpush1.bf16.msra.mxu1 %v14424_v9  ;;  %10535 = vmatprep.mubr.bf16.mxu1 %v17181_v54  ;;  %v3841_v9 = vld [vmem:[#allocation8 + $0x460] sm:$0xff] }
 0x4dd   :  { %10589 = vmatprep.subr.bf16.mxu0 %v13947_v6  ;;  %10505 = vmatprep.subr.bf16.mxu1 %v14441_v7  ;;  %v4328_v6 = vld [vmem:[#allocation8 + $0x1398] sm:$0xff]  ;;  %v14043_v5 = vcombine.high %v3833_v4, %v3841_v9  ;;  %v14042_v62 = vcombine.low %v3833_v4, %v3841_v9 }
 0x4de   :  { %v4336_v7 = vld [vmem:[#allocation8 + $0x13d8] sm:$0xff] }
 0x4df   :  { %10590 = vmatpush1.bf16.msra.mxu0 %v13946_v31  ;;  %v14537_v12 = vcombine.high %v4328_v6, %v4336_v7  ;;  %v3849_v31 = vld [vmem:[#allocation8 + $0x4a0] sm:$0xff]  ;;  %v14536_v0 = vcombine.low %v4328_v6, %v4336_v7 }
 0x4e0   :  { %10506 = vmatpush1.bf16.msra.mxu1 %v14440_v16  ;;  %10591 = vmatprep.subr.bf16.mxu0 %v13963_v18  ;;  %v3857_v16 = vld [vmem:[#allocation8 + $0x4e0] sm:$0xff]  ;;  %v4344_v18 = vld [vmem:[#allocation8 + $0x1418] sm:$0xff] }
 0x4e1   :  { %10507 = vmatprep.subr.bf16.mxu1 %v14457_v20  ;;  %v4352_v20 = vld [vmem:[#allocation8 + $0x1458] sm:$0xff]  ;;  %v14059_v23 = vcombine.high %v3849_v31, %v3857_v16  ;;  %v14058_v32 = vcombine.low %v3849_v31, %v3857_v16 }
 0x4e2   :  { %v14553_v26 = vcombine.high %v4344_v18, %v4352_v20  ;;  %v14552_v33 = vcombine.low %v4344_v18, %v4352_v20 }
 0x4e3   :  { %10592 = vmatpush1.bf16.msra.mxu0 %v13962_v27  ;;  %v3865_v27 = vld [vmem:[#allocation8 + $0x520] sm:$0xff] }
 0x4e4   :  { %10508 = vmatpush1.bf16.msra.mxu1 %v14456_v28  ;;  %10593 = vmatprep.subr.bf16.mxu0 %v13979_v29  ;;  %v3873_v28 = vld [vmem:[#allocation8 + $0x560] sm:$0xff]  ;;  %v4360_v29 = vld [vmem:[#allocation8 + $0x1498] sm:$0xff] }
 0x4e5   :  { %10509 = vmatprep.subr.bf16.mxu1 %v14473_v24  ;;  %v4368_v24 = vld [vmem:[#allocation8 + $0x14d8] sm:$0xff]  ;;  %v14075_v44 = vcombine.high %v3865_v27, %v3873_v28  ;;  %v14074_v40 = vcombine.low %v3865_v27, %v3873_v28 }
 0x4e6   :  { %v14569_v46 = vcombine.high %v4360_v29, %v4368_v24  ;;  %v14568_v41 = vcombine.low %v4360_v29, %v4368_v24 }
 0x4e7   :  { %10594 = vmatpush1.bf16.msra.mxu0 %v13978_v56  ;;  %v3881_v56 = vld [vmem:[#allocation8 + $0x5a0] sm:$0xff] }
 0x4e8   :  { %10510 = vmatpush1.bf16.msra.mxu1 %v14472_v34  ;;  %10595 = vmatprep.subr.bf16.mxu0 %v13995_v50  ;;  %v3889_v34 = vld [vmem:[#allocation8 + $0x5e0] sm:$0xff]  ;;  %v4376_v50 = vld [vmem:[#allocation8 + $0x1518] sm:$0xff] }
 0x4e9   :  { %10511 = vmatprep.subr.bf16.mxu1 %v14489_v37  ;;  %v4384_v37 = vld [vmem:[#allocation8 + $0x1558] sm:$0xff]  ;;  %v14091_v42 = vcombine.high %v3881_v56, %v3889_v34  ;;  %v14090_v52 = vcombine.low %v3881_v56, %v3889_v34 }
 0x4ea   :  { %v14585_v43 = vcombine.high %v4376_v50, %v4384_v37  ;;  %v14584_v55 = vcombine.low %v4376_v50, %v4384_v37 }
 0x4eb   :  { %10596 = vmatpush1.bf16.msra.mxu0 %v13994_v19  ;;  %v3897_v19 = vld [vmem:[#allocation8 + $0x620] sm:$0xff] }
 0x4ec   :  { %10512 = vmatpush1.bf16.msra.mxu1 %v14488_v36  ;;  %10597 = vmatprep.subr.bf16.mxu0 %v14011_v63  ;;  %v3905_v36 = vld [vmem:[#allocation8 + $0x660] sm:$0xff]  ;;  %v4392_v63 = vld [vmem:[#allocation8 + $0x1598] sm:$0xff] }
 0x4ed   :  { %10513 = vmatprep.subr.bf16.mxu1 %v14505_v49  ;;  %v4400_v49 = vld [vmem:[#allocation8 + $0x15d8] sm:$0xff]  ;;  %v14107_v57 = vcombine.high %v3897_v19, %v3905_v36  ;;  %v14106_v4 = vcombine.low %v3897_v19, %v3905_v36 }
 0x4ee   :  { %v14601_v58 = vcombine.high %v4392_v63, %v4400_v49  ;;  %v14600_v9 = vcombine.low %v4392_v63, %v4400_v49 }
 0x4ef   :  { %10598 = vmatpush1.bf16.msra.mxu0 %v14010_v13  ;;  %v3913_v13 = vld [vmem:[#allocation8 + $0x6a0] sm:$0xff] }
 0x4f0   :  { %10514 = vmatpush1.bf16.msra.mxu1 %v14504_v1  ;;  %10599 = vmatprep.subr.bf16.mxu0 %v14027_v2  ;;  %v3921_v1 = vld [vmem:[#allocation8 + $0x6e0] sm:$0xff]  ;;  %v4408_v2 = vld [vmem:[#allocation8 + $0x1618] sm:$0xff] }
 0x4f1   :  { %10515 = vmatprep.subr.bf16.mxu1 %v14521_v3  ;;  %v4416_v3 = vld [vmem:[#allocation8 + $0x1658] sm:$0xff]  ;;  %v14123_v6 = vcombine.high %v3913_v13, %v3921_v1  ;;  %v14122_v31 = vcombine.low %v3913_v13, %v3921_v1 }
 0x4f2   :  { %v14617_v7 = vcombine.high %v4408_v2, %v4416_v3  ;;  %v14616_v16 = vcombine.low %v4408_v2, %v4416_v3 }
 0x4f3   :  { %10600 = vmatpush1.bf16.msra.mxu0 %v14026_v8  ;;  %v3929_v8 = vld [vmem:[#allocation8 + $0x720] sm:$0xff] }
 0x4f4   :  { %10516 = vmatpush1.bf16.msra.mxu1 %v14520_v11  ;;  %10601 = vmatprep.subr.bf16.mxu0 %v14043_v5  ;;  %v3937_v11 = vld [vmem:[#allocation8 + $0x760] sm:$0xff]  ;;  %v4424_v5 = vld [vmem:[#allocation8 + $0x1698] sm:$0xff] }
 0x4f5   :  { %10517 = vmatprep.subr.bf16.mxu1 %v14537_v12  ;;  %v4432_v12 = vld [vmem:[#allocation8 + $0x16d8] sm:$0xff]  ;;  %v14139_v18 = vcombine.high %v3929_v8, %v3937_v11  ;;  %v14138_v27 = vcombine.low %v3929_v8, %v3937_v11 }
 0x4f6   :  { %v14633_v20 = vcombine.high %v4424_v5, %v4432_v12  ;;  %v14632_v28 = vcombine.low %v4424_v5, %v4432_v12 }
 0x4f7   :  { %10602 = vmatpush1.bf16.msra.mxu0 %v14042_v62  ;;  %v3945_v62 = vld [vmem:[#allocation8 + $0x7a0] sm:$0xff] }
 0x4f8   :  { %10518 = vmatpush1.bf16.msra.mxu1 %v14536_v0  ;;  %10603 = vmatprep.subr.bf16.mxu0 %v14059_v23  ;;  %v3953_v0 = vld [vmem:[#allocation8 + $0x7e0] sm:$0xff]  ;;  %v4440_v23 = vld [vmem:[#allocation8 + $0x1718] sm:$0xff] }
 0x4f9   :  { %10519 = vmatprep.subr.bf16.mxu1 %v14553_v26  ;;  %v4448_v26 = vld [vmem:[#allocation8 + $0x1758] sm:$0xff]  ;;  %v14155_v29 = vcombine.high %v3945_v62, %v3953_v0  ;;  %v14154_v56 = vcombine.low %v3945_v62, %v3953_v0 }
 0x4fa   :  { %v14649_v24 = vcombine.high %v4440_v23, %v4448_v26  ;;  %v14648_v34 = vcombine.low %v4440_v23, %v4448_v26 }
 0x4fb   :  { %10604 = vmatpush1.bf16.msra.mxu0 %v14058_v32  ;;  %v3961_v32 = vld [vmem:[#allocation8 + $0x820] sm:$0xff] }
 0x4fc   :  { %10520 = vmatpush1.bf16.msra.mxu1 %v14552_v33  ;;  %10605 = vmatprep.subr.bf16.mxu0 %v14075_v44  ;;  %v3969_v33 = vld [vmem:[#allocation8 + $0x860] sm:$0xff]  ;;  %v4456_v44 = vld [vmem:[#allocation8 + $0x1798] sm:$0xff] }
 0x4fd   :  { %10521 = vmatprep.subr.bf16.mxu1 %v14569_v46  ;;  %v4464_v46 = vld [vmem:[#allocation8 + $0x17d8] sm:$0xff]  ;;  %v14171_v50 = vcombine.high %v3961_v32, %v3969_v33  ;;  %v14170_v19 = vcombine.low %v3961_v32, %v3969_v33 }
 0x4fe   :  { %v14665_v37 = vcombine.high %v4456_v44, %v4464_v46  ;;  %v14664_v36 = vcombine.low %v4456_v44, %v4464_v46 }
 0x4ff   :  { %10606 = vmatpush1.bf16.msra.mxu0 %v14074_v40  ;;  %v3977_v40 = vld [vmem:[#allocation8 + $0x8a0] sm:$0xff] }
 0x500   :  { %10522 = vmatpush1.bf16.msra.mxu1 %v14568_v41  ;;  %10607 = vmatprep.subr.bf16.mxu0 %v14091_v42  ;;  %v3985_v41 = vld [vmem:[#allocation8 + $0x8e0] sm:$0xff]  ;;  %v4472_v42 = vld [vmem:[#allocation8 + $0x1818] sm:$0xff] }
 0x501   :  { %10523 = vmatprep.subr.bf16.mxu1 %v14585_v43  ;;  %v4480_v43 = vld [vmem:[#allocation8 + $0x1858] sm:$0xff]  ;;  %v14187_v63 = vcombine.high %v3977_v40, %v3985_v41  ;;  %v14186_v13 = vcombine.low %v3977_v40, %v3985_v41 }
 0x502   :  { %v14681_v49 = vcombine.high %v4472_v42, %v4480_v43  ;;  %v14680_v1 = vcombine.low %v4472_v42, %v4480_v43 }
 0x503   :  { %10608 = vmatpush1.bf16.msra.mxu0 %v14090_v52  ;;  %v3993_v52 = vld [vmem:[#allocation8 + $0x920] sm:$0xff] }
 0x504   :  { %10524 = vmatpush1.bf16.msra.mxu1 %v14584_v55  ;;  %10609 = vmatprep.subr.bf16.mxu0 %v14107_v57  ;;  %v4001_v55 = vld [vmem:[#allocation8 + $0x960] sm:$0xff]  ;;  %v4488_v57 = vld [vmem:[#allocation8 + $0x1898] sm:$0xff] }
 0x505   :  { %10525 = vmatprep.subr.bf16.mxu1 %v14601_v58  ;;  %v4496_v58 = vld [vmem:[#allocation8 + $0x18d8] sm:$0xff]  ;;  %v14203_v2 = vcombine.high %v3993_v52, %v4001_v55  ;;  %v14202_v8 = vcombine.low %v3993_v52, %v4001_v55 }
 0x506   :  { %v14697_v3 = vcombine.high %v4488_v57, %v4496_v58  ;;  %v14696_v11 = vcombine.low %v4488_v57, %v4496_v58 }
 0x507   :  { %10610 = vmatpush1.bf16.msra.mxu0 %v14106_v4  ;;  %v4009_v4 = vld [vmem:[#allocation8 + $0x9a0] sm:$0xff] }
 0x508   :  { %10526 = vmatpush1.bf16.msra.mxu1 %v14600_v9  ;;  %10611 = vmatprep.subr.bf16.mxu0 %v14123_v6  ;;  %v4017_v9 = vld [vmem:[#allocation8 + $0x9e0] sm:$0xff]  ;;  %v4504_v6 = vld [vmem:[#allocation8 + $0x1918] sm:$0xff] }
 0x509   :  { %10527 = vmatprep.subr.bf16.mxu1 %v14617_v7  ;;  %v4512_v7 = vld [vmem:[#allocation8 + $0x1958] sm:$0xff]  ;;  %v14219_v5 = vcombine.high %v4009_v4, %v4017_v9  ;;  %v14218_v62 = vcombine.low %v4009_v4, %v4017_v9 }
 0x50a   :  { %v14713_v12 = vcombine.high %v4504_v6, %v4512_v7  ;;  %v14712_v0 = vcombine.low %v4504_v6, %v4512_v7  ;;  %v4592_v4 = vld [vmem:[#allocation8 + $0x1bd8] sm:$0xff] }
 0x50b   :  { %10612 = vmatpush1.bf16.msra.mxu0 %v14122_v31  ;;  %v4025_v31 = vld [vmem:[#allocation8 + $0xa20] sm:$0xff] }
 0x50c   :  { %10528 = vmatpush1.bf16.msra.mxu1 %v14616_v16  ;;  %10613 = vmatprep.subr.bf16.mxu0 %v14139_v18  ;;  %v4033_v16 = vld [vmem:[#allocation8 + $0xa60] sm:$0xff]  ;;  %v4520_v18 = vld [vmem:[#allocation8 + $0x1998] sm:$0xff] }
 0x50d   :  { %10529 = vmatprep.subr.bf16.mxu1 %v14633_v20  ;;  %v4528_v20 = vld [vmem:[#allocation8 + $0x19d8] sm:$0xff]  ;;  %v14235_v23 = vcombine.high %v4025_v31, %v4033_v16  ;;  %v14234_v32 = vcombine.low %v4025_v31, %v4033_v16  ;;  %v4105_v31 = vld [vmem:[#allocation8 + $0xca0] sm:$0xff] }
 0x50e   :  { %v14729_v26 = vcombine.high %v4520_v18, %v4528_v20  ;;  %v14728_v33 = vcombine.low %v4520_v18, %v4528_v20  ;;  %v4113_v16 = vld [vmem:[#allocation8 + $0xce0] sm:$0xff]  ;;  %v4600_v18 = vld [vmem:[#allocation8 + $0x1c18] sm:$0xff] }
 0x50f   :  { %10614 = vmatpush1.bf16.msra.mxu0 %v14138_v27  ;;  %v4041_v27 = vld [vmem:[#allocation8 + $0xaa0] sm:$0xff]  ;;  %v4608_v20 = vld [vmem:[#allocation8 + $0x1c58] sm:$0xff] }
 0x510   :  { %10530 = vmatpush1.bf16.msra.mxu1 %v14632_v28  ;;  %10615 = vmatprep.subr.bf16.mxu0 %v14155_v29  ;;  %v4049_v28 = vld [vmem:[#allocation8 + $0xae0] sm:$0xff]  ;;  %v4536_v29 = vld [vmem:[#allocation8 + $0x1a18] sm:$0xff] }
 0x511   :  { %10531 = vmatprep.subr.bf16.mxu1 %v14649_v24  ;;  %v4544_v24 = vld [vmem:[#allocation8 + $0x1a58] sm:$0xff]  ;;  %v14251_v44 = vcombine.high %v4041_v27, %v4049_v28  ;;  %v14250_v40 = vcombine.low %v4041_v27, %v4049_v28  ;;  %v4121_v27 = vld [vmem:[#allocation8 + $0xd20] sm:$0xff] }
 0x512   :  { %v14745_v46 = vcombine.high %v4536_v29, %v4544_v24  ;;  %v14744_v41 = vcombine.low %v4536_v29, %v4544_v24  ;;  %v4129_v28 = vld [vmem:[#allocation8 + $0xd60] sm:$0xff]  ;;  %v4616_v29 = vld [vmem:[#allocation8 + $0x1c98] sm:$0xff] }
 0x513   :  { %10616 = vmatpush1.bf16.msra.mxu0 %v14154_v56  ;;  %v4057_v56 = vld [vmem:[#allocation8 + $0xb20] sm:$0xff]  ;;  %v4624_v24 = vld [vmem:[#allocation8 + $0x1cd8] sm:$0xff] }
 0x514   :  { %10532 = vmatpush1.bf16.msra.mxu1 %v14648_v34  ;;  %10626 = vmatprep.subr.bf16.mxu0 %v14171_v50  ;;  %v4065_v34 = vld [vmem:[#allocation8 + $0xb60] sm:$0xff]  ;;  %v4552_v50 = vld [vmem:[#allocation8 + $0x1a98] sm:$0xff] }
 0x515   :  { %10533 = vmatprep.subr.bf16.mxu1 %v14665_v37  ;;  %v4560_v37 = vld [vmem:[#allocation8 + $0x1ad8] sm:$0xff]  ;;  %v14267_v42 = vcombine.high %v4057_v56, %v4065_v34  ;;  %v14266_v52 = vcombine.low %v4057_v56, %v4065_v34  ;;  %v4137_v56 = vld [vmem:[#allocation8 + $0xda0] sm:$0xff] }
 0x516   :  { %10618 = vmatmul.mubr.bf16.vlgmr.msra.gmra.mrb[16].mxu0 %v17138_v15  ;;  %v14761_v43 = vcombine.high %v4552_v50, %v4560_v37  ;;  %v14760_v55 = vcombine.low %v4552_v50, %v4560_v37  ;;  %v4145_v34 = vld [vmem:[#allocation8 + $0xde0] sm:$0xff]  ;;  %v4632_v50 = vld [vmem:[#allocation8 + $0x1d18] sm:$0xff] }
 0x517   :  { %10627 = vmatpush1.bf16.msra.mxu0 %v14170_v19  ;;  %10658 = vmatprep.mubr.bf16.mxu0 %v17176_v45  ;;  %v4073_v19 = vld [vmem:[#allocation8 + $0xba0] sm:$0xff]  ;;  %v4640_v37 = vld [vmem:[#allocation8 + $0x1d58] sm:$0xff] }
 0x518   :  { %10534 = vmatpush1.bf16.msra.mxu1 %v14664_v36  ;;  %10628 = vmatprep.subr.bf16.mxu0 %v14187_v63  ;;  %v4081_v36 = vld [vmem:[#allocation8 + $0xbe0] sm:$0xff]  ;;  %v4568_v63 = vld [vmem:[#allocation8 + $0x1b18] sm:$0xff] }
 0x519   :  { %10544 = vmatprep.subr.bf16.mxu1 %v14681_v49  ;;  %v4576_v49 = vld [vmem:[#allocation8 + $0x1b58] sm:$0xff]  ;;  %v14283_v57 = vcombine.high %v4073_v19, %v4081_v36  ;;  %v14282_v6 = vcombine.low %v4073_v19, %v4081_v36  ;;  %v4153_v19 = vld [vmem:[#allocation8 + $0xe20] sm:$0xff] }
 0x51a   :  { %v14777_v58 = vcombine.high %v4568_v63, %v4576_v49  ;;  %v4161_v36 = vld [vmem:[#allocation8 + $0xe60] sm:$0xff] }
 0x51b   :  { %10536 = vmatmul.mubr.bf16.vlgmr.msra.gmra.mrb[28].mxu1 %v17212_v39  ;;  %10629 = vmatpush1.bf16.msra.mxu0 %v14186_v13  ;;  %v4089_v13 = vld [vmem:[#allocation8 + $0xc20] sm:$0xff] }
 0x51c   :  { %10545 = vmatpush1.bf16.msra.mxu1 %v14680_v1  ;;  %10576 = vmatprep.mubr.bf16.mxu1 %v17234_v59  ;;  %v4097_v1 = vld [vmem:[#allocation8 + $0xc60] sm:$0xff] }
 0x51d   :  { %10630 = vmatprep.subr.bf16.mxu0 %v14203_v2  ;;  %10546 = vmatprep.subr.bf16.mxu1 %v14697_v3  ;;  %v4584_v3 = vld [vmem:[#allocation8 + $0x1b98] sm:$0xff] }
 0x51f   :  { %10631 = vmatpush1.bf16.msra.mxu0 %v14202_v8  ;;  %v14776_v8 = vcombine.low %v4568_v63, %v4576_v49  ;;  %v4648_v63 = vld [vmem:[#allocation8 + $0x1d98] sm:$0xff] }
 0x520   :  { %10547 = vmatpush1.bf16.msra.mxu1 %v14696_v11  ;;  %10632 = vmatprep.subr.bf16.mxu0 %v14219_v5  ;;  %v14299_v11 = vcombine.high %v4089_v13, %v4097_v1  ;;  %v4656_v49 = vld [vmem:[#allocation8 + $0x1dd8] sm:$0xff] }
 0x521   :  { %10548 = vmatprep.subr.bf16.mxu1 %v14713_v12  ;;  %v14793_v12 = vcombine.high %v4584_v3, %v4592_v4 }
 0x523   :  { %10633 = vmatpush1.bf16.msra.mxu0 %v14218_v62  ;;  %v14298_v62 = vcombine.low %v4089_v13, %v4097_v1  ;;  %v4169_v13 = vld [vmem:[#allocation8 + $0xea0] sm:$0xff] }
 0x524   :  { %10549 = vmatpush1.bf16.msra.mxu1 %v14712_v0  ;;  %10634 = vmatprep.subr.bf16.mxu0 %v14235_v23  ;;  %v14792_v0 = vcombine.low %v4584_v3, %v4592_v4  ;;  %v14315_v23 = vcombine.high %v4105_v31, %v4113_v16  ;;  %v4177_v1 = vld [vmem:[#allocation8 + $0xee0] sm:$0xff]  ;;  %v4664_v3 = vld [vmem:[#allocation8 + $0x1e18] sm:$0xff] }
 0x525   :  { %10550 = vmatprep.subr.bf16.mxu1 %v14729_v26  ;;  %v14809_v26 = vcombine.high %v4600_v18, %v4608_v20  ;;  %v4672_v4 = vld [vmem:[#allocation8 + $0x1e58] sm:$0xff] }
 0x527   :  { %10635 = vmatpush1.bf16.msra.mxu0 %v14234_v32  ;;  %v14314_v32 = vcombine.low %v4105_v31, %v4113_v16  ;;  %v4680_v31 = vld [vmem:[#allocation8 + $0x1e98] sm:$0xff] }
 0x528   :  { %10551 = vmatpush1.bf16.msra.mxu1 %v14728_v33  ;;  %10636 = vmatprep.subr.bf16.mxu0 %v14251_v44  ;;  %v14808_v33 = vcombine.low %v4600_v18, %v4608_v20  ;;  %v14331_v44 = vcombine.high %v4121_v27, %v4129_v28  ;;  %v4688_v16 = vld [vmem:[#allocation8 + $0x1ed8] sm:$0xff]  ;;  %v14378_v18 = vcombine.low %v4169_v13, %v4177_v1 }
 0x529   :  { %10552 = vmatprep.subr.bf16.mxu1 %v14745_v46  ;;  %v14825_v46 = vcombine.high %v4616_v29, %v4624_v24  ;;  %v14872_v20 = vcombine.low %v4664_v3, %v4672_v4 }
 0x52b   :  { %10637 = vmatpush1.bf16.msra.mxu0 %v14250_v40  ;;  %v14330_v40 = vcombine.low %v4121_v27, %v4129_v28  ;;  %v4696_v27 = vld [vmem:[#allocation8 + $0x1f18] sm:$0xff] }
 0x52c   :  { %10553 = vmatpush1.bf16.msra.mxu1 %v14744_v41  ;;  %10638 = vmatprep.subr.bf16.mxu0 %v14267_v42  ;;  %v14824_v41 = vcombine.low %v4616_v29, %v4624_v24  ;;  %v14347_v42 = vcombine.high %v4137_v56, %v4145_v34  ;;  %v4704_v28 = vld [vmem:[#allocation8 + $0x1f58] sm:$0xff]  ;;  %v14888_v24 = vcombine.low %v4680_v31, %v4688_v16 }
 0x52d   :  { %10554 = vmatprep.subr.bf16.mxu1 %v14761_v43  ;;  %v14841_v43 = vcombine.high %v4632_v50, %v4640_v37 }
 0x52e   :  { %v17279_v2 = vpop.f32.mrb[24].mxu1 }
 0x52f   :  { %v17281_v9 = vpop.f32.mrb[25].mxu1  ;;  %10639 = vmatpush1.bf16.msra.mxu0 %v14266_v52  ;;  %v14346_v52 = vcombine.low %v4137_v56, %v4145_v34  ;;  %v4712_v56 = vld [vmem:[#allocation8 + $0x1f98] sm:$0xff] }
 0x530   :  { %v10254_v7 = vpop.f32.mrb[26].mxu1  ;;  %10555 = vmatpush1.bf16.msra.mxu1 %v14760_v55  ;;  %10640 = vmatprep.subr.bf16.mxu0 %v14283_v57  ;;  %v14840_v55 = vcombine.low %v4632_v50, %v4640_v37  ;;  %v14363_v57 = vcombine.high %v4153_v19, %v4161_v36  ;;  %v4720_v34 = vld [vmem:[#allocation8 + $0x1fd8] sm:$0xff]  ;;  %v14904_v37 = vcombine.low %v4696_v27, %v4704_v28 }
 0x531   :  { %v10255_v5 = vpop.f32.mrb[27].mxu1  ;;  %10556 = vmatprep.subr.bf16.mxu1 %v14777_v58  ;;  %v14857_v58 = vcombine.high %v4648_v63, %v4656_v49  ;;  %v14856_v7 = vcombine.low %v4648_v63, %v4656_v49  ;;  %v14920_v49 = vcombine.low %v4712_v56, %v4720_v34 }
 0x532   :  { %v4185_v5 = vld [vmem:[#allocation8 + $0xf20] sm:$0xff] }
 0x533   :  { %10641 = vmatpush1.bf16.msra.mxu0 %v14282_v6  ;;  %v14362_v6 = vcombine.low %v4153_v19, %v4161_v36  ;;  %v3706_v19 = vld [vmem:[#allocation8 + $0x28] sm:$0xff] }
 0x534   :  { %10557 = vmatpush1.bf16.msra.mxu1 %v14776_v8  ;;  %10642 = vmatprep.subr.bf16.mxu0 %v14299_v11  ;;  %v14379_v8 = vcombine.high %v4169_v13, %v4177_v1  ;;  %v14873_v11 = vcombine.high %v4664_v3, %v4672_v4  ;;  %v3714_v36 = vld [vmem:[#allocation8 + $0x68] sm:$0xff] }
 0x535   :  { %10558 = vmatprep.subr.bf16.mxu1 %v14793_v12  ;;  %v4193_v12 = vld [vmem:[#allocation8 + $0xf60] sm:$0xff]  ;;  %v3722_v13 = vld [vmem:[#allocation8 + $0xa8] sm:$0xff]  ;;  %v13916_v4 = vcombine.low %v3706_v19, %v3714_v36 }
 0x536   :  { %v14394_v29 = vcombine.low %v4185_v5, %v4193_v12  ;;  %v3730_v1 = vld [vmem:[#allocation8 + $0xe8] sm:$0xff] }
 0x537   :  { %10643 = vmatpush1.bf16.msra.mxu0 %v14298_v62  ;;  %v14395_v62 = vcombine.high %v4185_v5, %v4193_v12  ;;  %v3738_v5 = vld [vmem:[#allocation8 + $0x128] sm:$0xff] }
 0x538   :  { %10559 = vmatpush1.bf16.msra.mxu1 %v14792_v0  ;;  %10644 = vmatprep.subr.bf16.mxu0 %v14315_v23  ;;  %v14889_v0 = vcombine.high %v4680_v31, %v4688_v16  ;;  %v4201_v23 = vld [vmem:[#allocation8 + $0xfa0] sm:$0xff]  ;;  %v3746_v12 = vld [vmem:[#allocation8 + $0x168] sm:$0xff]  ;;  %v13932_v16 = vcombine.low %v3722_v13, %v3730_v1 }
 0x539   :  { %10560 = vmatprep.subr.bf16.mxu1 %v14809_v26  ;;  %v4209_v26 = vld [vmem:[#allocation8 + $0xfe0] sm:$0xff] }
 0x53a   :  { %v14410_v50 = vcombine.low %v4201_v23, %v4209_v26 }
 0x53b   :  { %10645 = vmatpush1.bf16.msra.mxu0 %v14314_v32  ;;  %v14411_v32 = vcombine.high %v4201_v23, %v4209_v26  ;;  %v3754_v23 = vld [vmem:[#allocation8 + $0x1a8] sm:$0xff] }
 0x53c   :  { %10561 = vmatpush1.bf16.msra.mxu1 %v14808_v33  ;;  %10646 = vmatprep.subr.bf16.mxu0 %v14331_v44  ;;  %v14905_v33 = vcombine.high %v4696_v27, %v4704_v28  ;;  %v4217_v44 = vld [vmem:[#allocation8 + $0x1020] sm:$0xff]  ;;  %v3762_v26 = vld [vmem:[#allocation8 + $0x1e8] sm:$0xff]  ;;  %v13948_v28 = vcombine.low %v3738_v5, %v3746_v12 }
 0x53d   :  { %10562 = vmatprep.subr.bf16.mxu1 %v14825_v46  ;;  %v4225_v46 = vld [vmem:[#allocation8 + $0x1060] sm:$0xff] }
 0x53e   :  { %v14426_v63 = vcombine.low %v4217_v44, %v4225_v46 }
 0x53f   :  { %10647 = vmatpush1.bf16.msra.mxu0 %v14330_v40  ;;  %v14427_v40 = vcombine.high %v4217_v44, %v4225_v46  ;;  %v3770_v44 = vld [vmem:[#allocation8 + $0x228] sm:$0xff] }
 0x540   :  { %10563 = vmatpush1.bf16.msra.mxu1 %v14824_v41  ;;  %10648 = vmatprep.subr.bf16.mxu0 %v14347_v42  ;;  %v14921_v41 = vcombine.high %v4712_v56, %v4720_v34  ;;  %v4233_v42 = vld [vmem:[#allocation8 + $0x10a0] sm:$0xff]  ;;  %v3778_v46 = vld [vmem:[#allocation8 + $0x268] sm:$0xff]  ;;  %v13964_v34 = vcombine.low %v3754_v23, %v3762_v26 }
 0x541   :  { %10564 = vmatprep.subr.bf16.mxu1 %v14841_v43  ;;  %v4241_v43 = vld [vmem:[#allocation8 + $0x10e0] sm:$0xff] }
 0x542   :  { %v14442_v3 = vcombine.low %v4233_v42, %v4241_v43 }
 0x543   :  { %10649 = vmatpush1.bf16.msra.mxu0 %v14346_v52  ;;  %v14443_v52 = vcombine.high %v4233_v42, %v4241_v43  ;;  %v3786_v42 = vld [vmem:[#allocation8 + $0x2a8] sm:$0xff] }
 0x544   :  { %10565 = vmatpush1.bf16.msra.mxu1 %v14840_v55  ;;  %10650 = vmatprep.subr.bf16.mxu0 %v14363_v57  ;;  %v13917_v55 = vcombine.high %v3706_v19, %v3714_v36  ;;  %v4249_v57 = vld [vmem:[#allocation8 + $0x1120] sm:$0xff]  ;;  %v3794_v43 = vld [vmem:[#allocation8 + $0x2e8] sm:$0xff]  ;;  %v13980_v36 = vcombine.low %v3770_v44, %v3778_v46 }
 0x545   :  { %10566 = vmatprep.subr.bf16.mxu1 %v14857_v58  ;;  %v4257_v58 = vld [vmem:[#allocation8 + $0x1160] sm:$0xff] }
 0x546   :  { %v14458_v31 = vcombine.low %v4249_v57, %v4257_v58 }
 0x547   :  { %10651 = vmatpush1.bf16.msra.mxu0 %v14362_v6  ;;  %v14459_v6 = vcombine.high %v4249_v57, %v4257_v58  ;;  %v3802_v57 = vld [vmem:[#allocation8 + $0x328] sm:$0xff] }
 0x548   :  { %10567 = vmatpush1.bf16.msra.mxu1 %v14856_v7  ;;  %10652 = vmatprep.subr.bf16.mxu0 %v14379_v8  ;;  %v13933_v7 = vcombine.high %v3722_v13, %v3730_v1  ;;  %v4265_v8 = vld [vmem:[#allocation8 + $0x11a0] sm:$0xff]  ;;  %v3810_v58 = vld [vmem:[#allocation8 + $0x368] sm:$0xff]  ;;  %v13996_v1 = vcombine.low %v3786_v42, %v3794_v43 }
 0x549   :  { %10568 = vmatprep.subr.bf16.mxu1 %v14873_v11  ;;  %v4273_v11 = vld [vmem:[#allocation8 + $0x11e0] sm:$0xff] }
 0x54a   :  { %v14474_v27 = vcombine.low %v4265_v8, %v4273_v11 }
 0x54b   :  { %10653 = vmatpush1.bf16.msra.mxu0 %v14378_v18  ;;  %v14475_v18 = vcombine.high %v4265_v8, %v4273_v11  ;;  %v3818_v8 = vld [vmem:[#allocation8 + $0x3a8] sm:$0xff] }
 0x54c   :  { %10569 = vmatpush1.bf16.msra.mxu1 %v14872_v20  ;;  %10654 = vmatprep.subr.bf16.mxu0 %v14395_v62  ;;  %v13949_v20 = vcombine.high %v3738_v5, %v3746_v12  ;;  %v4281_v62 = vld [vmem:[#allocation8 + $0x1220] sm:$0xff]  ;;  %v3826_v11 = vld [vmem:[#allocation8 + $0x3e8] sm:$0xff]  ;;  %v14012_v12 = vcombine.low %v3802_v57, %v3810_v58 }
 0x54d   :  { %10570 = vmatprep.subr.bf16.mxu1 %v14889_v0  ;;  %v4289_v0 = vld [vmem:[#allocation8 + $0x1260] sm:$0xff] }
 0x54e   :  { %v14490_v56 = vcombine.low %v4281_v62, %v4289_v0 }
 0x54f   :  { %10655 = vmatpush1.bf16.msra.mxu0 %v14394_v29  ;;  %v14491_v29 = vcombine.high %v4281_v62, %v4289_v0  ;;  %v3834_v62 = vld [vmem:[#allocation8 + $0x428] sm:$0xff] }
 0x550   :  { %10571 = vmatpush1.bf16.msra.mxu1 %v14888_v24  ;;  %10656 = vmatprep.subr.bf16.mxu0 %v14411_v32  ;;  %v13965_v24 = vcombine.high %v3754_v23, %v3762_v26  ;;  %v4297_v32 = vld [vmem:[#allocation8 + $0x12a0] sm:$0xff]  ;;  %v3842_v0 = vld [vmem:[#allocation8 + $0x468] sm:$0xff]  ;;  %v14028_v26 = vcombine.low %v3818_v8, %v3826_v11 }
 0x551   :  { %10572 = vmatprep.subr.bf16.mxu1 %v14905_v33  ;;  %v4305_v33 = vld [vmem:[#allocation8 + $0x12e0] sm:$0xff] }
 0x552   :  { %v14506_v19 = vcombine.low %v4297_v32, %v4305_v33 }
 0x553   :  { %10657 = vmatpush1.bf16.msra.mxu0 %v14410_v50  ;;  %v14507_v50 = vcombine.high %v4297_v32, %v4305_v33  ;;  %v3850_v32 = vld [vmem:[#allocation8 + $0x4a8] sm:$0xff] }
 0x554   :  { %10573 = vmatpush1.bf16.msra.mxu1 %v14904_v37  ;;  %10667 = vmatprep.subr.bf16.mxu0 %v14427_v40  ;;  %v13981_v37 = vcombine.high %v3770_v44, %v3778_v46  ;;  %v4313_v40 = vld [vmem:[#allocation8 + $0x1320] sm:$0xff]  ;;  %v3858_v33 = vld [vmem:[#allocation8 + $0x4e8] sm:$0xff]  ;;  %v14044_v46 = vcombine.low %v3834_v62, %v3842_v0 }
 0x555   :  { %10574 = vmatprep.subr.bf16.mxu1 %v14921_v41  ;;  %v4321_v41 = vld [vmem:[#allocation8 + $0x1360] sm:$0xff] }
 0x556   :  { %10659 = vmatmul.mubr.bf16.vlgmr.msra.gmra.mrb[16].mxu0 %v17178_v47  ;;  %v14522_v13 = vcombine.low %v4313_v40, %v4321_v41 }
 0x557   :  { %10668 = vmatpush1.bf16.msra.mxu0 %v14426_v63  ;;  %10699 = vmatprep.mubr.bf16.mxu0 %v17181_v54  ;;  %v14523_v63 = vcombine.high %v4313_v40, %v4321_v41  ;;  %v3866_v40 = vld [vmem:[#allocation8 + $0x528] sm:$0xff] }
 0x558   :  { %10575 = vmatpush1.bf16.msra.mxu1 %v14920_v49  ;;  %10669 = vmatprep.subr.bf16.mxu0 %v14443_v52  ;;  %v13997_v49 = vcombine.high %v3786_v42, %v3794_v43  ;;  %v4329_v52 = vld [vmem:[#allocation8 + $0x13a0] sm:$0xff]  ;;  %v3874_v41 = vld [vmem:[#allocation8 + $0x568] sm:$0xff]  ;;  %v14060_v43 = vcombine.low %v3850_v32, %v3858_v33 }
 0x559   :  { %10749 = vmatprep.subr.bf16.mxu1 %v13917_v55  ;;  %v4337_v55 = vld [vmem:[#allocation8 + $0x13e0] sm:$0xff] }
 0x55a   :  { %v14538_v5 = vcombine.low %v4329_v52, %v4337_v55 }
 0x55b   :  { %10577 = vmatmul.mubr.bf16.vlgmr.msra.gmra.mrb[28].mxu1 %v17236_v14  ;;  %10670 = vmatpush1.bf16.msra.mxu0 %v14442_v3  ;;  %v14539_v3 = vcombine.high %v4329_v52, %v4337_v55  ;;  %v3882_v52 = vld [vmem:[#allocation8 + $0x5a8] sm:$0xff] }
 0x55c   :  { %10750 = vmatpush1.bf16.msra.mxu1 %v13916_v4  ;;  %10781 = vmatprep.mubr.bf16.mxu1 %v17136_v10  ;;  %v14013_v4 = vcombine.high %v3802_v57, %v3810_v58  ;;  %v3890_v55 = vld [vmem:[#allocation8 + $0x5e8] sm:$0xff]  ;;  %v14076_v58 = vcombine.low %v3866_v40, %v3874_v41 }
 0x55d   :  { %10671 = vmatprep.subr.bf16.mxu0 %v14459_v6  ;;  %10751 = vmatprep.subr.bf16.mxu1 %v13933_v7  ;;  %v4345_v6 = vld [vmem:[#allocation8 + $0x1420] sm:$0xff] }
 0x55e   :  { %v4353_v7 = vld [vmem:[#allocation8 + $0x1460] sm:$0xff] }
 0x55f   :  { %10672 = vmatpush1.bf16.msra.mxu0 %v14458_v31  ;;  %v14555_v31 = vcombine.high %v4345_v6, %v4353_v7  ;;  %v14554_v23 = vcombine.low %v4345_v6, %v4353_v7  ;;  %v3898_v6 = vld [vmem:[#allocation8 + $0x628] sm:$0xff] }
 0x560   :  { %10752 = vmatpush1.bf16.msra.mxu1 %v13932_v16  ;;  %10673 = vmatprep.subr.bf16.mxu0 %v14475_v18  ;;  %v14029_v16 = vcombine.high %v3818_v8, %v3826_v11  ;;  %v4361_v18 = vld [vmem:[#allocation8 + $0x14a0] sm:$0xff]  ;;  %v3906_v7 = vld [vmem:[#allocation8 + $0x668] sm:$0xff]  ;;  %v14092_v11 = vcombine.low %v3882_v52, %v3890_v55 }
 0x561   :  { %10753 = vmatprep.subr.bf16.mxu1 %v13949_v20  ;;  %v4369_v20 = vld [vmem:[#allocation8 + $0x14e0] sm:$0xff] }
 0x562   :  { %v14570_v44 = vcombine.low %v4361_v18, %v4369_v20 }
 0x563   :  { %10674 = vmatpush1.bf16.msra.mxu0 %v14474_v27  ;;  %v14571_v27 = vcombine.high %v4361_v18, %v4369_v20  ;;  %v3914_v18 = vld [vmem:[#allocation8 + $0x6a8] sm:$0xff] }
 0x564   :  { %10754 = vmatpush1.bf16.msra.mxu1 %v13948_v28  ;;  %10675 = vmatprep.subr.bf16.mxu0 %v14491_v29  ;;  %v14045_v28 = vcombine.high %v3834_v62, %v3842_v0  ;;  %v4377_v29 = vld [vmem:[#allocation8 + $0x1520] sm:$0xff]  ;;  %v3922_v20 = vld [vmem:[#allocation8 + $0x6e8] sm:$0xff]  ;;  %v14108_v0 = vcombine.low %v3898_v6, %v3906_v7 }
 0x565   :  { %10755 = vmatprep.subr.bf16.mxu1 %v13965_v24  ;;  %v4385_v24 = vld [vmem:[#allocation8 + $0x1560] sm:$0xff] }
 0x566   :  { %v14586_v42 = vcombine.low %v4377_v29, %v4385_v24 }
 0x567   :  { %10676 = vmatpush1.bf16.msra.mxu0 %v14490_v56  ;;  %v14587_v56 = vcombine.high %v4377_v29, %v4385_v24  ;;  %v3930_v29 = vld [vmem:[#allocation8 + $0x728] sm:$0xff] }
 0x568   :  { %10756 = vmatpush1.bf16.msra.mxu1 %v13964_v34  ;;  %10677 = vmatprep.subr.bf16.mxu0 %v14507_v50  ;;  %v14061_v34 = vcombine.high %v3850_v32, %v3858_v33  ;;  %v4393_v50 = vld [vmem:[#allocation8 + $0x15a0] sm:$0xff]  ;;  %v3938_v24 = vld [vmem:[#allocation8 + $0x768] sm:$0xff]  ;;  %v14124_v33 = vcombine.low %v3914_v18, %v3922_v20 }
 0x569   :  { %10757 = vmatprep.subr.bf16.mxu1 %v13981_v37  ;;  %v4401_v37 = vld [vmem:[#allocation8 + $0x15e0] sm:$0xff] }
 0x56a   :  { %v14602_v57 = vcombine.low %v4393_v50, %v4401_v37 }
 0x56b   :  { %10678 = vmatpush1.bf16.msra.mxu0 %v14506_v19  ;;  %v14603_v19 = vcombine.high %v4393_v50, %v4401_v37  ;;  %v3946_v50 = vld [vmem:[#allocation8 + $0x7a8] sm:$0xff] }
 0x56c   :  { %10758 = vmatpush1.bf16.msra.mxu1 %v13980_v36  ;;  %10679 = vmatprep.subr.bf16.mxu0 %v14523_v63  ;;  %v14077_v36 = vcombine.high %v3866_v40, %v3874_v41  ;;  %v4409_v63 = vld [vmem:[#allocation8 + $0x1620] sm:$0xff]  ;;  %v3954_v37 = vld [vmem:[#allocation8 + $0x7e8] sm:$0xff]  ;;  %v14140_v41 = vcombine.low %v3930_v29, %v3938_v24 }
 0x56d   :  { %10759 = vmatprep.subr.bf16.mxu1 %v13997_v49  ;;  %v4417_v49 = vld [vmem:[#allocation8 + $0x1660] sm:$0xff] }
 0x56e   :  { %v14618_v8 = vcombine.low %v4409_v63, %v4417_v49 }
 0x56f   :  { %10680 = vmatpush1.bf16.msra.mxu0 %v14522_v13  ;;  %v14619_v13 = vcombine.high %v4409_v63, %v4417_v49  ;;  %v3962_v63 = vld [vmem:[#allocation8 + $0x828] sm:$0xff] }
 0x570   :  { %10760 = vmatpush1.bf16.msra.mxu1 %v13996_v1  ;;  %10681 = vmatprep.subr.bf16.mxu0 %v14539_v3  ;;  %v14093_v1 = vcombine.high %v3882_v52, %v3890_v55  ;;  %v4425_v3 = vld [vmem:[#allocation8 + $0x16a0] sm:$0xff]  ;;  %v3970_v49 = vld [vmem:[#allocation8 + $0x868] sm:$0xff]  ;;  %v14156_v55 = vcombine.low %v3946_v50, %v3954_v37 }
 0x571   :  { %10761 = vmatprep.subr.bf16.mxu1 %v14013_v4  ;;  %v4433_v4 = vld [vmem:[#allocation8 + $0x16e0] sm:$0xff] }
 0x572   :  { %v14634_v62 = vcombine.low %v4425_v3, %v4433_v4 }
 0x573   :  { %10682 = vmatpush1.bf16.msra.mxu0 %v14538_v5  ;;  %v14635_v5 = vcombine.high %v4425_v3, %v4433_v4  ;;  %v3978_v3 = vld [vmem:[#allocation8 + $0x8a8] sm:$0xff] }
 0x574   :  { %10762 = vmatpush1.bf16.msra.mxu1 %v14012_v12  ;;  %10683 = vmatprep.subr.bf16.mxu0 %v14555_v31  ;;  %v14109_v12 = vcombine.high %v3898_v6, %v3906_v7  ;;  %v4441_v31 = vld [vmem:[#allocation8 + $0x1720] sm:$0xff]  ;;  %v3986_v4 = vld [vmem:[#allocation8 + $0x8e8] sm:$0xff]  ;;  %v14172_v7 = vcombine.low %v3962_v63, %v3970_v49 }
 0x575   :  { %10763 = vmatprep.subr.bf16.mxu1 %v14029_v16  ;;  %v4449_v16 = vld [vmem:[#allocation8 + $0x1760] sm:$0xff] }
 0x576   :  { %v14650_v32 = vcombine.low %v4441_v31, %v4449_v16 }
 0x577   :  { %10684 = vmatpush1.bf16.msra.mxu0 %v14554_v23  ;;  %v14651_v23 = vcombine.high %v4441_v31, %v4449_v16  ;;  %v3994_v31 = vld [vmem:[#allocation8 + $0x928] sm:$0xff] }
 0x578   :  { %10764 = vmatpush1.bf16.msra.mxu1 %v14028_v26  ;;  %10685 = vmatprep.subr.bf16.mxu0 %v14571_v27  ;;  %v14125_v26 = vcombine.high %v3914_v18, %v3922_v20  ;;  %v4457_v27 = vld [vmem:[#allocation8 + $0x17a0] sm:$0xff]  ;;  %v4002_v16 = vld [vmem:[#allocation8 + $0x968] sm:$0xff]  ;;  %v14188_v20 = vcombine.low %v3978_v3, %v3986_v4 }
 0x579   :  { %10765 = vmatprep.subr.bf16.mxu1 %v14045_v28  ;;  %v4465_v28 = vld [vmem:[#allocation8 + $0x17e0] sm:$0xff] }
 0x57a   :  { %v14666_v40 = vcombine.low %v4457_v27, %v4465_v28 }
 0x57b   :  { %10686 = vmatpush1.bf16.msra.mxu0 %v14570_v44  ;;  %v14667_v44 = vcombine.high %v4457_v27, %v4465_v28  ;;  %v4010_v27 = vld [vmem:[#allocation8 + $0x9a8] sm:$0xff] }
 0x57c   :  { %10766 = vmatpush1.bf16.msra.mxu1 %v14044_v46  ;;  %10687 = vmatprep.subr.bf16.mxu0 %v14587_v56  ;;  %v14141_v46 = vcombine.high %v3930_v29, %v3938_v24  ;;  %v4473_v56 = vld [vmem:[#allocation8 + $0x1820] sm:$0xff]  ;;  %v4018_v28 = vld [vmem:[#allocation8 + $0x9e8] sm:$0xff]  ;;  %v14204_v24 = vcombine.low %v3994_v31, %v4002_v16 }
 0x57d   :  { %10767 = vmatprep.subr.bf16.mxu1 %v14061_v34  ;;  %v4481_v34 = vld [vmem:[#allocation8 + $0x1860] sm:$0xff] }
 0x57e   :  { %v14682_v52 = vcombine.low %v4473_v56, %v4481_v34 }
 0x57f   :  { %10688 = vmatpush1.bf16.msra.mxu0 %v14586_v42  ;;  %v14683_v42 = vcombine.high %v4473_v56, %v4481_v34  ;;  %v4026_v56 = vld [vmem:[#allocation8 + $0xa28] sm:$0xff] }
 0x580   :  { %10768 = vmatpush1.bf16.msra.mxu1 %v14060_v43  ;;  %10689 = vmatprep.subr.bf16.mxu0 %v14603_v19  ;;  %v14157_v43 = vcombine.high %v3946_v50, %v3954_v37  ;;  %v4489_v19 = vld [vmem:[#allocation8 + $0x18a0] sm:$0xff]  ;;  %v4034_v34 = vld [vmem:[#allocation8 + $0xa68] sm:$0xff]  ;;  %v14220_v37 = vcombine.low %v4010_v27, %v4018_v28 }
 0x581   :  { %10769 = vmatprep.subr.bf16.mxu1 %v14077_v36  ;;  %v4497_v36 = vld [vmem:[#allocation8 + $0x18e0] sm:$0xff] }
 0x582   :  { %v14698_v6 = vcombine.low %v4489_v19, %v4497_v36 }
 0x583   :  { %10690 = vmatpush1.bf16.msra.mxu0 %v14602_v57  ;;  %v14699_v57 = vcombine.high %v4489_v19, %v4497_v36  ;;  %v4042_v19 = vld [vmem:[#allocation8 + $0xaa8] sm:$0xff] }
 0x584   :  { %10770 = vmatpush1.bf16.msra.mxu1 %v14076_v58  ;;  %10691 = vmatprep.subr.bf16.mxu0 %v14619_v13  ;;  %v14173_v58 = vcombine.high %v3962_v63, %v3970_v49  ;;  %v4505_v13 = vld [vmem:[#allocation8 + $0x1920] sm:$0xff]  ;;  %v4050_v36 = vld [vmem:[#allocation8 + $0xae8] sm:$0xff]  ;;  %v14236_v49 = vcombine.low %v4026_v56, %v4034_v34 }
 0x585   :  { %10771 = vmatprep.subr.bf16.mxu1 %v14093_v1  ;;  %v4513_v1 = vld [vmem:[#allocation8 + $0x1960] sm:$0xff] }
 0x586   :  { %v14714_v18 = vcombine.low %v4505_v13, %v4513_v1 }
 0x587   :  { %10692 = vmatpush1.bf16.msra.mxu0 %v14618_v8  ;;  %v14715_v8 = vcombine.high %v4505_v13, %v4513_v1  ;;  %v4593_v13 = vld [vmem:[#allocation8 + $0x1be0] sm:$0xff] }
 0x588   :  { %10772 = vmatpush1.bf16.msra.mxu1 %v14092_v11  ;;  %10693 = vmatprep.subr.bf16.mxu0 %v14635_v5  ;;  %v14189_v11 = vcombine.high %v3978_v3, %v3986_v4  ;;  %v4521_v5 = vld [vmem:[#allocation8 + $0x19a0] sm:$0xff]  ;;  %v4058_v3 = vld [vmem:[#allocation8 + $0xb28] sm:$0xff] }
 0x589   :  { %10773 = vmatprep.subr.bf16.mxu1 %v14109_v12  ;;  %v4529_v12 = vld [vmem:[#allocation8 + $0x19e0] sm:$0xff]  ;;  %v4066_v4 = vld [vmem:[#allocation8 + $0xb68] sm:$0xff] }
 0x58a   :  { %v14730_v29 = vcombine.low %v4521_v5, %v4529_v12 }
 0x58b   :  { %10694 = vmatpush1.bf16.msra.mxu0 %v14634_v62  ;;  %v14731_v62 = vcombine.high %v4521_v5, %v4529_v12  ;;  %v14269_v12 = vcombine.high %v4058_v3, %v4066_v4 }
 0x58c   :  { %10774 = vmatpush1.bf16.msra.mxu1 %v14108_v0  ;;  %10695 = vmatprep.subr.bf16.mxu0 %v14651_v23  ;;  %v14205_v0 = vcombine.high %v3994_v31, %v4002_v16  ;;  %v4537_v23 = vld [vmem:[#allocation8 + $0x1a20] sm:$0xff] }
 0x58d   :  { %10775 = vmatprep.subr.bf16.mxu1 %v14125_v26  ;;  %v4545_v26 = vld [vmem:[#allocation8 + $0x1a60] sm:$0xff] }
 0x58e   :  { %v14746_v50 = vcombine.low %v4537_v23, %v4545_v26  ;;  %v4601_v31 = vld [vmem:[#allocation8 + $0x1c20] sm:$0xff] }
 0x58f   :  { %10696 = vmatpush1.bf16.msra.mxu0 %v14650_v32  ;;  %v14747_v32 = vcombine.high %v4537_v23, %v4545_v26  ;;  %v4609_v16 = vld [vmem:[#allocation8 + $0x1c60] sm:$0xff] }
 0x590   :  { %10776 = vmatpush1.bf16.msra.mxu1 %v14124_v33  ;;  %10697 = vmatprep.subr.bf16.mxu0 %v14667_v44  ;;  %v14221_v33 = vcombine.high %v4010_v27, %v4018_v28  ;;  %v4553_v44 = vld [vmem:[#allocation8 + $0x1aa0] sm:$0xff]  ;;  %v14811_v23 = vcombine.high %v4601_v31, %v4609_v16 }
 0x591   :  { %10777 = vmatprep.subr.bf16.mxu1 %v14141_v46  ;;  %v4561_v46 = vld [vmem:[#allocation8 + $0x1ae0] sm:$0xff] }
 0x592   :  { %v14762_v63 = vcombine.low %v4553_v44, %v4561_v46  ;;  %v4617_v27 = vld [vmem:[#allocation8 + $0x1ca0] sm:$0xff] }
 0x593   :  { %10698 = vmatpush1.bf16.msra.mxu0 %v14666_v40  ;;  %v14763_v40 = vcombine.high %v4553_v44, %v4561_v46  ;;  %v4625_v28 = vld [vmem:[#allocation8 + $0x1ce0] sm:$0xff] }
 0x594   :  { %10778 = vmatpush1.bf16.msra.mxu1 %v14140_v41  ;;  %10708 = vmatprep.subr.bf16.mxu0 %v14683_v42  ;;  %v14237_v41 = vcombine.high %v4026_v56, %v4034_v34  ;;  %v4569_v42 = vld [vmem:[#allocation8 + $0x1b20] sm:$0xff]  ;;  %v14827_v44 = vcombine.high %v4617_v27, %v4625_v28 }
 0x595   :  { %10779 = vmatprep.subr.bf16.mxu1 %v14157_v43  ;;  %v4577_v43 = vld [vmem:[#allocation8 + $0x1b60] sm:$0xff] }
 0x596   :  { %10700 = vmatmul.mubr.bf16.vlgmr.msra.gmra.mrb[16].mxu0 %v17212_v39  ;;  %v4633_v56 = vld [vmem:[#allocation8 + $0x1d20] sm:$0xff] }
 0x597   :  { %10709 = vmatpush1.bf16.msra.mxu0 %v14682_v52  ;;  %10740 = vmatprep.mubr.bf16.mxu0 %v17234_v59  ;;  %v14779_v52 = vcombine.high %v4569_v42, %v4577_v43  ;;  %v4641_v34 = vld [vmem:[#allocation8 + $0x1d60] sm:$0xff] }
 0x598   :  { %10780 = vmatpush1.bf16.msra.mxu1 %v14156_v55  ;;  %10710 = vmatprep.subr.bf16.mxu0 %v14699_v57  ;;  %v14253_v57 = vcombine.high %v4042_v19, %v4050_v36 }
 0x599   :  { %10790 = vmatprep.subr.bf16.mxu1 %v14173_v58  ;;  %v4585_v58 = vld [vmem:[#allocation8 + $0x1ba0] sm:$0xff] }
 0x59a   :  { %v14795_v5 = vcombine.high %v4585_v58, %v4593_v13 }
 0x59b   :  { %10711 = vmatpush1.bf16.msra.mxu0 %v14698_v6  ;;  %10782 = vmatmul.mubr.bf16.vlgmr.msra.gmra.mrb[32].mxu1 %v17138_v15 }
 0x59c   :  { %10791 = vmatpush1.bf16.msra.mxu1 %v14172_v7  ;;  %10822 = vmatprep.mubr.bf16.mxu1 %v17176_v45  ;;  %v14778_v7 = vcombine.low %v4569_v42, %v4577_v43  ;;  %v14843_v42 = vcombine.high %v4633_v56, %v4641_v34 }
 0x59d   :  { %10712 = vmatprep.subr.bf16.mxu0 %v14715_v8  ;;  %10792 = vmatprep.subr.bf16.mxu1 %v14189_v11  ;;  %v14252_v11 = vcombine.low %v4042_v19, %v4050_v36  ;;  %v4649_v19 = vld [vmem:[#allocation8 + $0x1da0] sm:$0xff] }
 0x59e   :  { %v4657_v36 = vld [vmem:[#allocation8 + $0x1de0] sm:$0xff] }
 0x59f   :  { %10713 = vmatpush1.bf16.msra.mxu0 %v14714_v18  ;;  %v4074_v18 = vld [vmem:[#allocation8 + $0xba8] sm:$0xff] }
 0x5a0   :  { %10793 = vmatpush1.bf16.msra.mxu1 %v14188_v20  ;;  %10714 = vmatprep.subr.bf16.mxu0 %v14731_v62  ;;  %v4082_v20 = vld [vmem:[#allocation8 + $0xbe8] sm:$0xff]  ;;  %v14794_v62 = vcombine.low %v4585_v58, %v4593_v13  ;;  %v14859_v58 = vcombine.high %v4649_v19, %v4657_v36 }
 0x5a1   :  { %10794 = vmatprep.subr.bf16.mxu1 %v14205_v0  ;;  %v14268_v0 = vcombine.low %v4058_v3, %v4066_v4  ;;  %v14285_v26 = vcombine.high %v4074_v18, %v4082_v20  ;;  %v4665_v3 = vld [vmem:[#allocation8 + $0x1e20] sm:$0xff] }
 0x5a2   :  { %v4673_v4 = vld [vmem:[#allocation8 + $0x1e60] sm:$0xff] }
 0x5a3   :  { %10715 = vmatpush1.bf16.msra.mxu0 %v14730_v29  ;;  %v4090_v29 = vld [vmem:[#allocation8 + $0xc28] sm:$0xff] }
 0x5a4   :  { %10795 = vmatpush1.bf16.msra.mxu1 %v14204_v24  ;;  %10716 = vmatprep.subr.bf16.mxu0 %v14747_v32  ;;  %v4098_v24 = vld [vmem:[#allocation8 + $0xc68] sm:$0xff]  ;;  %v14810_v32 = vcombine.low %v4601_v31, %v4609_v16  ;;  %v4681_v31 = vld [vmem:[#allocation8 + $0x1ea0] sm:$0xff] }
 0x5a5   :  { %10796 = vmatprep.subr.bf16.mxu1 %v14221_v33  ;;  %v14284_v33 = vcombine.low %v4074_v18, %v4082_v20  ;;  %v14301_v46 = vcombine.high %v4090_v29, %v4098_v24  ;;  %v4689_v16 = vld [vmem:[#allocation8 + $0x1ee0] sm:$0xff]  ;;  %v4154_v18 = vld [vmem:[#allocation8 + $0xe28] sm:$0xff] }
 0x5a6   :  { %v4162_v20 = vld [vmem:[#allocation8 + $0xe68] sm:$0xff] }
 0x5a7   :  { %10717 = vmatpush1.bf16.msra.mxu0 %v14746_v50  ;;  %v4106_v50 = vld [vmem:[#allocation8 + $0xca8] sm:$0xff] }
 0x5a8   :  { %10797 = vmatpush1.bf16.msra.mxu1 %v14220_v37  ;;  %10718 = vmatprep.subr.bf16.mxu0 %v14763_v40  ;;  %v4114_v37 = vld [vmem:[#allocation8 + $0xce8] sm:$0xff]  ;;  %v14826_v40 = vcombine.low %v4617_v27, %v4625_v28  ;;  %v4697_v27 = vld [vmem:[#allocation8 + $0x1f20] sm:$0xff] }
 0x5a9   :  { %v17291_v55 = vpop.f32.mrb[12].mxu0  ;;  %10798 = vmatprep.subr.bf16.mxu1 %v14237_v41  ;;  %v14300_v41 = vcombine.low %v4090_v29, %v4098_v24  ;;  %v14317_v43 = vcombine.high %v4106_v50, %v4114_v37  ;;  %v4705_v28 = vld [vmem:[#allocation8 + $0x1f60] sm:$0xff]  ;;  %v4170_v29 = vld [vmem:[#allocation8 + $0xea8] sm:$0xff] }
 0x5aa   :  { %v17293_v1 = vpop.f32.mrb[13].mxu0  ;;  %v4178_v24 = vld [vmem:[#allocation8 + $0xee8] sm:$0xff] }
 0x5ab   :  { %v10418_v6 = vpop.f32.mrb[14].mxu0  ;;  %10719 = vmatpush1.bf16.msra.mxu0 %v14762_v63  ;;  %v4122_v63 = vld [vmem:[#allocation8 + $0xd28] sm:$0xff] }
 0x5ac   :  { %v10419_v8 = vpop.f32.mrb[15].mxu0  ;;  %10799 = vmatpush1.bf16.msra.mxu1 %v14236_v49  ;;  %10720 = vmatprep.subr.bf16.mxu0 %v14779_v52  ;;  %v4130_v49 = vld [vmem:[#allocation8 + $0xd68] sm:$0xff]  ;;  %v14842_v52 = vcombine.low %v4633_v56, %v4641_v34  ;;  %v4713_v56 = vld [vmem:[#allocation8 + $0x1fa0] sm:$0xff] }
 0x5ad   :  { %10800 = vmatprep.subr.bf16.mxu1 %v14253_v57  ;;  %v14316_v57 = vcombine.low %v4106_v50, %v4114_v37  ;;  %v14333_v13 = vcombine.high %v4122_v63, %v4130_v49  ;;  %v4138_v6 = vld [vmem:[#allocation8 + $0xda8] sm:$0xff]  ;;  %v14858_v8 = vcombine.low %v4649_v19, %v4657_v36  ;;  %v4721_v34 = vld [vmem:[#allocation8 + $0x1fe0] sm:$0xff]  ;;  %v3707_v19 = vld [vmem:[#allocation8 + $0x30] sm:$0xff] }
 0x5ae   :  { %v4186_v50 = vld [vmem:[#allocation8 + $0xf28] sm:$0xff]  ;;  %v3715_v36 = vld [vmem:[#allocation8 + $0x70] sm:$0xff] }
 0x5af   :  { %10721 = vmatpush1.bf16.msra.mxu0 %v14778_v7  ;;  %v4146_v7 = vld [vmem:[#allocation8 + $0xde8] sm:$0xff] }
 0x5b0   :  { %10801 = vmatpush1.bf16.msra.mxu1 %v14252_v11  ;;  %10722 = vmatprep.subr.bf16.mxu0 %v14795_v5  ;;  %v14332_v11 = vcombine.low %v4122_v63, %v4130_v49  ;;  %v14875_v5 = vcombine.high %v4665_v3, %v4673_v4  ;;  %v4194_v37 = vld [vmem:[#allocation8 + $0xf68] sm:$0xff] }
 0x5b1   :  { %10802 = vmatprep.subr.bf16.mxu1 %v14269_v12  ;;  %v14349_v12 = vcombine.high %v4138_v6, %v4146_v7  ;;  %v4202_v63 = vld [vmem:[#allocation8 + $0xfa8] sm:$0xff] }
 0x5b2   :  { %v4210_v49 = vld [vmem:[#allocation8 + $0xfe8] sm:$0xff] }
 0x5b3   :  { %10723 = vmatpush1.bf16.msra.mxu0 %v14794_v62  ;;  %v14874_v62 = vcombine.low %v4665_v3, %v4673_v4  ;;  %v3723_v3 = vld [vmem:[#allocation8 + $0xb0] sm:$0xff] }
 0x5b4   :  { %10803 = vmatpush1.bf16.msra.mxu1 %v14268_v0  ;;  %10724 = vmatprep.subr.bf16.mxu0 %v14811_v23  ;;  %v14348_v0 = vcombine.low %v4138_v6, %v4146_v7  ;;  %v14891_v23 = vcombine.high %v4681_v31, %v4689_v16  ;;  %v3731_v4 = vld [vmem:[#allocation8 + $0xf0] sm:$0xff]  ;;  %v4218_v6 = vld [vmem:[#allocation8 + $0x1028] sm:$0xff] }
 0x5b5   :  { %10804 = vmatprep.subr.bf16.mxu1 %v14285_v26  ;;  %v14365_v26 = vcombine.high %v4154_v18, %v4162_v20  ;;  %v4226_v7 = vld [vmem:[#allocation8 + $0x1068] sm:$0xff] }
 0x5b7   :  { %10725 = vmatpush1.bf16.msra.mxu0 %v14810_v32  ;;  %v14890_v32 = vcombine.low %v4681_v31, %v4689_v16  ;;  %v3739_v31 = vld [vmem:[#allocation8 + $0x130] sm:$0xff] }
 0x5b8   :  { %10805 = vmatpush1.bf16.msra.mxu1 %v14284_v33  ;;  %10726 = vmatprep.subr.bf16.mxu0 %v14827_v44  ;;  %v14364_v33 = vcombine.low %v4154_v18, %v4162_v20  ;;  %v14907_v44 = vcombine.high %v4697_v27, %v4705_v28  ;;  %v3747_v16 = vld [vmem:[#allocation8 + $0x170] sm:$0xff]  ;;  %v4234_v18 = vld [vmem:[#allocation8 + $0x10a8] sm:$0xff] }
 0x5b9   :  { %10806 = vmatprep.subr.bf16.mxu1 %v14301_v46  ;;  %v14381_v46 = vcombine.high %v4170_v29, %v4178_v24  ;;  %v4242_v20 = vld [vmem:[#allocation8 + $0x10e8] sm:$0xff] }
 0x5bb   :  { %10727 = vmatpush1.bf16.msra.mxu0 %v14826_v40  ;;  %v14906_v40 = vcombine.low %v4697_v27, %v4705_v28  ;;  %v3755_v27 = vld [vmem:[#allocation8 + $0x1b0] sm:$0xff] }
 0x5bc   :  { %10807 = vmatpush1.bf16.msra.mxu1 %v14300_v41  ;;  %10728 = vmatprep.subr.bf16.mxu0 %v14843_v42  ;;  %v14380_v41 = vcombine.low %v4170_v29, %v4178_v24  ;;  %v14923_v42 = vcombine.high %v4713_v56, %v4721_v34  ;;  %v3763_v28 = vld [vmem:[#allocation8 + $0x1f0] sm:$0xff]  ;;  %v4250_v29 = vld [vmem:[#allocation8 + $0x1128] sm:$0xff] }
 0x5bd   :  { %10808 = vmatprep.subr.bf16.mxu1 %v14317_v43  ;;  %v14397_v43 = vcombine.high %v4186_v50, %v4194_v37  ;;  %v4258_v24 = vld [vmem:[#allocation8 + $0x1168] sm:$0xff] }
 0x5bf   :  { %10729 = vmatpush1.bf16.msra.mxu0 %v14842_v52  ;;  %v14922_v52 = vcombine.low %v4713_v56, %v4721_v34  ;;  %v3771_v56 = vld [vmem:[#allocation8 + $0x230] sm:$0xff] }
 0x5c0   :  { %10809 = vmatpush1.bf16.msra.mxu1 %v14316_v57  ;;  %10730 = vmatprep.subr.bf16.mxu0 %v14859_v58  ;;  %v14396_v57 = vcombine.low %v4186_v50, %v4194_v37  ;;  %v13919_v58 = vcombine.high %v3707_v19, %v3715_v36  ;;  %v3779_v34 = vld [vmem:[#allocation8 + $0x270] sm:$0xff]  ;;  %v4266_v50 = vld [vmem:[#allocation8 + $0x11a8] sm:$0xff] }
 0x5c1   :  { %10810 = vmatprep.subr.bf16.mxu1 %v14333_v13  ;;  %v14413_v13 = vcombine.high %v4202_v63, %v4210_v49  ;;  %v4274_v37 = vld [vmem:[#allocation8 + $0x11e8] sm:$0xff] }
 0x5c3   :  { %10731 = vmatpush1.bf16.msra.mxu0 %v14858_v8  ;;  %v13918_v8 = vcombine.low %v3707_v19, %v3715_v36  ;;  %v3787_v19 = vld [vmem:[#allocation8 + $0x2b0] sm:$0xff] }
 0x5c4   :  { %10811 = vmatpush1.bf16.msra.mxu1 %v14332_v11  ;;  %10732 = vmatprep.subr.bf16.mxu0 %v14875_v5  ;;  %v14412_v11 = vcombine.low %v4202_v63, %v4210_v49  ;;  %v13935_v5 = vcombine.high %v3723_v3, %v3731_v4  ;;  %v3795_v36 = vld [vmem:[#allocation8 + $0x2f0] sm:$0xff]  ;;  %v4282_v63 = vld [vmem:[#allocation8 + $0x1228] sm:$0xff] }
 0x5c5   :  { %10812 = vmatprep.subr.bf16.mxu1 %v14349_v12  ;;  %v14429_v12 = vcombine.high %v4218_v6, %v4226_v7  ;;  %v4290_v49 = vld [vmem:[#allocation8 + $0x1268] sm:$0xff] }
 0x5c7   :  { %10733 = vmatpush1.bf16.msra.mxu0 %v14874_v62  ;;  %v13934_v62 = vcombine.low %v3723_v3, %v3731_v4  ;;  %v3803_v3 = vld [vmem:[#allocation8 + $0x330] sm:$0xff] }
 0x5c8   :  { %10813 = vmatpush1.bf16.msra.mxu1 %v14348_v0  ;;  %10734 = vmatprep.subr.bf16.mxu0 %v14891_v23  ;;  %v14428_v0 = vcombine.low %v4218_v6, %v4226_v7  ;;  %v13951_v23 = vcombine.high %v3739_v31, %v3747_v16  ;;  %v3811_v4 = vld [vmem:[#allocation8 + $0x370] sm:$0xff]  ;;  %v4298_v6 = vld [vmem:[#allocation8 + $0x12a8] sm:$0xff] }
 0x5c9   :  { %10814 = vmatprep.subr.bf16.mxu1 %v14365_v26  ;;  %v14445_v26 = vcombine.high %v4234_v18, %v4242_v20  ;;  %v4306_v7 = vld [vmem:[#allocation8 + $0x12e8] sm:$0xff] }
 0x5cb   :  { %10735 = vmatpush1.bf16.msra.mxu0 %v14890_v32  ;;  %v13950_v32 = vcombine.low %v3739_v31, %v3747_v16  ;;  %v3819_v31 = vld [vmem:[#allocation8 + $0x3b0] sm:$0xff] }
 0x5cc   :  { %10815 = vmatpush1.bf16.msra.mxu1 %v14364_v33  ;;  %10736 = vmatprep.subr.bf16.mxu0 %v14907_v44  ;;  %v14444_v33 = vcombine.low %v4234_v18, %v4242_v20  ;;  %v13967_v44 = vcombine.high %v3755_v27, %v3763_v28  ;;  %v3827_v16 = vld [vmem:[#allocation8 + $0x3f0] sm:$0xff]  ;;  %v4314_v18 = vld [vmem:[#allocation8 + $0x1328] sm:$0xff] }
 0x5cd   :  { %10816 = vmatprep.subr.bf16.mxu1 %v14381_v46  ;;  %v14461_v46 = vcombine.high %v4250_v29, %v4258_v24  ;;  %v4322_v20 = vld [vmem:[#allocation8 + $0x1368] sm:$0xff] }
 0x5cf   :  { %10737 = vmatpush1.bf16.msra.mxu0 %v14906_v40  ;;  %v13966_v40 = vcombine.low %v3755_v27, %v3763_v28  ;;  %v3835_v27 = vld [vmem:[#allocation8 + $0x430] sm:$0xff] }
 0x5d0   :  { %10817 = vmatpush1.bf16.msra.mxu1 %v14380_v41  ;;  %10738 = vmatprep.subr.bf16.mxu0 %v14923_v42  ;;  %v14460_v41 = vcombine.low %v4250_v29, %v4258_v24  ;;  %v13983_v42 = vcombine.high %v3771_v56, %v3779_v34  ;;  %v3843_v28 = vld [vmem:[#allocation8 + $0x470] sm:$0xff]  ;;  %v4330_v29 = vld [vmem:[#allocation8 + $0x13a8] sm:$0xff] }
 0x5d1   :  { %10818 = vmatprep.subr.bf16.mxu1 %v14397_v43  ;;  %v14477_v43 = vcombine.high %v4266_v50, %v4274_v37  ;;  %v4338_v24 = vld [vmem:[#allocation8 + $0x13e8] sm:$0xff] }
 0x5d3   :  { %10739 = vmatpush1.bf16.msra.mxu0 %v14922_v52  ;;  %v13982_v52 = vcombine.low %v3771_v56, %v3779_v34  ;;  %v3851_v56 = vld [vmem:[#allocation8 + $0x4b0] sm:$0xff] }
 0x5d4   :  { %10819 = vmatpush1.bf16.msra.mxu1 %v14396_v57  ;;  %10913 = vmatprep.subr.bf16.mxu0 %v13919_v58  ;;  %v14476_v57 = vcombine.low %v4266_v50, %v4274_v37  ;;  %v13999_v58 = vcombine.high %v3787_v19, %v3795_v36  ;;  %v3859_v34 = vld [vmem:[#allocation8 + $0x4f0] sm:$0xff]  ;;  %v4346_v50 = vld [vmem:[#allocation8 + $0x1428] sm:$0xff] }
 0x5d5   :  { %10820 = vmatprep.subr.bf16.mxu1 %v14413_v13  ;;  %v14493_v13 = vcombine.high %v4282_v63, %v4290_v49  ;;  %v4354_v37 = vld [vmem:[#allocation8 + $0x1468] sm:$0xff] }
 0x5d6   :  { %10741 = vmatmul.mubr.bf16.vlgmr.msra.gmra.mrb[16].mxu0 %v17236_v14 }
 0x5d7   :  { %10914 = vmatpush1.bf16.msra.mxu0 %v13918_v8  ;;  %10945 = vmatprep.mubr.bf16.mxu0 %v17136_v10  ;;  %v13998_v8 = vcombine.low %v3787_v19, %v3795_v36  ;;  %v3867_v19 = vld [vmem:[#allocation8 + $0x530] sm:$0xff] }
 0x5d8   :  { %10821 = vmatpush1.bf16.msra.mxu1 %v14412_v11  ;;  %10915 = vmatprep.subr.bf16.mxu0 %v13935_v5  ;;  %v14492_v11 = vcombine.low %v4282_v63, %v4290_v49  ;;  %v14015_v5 = vcombine.high %v3803_v3, %v3811_v4  ;;  %v3875_v36 = vld [vmem:[#allocation8 + $0x570] sm:$0xff]  ;;  %v4362_v63 = vld [vmem:[#allocation8 + $0x14a8] sm:$0xff] }
 0x5d9   :  { %10831 = vmatprep.subr.bf16.mxu1 %v14429_v12  ;;  %v14509_v12 = vcombine.high %v4298_v6, %v4306_v7  ;;  %v4370_v49 = vld [vmem:[#allocation8 + $0x14e8] sm:$0xff] }
 0x5db   :  { %10823 = vmatmul.mubr.bf16.vlgmr.msra.gmra.mrb[32].mxu1 %v17178_v47  ;;  %10916 = vmatpush1.bf16.msra.mxu0 %v13934_v62  ;;  %v14014_v62 = vcombine.low %v3803_v3, %v3811_v4  ;;  %v3883_v3 = vld [vmem:[#allocation8 + $0x5b0] sm:$0xff] }
 0x5dc   :  { %10832 = vmatpush1.bf16.msra.mxu1 %v14428_v0  ;;  %10863 = vmatprep.mubr.bf16.mxu1 %v17181_v54  ;;  %v14508_v0 = vcombine.low %v4298_v6, %v4306_v7  ;;  %v3891_v4 = vld [vmem:[#allocation8 + $0x5f0] sm:$0xff]  ;;  %v4378_v6 = vld [vmem:[#allocation8 + $0x1528] sm:$0xff] }
 0x5dd   :  { %10917 = vmatprep.subr.bf16.mxu0 %v13951_v23  ;;  %10833 = vmatprep.subr.bf16.mxu1 %v14445_v26  ;;  %v14031_v23 = vcombine.high %v3819_v31, %v3827_v16  ;;  %v14525_v26 = vcombine.high %v4314_v18, %v4322_v20  ;;  %v4386_v7 = vld [vmem:[#allocation8 + $0x1568] sm:$0xff] }
 0x5df   :  { %10918 = vmatpush1.bf16.msra.mxu0 %v13950_v32  ;;  %v14030_v32 = vcombine.low %v3819_v31, %v3827_v16  ;;  %v3899_v31 = vld [vmem:[#allocation8 + $0x630] sm:$0xff] }
 0x5e0   :  { %10834 = vmatpush1.bf16.msra.mxu1 %v14444_v33  ;;  %10919 = vmatprep.subr.bf16.mxu0 %v13967_v44  ;;  %v14524_v33 = vcombine.low %v4314_v18, %v4322_v20  ;;  %v14047_v44 = vcombine.high %v3835_v27, %v3843_v28  ;;  %v3907_v16 = vld [vmem:[#allocation8 + $0x670] sm:$0xff]  ;;  %v4394_v18 = vld [vmem:[#allocation8 + $0x15a8] sm:$0xff] }
 0x5e1   :  { %10835 = vmatprep.subr.bf16.mxu1 %v14461_v46  ;;  %v14541_v46 = vcombine.high %v4330_v29, %v4338_v24  ;;  %v4402_v20 = vld [vmem:[#allocation8 + $0x15e8] sm:$0xff] }
 0x5e3   :  { %10920 = vmatpush1.bf16.msra.mxu0 %v13966_v40  ;;  %v14046_v40 = vcombine.low %v3835_v27, %v3843_v28  ;;  %v3915_v27 = vld [vmem:[#allocation8 + $0x6b0] sm:$0xff] }
 0x5e4   :  { %10836 = vmatpush1.bf16.msra.mxu1 %v14460_v41  ;;  %10921 = vmatprep.subr.bf16.mxu0 %v13983_v42  ;;  %v14540_v41 = vcombine.low %v4330_v29, %v4338_v24  ;;  %v14063_v42 = vcombine.high %v3851_v56, %v3859_v34  ;;  %v3923_v28 = vld [vmem:[#allocation8 + $0x6f0] sm:$0xff]  ;;  %v4410_v29 = vld [vmem:[#allocation8 + $0x1628] sm:$0xff] }
 0x5e5   :  { %10837 = vmatprep.subr.bf16.mxu1 %v14477_v43  ;;  %v14557_v43 = vcombine.high %v4346_v50, %v4354_v37  ;;  %v4418_v24 = vld [vmem:[#allocation8 + $0x1668] sm:$0xff] }
 0x5e7   :  { %10922 = vmatpush1.bf16.msra.mxu0 %v13982_v52  ;;  %v14062_v52 = vcombine.low %v3851_v56, %v3859_v34  ;;  %v3931_v56 = vld [vmem:[#allocation8 + $0x730] sm:$0xff] }
 0x5e8   :  { %10838 = vmatpush1.bf16.msra.mxu1 %v14476_v57  ;;  %10923 = vmatprep.subr.bf16.mxu0 %v13999_v58  ;;  %v14556_v57 = vcombine.low %v4346_v50, %v4354_v37  ;;  %v14079_v58 = vcombine.high %v3867_v19, %v3875_v36  ;;  %v3939_v34 = vld [vmem:[#allocation8 + $0x770] sm:$0xff]  ;;  %v4426_v50 = vld [vmem:[#allocation8 + $0x16a8] sm:$0xff] }
 0x5e9   :  { %10839 = vmatprep.subr.bf16.mxu1 %v14493_v13  ;;  %v14573_v13 = vcombine.high %v4362_v63, %v4370_v49  ;;  %v4434_v37 = vld [vmem:[#allocation8 + $0x16e8] sm:$0xff] }
 0x5eb   :  { %10924 = vmatpush1.bf16.msra.mxu0 %v13998_v8  ;;  %v14078_v8 = vcombine.low %v3867_v19, %v3875_v36  ;;  %v3947_v19 = vld [vmem:[#allocation8 + $0x7b0] sm:$0xff] }
 0x5ec   :  { %10840 = vmatpush1.bf16.msra.mxu1 %v14492_v11  ;;  %10925 = vmatprep.subr.bf16.mxu0 %v14015_v5  ;;  %v14572_v11 = vcombine.low %v4362_v63, %v4370_v49  ;;  %v14095_v5 = vcombine.high %v3883_v3, %v3891_v4  ;;  %v3955_v36 = vld [vmem:[#allocation8 + $0x7f0] sm:$0xff]  ;;  %v4442_v63 = vld [vmem:[#allocation8 + $0x1728] sm:$0xff] }
 0x5ed   :  { %10841 = vmatprep.subr.bf16.mxu1 %v14509_v12  ;;  %v14589_v12 = vcombine.high %v4378_v6, %v4386_v7  ;;  %v4450_v49 = vld [vmem:[#allocation8 + $0x1768] sm:$0xff] }
 0x5ef   :  { %10926 = vmatpush1.bf16.msra.mxu0 %v14014_v62  ;;  %v14094_v62 = vcombine.low %v3883_v3, %v3891_v4  ;;  %v3963_v3 = vld [vmem:[#allocation8 + $0x830] sm:$0xff] }
 0x5f0   :  { %10842 = vmatpush1.bf16.msra.mxu1 %v14508_v0  ;;  %10927 = vmatprep.subr.bf16.mxu0 %v14031_v23  ;;  %v14588_v0 = vcombine.low %v4378_v6, %v4386_v7  ;;  %v14111_v23 = vcombine.high %v3899_v31, %v3907_v16  ;;  %v3971_v4 = vld [vmem:[#allocation8 + $0x870] sm:$0xff]  ;;  %v4458_v6 = vld [vmem:[#allocation8 + $0x17a8] sm:$0xff] }
 0x5f1   :  { %10843 = vmatprep.subr.bf16.mxu1 %v14525_v26  ;;  %v14605_v26 = vcombine.high %v4394_v18, %v4402_v20  ;;  %v4466_v7 = vld [vmem:[#allocation8 + $0x17e8] sm:$0xff] }
 0x5f3   :  { %10928 = vmatpush1.bf16.msra.mxu0 %v14030_v32  ;;  %v14110_v32 = vcombine.low %v3899_v31, %v3907_v16  ;;  %v3979_v31 = vld [vmem:[#allocation8 + $0x8b0] sm:$0xff] }
 0x5f4   :  { %10844 = vmatpush1.bf16.msra.mxu1 %v14524_v33  ;;  %10929 = vmatprep.subr.bf16.mxu0 %v14047_v44  ;;  %v14604_v33 = vcombine.low %v4394_v18, %v4402_v20  ;;  %v14127_v44 = vcombine.high %v3915_v27, %v3923_v28  ;;  %v3987_v16 = vld [vmem:[#allocation8 + $0x8f0] sm:$0xff]  ;;  %v4474_v18 = vld [vmem:[#allocation8 + $0x1828] sm:$0xff] }
 0x5f5   :  { %10845 = vmatprep.subr.bf16.mxu1 %v14541_v46  ;;  %v14621_v46 = vcombine.high %v4410_v29, %v4418_v24  ;;  %v4482_v20 = vld [vmem:[#allocation8 + $0x1868] sm:$0xff] }
 0x5f7   :  { %10930 = vmatpush1.bf16.msra.mxu0 %v14046_v40  ;;  %v14126_v40 = vcombine.low %v3915_v27, %v3923_v28  ;;  %v3995_v27 = vld [vmem:[#allocation8 + $0x930] sm:$0xff] }
 0x5f8   :  { %10846 = vmatpush1.bf16.msra.mxu1 %v14540_v41  ;;  %10931 = vmatprep.subr.bf16.mxu0 %v14063_v42  ;;  %v14620_v41 = vcombine.low %v4410_v29, %v4418_v24  ;;  %v14143_v42 = vcombine.high %v3931_v56, %v3939_v34  ;;  %v4003_v28 = vld [vmem:[#allocation8 + $0x970] sm:$0xff]  ;;  %v4490_v29 = vld [vmem:[#allocation8 + $0x18a8] sm:$0xff] }
 0x5f9   :  { %10847 = vmatprep.subr.bf16.mxu1 %v14557_v43  ;;  %v14637_v43 = vcombine.high %v4426_v50, %v4434_v37  ;;  %v4498_v24 = vld [vmem:[#allocation8 + $0x18e8] sm:$0xff] }
 0x5fb   :  { %10932 = vmatpush1.bf16.msra.mxu0 %v14062_v52  ;;  %v14142_v52 = vcombine.low %v3931_v56, %v3939_v34  ;;  %v4011_v56 = vld [vmem:[#allocation8 + $0x9b0] sm:$0xff] }
 0x5fc   :  { %10848 = vmatpush1.bf16.msra.mxu1 %v14556_v57  ;;  %10933 = vmatprep.subr.bf16.mxu0 %v14079_v58  ;;  %v14636_v57 = vcombine.low %v4426_v50, %v4434_v37  ;;  %v14159_v58 = vcombine.high %v3947_v19, %v3955_v36  ;;  %v4019_v34 = vld [vmem:[#allocation8 + $0x9f0] sm:$0xff]  ;;  %v4506_v50 = vld [vmem:[#allocation8 + $0x1928] sm:$0xff] }
 0x5fd   :  { %10849 = vmatprep.subr.bf16.mxu1 %v14573_v13  ;;  %v14653_v13 = vcombine.high %v4442_v63, %v4450_v49  ;;  %v4514_v37 = vld [vmem:[#allocation8 + $0x1968] sm:$0xff] }
 0x5ff   :  { %10934 = vmatpush1.bf16.msra.mxu0 %v14078_v8  ;;  %v14158_v8 = vcombine.low %v3947_v19, %v3955_v36  ;;  %v4027_v19 = vld [vmem:[#allocation8 + $0xa30] sm:$0xff] }
 0x600   :  { %10850 = vmatpush1.bf16.msra.mxu1 %v14572_v11  ;;  %10935 = vmatprep.subr.bf16.mxu0 %v14095_v5  ;;  %v14652_v11 = vcombine.low %v4442_v63, %v4450_v49  ;;  %v14175_v5 = vcombine.high %v3963_v3, %v3971_v4  ;;  %v4035_v36 = vld [vmem:[#allocation8 + $0xa70] sm:$0xff]  ;;  %v4522_v63 = vld [vmem:[#allocation8 + $0x19a8] sm:$0xff] }
 0x601   :  { %10851 = vmatprep.subr.bf16.mxu1 %v14589_v12  ;;  %v14669_v12 = vcombine.high %v4458_v6, %v4466_v7  ;;  %v4530_v49 = vld [vmem:[#allocation8 + $0x19e8] sm:$0xff] }
 0x603   :  { %10936 = vmatpush1.bf16.msra.mxu0 %v14094_v62  ;;  %v14174_v62 = vcombine.low %v3963_v3, %v3971_v4  ;;  %v4043_v3 = vld [vmem:[#allocation8 + $0xab0] sm:$0xff] }
 0x604   :  { %10852 = vmatpush1.bf16.msra.mxu1 %v14588_v0  ;;  %10937 = vmatprep.subr.bf16.mxu0 %v14111_v23  ;;  %v14668_v0 = vcombine.low %v4458_v6, %v4466_v7  ;;  %v14191_v23 = vcombine.high %v3979_v31, %v3987_v16  ;;  %v4051_v4 = vld [vmem:[#allocation8 + $0xaf0] sm:$0xff]  ;;  %v4538_v6 = vld [vmem:[#allocation8 + $0x1a28] sm:$0xff] }
 0x605   :  { %10853 = vmatprep.subr.bf16.mxu1 %v14605_v26  ;;  %v14685_v26 = vcombine.high %v4474_v18, %v4482_v20  ;;  %v4546_v7 = vld [vmem:[#allocation8 + $0x1a68] sm:$0xff] }
 0x607   :  { %10938 = vmatpush1.bf16.msra.mxu0 %v14110_v32  ;;  %v14190_v32 = vcombine.low %v3979_v31, %v3987_v16  ;;  %v4059_v31 = vld [vmem:[#allocation8 + $0xb30] sm:$0xff] }
 0x608   :  { %10854 = vmatpush1.bf16.msra.mxu1 %v14604_v33  ;;  %10939 = vmatprep.subr.bf16.mxu0 %v14127_v44  ;;  %v14684_v33 = vcombine.low %v4474_v18, %v4482_v20  ;;  %v14207_v44 = vcombine.high %v3995_v27, %v4003_v28  ;;  %v4067_v16 = vld [vmem:[#allocation8 + $0xb70] sm:$0xff]  ;;  %v4554_v18 = vld [vmem:[#allocation8 + $0x1aa8] sm:$0xff] }
 0x609   :  { %10855 = vmatprep.subr.bf16.mxu1 %v14621_v46  ;;  %v14701_v46 = vcombine.high %v4490_v29, %v4498_v24  ;;  %v4562_v20 = vld [vmem:[#allocation8 + $0x1ae8] sm:$0xff] }
 0x60b   :  { %10940 = vmatpush1.bf16.msra.mxu0 %v14126_v40  ;;  %v14206_v40 = vcombine.low %v3995_v27, %v4003_v28  ;;  %v4075_v27 = vld [vmem:[#allocation8 + $0xbb0] sm:$0xff] }
 0x60c   :  { %10856 = vmatpush1.bf16.msra.mxu1 %v14620_v41  ;;  %10941 = vmatprep.subr.bf16.mxu0 %v14143_v42  ;;  %v14700_v41 = vcombine.low %v4490_v29, %v4498_v24  ;;  %v14223_v42 = vcombine.high %v4011_v56, %v4019_v34  ;;  %v4083_v28 = vld [vmem:[#allocation8 + $0xbf0] sm:$0xff]  ;;  %v4570_v29 = vld [vmem:[#allocation8 + $0x1b28] sm:$0xff] }
 0x60d   :  { %10857 = vmatprep.subr.bf16.mxu1 %v14637_v43  ;;  %v14717_v43 = vcombine.high %v4506_v50, %v4514_v37  ;;  %v4578_v24 = vld [vmem:[#allocation8 + $0x1b68] sm:$0xff] }
 0x60f   :  { %10942 = vmatpush1.bf16.msra.mxu0 %v14142_v52  ;;  %v14222_v52 = vcombine.low %v4011_v56, %v4019_v34  ;;  %v4091_v56 = vld [vmem:[#allocation8 + $0xc30] sm:$0xff] }
 0x610   :  { %10858 = vmatpush1.bf16.msra.mxu1 %v14636_v57  ;;  %10943 = vmatprep.subr.bf16.mxu0 %v14159_v58  ;;  %v14716_v57 = vcombine.low %v4506_v50, %v4514_v37  ;;  %v14239_v58 = vcombine.high %v4027_v19, %v4035_v36  ;;  %v4099_v34 = vld [vmem:[#allocation8 + $0xc70] sm:$0xff]  ;;  %v4586_v37 = vld [vmem:[#allocation8 + $0x1ba8] sm:$0xff] }
 0x611   :  { %10859 = vmatprep.subr.bf16.mxu1 %v14653_v13  ;;  %v14733_v13 = vcombine.high %v4522_v63, %v4530_v49 }
 0x613   :  { %10944 = vmatpush1.bf16.msra.mxu0 %v14158_v8  ;;  %v14238_v8 = vcombine.low %v4027_v19, %v4035_v36  ;;  %v14780_v19 = vcombine.low %v4570_v29, %v4578_v24  ;;  %v14303_v36 = vcombine.high %v4091_v56, %v4099_v34 }
 0x614   :  { %10860 = vmatpush1.bf16.msra.mxu1 %v14652_v11  ;;  %10954 = vmatprep.subr.bf16.mxu0 %v14175_v5  ;;  %v14732_v11 = vcombine.low %v4522_v63, %v4530_v49  ;;  %v14255_v5 = vcombine.high %v4043_v3, %v4051_v4 }
 0x615   :  { %10861 = vmatprep.subr.bf16.mxu1 %v14669_v12  ;;  %v14749_v12 = vcombine.high %v4538_v6, %v4546_v7 }
 0x616   :  { %10946 = vmatmul.mubr.bf16.vlgmr.msra.gmra.mrb[20].mxu0 %v17138_v15 }
 0x617   :  { %10955 = vmatpush1.bf16.msra.mxu0 %v14174_v62  ;;  %10986 = vmatprep.mubr.bf16.mxu0 %v17176_v45  ;;  %v14254_v62 = vcombine.low %v4043_v3, %v4051_v4  ;;  %v14302_v3 = vcombine.low %v4091_v56, %v4099_v34 }
 0x618   :  { %10862 = vmatpush1.bf16.msra.mxu1 %v14668_v0  ;;  %10956 = vmatprep.subr.bf16.mxu0 %v14191_v23  ;;  %v14748_v0 = vcombine.low %v4538_v6, %v4546_v7  ;;  %v14271_v23 = vcombine.high %v4059_v31, %v4067_v16 }
 0x619   :  { %10872 = vmatprep.subr.bf16.mxu1 %v14685_v26  ;;  %v14765_v26 = vcombine.high %v4554_v18, %v4562_v20 }
 0x61b   :  { %10864 = vmatmul.mubr.bf16.vlgmr.msra.gmra.mrb[32].mxu1 %v17212_v39  ;;  %10957 = vmatpush1.bf16.msra.mxu0 %v14190_v32  ;;  %v14270_v32 = vcombine.low %v4059_v31, %v4067_v16 }
 0x61c   :  { %10873 = vmatpush1.bf16.msra.mxu1 %v14684_v33  ;;  %10904 = vmatprep.mubr.bf16.mxu1 %v17234_v59  ;;  %v14764_v33 = vcombine.low %v4554_v18, %v4562_v20 }
 0x61d   :  { %10958 = vmatprep.subr.bf16.mxu0 %v14207_v44  ;;  %10874 = vmatprep.subr.bf16.mxu1 %v14701_v46  ;;  %v14287_v44 = vcombine.high %v4075_v27, %v4083_v28  ;;  %v14781_v46 = vcombine.high %v4570_v29, %v4578_v24 }
 0x61f   :  { %10959 = vmatpush1.bf16.msra.mxu0 %v14206_v40  ;;  %v4594_v40 = vld [vmem:[#allocation8 + $0x1be8] sm:$0xff] }
 0x620   :  { %10875 = vmatpush1.bf16.msra.mxu1 %v14700_v41  ;;  %10960 = vmatprep.subr.bf16.mxu0 %v14223_v42  ;;  %v14286_v42 = vcombine.low %v4075_v27, %v4083_v28  ;;  %v14797_v49 = vcombine.high %v4586_v37, %v4594_v40  ;;  %v14796_v4 = vcombine.low %v4586_v37, %v4594_v40 }
 0x621   :  { %10876 = vmatprep.subr.bf16.mxu1 %v14717_v43 }
 0x623   :  { %10961 = vmatpush1.bf16.msra.mxu0 %v14222_v52  ;;  %v4107_v52 = vld [vmem:[#allocation8 + $0xcb0] sm:$0xff] }
 0x624   :  { %10877 = vmatpush1.bf16.msra.mxu1 %v14716_v57  ;;  %10962 = vmatprep.subr.bf16.mxu0 %v14239_v58  ;;  %v4115_v57 = vld [vmem:[#allocation8 + $0xcf0] sm:$0xff]  ;;  %v4602_v58 = vld [vmem:[#allocation8 + $0x1c28] sm:$0xff] }
 0x625   :  { %10878 = vmatprep.subr.bf16.mxu1 %v14733_v13  ;;  %v4610_v13 = vld [vmem:[#allocation8 + $0x1c68] sm:$0xff]  ;;  %v14319_v6 = vcombine.high %v4107_v52, %v4115_v57  ;;  %v14318_v31 = vcombine.low %v4107_v52, %v4115_v57 }
 0x626   :  { %v14813_v7 = vcombine.high %v4602_v58, %v4610_v13  ;;  %v14812_v16 = vcombine.low %v4602_v58, %v4610_v13  ;;  %v4187_v58 = vld [vmem:[#allocation8 + $0xf30] sm:$0xff] }
 0x627   :  { %10963 = vmatpush1.bf16.msra.mxu0 %v14238_v8  ;;  %v4123_v8 = vld [vmem:[#allocation8 + $0xd30] sm:$0xff] }
 0x628   :  { %10879 = vmatpush1.bf16.msra.mxu1 %v14732_v11  ;;  %10964 = vmatprep.subr.bf16.mxu0 %v14255_v5  ;;  %v4131_v11 = vld [vmem:[#allocation8 + $0xd70] sm:$0xff]  ;;  %v4618_v5 = vld [vmem:[#allocation8 + $0x1ca8] sm:$0xff] }
 0x629   :  { %10880 = vmatprep.subr.bf16.mxu1 %v14749_v12  ;;  %v4626_v12 = vld [vmem:[#allocation8 + $0x1ce8] sm:$0xff]  ;;  %v14335_v18 = vcombine.high %v4123_v8, %v4131_v11  ;;  %v14334_v27 = vcombine.low %v4123_v8, %v4131_v11  ;;  %v4195_v13 = vld [vmem:[#allocation8 + $0xf70] sm:$0xff] }
 0x62a   :  { %v14829_v20 = vcombine.high %v4618_v5, %v4626_v12  ;;  %v14828_v28 = vcombine.low %v4618_v5, %v4626_v12  ;;  %v14399_v8 = vcombine.high %v4187_v58, %v4195_v13  ;;  %v4203_v5 = vld [vmem:[#allocation8 + $0xfb0] sm:$0xff] }
 0x62b   :  { %10965 = vmatpush1.bf16.msra.mxu0 %v14254_v62  ;;  %v4139_v62 = vld [vmem:[#allocation8 + $0xdb0] sm:$0xff] }
 0x62c   :  { %10881 = vmatpush1.bf16.msra.mxu1 %v14748_v0  ;;  %10966 = vmatprep.subr.bf16.mxu0 %v14271_v23  ;;  %v4147_v0 = vld [vmem:[#allocation8 + $0xdf0] sm:$0xff]  ;;  %v4634_v23 = vld [vmem:[#allocation8 + $0x1d28] sm:$0xff] }
 0x62d   :  { %10882 = vmatprep.subr.bf16.mxu1 %v14765_v26  ;;  %v4642_v26 = vld [vmem:[#allocation8 + $0x1d68] sm:$0xff]  ;;  %v14351_v29 = vcombine.high %v4139_v62, %v4147_v0  ;;  %v14350_v56 = vcombine.low %v4139_v62, %v4147_v0  ;;  %v4211_v12 = vld [vmem:[#allocation8 + $0xff0] sm:$0xff] }
 0x62e   :  { %v17303_v50 = vpop.f32.mrb[28].mxu1  ;;  %v14845_v24 = vcombine.high %v4634_v23, %v4642_v26  ;;  %v14844_v34 = vcombine.low %v4634_v23, %v4642_v26  ;;  %v14415_v62 = vcombine.high %v4203_v5, %v4211_v12  ;;  %v4219_v23 = vld [vmem:[#allocation8 + $0x1030] sm:$0xff] }
 0x62f   :  { %v17305_v41 = vpop.f32.mrb[29].mxu1  ;;  %10967 = vmatpush1.bf16.msra.mxu0 %v14270_v32  ;;  %v4155_v32 = vld [vmem:[#allocation8 + $0xe30] sm:$0xff] }
 0x630   :  { %v10582_v43 = vpop.f32.mrb[30].mxu1  ;;  %10883 = vmatpush1.bf16.msra.mxu1 %v14764_v33  ;;  %10968 = vmatprep.subr.bf16.mxu0 %v14287_v44  ;;  %v4163_v33 = vld [vmem:[#allocation8 + $0xe70] sm:$0xff]  ;;  %v4650_v44 = vld [vmem:[#allocation8 + $0x1da8] sm:$0xff] }
 0x631   :  { %v10583_v63 = vpop.f32.mrb[31].mxu1  ;;  %10884 = vmatprep.subr.bf16.mxu1 %v14781_v46  ;;  %v4658_v46 = vld [vmem:[#allocation8 + $0x1de8] sm:$0xff]  ;;  %v14367_v37 = vcombine.high %v4155_v32, %v4163_v33  ;;  %v4179_v43 = vld [vmem:[#allocation8 + $0xef0] sm:$0xff] }
 0x632   :  { %v14861_v40 = vcombine.high %v4650_v44, %v4658_v46  ;;  %v14366_v63 = vcombine.low %v4155_v32, %v4163_v33  ;;  %v4227_v26 = vld [vmem:[#allocation8 + $0x1070] sm:$0xff] }
 0x633   :  { %10969 = vmatpush1.bf16.msra.mxu0 %v14286_v42  ;;  %v4171_v42 = vld [vmem:[#allocation8 + $0xeb0] sm:$0xff]  ;;  %v14431_v32 = vcombine.high %v4219_v23, %v4227_v26 }
 0x634   :  { %10885 = vmatpush1.bf16.msra.mxu1 %v14780_v19  ;;  %10970 = vmatprep.subr.bf16.mxu0 %v14303_v36  ;;  %v4666_v19 = vld [vmem:[#allocation8 + $0x1e28] sm:$0xff]  ;;  %v14383_v52 = vcombine.high %v4171_v42, %v4179_v43 }
 0x635   :  { %10886 = vmatprep.subr.bf16.mxu1 %v14797_v49  ;;  %v4674_v36 = vld [vmem:[#allocation8 + $0x1e68] sm:$0xff]  ;;  %v14860_v49 = vcombine.low %v4650_v44, %v4658_v46  ;;  %v4235_v44 = vld [vmem:[#allocation8 + $0x10b0] sm:$0xff] }
 0x636   :  { %v14877_v57 = vcombine.high %v4666_v19, %v4674_v36  ;;  %v4243_v46 = vld [vmem:[#allocation8 + $0x10f0] sm:$0xff] }
 0x637   :  { %10971 = vmatpush1.bf16.msra.mxu0 %v14302_v3  ;;  %v4682_v3 = vld [vmem:[#allocation8 + $0x1ea8] sm:$0xff] }
 0x638   :  { %10887 = vmatpush1.bf16.msra.mxu1 %v14796_v4  ;;  %10972 = vmatprep.subr.bf16.mxu0 %v14319_v6  ;;  %v4690_v4 = vld [vmem:[#allocation8 + $0x1ee8] sm:$0xff]  ;;  %v14382_v6 = vcombine.low %v4171_v42, %v4179_v43  ;;  %v14447_v42 = vcombine.high %v4235_v44, %v4243_v46 }
 0x639   :  { %10888 = vmatprep.subr.bf16.mxu1 %v14813_v7  ;;  %v14876_v7 = vcombine.low %v4666_v19, %v4674_v36  ;;  %v14893_v11 = vcombine.high %v4682_v3, %v4690_v4  ;;  %v4251_v19 = vld [vmem:[#allocation8 + $0x1130] sm:$0xff] }
 0x63a   :  { %v4259_v36 = vld [vmem:[#allocation8 + $0x1170] sm:$0xff] }
 0x63b   :  { %10973 = vmatpush1.bf16.msra.mxu0 %v14318_v31  ;;  %v4698_v31 = vld [vmem:[#allocation8 + $0x1f28] sm:$0xff] }
 0x63c   :  { %10889 = vmatpush1.bf16.msra.mxu1 %v14812_v16  ;;  %10974 = vmatprep.subr.bf16.mxu0 %v14335_v18  ;;  %v4706_v16 = vld [vmem:[#allocation8 + $0x1f68] sm:$0xff]  ;;  %v14398_v18 = vcombine.low %v4187_v58, %v4195_v13  ;;  %v14463_v58 = vcombine.high %v4251_v19, %v4259_v36 }
 0x63d   :  { %10890 = vmatprep.subr.bf16.mxu1 %v14829_v20  ;;  %v14892_v20 = vcombine.low %v4682_v3, %v4690_v4  ;;  %v14909_v0 = vcombine.high %v4698_v31, %v4706_v16  ;;  %v4267_v3 = vld [vmem:[#allocation8 + $0x11b0] sm:$0xff] }
 0x63e   :  { %v4275_v4 = vld [vmem:[#allocation8 + $0x11f0] sm:$0xff] }
 0x63f   :  { %10975 = vmatpush1.bf16.msra.mxu0 %v14334_v27  ;;  %v4714_v27 = vld [vmem:[#allocation8 + $0x1fa8] sm:$0xff] }
 0x640   :  { %10891 = vmatpush1.bf16.msra.mxu1 %v14828_v28  ;;  %10976 = vmatprep.subr.bf16.mxu0 %v14351_v29  ;;  %v4722_v28 = vld [vmem:[#allocation8 + $0x1fe8] sm:$0xff]  ;;  %v14414_v29 = vcombine.low %v4203_v5, %v4211_v12  ;;  %v14479_v5 = vcombine.high %v4267_v3, %v4275_v4 }
 0x641   :  { %10892 = vmatprep.subr.bf16.mxu1 %v14845_v24  ;;  %v14908_v24 = vcombine.low %v4698_v31, %v4706_v16  ;;  %v14925_v33 = vcombine.high %v4714_v27, %v4722_v28  ;;  %v4283_v31 = vld [vmem:[#allocation8 + $0x1230] sm:$0xff] }
 0x642   :  { %v4291_v16 = vld [vmem:[#allocation8 + $0x1270] sm:$0xff] }
 0x643   :  { %10977 = vmatpush1.bf16.msra.mxu0 %v14350_v56  ;;  %v3708_v56 = vld [vmem:[#allocation8 + $0x38] sm:$0xff] }
 0x644   :  { %10893 = vmatpush1.bf16.msra.mxu1 %v14844_v34  ;;  %10978 = vmatprep.subr.bf16.mxu0 %v14367_v37  ;;  %v3716_v34 = vld [vmem:[#allocation8 + $0x78] sm:$0xff]  ;;  %v14430_v37 = vcombine.low %v4219_v23, %v4227_v26  ;;  %v14495_v23 = vcombine.high %v4283_v31, %v4291_v16 }
 0x645   :  { %10894 = vmatprep.subr.bf16.mxu1 %v14861_v40  ;;  %v14924_v40 = vcombine.low %v4714_v27, %v4722_v28  ;;  %v13921_v43 = vcombine.high %v3708_v56, %v3716_v34  ;;  %v4299_v27 = vld [vmem:[#allocation8 + $0x12b0] sm:$0xff] }
 0x646   :  { %v4307_v28 = vld [vmem:[#allocation8 + $0x12f0] sm:$0xff] }
 0x647   :  { %10979 = vmatpush1.bf16.msra.mxu0 %v14366_v63  ;;  %v3724_v63 = vld [vmem:[#allocation8 + $0xb8] sm:$0xff] }
 0x648   :  { %10895 = vmatpush1.bf16.msra.mxu1 %v14860_v49  ;;  %10980 = vmatprep.subr.bf16.mxu0 %v14383_v52  ;;  %v3732_v49 = vld [vmem:[#allocation8 + $0xf8] sm:$0xff]  ;;  %v14446_v52 = vcombine.low %v4235_v44, %v4243_v46  ;;  %v4315_v46 = vld [vmem:[#allocation8 + $0x1330] sm:$0xff] }
 0x649   :  { %10896 = vmatprep.subr.bf16.mxu1 %v14877_v57  ;;  %v13920_v57 = vcombine.low %v3708_v56, %v3716_v34  ;;  %v13937_v13 = vcombine.high %v3724_v63, %v3732_v49  ;;  %v4323_v56 = vld [vmem:[#allocation8 + $0x1370] sm:$0xff]  ;;  %v3788_v34 = vld [vmem:[#allocation8 + $0x2b8] sm:$0xff] }
 0x64b   :  { %10981 = vmatpush1.bf16.msra.mxu0 %v14382_v6  ;;  %v3740_v6 = vld [vmem:[#allocation8 + $0x138] sm:$0xff] }
 0x64c   :  { %10897 = vmatpush1.bf16.msra.mxu1 %v14876_v7  ;;  %10982 = vmatprep.subr.bf16.mxu0 %v14399_v8  ;;  %v3748_v7 = vld [vmem:[#allocation8 + $0x178] sm:$0xff]  ;;  %v14462_v8 = vcombine.low %v4251_v19, %v4259_v36  ;;  %v4331_v36 = vld [vmem:[#allocation8 + $0x13b0] sm:$0xff] }
 0x64d   :  { %10898 = vmatprep.subr.bf16.mxu1 %v14893_v11  ;;  %v13936_v11 = vcombine.low %v3724_v63, %v3732_v49  ;;  %v13953_v12 = vcombine.high %v3740_v6, %v3748_v7  ;;  %v4339_v63 = vld [vmem:[#allocation8 + $0x13f0] sm:$0xff]  ;;  %v3804_v49 = vld [vmem:[#allocation8 + $0x338] sm:$0xff] }
 0x64f   :  { %10983 = vmatpush1.bf16.msra.mxu0 %v14398_v18  ;;  %v3756_v18 = vld [vmem:[#allocation8 + $0x1b8] sm:$0xff] }
 0x650   :  { %10899 = vmatpush1.bf16.msra.mxu1 %v14892_v20  ;;  %10984 = vmatprep.subr.bf16.mxu0 %v14415_v62  ;;  %v3764_v20 = vld [vmem:[#allocation8 + $0x1f8] sm:$0xff]  ;;  %v14478_v62 = vcombine.low %v4267_v3, %v4275_v4  ;;  %v4347_v4 = vld [vmem:[#allocation8 + $0x1430] sm:$0xff] }
 0x651   :  { %10900 = vmatprep.subr.bf16.mxu1 %v14909_v0  ;;  %v13952_v0 = vcombine.low %v3740_v6, %v3748_v7  ;;  %v13969_v26 = vcombine.high %v3756_v18, %v3764_v20  ;;  %v4355_v6 = vld [vmem:[#allocation8 + $0x1470] sm:$0xff]  ;;  %v3820_v7 = vld [vmem:[#allocation8 + $0x3b8] sm:$0xff] }
 0x653   :  { %10985 = vmatpush1.bf16.msra.mxu0 %v14414_v29  ;;  %v3780_v29 = vld [vmem:[#allocation8 + $0x278] sm:$0xff] }
 0x654   :  { %10901 = vmatpush1.bf16.msra.mxu1 %v14908_v24  ;;  %10995 = vmatprep.subr.bf16.mxu0 %v14431_v32  ;;  %v14494_v24 = vcombine.low %v4283_v31, %v4291_v16  ;;  %v13968_v32 = vcombine.low %v3756_v18, %v3764_v20  ;;  %v4363_v16 = vld [vmem:[#allocation8 + $0x14b0] sm:$0xff]  ;;  %v3836_v20 = vld [vmem:[#allocation8 + $0x438] sm:$0xff] }
 0x655   :  { %10902 = vmatprep.subr.bf16.mxu1 %v14925_v33  ;;  %v14511_v33 = vcombine.high %v4299_v27, %v4307_v28  ;;  %v4371_v18 = vld [vmem:[#allocation8 + $0x14f0] sm:$0xff] }
 0x656   :  { %10987 = vmatmul.mubr.bf16.vlgmr.msra.gmra.mrb[20].mxu0 %v17178_v47 }
 0x657   :  { %10996 = vmatpush1.bf16.msra.mxu0 %v14430_v37  ;;  %11027 = vmatprep.mubr.bf16.mxu0 %v17181_v54  ;;  %v3796_v37 = vld [vmem:[#allocation8 + $0x2f8] sm:$0xff] }
 0x658   :  { %10903 = vmatpush1.bf16.msra.mxu1 %v14924_v40  ;;  %10997 = vmatprep.subr.bf16.mxu0 %v14447_v42  ;;  %v14510_v40 = vcombine.low %v4299_v27, %v4307_v28  ;;  %v14001_v19 = vcombine.high %v3788_v34, %v3796_v37  ;;  %v4379_v28 = vld [vmem:[#allocation8 + $0x1530] sm:$0xff] }
 0x659   :  { %11077 = vmatprep.subr.bf16.mxu1 %v13921_v43  ;;  %v14527_v43 = vcombine.high %v4315_v46, %v4323_v56 }
 0x65b   :  { %10905 = vmatmul.mubr.bf16.vlgmr.msra.gmra.mrb[32].mxu1 %v17236_v14  ;;  %10998 = vmatpush1.bf16.msra.mxu0 %v14446_v52  ;;  %v3812_v52 = vld [vmem:[#allocation8 + $0x378] sm:$0xff] }
 0x65c   :  { %11078 = vmatpush1.bf16.msra.mxu1 %v13920_v57  ;;  %11109 = vmatprep.mubr.bf16.mxu1 %v17136_v10  ;;  %v3772_v10 = vld [vmem:[#allocation8 + $0x238] sm:$0xff]  ;;  %v14526_v57 = vcombine.low %v4315_v46, %v4323_v56  ;;  %v14017_v3 = vcombine.high %v3804_v49, %v3812_v52  ;;  %v4395_v56 = vld [vmem:[#allocation8 + $0x15b0] sm:$0xff] }
 0x65d   :  { %10999 = vmatprep.subr.bf16.mxu0 %v14463_v58  ;;  %11079 = vmatprep.subr.bf16.mxu1 %v13937_v13  ;;  %v13985_v44 = vcombine.high %v3772_v10, %v3780_v29  ;;  %v13984_v42 = vcombine.low %v3772_v10, %v3780_v29  ;;  %v14000_v58 = vcombine.low %v3788_v34, %v3796_v37  ;;  %v4387_v10 = vld [vmem:[#allocation8 + $0x1570] sm:$0xff]  ;;  %v3852_v29 = vld [vmem:[#allocation8 + $0x4b8] sm:$0xff] }
 0x65e   :  { %v14543_v13 = vcombine.high %v4331_v36, %v4339_v63  ;;  %v4403_v34 = vld [vmem:[#allocation8 + $0x15f0] sm:$0xff]  ;;  %v3868_v37 = vld [vmem:[#allocation8 + $0x538] sm:$0xff] }
 0x65f   :  { %11000 = vmatpush1.bf16.msra.mxu0 %v14462_v8  ;;  %v3828_v8 = vld [vmem:[#allocation8 + $0x3f8] sm:$0xff] }
 0x660   :  { %11080 = vmatpush1.bf16.msra.mxu1 %v13936_v11  ;;  %11001 = vmatprep.subr.bf16.mxu0 %v14479_v5  ;;  %v14542_v11 = vcombine.low %v4331_v36, %v4339_v63  ;;  %v14016_v5 = vcombine.low %v3804_v49, %v3812_v52  ;;  %v14033_v31 = vcombine.high %v3820_v7, %v3828_v8  ;;  %v4411_v63 = vld [vmem:[#allocation8 + $0x1630] sm:$0xff]  ;;  %v3884_v52 = vld [vmem:[#allocation8 + $0x5b8] sm:$0xff] }
 0x661   :  { %11081 = vmatprep.subr.bf16.mxu1 %v13953_v12  ;;  %v14559_v12 = vcombine.high %v4347_v4, %v4355_v6  ;;  %v4419_v49 = vld [vmem:[#allocation8 + $0x1670] sm:$0xff] }
 0x663   :  { %11002 = vmatpush1.bf16.msra.mxu0 %v14478_v62  ;;  %v3844_v62 = vld [vmem:[#allocation8 + $0x478] sm:$0xff] }
 0x664   :  { %11082 = vmatpush1.bf16.msra.mxu1 %v13952_v0  ;;  %11003 = vmatprep.subr.bf16.mxu0 %v14495_v23  ;;  %v14558_v0 = vcombine.low %v4347_v4, %v4355_v6  ;;  %v14032_v23 = vcombine.low %v3820_v7, %v3828_v8  ;;  %v14049_v27 = vcombine.high %v3836_v20, %v3844_v62  ;;  %v4427_v6 = vld [vmem:[#allocation8 + $0x16b0] sm:$0xff]  ;;  %v3900_v8 = vld [vmem:[#allocation8 + $0x638] sm:$0xff] }
 0x665   :  { %11083 = vmatprep.subr.bf16.mxu1 %v13969_v26  ;;  %v14575_v26 = vcombine.high %v4363_v16, %v4371_v18  ;;  %v4435_v7 = vld [vmem:[#allocation8 + $0x16f0] sm:$0xff] }
 0x667   :  { %11004 = vmatpush1.bf16.msra.mxu0 %v14494_v24  ;;  %v3860_v24 = vld [vmem:[#allocation8 + $0x4f8] sm:$0xff] }
 0x668   :  { %11084 = vmatpush1.bf16.msra.mxu1 %v13968_v32  ;;  %11005 = vmatprep.subr.bf16.mxu0 %v14511_v33  ;;  %v14574_v32 = vcombine.low %v4363_v16, %v4371_v18  ;;  %v14048_v33 = vcombine.low %v3836_v20, %v3844_v62  ;;  %v14065_v46 = vcombine.high %v3852_v29, %v3860_v24  ;;  %v4443_v18 = vld [vmem:[#allocation8 + $0x1730] sm:$0xff]  ;;  %v3916_v62 = vld [vmem:[#allocation8 + $0x6b8] sm:$0xff] }
 0x669   :  { %11085 = vmatprep.subr.bf16.mxu1 %v13985_v44  ;;  %v14591_v44 = vcombine.high %v4379_v28, %v4387_v10  ;;  %v4451_v20 = vld [vmem:[#allocation8 + $0x1770] sm:$0xff] }
 0x66b   :  { %11006 = vmatpush1.bf16.msra.mxu0 %v14510_v40  ;;  %v3876_v40 = vld [vmem:[#allocation8 + $0x578] sm:$0xff] }
 0x66c   :  { %11086 = vmatpush1.bf16.msra.mxu1 %v13984_v42  ;;  %11007 = vmatprep.subr.bf16.mxu0 %v14527_v43  ;;  %v14590_v42 = vcombine.low %v4379_v28, %v4387_v10  ;;  %v14064_v43 = vcombine.low %v3852_v29, %v3860_v24  ;;  %v14081_v36 = vcombine.high %v3868_v37, %v3876_v40  ;;  %v4459_v10 = vld [vmem:[#allocation8 + $0x17b0] sm:$0xff]  ;;  %v3932_v24 = vld [vmem:[#allocation8 + $0x738] sm:$0xff] }
 0x66d   :  { %11087 = vmatprep.subr.bf16.mxu1 %v14001_v19  ;;  %v14607_v19 = vcombine.high %v4395_v56, %v4403_v34  ;;  %v4467_v29 = vld [vmem:[#allocation8 + $0x17f0] sm:$0xff] }
 0x66f   :  { %11008 = vmatpush1.bf16.msra.mxu0 %v14526_v57  ;;  %v3892_v57 = vld [vmem:[#allocation8 + $0x5f8] sm:$0xff] }
 0x670   :  { %11088 = vmatpush1.bf16.msra.mxu1 %v14000_v58  ;;  %11009 = vmatprep.subr.bf16.mxu0 %v14543_v13  ;;  %v14606_v58 = vcombine.low %v4395_v56, %v4403_v34  ;;  %v14080_v13 = vcombine.low %v3868_v37, %v3876_v40  ;;  %v14097_v4 = vcombine.high %v3884_v52, %v3892_v57  ;;  %v4475_v34 = vld [vmem:[#allocation8 + $0x1830] sm:$0xff]  ;;  %v3948_v40 = vld [vmem:[#allocation8 + $0x7b8] sm:$0xff] }
 0x671   :  { %11089 = vmatprep.subr.bf16.mxu1 %v14017_v3  ;;  %v14623_v3 = vcombine.high %v4411_v63, %v4419_v49  ;;  %v4483_v37 = vld [vmem:[#allocation8 + $0x1870] sm:$0xff] }
 0x673   :  { %11010 = vmatpush1.bf16.msra.mxu0 %v14542_v11  ;;  %v3908_v11 = vld [vmem:[#allocation8 + $0x678] sm:$0xff] }
 0x674   :  { %11090 = vmatpush1.bf16.msra.mxu1 %v14016_v5  ;;  %11011 = vmatprep.subr.bf16.mxu0 %v14559_v12  ;;  %v14622_v5 = vcombine.low %v4411_v63, %v4419_v49  ;;  %v14096_v12 = vcombine.low %v3884_v52, %v3892_v57  ;;  %v14113_v16 = vcombine.high %v3900_v8, %v3908_v11  ;;  %v4491_v49 = vld [vmem:[#allocation8 + $0x18b0] sm:$0xff]  ;;  %v3964_v57 = vld [vmem:[#allocation8 + $0x838] sm:$0xff] }
 0x675   :  { %11091 = vmatprep.subr.bf16.mxu1 %v14033_v31  ;;  %v14639_v31 = vcombine.high %v4427_v6, %v4435_v7  ;;  %v4499_v52 = vld [vmem:[#allocation8 + $0x18f0] sm:$0xff] }
 0x677   :  { %11012 = vmatpush1.bf16.msra.mxu0 %v14558_v0  ;;  %v3924_v0 = vld [vmem:[#allocation8 + $0x6f8] sm:$0xff] }
 0x678   :  { %11092 = vmatpush1.bf16.msra.mxu1 %v14032_v23  ;;  %11013 = vmatprep.subr.bf16.mxu0 %v14575_v26  ;;  %v14638_v23 = vcombine.low %v4427_v6, %v4435_v7  ;;  %v14112_v26 = vcombine.low %v3900_v8, %v3908_v11  ;;  %v14129_v28 = vcombine.high %v3916_v62, %v3924_v0  ;;  %v4507_v7 = vld [vmem:[#allocation8 + $0x1930] sm:$0xff]  ;;  %v3980_v11 = vld [vmem:[#allocation8 + $0x8b8] sm:$0xff] }
 0x679   :  { %11093 = vmatprep.subr.bf16.mxu1 %v14049_v27  ;;  %v14655_v27 = vcombine.high %v4443_v18, %v4451_v20  ;;  %v4515_v8 = vld [vmem:[#allocation8 + $0x1970] sm:$0xff] }
 0x67b   :  { %11014 = vmatpush1.bf16.msra.mxu0 %v14574_v32  ;;  %v3940_v32 = vld [vmem:[#allocation8 + $0x778] sm:$0xff] }
 0x67c   :  { %11094 = vmatpush1.bf16.msra.mxu1 %v14048_v33  ;;  %11015 = vmatprep.subr.bf16.mxu0 %v14591_v44  ;;  %v14654_v33 = vcombine.low %v4443_v18, %v4451_v20  ;;  %v14128_v44 = vcombine.low %v3916_v62, %v3924_v0  ;;  %v14145_v56 = vcombine.high %v3932_v24, %v3940_v32  ;;  %v4523_v20 = vld [vmem:[#allocation8 + $0x19b0] sm:$0xff]  ;;  %v3996_v0 = vld [vmem:[#allocation8 + $0x938] sm:$0xff] }
 0x67d   :  { %11095 = vmatprep.subr.bf16.mxu1 %v14065_v46  ;;  %v14671_v46 = vcombine.high %v4459_v10, %v4467_v29  ;;  %v4531_v62 = vld [vmem:[#allocation8 + $0x19f0] sm:$0xff] }
 0x67f   :  { %11016 = vmatpush1.bf16.msra.mxu0 %v14590_v42  ;;  %v3956_v42 = vld [vmem:[#allocation8 + $0x7f8] sm:$0xff] }
 0x680   :  { %11096 = vmatpush1.bf16.msra.mxu1 %v14064_v43  ;;  %11017 = vmatprep.subr.bf16.mxu0 %v14607_v19  ;;  %v14670_v43 = vcombine.low %v4459_v10, %v4467_v29  ;;  %v14144_v19 = vcombine.low %v3932_v24, %v3940_v32  ;;  %v14161_v63 = vcombine.high %v3948_v40, %v3956_v42  ;;  %v4539_v29 = vld [vmem:[#allocation8 + $0x1a30] sm:$0xff]  ;;  %v4012_v32 = vld [vmem:[#allocation8 + $0x9b8] sm:$0xff] }
 0x681   :  { %11097 = vmatprep.subr.bf16.mxu1 %v14081_v36  ;;  %v14687_v36 = vcombine.high %v4475_v34, %v4483_v37  ;;  %v4547_v24 = vld [vmem:[#allocation8 + $0x1a70] sm:$0xff] }
 0x683   :  { %11018 = vmatpush1.bf16.msra.mxu0 %v14606_v58  ;;  %v3972_v58 = vld [vmem:[#allocation8 + $0x878] sm:$0xff] }
 0x684   :  { %11098 = vmatpush1.bf16.msra.mxu1 %v14080_v13  ;;  %11019 = vmatprep.subr.bf16.mxu0 %v14623_v3  ;;  %v14686_v13 = vcombine.low %v4475_v34, %v4483_v37  ;;  %v14160_v3 = vcombine.low %v3948_v40, %v3956_v42  ;;  %v14177_v6 = vcombine.high %v3964_v57, %v3972_v58  ;;  %v4555_v34 = vld [vmem:[#allocation8 + $0x1ab0] sm:$0xff]  ;;  %v4036_v40 = vld [vmem:[#allocation8 + $0xa78] sm:$0xff] }
 0x685   :  { %11099 = vmatprep.subr.bf16.mxu1 %v14097_v4  ;;  %v14703_v4 = vcombine.high %v4491_v49, %v4499_v52  ;;  %v4563_v37 = vld [vmem:[#allocation8 + $0x1af0] sm:$0xff]  ;;  %v14750_v42 = vcombine.low %v4539_v29, %v4547_v24 }
 0x687   :  { %11020 = vmatpush1.bf16.msra.mxu0 %v14622_v5  ;;  %v3988_v5 = vld [vmem:[#allocation8 + $0x8f8] sm:$0xff] }
 0x688   :  { %11100 = vmatpush1.bf16.msra.mxu1 %v14096_v12  ;;  %11021 = vmatprep.subr.bf16.mxu0 %v14639_v31  ;;  %v14702_v12 = vcombine.low %v4491_v49, %v4499_v52  ;;  %v14176_v31 = vcombine.low %v3964_v57, %v3972_v58  ;;  %v14193_v18 = vcombine.high %v3980_v11, %v3988_v5  ;;  %v4579_v49 = vld [vmem:[#allocation8 + $0x1b70] sm:$0xff]  ;;  %v4044_v52 = vld [vmem:[#allocation8 + $0xab8] sm:$0xff] }
 0x689   :  { %11101 = vmatprep.subr.bf16.mxu1 %v14113_v16  ;;  %v14719_v16 = vcombine.high %v4507_v7, %v4515_v8  ;;  %v4052_v57 = vld [vmem:[#allocation8 + $0xaf8] sm:$0xff]  ;;  %v14766_v58 = vcombine.low %v4555_v34, %v4563_v37 }
 0x68b   :  { %11022 = vmatpush1.bf16.msra.mxu0 %v14638_v23  ;;  %v4004_v23 = vld [vmem:[#allocation8 + $0x978] sm:$0xff] }
 0x68c   :  { %11102 = vmatpush1.bf16.msra.mxu1 %v14112_v26  ;;  %11023 = vmatprep.subr.bf16.mxu0 %v14655_v27  ;;  %v14718_v26 = vcombine.low %v4507_v7, %v4515_v8  ;;  %v14192_v27 = vcombine.low %v3980_v11, %v3988_v5  ;;  %v14209_v10 = vcombine.high %v3996_v0, %v4004_v23  ;;  %v4587_v7 = vld [vmem:[#allocation8 + $0x1bb0] sm:$0xff]  ;;  %v4060_v5 = vld [vmem:[#allocation8 + $0xb38] sm:$0xff] }
 0x68d   :  { %11103 = vmatprep.subr.bf16.mxu1 %v14129_v28  ;;  %v14735_v28 = vcombine.high %v4523_v20, %v4531_v62  ;;  %v4595_v8 = vld [vmem:[#allocation8 + $0x1bf0] sm:$0xff] }
 0x68f   :  { %11024 = vmatpush1.bf16.msra.mxu0 %v14654_v33  ;;  %v4020_v33 = vld [vmem:[#allocation8 + $0x9f8] sm:$0xff] }
 0x690   :  { %11104 = vmatpush1.bf16.msra.mxu1 %v14128_v44  ;;  %11025 = vmatprep.subr.bf16.mxu0 %v14671_v46  ;;  %v14734_v44 = vcombine.low %v4523_v20, %v4531_v62  ;;  %v14208_v46 = vcombine.low %v3996_v0, %v4004_v23  ;;  %v14256_v20 = vcombine.low %v4044_v52, %v4052_v57  ;;  %v4603_v23 = vld [vmem:[#allocation8 + $0x1c30] sm:$0xff] }
 0x691   :  { %11105 = vmatprep.subr.bf16.mxu1 %v14145_v56  ;;  %v14751_v56 = vcombine.high %v4539_v29, %v4547_v24  ;;  %v14799_v62 = vcombine.high %v4587_v7, %v4595_v8 }
 0x693   :  { %11026 = vmatpush1.bf16.msra.mxu0 %v14670_v43  ;;  %v14224_v43 = vcombine.low %v4012_v32, %v4020_v33 }
 0x694   :  { %11106 = vmatpush1.bf16.msra.mxu1 %v14144_v19  ;;  %11036 = vmatprep.subr.bf16.mxu0 %v14687_v36  ;;  %v14767_v19 = vcombine.high %v4555_v34, %v4563_v37 }
 0x695   :  { %11107 = vmatprep.subr.bf16.mxu1 %v14161_v63  ;;  %v4571_v63 = vld [vmem:[#allocation8 + $0x1b30] sm:$0xff] }
 0x696   :  { %11028 = vmatmul.mubr.bf16.vlgmr.msra.gmra.mrb[20].mxu0 %v17212_v39 }
 0x697   :  { %11037 = vmatpush1.bf16.msra.mxu0 %v14686_v13  ;;  %11068 = vmatprep.mubr.bf16.mxu0 %v17234_v59 }
 0x698   :  { %11108 = vmatpush1.bf16.msra.mxu1 %v14160_v3  ;;  %11038 = vmatprep.subr.bf16.mxu0 %v14703_v4  ;;  %v14783_v3 = vcombine.high %v4571_v63, %v4579_v49 }
 0x699   :  { %11118 = vmatprep.subr.bf16.mxu1 %v14177_v6  ;;  %v14257_v6 = vcombine.high %v4044_v52, %v4052_v57  ;;  %v4651_v57 = vld [vmem:[#allocation8 + $0x1db0] sm:$0xff] }
 0x69b   :  { %11039 = vmatpush1.bf16.msra.mxu0 %v14702_v12  ;;  %11110 = vmatmul.mubr.bf16.vlgmr.msra.gmra.mrb[36].mxu1 %v17138_v15  ;;  %v14225_v15 = vcombine.high %v4012_v32, %v4020_v33  ;;  %v4068_v12 = vld [vmem:[#allocation8 + $0xb78] sm:$0xff]  ;;  %v4619_v33 = vld [vmem:[#allocation8 + $0x1cb0] sm:$0xff] }
 0x69c   :  { %11119 = vmatpush1.bf16.msra.mxu1 %v14176_v31  ;;  %11150 = vmatprep.mubr.bf16.mxu1 %v17176_v45  ;;  %v4028_v45 = vld [vmem:[#allocation8 + $0xa38] sm:$0xff]  ;;  %v14273_v0 = vcombine.high %v4060_v5, %v4068_v12  ;;  %v14272_v29 = vcombine.low %v4060_v5, %v4068_v12  ;;  %v4667_v12 = vld [vmem:[#allocation8 + $0x1e30] sm:$0xff] }
 0x69d   :  { %11040 = vmatprep.subr.bf16.mxu0 %v14719_v16  ;;  %11120 = vmatprep.subr.bf16.mxu1 %v14193_v18  ;;  %v14241_v36 = vcombine.high %v4028_v45, %v4036_v40  ;;  %v14240_v13 = vcombine.low %v4028_v45, %v4036_v40  ;;  %v14782_v16 = vcombine.low %v4571_v63, %v4579_v49  ;;  %v4635_v40 = vld [vmem:[#allocation8 + $0x1d30] sm:$0xff] }
 0x69f   :  { %11041 = vmatpush1.bf16.msra.mxu0 %v14718_v26  ;;  %v4611_v26 = vld [vmem:[#allocation8 + $0x1c70] sm:$0xff] }
 0x6a0   :  { %11121 = vmatpush1.bf16.msra.mxu1 %v14192_v27  ;;  %11042 = vmatprep.subr.bf16.mxu0 %v14735_v28  ;;  %v4076_v27 = vld [vmem:[#allocation8 + $0xbb8] sm:$0xff]  ;;  %v14815_v24 = vcombine.high %v4603_v23, %v4611_v26 }
 0x6a1   :  { %11122 = vmatprep.subr.bf16.mxu1 %v14209_v10  ;;  %v4084_v28 = vld [vmem:[#allocation8 + $0xbf8] sm:$0xff]  ;;  %v14798_v10 = vcombine.low %v4587_v7, %v4595_v8 }
 0x6a2   :  { %v14289_v32 = vcombine.high %v4076_v27, %v4084_v28  ;;  %v14288_v34 = vcombine.low %v4076_v27, %v4084_v28  ;;  %v4691_v27 = vld [vmem:[#allocation8 + $0x1ef0] sm:$0xff]  ;;  %v4156_v28 = vld [vmem:[#allocation8 + $0xe38] sm:$0xff] }
 0x6a3   :  { %11043 = vmatpush1.bf16.msra.mxu0 %v14734_v44  ;;  %v4627_v44 = vld [vmem:[#allocation8 + $0x1cf0] sm:$0xff] }
 0x6a4   :  { %11123 = vmatpush1.bf16.msra.mxu1 %v14208_v46  ;;  %11044 = vmatprep.subr.bf16.mxu0 %v14751_v56  ;;  %v4092_v46 = vld [vmem:[#allocation8 + $0xc38] sm:$0xff]  ;;  %v14831_v37 = vcombine.high %v4619_v33, %v4627_v44 }
 0x6a5   :  { %11124 = vmatprep.subr.bf16.mxu1 %v14225_v15  ;;  %v4100_v56 = vld [vmem:[#allocation8 + $0xc78] sm:$0xff]  ;;  %v14814_v15 = vcombine.low %v4603_v23, %v4611_v26  ;;  %v4683_v26 = vld [vmem:[#allocation8 + $0x1eb0] sm:$0xff] }
 0x6a6   :  { %v14305_v45 = vcombine.high %v4092_v46, %v4100_v56  ;;  %v14304_v63 = vcombine.low %v4092_v46, %v4100_v56  ;;  %v4707_v46 = vld [vmem:[#allocation8 + $0x1f70] sm:$0xff]  ;;  %v17319_v56 = vld [vmem:[#allocation10] sm:$0xff] }
 0x6a7   :  { %11045 = vmatpush1.bf16.msra.mxu0 %v14750_v42  ;;  %v4643_v42 = vld [vmem:[#allocation8 + $0x1d70] sm:$0xff] }
 0x6a8   :  { %11125 = vmatpush1.bf16.msra.mxu1 %v14224_v43  ;;  %11046 = vmatprep.subr.bf16.mxu0 %v14767_v19  ;;  %v4108_v43 = vld [vmem:[#allocation8 + $0xcb8] sm:$0xff]  ;;  %v14847_v49 = vcombine.high %v4635_v40, %v4643_v42 }
 0x6a9   :  { %v17315_v4 = vpop.f32.mrb[16].mxu0  ;;  %11126 = vmatprep.subr.bf16.mxu1 %v14241_v36  ;;  %v4116_v19 = vld [vmem:[#allocation8 + $0xcf8] sm:$0xff]  ;;  %v14830_v36 = vcombine.low %v4619_v33, %v4627_v44  ;;  %v4699_v44 = vld [vmem:[#allocation8 + $0x1f30] sm:$0xff] }
 0x6aa   :  { %v17317_v11 = vpop.f32.mrb[17].mxu0  ;;  %v14321_v52 = vcombine.high %v4108_v43, %v4116_v19  ;;  %v14320_v7 = vcombine.low %v4108_v43, %v4116_v19  ;;  %v4715_v19 = vld [vmem:[#allocation8 + $0x1fb0] sm:$0xff] }
 0x6ab   :  { %v10746_v31 = vpop.f32.mrb[18].mxu0  ;;  %11047 = vmatpush1.bf16.msra.mxu0 %v14766_v58  ;;  %v4659_v58 = vld [vmem:[#allocation8 + $0x1df0] sm:$0xff] }
 0x6ac   :  { %v10747_v18 = vpop.f32.mrb[19].mxu0  ;;  %11127 = vmatpush1.bf16.msra.mxu1 %v14240_v13  ;;  %11048 = vmatprep.subr.bf16.mxu0 %v14783_v3  ;;  %v4124_v13 = vld [vmem:[#allocation8 + $0xd38] sm:$0xff]  ;;  %v14863_v8 = vcombine.high %v4651_v57, %v4659_v58  ;;  %v4675_v31 = vld [vmem:[#allocation8 + $0x1e70] sm:$0xff] }
 0x6ad   :  { %11128 = vmatprep.subr.bf16.mxu1 %v14257_v6  ;;  %v4132_v3 = vld [vmem:[#allocation8 + $0xd78] sm:$0xff]  ;;  %v14846_v6 = vcombine.low %v4635_v40, %v4643_v42  ;;  %v14911_v40 = vcombine.high %v4699_v44, %v4707_v46  ;;  %v4736_v42 = vrot.slane %v17319_v56, %v17130_v51 }
 0x6ae   :  { %v14337_v5 = vcombine.high %v4124_v13, %v4132_v3  ;;  %v4148_v18 = vld [vmem:[#allocation8 + $0xdf8] sm:$0xff] }
 0x6af   :  { %11049 = vmatpush1.bf16.msra.mxu0 %v14782_v16  ;;  %v4140_v16 = vld [vmem:[#allocation8 + $0xdb8] sm:$0xff] }
 0x6b0   :  { %11129 = vmatpush1.bf16.msra.mxu1 %v14256_v20  ;;  %11050 = vmatprep.subr.bf16.mxu0 %v14799_v62  ;;  %v14862_v20 = vcombine.low %v4651_v57, %v4659_v58  ;;  %v14336_v62 = vcombine.low %v4124_v13, %v4132_v3  ;;  %v14353_v23 = vcombine.high %v4140_v16, %v4148_v18 }
 0x6b1   :  { %11130 = vmatprep.subr.bf16.mxu1 %v14273_v0  ;;  %v14879_v0 = vcombine.high %v4667_v12, %v4675_v31  ;;  %v15368_v13 = vadd.f32 %v17269_v61, %v4736_v42  ;;  %v16203_v42 = vld [vmem:[#allocation11 + $0x30] ss:$8 sps:$4 sm:$0xff]  }
 0x6b3   :  { %11051 = vmatpush1.bf16.msra.mxu0 %v14798_v10  ;;  %v4164_v10 = vld [vmem:[#allocation8 + $0xe78] sm:$0xff] }
 0x6b4   :  { %11131 = vmatpush1.bf16.msra.mxu1 %v14272_v29  ;;  %11052 = vmatprep.subr.bf16.mxu0 %v14815_v24  ;;  %v14878_v29 = vcombine.low %v4667_v12, %v4675_v31  ;;  %v14352_v24 = vcombine.low %v4140_v16, %v4148_v18  ;;  %v14369_v33 = vcombine.high %v4156_v28, %v4164_v10  ;;  %v16196_v12 = vld [vmem:[#allocation11 + $0x4] ss:$8 sps:$4 sm:$0xff]   ;;  %v11242_v31 = vmax.f32 %v15368_v13, 0.0 }
 0x6b5   :  { %11132 = vmatprep.subr.bf16.mxu1 %v14289_v32  ;;  %v14895_v32 = vcombine.high %v4683_v26, %v4691_v27  ;;  %v4220_v18 = vld [vmem:[#allocation8 + $0x1038] sm:$0xff] }
 0x6b6   :  { %v4308_v13 = vld [vmem:[#allocation8 + $0x12f8] sm:$0xff] }
 0x6b7   :  { %11053 = vmatpush1.bf16.msra.mxu0 %v14814_v15  ;;  %v4172_v15 = vld [vmem:[#allocation8 + $0xeb8] sm:$0xff] }
 0x6b8   :  { %11133 = vmatpush1.bf16.msra.mxu1 %v14288_v34  ;;  %11054 = vmatprep.subr.bf16.mxu0 %v14831_v37  ;;  %v4180_v34 = vld [vmem:[#allocation8 + $0xef8] sm:$0xff]  ;;  %v14894_v37 = vcombine.low %v4683_v26, %v4691_v27 }
 0x6b9   :  { %11134 = vmatprep.subr.bf16.mxu1 %v14305_v45  ;;  %v14368_v45 = vcombine.low %v4156_v28, %v4164_v10  ;;  %v14385_v43 = vcombine.high %v4172_v15, %v4180_v34  ;;  %v14384_v57 = vcombine.low %v4172_v15, %v4180_v34  ;;  %v4236_v27 = vld [vmem:[#allocation8 + $0x10b8] sm:$0xff]  ;;  %v16197_v10 = vld [vmem:[#allocation11 + $0x10] ss:$8 sps:$4 sm:$0xff]   ;;  %v16205_v34 = vld [vmem:[#allocation11 + $0x34] ss:$8 sps:$4 sm:$0xff]  }
 0x6ba   :  { %v4244_v28 = vld [vmem:[#allocation8 + $0x10f8] sm:$0xff] }
 0x6bb   :  { %11055 = vmatpush1.bf16.msra.mxu0 %v14830_v36  ;;  %v4723_v36 = vld [vmem:[#allocation8 + $0x1ff0] sm:$0xff]  ;;  %v14448_v15 = vcombine.low %v4236_v27, %v4244_v28 }
 0x6bc   :  { %11135 = vmatpush1.bf16.msra.mxu1 %v14304_v63  ;;  %11056 = vmatprep.subr.bf16.mxu0 %v14847_v49  ;;  %v4188_v63 = vld [vmem:[#allocation8 + $0xf38] sm:$0xff]  ;;  %v14927_v58 = vcombine.high %v4715_v19, %v4723_v36 }
 0x6bd   :  { %11136 = vmatprep.subr.bf16.mxu1 %v14321_v52  ;;  %v4196_v49 = vld [vmem:[#allocation8 + $0xf78] sm:$0xff]  ;;  %v14910_v52 = vcombine.low %v4699_v44, %v4707_v46 }
 0x6be   :  { %v14401_v3 = vcombine.high %v4188_v63, %v4196_v49  ;;  %v4260_v44 = vld [vmem:[#allocation8 + $0x1178] sm:$0xff] }
 0x6bf   :  { %11057 = vmatpush1.bf16.msra.mxu0 %v14846_v6  ;;  %v4204_v6 = vld [vmem:[#allocation8 + $0xfb8] sm:$0xff] }
 0x6c0   :  { %11137 = vmatpush1.bf16.msra.mxu1 %v14320_v7  ;;  %11058 = vmatprep.subr.bf16.mxu0 %v14863_v8  ;;  %v4212_v7 = vld [vmem:[#allocation8 + $0xff8] sm:$0xff]  ;;  %v14926_v8 = vcombine.low %v4715_v19, %v4723_v36 }
 0x6c1   :  { %11138 = vmatprep.subr.bf16.mxu1 %v14337_v5  ;;  %v14400_v5 = vcombine.low %v4188_v63, %v4196_v49  ;;  %v14417_v16 = vcombine.high %v4204_v6, %v4212_v7  ;;  %v14416_v61 = vcombine.low %v4204_v6, %v4212_v7  ;;  %v16200_v46 = vld [vmem:[#allocation11 + $0x20] ss:$8 sps:$4 sm:$0xff]   ;;  %v16208_v19 = vld [vmem:[#allocation11 + $0x44] ss:$8 sps:$4 sm:$0xff]  }
 0x6c2   :  { %v4284_v36 = vld [vmem:[#allocation8 + $0x1238] sm:$0xff] }
 0x6c3   :  { %11059 = vmatpush1.bf16.msra.mxu0 %v14862_v20  ;;  %v4228_v20 = vld [vmem:[#allocation8 + $0x1078] sm:$0xff] }
 0x6c4   :  { %11139 = vmatpush1.bf16.msra.mxu1 %v14336_v62  ;;  %11060 = vmatprep.subr.bf16.mxu0 %v14879_v0  ;;  %v16194_v62 = vld [vmem:[#allocation11] ss:$8 sps:$4 sm:$0xff]   ;;  %v16199_v0 = vld [vmem:[#allocation11 + $0x14] ss:$8 sps:$4 sm:$0xff]   ;;  %v14433_v26 = vcombine.high %v4220_v18, %v4228_v20  ;;  %v16214_v7 = vld [vmem:[#allocation11 + $0x64] ss:$8 sps:$4 sm:$0xff]  }
 0x6c5   :  { %11140 = vmatprep.subr.bf16.mxu1 %v14353_v23  ;;  %v11258_v23 = vpack.c.bf16 %v11242_v31, %v11242_v31  ;;  %v4292_v63 = vld [vmem:[#allocation8 + $0x1278] sm:$0xff] }
 0x6c6   :  { %v16206_v49 = vld [vmem:[#allocation11 + $0x40] ss:$8 sps:$4 sm:$0xff]   ;;  %v14496_v6 = vcombine.low %v4284_v36, %v4292_v63 }
 0x6c7   :  { %11061 = vmatpush1.bf16.msra.mxu0 %v14878_v29  ;;  %v14432_v29 = vcombine.low %v4220_v18, %v4228_v20  ;;  %v16212_v31 = vld [vmem:[#allocation11 + $0x60] ss:$8 sps:$4 sm:$0xff]   ;;  %v16217_v18 = vld [vmem:[#allocation11 + $0x74] ss:$8 sps:$4 sm:$0xff]  }
 0x6c8   :  { %11141 = vmatpush1.bf16.msra.mxu1 %v14352_v24  ;;  %11062 = vmatprep.subr.bf16.mxu0 %v14895_v32  ;;  %v16202_v24 = vld [vmem:[#allocation11 + $0x24] ss:$8 sps:$4 sm:$0xff]   ;;  %v14449_v32 = vcombine.high %v4236_v27, %v4244_v28 }
 0x6c9   :  { %11142 = vmatprep.subr.bf16.mxu1 %v14369_v33  ;;  %v4252_v33 = vld [vmem:[#allocation8 + $0x1138] sm:$0xff] }
 0x6ca   :  { %v4348_v28 = vld [vmem:[#allocation8 + $0x1438] sm:$0xff] }
 0x6cb   :  { %11063 = vmatpush1.bf16.msra.mxu0 %v14894_v37  ;;  %v14465_v37 = vcombine.high %v4252_v33, %v4260_v44 }
 0x6cc   :  { %11143 = vmatpush1.bf16.msra.mxu1 %v14368_v45  ;;  %11064 = vmatprep.subr.bf16.mxu0 %v14911_v40  ;;  %v4268_v45 = vld [vmem:[#allocation8 + $0x11b8] sm:$0xff] }
 0x6cd   :  { %11144 = vmatprep.subr.bf16.mxu1 %v14385_v43  ;;  %v4276_v40 = vld [vmem:[#allocation8 + $0x11f8] sm:$0xff]  ;;  %v14464_v43 = vcombine.low %v4252_v33, %v4260_v44 }
 0x6ce   :  { %v4364_v44 = vld [vmem:[#allocation8 + $0x14b8] sm:$0xff] }
 0x6cf   :  { %11065 = vmatpush1.bf16.msra.mxu0 %v14910_v52  ;;  %v16211_v52 = vld [vmem:[#allocation11 + $0x54] ss:$8 sps:$4 sm:$0xff]  }
 0x6d0   :  { %11145 = vmatpush1.bf16.msra.mxu1 %v14384_v57  ;;  %11066 = vmatprep.subr.bf16.mxu0 %v14927_v58  ;;  %v14497_v57 = vcombine.high %v4284_v36, %v4292_v63  ;;  %v4300_v58 = vld [vmem:[#allocation8 + $0x12b8] sm:$0xff] }
 0x6d1   :  { %11146 = vmatprep.subr.bf16.mxu1 %v14401_v3  ;;  %v16209_v3 = vld [vmem:[#allocation11 + $0x50] ss:$8 sps:$4 sm:$0xff]   ;;  %v4396_v63 = vld [vmem:[#allocation8 + $0x15b8] sm:$0xff] }
 0x6d3   :  { %11067 = vmatpush1.bf16.msra.mxu0 %v14926_v8  ;;  %v14513_v8 = vcombine.high %v4300_v58, %v4308_v13 }
 0x6d4   :  { %11147 = vmatpush1.bf16.msra.mxu1 %v14400_v5  ;;  %12821 = vmatprep.subr.bf16.mxu0 %v16196_v12  ;;  %v4316_v5 = vld [vmem:[#allocation8 + $0x1338] sm:$0xff] }
 0x6d5   :  { %11148 = vmatprep.subr.bf16.mxu1 %v14417_v16  ;;  %v4324_v12 = vld [vmem:[#allocation8 + $0x1378] sm:$0xff]  ;;  %v14512_v16 = vcombine.low %v4300_v58, %v4308_v13 }
 0x6d6   :  { %11069 = vmatmul.mubr.bf16.vlgmr.msra.gmra.mrb[20].mxu0 %v17236_v14  ;;  %v14529_v20 = vcombine.high %v4316_v5, %v4324_v12  ;;  %v4412_v13 = vld [vmem:[#allocation8 + $0x1638] sm:$0xff] }
 0x6d7   :  { %12822 = vmatpush1.bf16.msra.mxu0 %v16194_v62  ;;  %12853 = vmatprep.mubr.bf16.mxu0 %v11258_v23  ;;  %v4332_v62 = vld [vmem:[#allocation8 + $0x13b8] sm:$0xff]  ;;  %v14528_v23 = vcombine.low %v4316_v5, %v4324_v12 }
 0x6d8   :  { %11149 = vmatpush1.bf16.msra.mxu1 %v14416_v61  ;;  %12823 = vmatprep.subr.bf16.mxu0 %v16199_v0  ;;  %v4340_v61 = vld [vmem:[#allocation8 + $0x13f8] sm:$0xff]  ;;  %v16215_v0 = vld [vmem:[#allocation11 + $0x70] ss:$8 sps:$4 sm:$0xff]  }
 0x6d9   :  { %11159 = vmatprep.subr.bf16.mxu1 %v14433_v26  ;;  %v16220_v26 = vld [vmem:[#allocation11 + $0x84] ss:$8 sps:$4 sm:$0xff]   ;;  %v14545_v27 = vcombine.high %v4332_v62, %v4340_v61 }
 0x6da   :  { %v4428_v12 = vld [vmem:[#allocation8 + $0x16b8] sm:$0xff] }
 0x6db   :  { %11151 = vmatmul.mubr.bf16.vlgmr.msra.gmra.mrb[36].mxu1 %v17178_v47  ;;  %12824 = vmatpush1.bf16.msra.mxu0 %v16197_v10  ;;  %v14481_v47 = vcombine.high %v4268_v45, %v4276_v40  ;;  %v4356_v10 = vld [vmem:[#allocation8 + $0x1478] sm:$0xff] }
 0x6dc   :  { %11160 = vmatpush1.bf16.msra.mxu1 %v14432_v29  ;;  %11191 = vmatprep.mubr.bf16.mxu1 %v17181_v54  ;;  %v14480_v54 = vcombine.low %v4268_v45, %v4276_v40  ;;  %v16218_v29 = vld [vmem:[#allocation11 + $0x80] ss:$8 sps:$4 sm:$0xff]   ;;  %v14561_v33 = vcombine.high %v4348_v28, %v4356_v10 }
 0x6dd   :  { %12825 = vmatprep.subr.bf16.mxu0 %v16202_v24  ;;  %11161 = vmatprep.subr.bf16.mxu1 %v14449_v32  ;;  %v14544_v24 = vcombine.low %v4332_v62, %v4340_v61  ;;  %v16223_v32 = vld [vmem:[#allocation11 + $0x94] ss:$8 sps:$4 sm:$0xff]   ;;  %v4380_v40 = vld [vmem:[#allocation8 + $0x1538] sm:$0xff]  ;;  %v4744_v61 = vrot.slane %v17319_v56, %v17167_v25 }
 0x6de   :  { %v16238_v62 = vld [vmem:[#allocation11 + $0xe4] ss:$8 sps:$4 sm:$0xff]  }
 0x6df   :  { %12826 = vmatpush1.bf16.msra.mxu0 %v16200_v46  ;;  %v4372_v46 = vld [vmem:[#allocation8 + $0x14f8] sm:$0xff] }
 0x6e0   :  { %11162 = vmatpush1.bf16.msra.mxu1 %v14448_v15  ;;  %12827 = vmatprep.subr.bf16.mxu0 %v16205_v34  ;;  %v16221_v15 = vld [vmem:[#allocation11 + $0x90] ss:$8 sps:$4 sm:$0xff]   ;;  %v14560_v34 = vcombine.low %v4348_v28, %v4356_v10  ;;  %v14577_v45 = vcombine.high %v4364_v44, %v4372_v46 }
 0x6e1   :  { %11163 = vmatprep.subr.bf16.mxu1 %v14465_v37  ;;  %v16226_v37 = vld [vmem:[#allocation11 + $0xa4] ss:$8 sps:$4 sm:$0xff]  }
 0x6e3   :  { %12828 = vmatpush1.bf16.msra.mxu0 %v16203_v42  ;;  %v4388_v42 = vld [vmem:[#allocation8 + $0x1578] sm:$0xff] }
 0x6e4   :  { %11164 = vmatpush1.bf16.msra.mxu1 %v14464_v43  ;;  %12829 = vmatprep.subr.bf16.mxu0 %v16208_v19  ;;  %v16224_v43 = vld [vmem:[#allocation11 + $0xa0] ss:$8 sps:$4 sm:$0xff]   ;;  %v14576_v19 = vcombine.low %v4364_v44, %v4372_v46  ;;  %v14593_v36 = vcombine.high %v4380_v40, %v4388_v42  ;;  %v16239_v46 = vld [vmem:[#allocation11 + $0xf0] ss:$8 sps:$4 sm:$0xff]  }
 0x6e5   :  { %11165 = vmatprep.subr.bf16.mxu1 %v14481_v47  ;;  %v16229_v47 = vld [vmem:[#allocation11 + $0xb4] ss:$8 sps:$4 sm:$0xff]   ;;  %v4468_v44 = vld [vmem:[#allocation8 + $0x17f8] sm:$0xff] }
 0x6e7   :  { %12830 = vmatpush1.bf16.msra.mxu0 %v16206_v49  ;;  %v4404_v49 = vld [vmem:[#allocation8 + $0x15f8] sm:$0xff] }
 0x6e8   :  { %11166 = vmatpush1.bf16.msra.mxu1 %v14480_v54  ;;  %12831 = vmatprep.subr.bf16.mxu0 %v16211_v52  ;;  %v16227_v54 = vld [vmem:[#allocation11 + $0xb0] ss:$8 sps:$4 sm:$0xff]   ;;  %v14592_v52 = vcombine.low %v4380_v40, %v4388_v42  ;;  %v14609_v58 = vcombine.high %v4396_v63, %v4404_v49  ;;  %v4476_v40 = vld [vmem:[#allocation8 + $0x1838] sm:$0xff] }
 0x6e9   :  { %11167 = vmatprep.subr.bf16.mxu1 %v14497_v57  ;;  %v16232_v57 = vld [vmem:[#allocation11 + $0xc4] ss:$8 sps:$4 sm:$0xff]  }
 0x6ea   :  { %v4484_v42 = vld [vmem:[#allocation8 + $0x1878] sm:$0xff] }
 0x6eb   :  { %12832 = vmatpush1.bf16.msra.mxu0 %v16209_v3  ;;  %v4420_v3 = vld [vmem:[#allocation8 + $0x1678] sm:$0xff] }
 0x6ec   :  { %11168 = vmatpush1.bf16.msra.mxu1 %v14496_v6  ;;  %12833 = vmatprep.subr.bf16.mxu0 %v16214_v7  ;;  %v16230_v6 = vld [vmem:[#allocation11 + $0xc0] ss:$8 sps:$4 sm:$0xff]   ;;  %v14608_v7 = vcombine.low %v4396_v63, %v4404_v49  ;;  %v14625_v5 = vcombine.high %v4412_v13, %v4420_v3  ;;  %v14689_v63 = vcombine.high %v4476_v40, %v4484_v42 }
 0x6ed   :  { %11169 = vmatprep.subr.bf16.mxu1 %v14513_v8  ;;  %v16235_v8 = vld [vmem:[#allocation11 + $0xd4] ss:$8 sps:$4 sm:$0xff]   ;;  %v4492_v49 = vld [vmem:[#allocation8 + $0x18b8] sm:$0xff] }
 0x6ef   :  { %12834 = vmatpush1.bf16.msra.mxu0 %v16212_v31  ;;  %v4436_v31 = vld [vmem:[#allocation8 + $0x16f8] sm:$0xff] }
 0x6f0   :  { %11170 = vmatpush1.bf16.msra.mxu1 %v14512_v16  ;;  %12835 = vmatprep.subr.bf16.mxu0 %v16217_v18  ;;  %v16233_v16 = vld [vmem:[#allocation11 + $0xd0] ss:$8 sps:$4 sm:$0xff]   ;;  %v4732_v18 = vrot.slane %v17319_v56, %v17125_v48  ;;  %v14640_v10 = vcombine.low %v4428_v12, %v4436_v31 }
 0x6f1   :  { %11171 = vmatprep.subr.bf16.mxu1 %v14529_v20  ;;  %v14624_v20 = vcombine.low %v4412_v13, %v4420_v3  ;;  %v4508_v3 = vld [vmem:[#allocation8 + $0x1938] sm:$0xff] }
 0x6f2   :  { %v15367_v28 = vadd.f32 %v17267_v53, %v4732_v18  ;;  %v16251_v18 = vld [vmem:[#allocation11 + $0x130] ss:$8 sps:$4 sm:$0xff]  }
 0x6f3   :  { %12836 = vmatpush1.bf16.msra.mxu0 %v16215_v0  ;;  %v14641_v0 = vcombine.high %v4428_v12, %v4436_v31  ;;  %v4524_v31 = vld [vmem:[#allocation8 + $0x19b8] sm:$0xff] }
 0x6f4   :  { %11172 = vmatpush1.bf16.msra.mxu1 %v14528_v23  ;;  %12837 = vmatprep.subr.bf16.mxu0 %v16220_v26  ;;  %v4444_v23 = vld [vmem:[#allocation8 + $0x1738] sm:$0xff] }
 0x6f5   :  { %11173 = vmatprep.subr.bf16.mxu1 %v14545_v27  ;;  %v4452_v26 = vld [vmem:[#allocation8 + $0x1778] sm:$0xff] }
 0x6f6   :  { %v16236_v27 = vld [vmem:[#allocation11 + $0xe0] ss:$8 sps:$4 sm:$0xff]  }
 0x6f7   :  { %12838 = vmatpush1.bf16.msra.mxu0 %v16218_v29  ;;  %v16241_v29 = vld [vmem:[#allocation11 + $0xf4] ss:$8 sps:$4 sm:$0xff]  }
 0x6f8   :  { %11174 = vmatpush1.bf16.msra.mxu1 %v14544_v24  ;;  %12839 = vmatprep.subr.bf16.mxu0 %v16223_v32  ;;  %v15370_v24 = vadd.f32 %v17281_v9, %v4744_v61  ;;  %v14657_v32 = vcombine.high %v4444_v23, %v4452_v26  ;;  %v4540_v61 = vld [vmem:[#allocation8 + $0x1a38] sm:$0xff] }
 0x6f9   :  { %11175 = vmatprep.subr.bf16.mxu1 %v14561_v33  ;;  %v4460_v33 = vld [vmem:[#allocation8 + $0x17b8] sm:$0xff] }
 0x6fa   :  { %v14673_v53 = vcombine.high %v4460_v33, %v4468_v44  ;;  %v14672_v9 = vcombine.low %v4460_v33, %v4468_v44  ;;  %v4572_v44 = vld [vmem:[#allocation8 + $0x1b38] sm:$0xff] }
 0x6fb   :  { %12840 = vmatpush1.bf16.msra.mxu0 %v16221_v15  ;;  %v11241_v15 = vmax.f32 %v15367_v28, 0.0  ;;  %v4556_v28 = vld [vmem:[#allocation8 + $0x1ab8] sm:$0xff] }
 0x6fc   :  { %11176 = vmatpush1.bf16.msra.mxu1 %v14560_v34  ;;  %12841 = vmatprep.subr.bf16.mxu0 %v16226_v37  ;;  %v14656_v34 = vcombine.low %v4444_v23, %v4452_v26  ;;  %v16244_v37 = vld [vmem:[#allocation11 + $0x104] ss:$8 sps:$4 sm:$0xff]   ;;  %v16254_v23 = vld [vmem:[#allocation11 + $0x140] ss:$8 sps:$4 sm:$0xff]   ;;  %v16259_v26 = vld [vmem:[#allocation11 + $0x154] ss:$8 sps:$4 sm:$0xff]  }
 0x6fd   :  { %11177 = vmatprep.subr.bf16.mxu1 %v14577_v45  ;;  %v11244_v45 = vmax.f32 %v15370_v24, 0.0 }
 0x6ff   :  { %12842 = vmatpush1.bf16.msra.mxu0 %v16224_v43  ;;  %v16242_v43 = vld [vmem:[#allocation11 + $0x100] ss:$8 sps:$4 sm:$0xff]  }
 0x700   :  { %11178 = vmatpush1.bf16.msra.mxu1 %v14576_v19  ;;  %12843 = vmatprep.subr.bf16.mxu0 %v16229_v47  ;;  %v11257_v19 = vpack.c.bf16 %v11241_v15, %v11241_v15  ;;  %v16247_v47 = vld [vmem:[#allocation11 + $0x114] ss:$8 sps:$4 sm:$0xff]   ;;  %v16260_v15 = vld [vmem:[#allocation11 + $0x160] ss:$8 sps:$4 sm:$0xff]  }
 0x701   :  { %11179 = vmatprep.subr.bf16.mxu1 %v14593_v36  ;;  %v11260_v36 = vpack.c.bf16 %v11244_v45, %v11244_v45 }
 0x703   :  { %12844 = vmatpush1.bf16.msra.mxu0 %v16227_v54  ;;  %v4500_v54 = vld [vmem:[#allocation8 + $0x18f8] sm:$0xff] }
 0x704   :  { %11180 = vmatpush1.bf16.msra.mxu1 %v14592_v52  ;;  %12845 = vmatprep.subr.bf16.mxu0 %v16232_v57  ;;  %v16245_v52 = vld [vmem:[#allocation11 + $0x110] ss:$8 sps:$4 sm:$0xff]   ;;  %v14688_v57 = vcombine.low %v4476_v40, %v4484_v42  ;;  %v14705_v13 = vcombine.high %v4492_v49, %v4500_v54  ;;  %v4588_v40 = vld [vmem:[#allocation8 + $0x1bb8] sm:$0xff] }
 0x705   :  { %11181 = vmatprep.subr.bf16.mxu1 %v14609_v58  ;;  %v16250_v58 = vld [vmem:[#allocation11 + $0x124] ss:$8 sps:$4 sm:$0xff]  }
 0x706   :  { %v4596_v42 = vld [vmem:[#allocation8 + $0x1bf8] sm:$0xff] }
 0x707   :  { %12846 = vmatpush1.bf16.msra.mxu0 %v16230_v6  ;;  %v4516_v6 = vld [vmem:[#allocation8 + $0x1978] sm:$0xff] }
 0x708   :  { %11182 = vmatpush1.bf16.msra.mxu1 %v14608_v7  ;;  %12847 = vmatprep.subr.bf16.mxu0 %v16235_v8  ;;  %v16248_v7 = vld [vmem:[#allocation11 + $0x120] ss:$8 sps:$4 sm:$0xff]   ;;  %v14704_v8 = vcombine.low %v4492_v49, %v4500_v54  ;;  %v14721_v12 = vcombine.high %v4508_v3, %v4516_v6  ;;  %v14801_v49 = vcombine.high %v4588_v40, %v4596_v42 }
 0x709   :  { %11183 = vmatprep.subr.bf16.mxu1 %v14625_v5  ;;  %v16253_v5 = vld [vmem:[#allocation11 + $0x134] ss:$8 sps:$4 sm:$0xff]   ;;  %v4604_v54 = vld [vmem:[#allocation8 + $0x1c38] sm:$0xff] }
 0x70b   :  { %12848 = vmatpush1.bf16.msra.mxu0 %v16233_v16  ;;  %v4532_v16 = vld [vmem:[#allocation8 + $0x19f8] sm:$0xff] }
 0x70c   :  { %11184 = vmatpush1.bf16.msra.mxu1 %v14624_v20  ;;  %12849 = vmatprep.subr.bf16.mxu0 %v16238_v62  ;;  %v14720_v20 = vcombine.low %v4508_v3, %v4516_v6  ;;  %v16256_v62 = vld [vmem:[#allocation11 + $0x144] ss:$8 sps:$4 sm:$0xff]  }
 0x70d   :  { %11185 = vmatprep.subr.bf16.mxu1 %v14641_v0  ;;  %v4548_v0 = vld [vmem:[#allocation8 + $0x1a78] sm:$0xff] }
 0x70e   :  { %v14752_v24 = vcombine.low %v4540_v61, %v4548_v0  ;;  %v4620_v6 = vld [vmem:[#allocation8 + $0x1cb8] sm:$0xff] }
 0x70f   :  { %12850 = vmatpush1.bf16.msra.mxu0 %v16236_v27  ;;  %v14753_v27 = vcombine.high %v4540_v61, %v4548_v0  ;;  %v4652_v0 = vld [vmem:[#allocation8 + $0x1db8] sm:$0xff] }
 0x710   :  { %11186 = vmatpush1.bf16.msra.mxu1 %v14640_v10  ;;  %12851 = vmatprep.subr.bf16.mxu0 %v16241_v29  ;;  %v4564_v10 = vld [vmem:[#allocation8 + $0x1af8] sm:$0xff]  ;;  %v16257_v29 = vld [vmem:[#allocation11 + $0x150] ss:$8 sps:$4 sm:$0xff]  }
 0x711   :  { %11187 = vmatprep.subr.bf16.mxu1 %v14657_v32  ;;  %v16262_v32 = vld [vmem:[#allocation11 + $0x164] ss:$8 sps:$4 sm:$0xff]   ;;  %v14769_v33 = vcombine.high %v4556_v28, %v4564_v10 }
 0x713   :  { %12852 = vmatpush1.bf16.msra.mxu0 %v16239_v46  ;;  %v4580_v46 = vld [vmem:[#allocation8 + $0x1b78] sm:$0xff] }
 0x714   :  { %11188 = vmatpush1.bf16.msra.mxu1 %v14656_v34  ;;  %12862 = vmatprep.subr.bf16.mxu0 %v16244_v37  ;;  %v14768_v34 = vcombine.low %v4556_v28, %v4564_v10  ;;  %v16265_v37 = vld [vmem:[#allocation11 + $0x174] ss:$8 sps:$4 sm:$0xff]   ;;  %v14785_v45 = vcombine.high %v4572_v44, %v4580_v46  ;;  %v4668_v10 = vld [vmem:[#allocation8 + $0x1e38] sm:$0xff] }
 0x715   :  { %11189 = vmatprep.subr.bf16.mxu1 %v14673_v53 }
 0x716   :  { %12854 = vmatmul.mubr.bf16.vlgmr.msra.gmra.mrb[24].mxu0 %v11257_v19  ;;  %v16263_v19 = vld [vmem:[#allocation11 + $0x170] ss:$8 sps:$4 sm:$0xff]  }
 0x717   :  { %12863 = vmatpush1.bf16.msra.mxu0 %v16242_v43  ;;  %12894 = vmatprep.mubr.bf16.mxu0 %v11260_v36  ;;  %v16268_v36 = vld [vmem:[#allocation11 + $0x184] ss:$8 sps:$4 sm:$0xff]  }
 0x718   :  { %11190 = vmatpush1.bf16.msra.mxu1 %v14672_v9  ;;  %12864 = vmatprep.subr.bf16.mxu0 %v16247_v47  ;;  %v14784_v47 = vcombine.low %v4572_v44, %v4580_v46  ;;  %v4684_v46 = vld [vmem:[#allocation8 + $0x1eb8] sm:$0xff] }
 0x719   :  { %11200 = vmatprep.subr.bf16.mxu1 %v14689_v63 }
 0x71b   :  { %11192 = vmatmul.mubr.bf16.vlgmr.msra.gmra.mrb[36].mxu1 %v17212_v39  ;;  %12865 = vmatpush1.bf16.msra.mxu0 %v16245_v52  ;;  %v14737_v39 = vcombine.high %v4524_v31, %v4532_v16  ;;  %v4612_v52 = vld [vmem:[#allocation8 + $0x1c78] sm:$0xff] }
 0x71c   :  { %11201 = vmatpush1.bf16.msra.mxu1 %v14688_v57  ;;  %11232 = vmatprep.mubr.bf16.mxu1 %v17234_v59  ;;  %v14736_v59 = vcombine.low %v4524_v31, %v4532_v16  ;;  %v16266_v57 = vld [vmem:[#allocation11 + $0x180] ss:$8 sps:$4 sm:$0xff]   ;;  %v14817_v3 = vcombine.high %v4604_v54, %v4612_v52 }
 0x71d   :  { %12866 = vmatprep.subr.bf16.mxu0 %v16250_v58  ;;  %11202 = vmatprep.subr.bf16.mxu1 %v14705_v13  ;;  %v14800_v58 = vcombine.low %v4588_v40, %v4596_v42  ;;  %v16271_v13 = vld [vmem:[#allocation11 + $0x194] ss:$8 sps:$4 sm:$0xff]   ;;  %v4636_v16 = vld [vmem:[#allocation8 + $0x1d38] sm:$0xff]  ;;  %v4752_v42 = vrot.slane %v17319_v56, %v17161_v21 }
 0x71e   :  { %v16286_v40 = vld [vmem:[#allocation11 + $0x1e4] ss:$8 sps:$4 sm:$0xff]  }
 0x71f   :  { %12867 = vmatpush1.bf16.msra.mxu0 %v16248_v7  ;;  %v4628_v7 = vld [vmem:[#allocation8 + $0x1cf8] sm:$0xff] }
 0x720   :  { %11203 = vmatpush1.bf16.msra.mxu1 %v14704_v8  ;;  %12868 = vmatprep.subr.bf16.mxu0 %v16253_v5  ;;  %v16269_v8 = vld [vmem:[#allocation11 + $0x190] ss:$8 sps:$4 sm:$0xff]   ;;  %v14816_v5 = vcombine.low %v4604_v54, %v4612_v52  ;;  %v14833_v31 = vcombine.high %v4620_v6, %v4628_v7  ;;  %v16289_v54 = vld [vmem:[#allocation11 + $0x1f4] ss:$8 sps:$4 sm:$0xff]   ;;  %v15372_v52 = vadd.f32 %v17293_v1, %v4752_v42 }
 0x721   :  { %11204 = vmatprep.subr.bf16.mxu1 %v14721_v12  ;;  %v16274_v12 = vld [vmem:[#allocation11 + $0x1a4] ss:$8 sps:$4 sm:$0xff]   ;;  %v16331_v42 = vld [vmem:[#allocation11 + $0x2d4] ss:$8 sps:$4 sm:$0xff]  }
 0x723   :  { %12869 = vmatpush1.bf16.msra.mxu0 %v16251_v18  ;;  %v4644_v18 = vld [vmem:[#allocation8 + $0x1d78] sm:$0xff] }
 0x724   :  { %11205 = vmatpush1.bf16.msra.mxu1 %v14720_v20  ;;  %12870 = vmatprep.subr.bf16.mxu0 %v16256_v62  ;;  %v16272_v20 = vld [vmem:[#allocation11 + $0x1a0] ss:$8 sps:$4 sm:$0xff]   ;;  %v14832_v62 = vcombine.low %v4620_v6, %v4628_v7  ;;  %v14849_v61 = vcombine.high %v4636_v16, %v4644_v18 }
 0x725   :  { %11206 = vmatprep.subr.bf16.mxu1 %v14737_v39  ;;  %v16277_v39 = vld [vmem:[#allocation11 + $0x1b4] ss:$8 sps:$4 sm:$0xff]  }
 0x727   :  { %12871 = vmatpush1.bf16.msra.mxu0 %v16254_v23  ;;  %v4660_v23 = vld [vmem:[#allocation8 + $0x1df8] sm:$0xff] }
 0x728   :  { %11207 = vmatpush1.bf16.msra.mxu1 %v14736_v59  ;;  %12872 = vmatprep.subr.bf16.mxu0 %v16259_v26  ;;  %v16275_v59 = vld [vmem:[#allocation11 + $0x1b0] ss:$8 sps:$4 sm:$0xff]   ;;  %v14848_v26 = vcombine.low %v4636_v16, %v4644_v18  ;;  %v14865_v28 = vcombine.high %v4652_v0, %v4660_v23  ;;  %v16295_v16 = vld [vmem:[#allocation11 + $0x214] ss:$8 sps:$4 sm:$0xff]  }
 0x729   :  { %11208 = vmatprep.subr.bf16.mxu1 %v14753_v27  ;;  %v16280_v27 = vld [vmem:[#allocation11 + $0x1c4] ss:$8 sps:$4 sm:$0xff]  }
 0x72b   :  { %12873 = vmatpush1.bf16.msra.mxu0 %v16257_v29  ;;  %v4676_v29 = vld [vmem:[#allocation8 + $0x1e78] sm:$0xff] }
 0x72c   :  { %11209 = vmatpush1.bf16.msra.mxu1 %v14752_v24  ;;  %12874 = vmatprep.subr.bf16.mxu0 %v16262_v32  ;;  %v16278_v24 = vld [vmem:[#allocation11 + $0x1c0] ss:$8 sps:$4 sm:$0xff]   ;;  %v14864_v32 = vcombine.low %v4652_v0, %v4660_v23  ;;  %v14881_v44 = vcombine.high %v4668_v10, %v4676_v29  ;;  %v16299_v0 = vld [vmem:[#allocation11 + $0x230] ss:$8 sps:$4 sm:$0xff]   ;;  %v16304_v23 = vld [vmem:[#allocation11 + $0x244] ss:$8 sps:$4 sm:$0xff]  }
 0x72d   :  { %11210 = vmatprep.subr.bf16.mxu1 %v14769_v33  ;;  %v16283_v33 = vld [vmem:[#allocation11 + $0x1d4] ss:$8 sps:$4 sm:$0xff]  }
 0x72e   :  { %v17335_v53 = vpop.f32.mrb[32].mxu1 }
 0x72f   :  { %v17337_v43 = vpop.f32.mrb[33].mxu1  ;;  %12875 = vmatpush1.bf16.msra.mxu0 %v16260_v15  ;;  %v4692_v15 = vld [vmem:[#allocation8 + $0x1ef8] sm:$0xff] }
 0x730   :  { %v10910_v9 = vpop.f32.mrb[34].mxu1  ;;  %11211 = vmatpush1.bf16.msra.mxu1 %v14768_v34  ;;  %12876 = vmatprep.subr.bf16.mxu0 %v16265_v37  ;;  %v16281_v34 = vld [vmem:[#allocation11 + $0x1d0] ss:$8 sps:$4 sm:$0xff]   ;;  %v4740_v37 = vrot.slane %v17319_v56, %v17164_v22 }
 0x731   :  { %v10911_v63 = vpop.f32.mrb[35].mxu1  ;;  %11212 = vmatprep.subr.bf16.mxu1 %v14785_v45  ;;  %v14880_v45 = vcombine.low %v4668_v10, %v4676_v29  ;;  %v4700_v9 = vld [vmem:[#allocation8 + $0x1f38] sm:$0xff]  ;;  %v16311_v29 = vld [vmem:[#allocation11 + $0x270] ss:$8 sps:$4 sm:$0xff]  }
 0x732   :  { %v15369_v63 = vadd.f32 %v17279_v2, %v4740_v37  ;;  %v16308_v10 = vld [vmem:[#allocation11 + $0x260] ss:$8 sps:$4 sm:$0xff]   ;;  %v16323_v37 = vld [vmem:[#allocation11 + $0x2b0] ss:$8 sps:$4 sm:$0xff]  }
 0x733   :  { %12877 = vmatpush1.bf16.msra.mxu0 %v16263_v19  ;;  %v14897_v19 = vcombine.high %v4684_v46, %v4692_v15 }
 0x734   :  { %11213 = vmatpush1.bf16.msra.mxu1 %v14784_v47  ;;  %12878 = vmatprep.subr.bf16.mxu0 %v16268_v36  ;;  %v4708_v47 = vld [vmem:[#allocation8 + $0x1f78] sm:$0xff]  ;;  %v11243_v6 = vmax.f32 %v15369_v63, 0.0 }
 0x735   :  { %11214 = vmatprep.subr.bf16.mxu1 %v14801_v49  ;;  %v16284_v36 = vld [vmem:[#allocation11 + $0x1e0] ss:$8 sps:$4 sm:$0xff]   ;;  %v14896_v49 = vcombine.low %v4684_v46, %v4692_v15  ;;  %v14912_v7 = vcombine.low %v4700_v9, %v4708_v47  ;;  %v16322_v46 = vld [vmem:[#allocation11 + $0x2a4] ss:$8 sps:$4 sm:$0xff]  }
 0x736   :  { %v16320_v15 = vld [vmem:[#allocation11 + $0x2a0] ss:$8 sps:$4 sm:$0xff]  }
 0x737   :  { %12879 = vmatpush1.bf16.msra.mxu0 %v16266_v57  ;;  %v14913_v57 = vcombine.high %v4700_v9, %v4708_v47  ;;  %v4748_v9 = vrot.slane %v17319_v56, %v17199_v17  ;;  %v16334_v47 = vld [vmem:[#allocation11 + $0x2e4] ss:$8 sps:$4 sm:$0xff]   ;;  %v16332_v63 = vld [vmem:[#allocation11 + $0x2e0] ss:$8 sps:$4 sm:$0xff]  }
 0x738   :  { %11215 = vmatpush1.bf16.msra.mxu1 %v14800_v58  ;;  %12880 = vmatprep.subr.bf16.mxu0 %v16271_v13  ;;  %v4716_v58 = vld [vmem:[#allocation8 + $0x1fb8] sm:$0xff] }
 0x739   :  { %11216 = vmatprep.subr.bf16.mxu1 %v14817_v3  ;;  %v4724_v13 = vld [vmem:[#allocation8 + $0x1ff8] sm:$0xff]  ;;  %v16287_v3 = vld [vmem:[#allocation11 + $0x1f0] ss:$8 sps:$4 sm:$0xff]  }
 0x73a   :  { %v14929_v2 = vcombine.high %v4716_v58, %v4724_v13  ;;  %v14928_v1 = vcombine.low %v4716_v58, %v4724_v13  ;;  %v16340_v13 = vld [vmem:[#allocation11 + $0x304] ss:$8 sps:$4 sm:$0xff]  }
 0x73b   :  { %12881 = vmatpush1.bf16.msra.mxu0 %v16269_v8  ;;  %v16292_v8 = vld [vmem:[#allocation11 + $0x204] ss:$8 sps:$4 sm:$0xff]  }
 0x73c   :  { %11217 = vmatpush1.bf16.msra.mxu1 %v14816_v5  ;;  %12882 = vmatprep.subr.bf16.mxu0 %v16274_v12  ;;  %v11246_v5 = vmax.f32 %v15372_v52, 0.0  ;;  %v16290_v12 = vld [vmem:[#allocation11 + $0x200] ss:$8 sps:$4 sm:$0xff]  }
 0x73d   :  { %11218 = vmatprep.subr.bf16.mxu1 %v14833_v31  ;;  %v11259_v31 = vpack.c.bf16 %v11243_v6, %v11243_v6  ;;  %v16338_v6 = vld [vmem:[#allocation11 + $0x300] ss:$8 sps:$4 sm:$0xff]  }
 0x73e   :  { %v11262_v18 = vpack.c.bf16 %v11246_v5, %v11246_v5  ;;  %v16346_v5 = vld [vmem:[#allocation11 + $0x324] ss:$8 sps:$4 sm:$0xff]  }
 0x73f   :  { %12883 = vmatpush1.bf16.msra.mxu0 %v16272_v20  ;;  %v16293_v20 = vld [vmem:[#allocation11 + $0x210] ss:$8 sps:$4 sm:$0xff]  }
 0x740   :  { %11219 = vmatpush1.bf16.msra.mxu1 %v14832_v62  ;;  %12884 = vmatprep.subr.bf16.mxu0 %v16277_v39  ;;  %v16298_v62 = vld [vmem:[#allocation11 + $0x224] ss:$8 sps:$4 sm:$0xff]   ;;  %v16296_v39 = vld [vmem:[#allocation11 + $0x220] ss:$8 sps:$4 sm:$0xff]  }
 0x741   :  { %11220 = vmatprep.subr.bf16.mxu1 %v14849_v61  ;;  %v16301_v61 = vld [vmem:[#allocation11 + $0x234] ss:$8 sps:$4 sm:$0xff]  }
 0x743   :  { %12885 = vmatpush1.bf16.msra.mxu0 %v16275_v59  ;;  %v16302_v59 = vld [vmem:[#allocation11 + $0x240] ss:$8 sps:$4 sm:$0xff]  }
 0x744   :  { %11221 = vmatpush1.bf16.msra.mxu1 %v14848_v26  ;;  %12886 = vmatprep.subr.bf16.mxu0 %v16280_v27  ;;  %v16307_v26 = vld [vmem:[#allocation11 + $0x254] ss:$8 sps:$4 sm:$0xff]   ;;  %v16305_v27 = vld [vmem:[#allocation11 + $0x250] ss:$8 sps:$4 sm:$0xff]  }
 0x745   :  { %11222 = vmatprep.subr.bf16.mxu1 %v14865_v28  ;;  %v16310_v28 = vld [vmem:[#allocation11 + $0x264] ss:$8 sps:$4 sm:$0xff]  }
 0x747   :  { %12887 = vmatpush1.bf16.msra.mxu0 %v16278_v24  ;;  %v16316_v24 = vld [vmem:[#allocation11 + $0x284] ss:$8 sps:$4 sm:$0xff]  }
 0x748   :  { %11223 = vmatpush1.bf16.msra.mxu1 %v14864_v32  ;;  %12888 = vmatprep.subr.bf16.mxu0 %v16283_v33  ;;  %v16314_v32 = vld [vmem:[#allocation11 + $0x280] ss:$8 sps:$4 sm:$0xff]   ;;  %v16319_v33 = vld [vmem:[#allocation11 + $0x294] ss:$8 sps:$4 sm:$0xff]  }
 0x749   :  { %11224 = vmatprep.subr.bf16.mxu1 %v14881_v44  ;;  %v16317_v44 = vld [vmem:[#allocation11 + $0x290] ss:$8 sps:$4 sm:$0xff]  }
 0x74b   :  { %12889 = vmatpush1.bf16.msra.mxu0 %v16281_v34  ;;  %v16325_v34 = vld [vmem:[#allocation11 + $0x2b4] ss:$8 sps:$4 sm:$0xff]  }
 0x74c   :  { %11225 = vmatpush1.bf16.msra.mxu1 %v14880_v45  ;;  %12890 = vmatprep.subr.bf16.mxu0 %v16286_v40  ;;  %v16328_v45 = vld [vmem:[#allocation11 + $0x2c4] ss:$8 sps:$4 sm:$0xff]   ;;  %v16326_v40 = vld [vmem:[#allocation11 + $0x2c0] ss:$8 sps:$4 sm:$0xff]  }
 0x74d   :  { %11226 = vmatprep.subr.bf16.mxu1 %v14897_v19  ;;  %v16329_v19 = vld [vmem:[#allocation11 + $0x2d0] ss:$8 sps:$4 sm:$0xff]  }
 0x74f   :  { %12891 = vmatpush1.bf16.msra.mxu0 %v16284_v36  ;;  %v4760_v36 = vrot.slane %v17319_v56, %v17230_v38 }
 0x750   :  { %11227 = vmatpush1.bf16.msra.mxu1 %v14896_v49  ;;  %12892 = vmatprep.subr.bf16.mxu0 %v16289_v54  ;;  %v15371_v49 = vadd.f32 %v17291_v55, %v4748_v9  ;;  %v16337_v54 = vld [vmem:[#allocation11 + $0x2f4] ss:$8 sps:$4 sm:$0xff]   ;;  %v16341_v55 = vld [vmem:[#allocation11 + $0x310] ss:$8 sps:$4 sm:$0xff]   ;;  %v16380_v9 = vld [vmem:[#allocation11 + $0x3e0] ss:$8 sps:$4 sm:$0xff]  }
 0x751   :  { %11228 = vmatprep.subr.bf16.mxu1 %v14913_v57  ;;  %v15374_v52 = vadd.f32 %v17305_v41, %v4760_v36  ;;  %v16335_v57 = vld [vmem:[#allocation11 + $0x2f0] ss:$8 sps:$4 sm:$0xff]   ;;  %v16344_v41 = vld [vmem:[#allocation11 + $0x320] ss:$8 sps:$4 sm:$0xff]   ;;  %v16385_v36 = vld [vmem:[#allocation11 + $0x3f4] ss:$8 sps:$4 sm:$0xff]  }
 0x752   :  { %v11245_v58 = vmax.f32 %v15371_v49, 0.0  ;;  %v16383_v49 = vld [vmem:[#allocation11 + $0x3f0] ss:$8 sps:$4 sm:$0xff]  }
 0x753   :  { %12893 = vmatpush1.bf16.msra.mxu0 %v16287_v3  ;;  %v11248_v3 = vmax.f32 %v15374_v52, 0.0  ;;  %v16388_v52 = vld [vmem:[#allocation11 + $0x404] ss:$8 sps:$4 sm:$0xff]  }
 0x754   :  { %11229 = vmatpush1.bf16.msra.mxu1 %v14912_v7  ;;  %12903 = vmatprep.subr.bf16.mxu0 %v16292_v8  ;;  %v11261_v7 = vpack.c.bf16 %v11245_v58, %v11245_v58  ;;  %v16343_v8 = vld [vmem:[#allocation11 + $0x314] ss:$8 sps:$4 sm:$0xff]   ;;  %v16386_v58 = vld [vmem:[#allocation11 + $0x400] ss:$8 sps:$4 sm:$0xff]  }
 0x755   :  { %11230 = vmatprep.subr.bf16.mxu1 %v14929_v2  ;;  %v11264_v56 = vpack.c.bf16 %v11248_v3, %v11248_v3  ;;  %v16349_v2 = vld [vmem:[#allocation11 + $0x334] ss:$8 sps:$4 sm:$0xff]  }
 0x756   :  { %12895 = vmatmul.mubr.bf16.vlgmr.msra.gmra.mrb[24].mxu0 %v11259_v31  ;;  %v16352_v31 = vld [vmem:[#allocation11 + $0x344] ss:$8 sps:$4 sm:$0xff]   ;;  %v16391_v3 = vld [vmem:[#allocation11 + $0x414] ss:$8 sps:$4 sm:$0xff]  }
 0x757   :  { %12904 = vmatpush1.bf16.msra.mxu0 %v16290_v12  ;;  %12935 = vmatprep.mubr.bf16.mxu0 %v11262_v18  ;;  %v16347_v12 = vld [vmem:[#allocation11 + $0x330] ss:$8 sps:$4 sm:$0xff]  }
 0x758   :  { %11231 = vmatpush1.bf16.msra.mxu1 %v14928_v1  ;;  %12905 = vmatprep.subr.bf16.mxu0 %v16295_v16  ;;  %v16350_v1 = vld [vmem:[#allocation11 + $0x340] ss:$8 sps:$4 sm:$0xff]   ;;  %v16355_v16 = vld [vmem:[#allocation11 + $0x354] ss:$8 sps:$4 sm:$0xff]   ;;  %v16353_v18 = vld [vmem:[#allocation11 + $0x350] ss:$8 sps:$4 sm:$0xff]  }
 0x75b   :  { %11233 = vmatmul.mubr.bf16.vlgmr.msra.gmra.mrb[36].mxu1 %v17236_v14  ;;  %12906 = vmatpush1.bf16.msra.mxu0 %v16293_v20  ;;  %v16313_v14 = vld [vmem:[#allocation11 + $0x274] ss:$8 sps:$4 sm:$0xff]   ;;  %v16358_v20 = vld [vmem:[#allocation11 + $0x364] ss:$8 sps:$4 sm:$0xff]  }
 0x75c   :  { %12907 = vmatprep.subr.bf16.mxu0 %v16298_v62 }
 0x75f   :  { %12908 = vmatpush1.bf16.msra.mxu0 %v16296_v39 }
 0x760   :  { %12909 = vmatprep.subr.bf16.mxu0 %v16301_v61 }
 0x763   :  { %12910 = vmatpush1.bf16.msra.mxu0 %v16299_v0  ;;  %v16356_v0 = vld [vmem:[#allocation11 + $0x360] ss:$8 sps:$4 sm:$0xff]  }
 0x764   :  { %12911 = vmatprep.subr.bf16.mxu0 %v16304_v23 }
 0x767   :  { %12912 = vmatpush1.bf16.msra.mxu0 %v16302_v59  ;;  %v16361_v59 = vld [vmem:[#allocation11 + $0x374] ss:$8 sps:$4 sm:$0xff]  }
 0x768   :  { %12913 = vmatprep.subr.bf16.mxu0 %v16307_v26  ;;  %v16359_v26 = vld [vmem:[#allocation11 + $0x370] ss:$8 sps:$4 sm:$0xff]  }
 0x76b   :  { %12914 = vmatpush1.bf16.msra.mxu0 %v16305_v27  ;;  %v16364_v27 = vld [vmem:[#allocation11 + $0x384] ss:$8 sps:$4 sm:$0xff]  }
 0x76c   :  { %12915 = vmatprep.subr.bf16.mxu0 %v16310_v28  ;;  %v16362_v28 = vld [vmem:[#allocation11 + $0x380] ss:$8 sps:$4 sm:$0xff]  }
 0x76f   :  { %12916 = vmatpush1.bf16.msra.mxu0 %v16308_v10  ;;  %v16367_v10 = vld [vmem:[#allocation11 + $0x394] ss:$8 sps:$4 sm:$0xff]  }
 0x770   :  { %12917 = vmatprep.subr.bf16.mxu0 %v16313_v14  ;;  %v16365_v14 = vld [vmem:[#allocation11 + $0x390] ss:$8 sps:$4 sm:$0xff]  }
 0x773   :  { %12918 = vmatpush1.bf16.msra.mxu0 %v16311_v29  ;;  %v16370_v29 = vld [vmem:[#allocation11 + $0x3a4] ss:$8 sps:$4 sm:$0xff]  }
 0x774   :  { %12919 = vmatprep.subr.bf16.mxu0 %v16316_v24  ;;  %v16368_v24 = vld [vmem:[#allocation11 + $0x3a0] ss:$8 sps:$4 sm:$0xff]  }
 0x777   :  { %12920 = vmatpush1.bf16.msra.mxu0 %v16314_v32  ;;  %v16373_v32 = vld [vmem:[#allocation11 + $0x3b4] ss:$8 sps:$4 sm:$0xff]  }
 0x778   :  { %12921 = vmatprep.subr.bf16.mxu0 %v16319_v33  ;;  %v16371_v33 = vld [vmem:[#allocation11 + $0x3b0] ss:$8 sps:$4 sm:$0xff]  }
 0x77b   :  { %12922 = vmatpush1.bf16.msra.mxu0 %v16317_v44  ;;  %v16376_v44 = vld [vmem:[#allocation11 + $0x3c4] ss:$8 sps:$4 sm:$0xff]  }
 0x77c   :  { %12923 = vmatprep.subr.bf16.mxu0 %v16322_v46  ;;  %v16374_v46 = vld [vmem:[#allocation11 + $0x3c0] ss:$8 sps:$4 sm:$0xff]  }
 0x77f   :  { %12924 = vmatpush1.bf16.msra.mxu0 %v16320_v15  ;;  %v16379_v15 = vld [vmem:[#allocation11 + $0x3d4] ss:$8 sps:$4 sm:$0xff]  }
 0x780   :  { %12925 = vmatprep.subr.bf16.mxu0 %v16325_v34  ;;  %v17356_v34 = vld [vmem:[#allocation10 + $0x8] sm:$0xff] }
 0x783   :  { %12926 = vmatpush1.bf16.msra.mxu0 %v16323_v37  ;;  %v16377_v37 = vld [vmem:[#allocation11 + $0x3d0] ss:$8 sps:$4 sm:$0xff]  }
 0x784   :  { %12927 = vmatprep.subr.bf16.mxu0 %v16328_v45  ;;  %v16603_v45 = vld [vmem:[#allocation10] sm:$0xff] }
 0x787   :  { %12928 = vmatpush1.bf16.msra.mxu0 %v16326_v40  ;;  %v4756_v40 = vrot.slane %v16603_v45, %v17227_v35  ;;  %v16431_v45 = vld [vmem:[#allocation11 + $0x4f0] ss:$8 sps:$4 sm:$0xff]  }
 0x788   :  { %12929 = vmatprep.subr.bf16.mxu0 %v16331_v42  ;;  %v16382_v42 = vld [vmem:[#allocation11 + $0x3e4] ss:$8 sps:$4 sm:$0xff]  }
 0x78b   :  { %12930 = vmatpush1.bf16.msra.mxu0 %v16329_v19  ;;  %v4768_v19 = vrot.slane %v17356_v34, %v17130_v51 }
 0x78c   :  { %12931 = vmatprep.subr.bf16.mxu0 %v16334_v47  ;;  %v15373_v47 = vadd.f32 %v17303_v50, %v4756_v40  ;;  %v16389_v50 = vld [vmem:[#allocation11 + $0x410] ss:$8 sps:$4 sm:$0xff]  }
 0x78f   :  { %12932 = vmatpush1.bf16.msra.mxu0 %v16332_v63  ;;  %v15376_v63 = vadd.f32 %v17317_v11, %v4768_v19  ;;  %v16392_v11 = vld [vmem:[#allocation11 + $0x420] ss:$8 sps:$4 sm:$0xff]  }
 0x790   :  { %12933 = vmatprep.subr.bf16.mxu0 %v16337_v54  ;;  %v11247_v54 = vmax.f32 %v15373_v47, 0.0 }
 0x793   :  { %12934 = vmatpush1.bf16.msra.mxu0 %v16335_v57  ;;  %v11250_v57 = vmax.f32 %v15376_v63, 0.0  ;;  %v16442_v63 = vld [vmem:[#allocation11 + $0x524] ss:$8 sps:$4 sm:$0xff]  }
 0x794   :  { %12944 = vmatprep.subr.bf16.mxu0 %v16340_v13  ;;  %v11263_v13 = vpack.c.bf16 %v11247_v54, %v11247_v54  ;;  %v16443_v54 = vld [vmem:[#allocation11 + $0x530] ss:$8 sps:$4 sm:$0xff]  }
 0x796   :  { %12936 = vmatmul.mubr.bf16.vlgmr.msra.gmra.mrb[24].mxu0 %v11261_v7  ;;  %v16394_v7 = vld [vmem:[#allocation11 + $0x424] ss:$8 sps:$4 sm:$0xff]  }
 0x797   :  { %12945 = vmatpush1.bf16.msra.mxu0 %v16338_v6  ;;  %12976 = vmatprep.mubr.bf16.mxu0 %v11264_v56  ;;  %v11266_v6 = vpack.c.bf16 %v11250_v57, %v11250_v57  ;;  %v16395_v56 = vld [vmem:[#allocation11 + $0x430] ss:$8 sps:$4 sm:$0xff]   ;;  %v16446_v57 = vld [vmem:[#allocation11 + $0x540] ss:$8 sps:$4 sm:$0xff]  }
 0x798   :  { %12946 = vmatprep.subr.bf16.mxu0 %v16343_v8  ;;  %v16397_v8 = vld [vmem:[#allocation11 + $0x434] ss:$8 sps:$4 sm:$0xff]  }
 0x79b   :  { %12947 = vmatpush1.bf16.msra.mxu0 %v16341_v55  ;;  %v16400_v55 = vld [vmem:[#allocation11 + $0x444] ss:$8 sps:$4 sm:$0xff]  }
 0x79c   :  { %12948 = vmatprep.subr.bf16.mxu0 %v16346_v5  ;;  %v16398_v5 = vld [vmem:[#allocation11 + $0x440] ss:$8 sps:$4 sm:$0xff]  }
 0x79f   :  { %12949 = vmatpush1.bf16.msra.mxu0 %v16344_v41  ;;  %v16403_v41 = vld [vmem:[#allocation11 + $0x454] ss:$8 sps:$4 sm:$0xff]  }
 0x7a0   :  { %12950 = vmatprep.subr.bf16.mxu0 %v16349_v2  ;;  %v16401_v2 = vld [vmem:[#allocation11 + $0x450] ss:$8 sps:$4 sm:$0xff]  }
 0x7a3   :  { %12951 = vmatpush1.bf16.msra.mxu0 %v16347_v12  ;;  %v16406_v12 = vld [vmem:[#allocation11 + $0x464] ss:$8 sps:$4 sm:$0xff]  }
 0x7a4   :  { %12952 = vmatprep.subr.bf16.mxu0 %v16352_v31  ;;  %v16404_v31 = vld [vmem:[#allocation11 + $0x460] ss:$8 sps:$4 sm:$0xff]  }
 0x7a7   :  { %12953 = vmatpush1.bf16.msra.mxu0 %v16350_v1  ;;  %v16409_v1 = vld [vmem:[#allocation11 + $0x474] ss:$8 sps:$4 sm:$0xff]  }
 0x7a8   :  { %12954 = vmatprep.subr.bf16.mxu0 %v16355_v16  ;;  %v16407_v16 = vld [vmem:[#allocation11 + $0x470] ss:$8 sps:$4 sm:$0xff]  }
 0x7a9   :  { %v17352_v62 = vpop.f32.mrb[20].mxu0 }
 0x7aa   :  { %v17354_v39 = vpop.f32.mrb[21].mxu0 }
 0x7ab   :  { %v11074_v61 = vpop.f32.mrb[22].mxu0  ;;  %12955 = vmatpush1.bf16.msra.mxu0 %v16353_v18  ;;  %v16412_v18 = vld [vmem:[#allocation11 + $0x484] ss:$8 sps:$4 sm:$0xff]  }
 0x7ac   :  { %v11075_v23 = vpop.f32.mrb[23].mxu0  ;;  %12956 = vmatprep.subr.bf16.mxu0 %v16358_v20  ;;  %v16410_v20 = vld [vmem:[#allocation11 + $0x480] ss:$8 sps:$4 sm:$0xff]   ;;  %v16415_v61 = vld [vmem:[#allocation11 + $0x494] ss:$8 sps:$4 sm:$0xff]  }
 0x7ad   :  { %v16418_v23 = vld [vmem:[#allocation11 + $0x4a4] ss:$8 sps:$4 sm:$0xff]  }
 0x7af   :  { %12957 = vmatpush1.bf16.msra.mxu0 %v16356_v0  ;;  %v16413_v0 = vld [vmem:[#allocation11 + $0x490] ss:$8 sps:$4 sm:$0xff]  }
 0x7b0   :  { %12958 = vmatprep.subr.bf16.mxu0 %v16361_v59  ;;  %v16416_v59 = vld [vmem:[#allocation11 + $0x4a0] ss:$8 sps:$4 sm:$0xff]  }
 0x7b3   :  { %12959 = vmatpush1.bf16.msra.mxu0 %v16359_v26  ;;  %v16421_v26 = vld [vmem:[#allocation11 + $0x4b4] ss:$8 sps:$4 sm:$0xff]  }
 0x7b4   :  { %12960 = vmatprep.subr.bf16.mxu0 %v16364_v27  ;;  %v16419_v27 = vld [vmem:[#allocation11 + $0x4b0] ss:$8 sps:$4 sm:$0xff]  }
 0x7b7   :  { %12961 = vmatpush1.bf16.msra.mxu0 %v16362_v28  ;;  %v16424_v28 = vld [vmem:[#allocation11 + $0x4c4] ss:$8 sps:$4 sm:$0xff]  }
 0x7b8   :  { %12962 = vmatprep.subr.bf16.mxu0 %v16367_v10  ;;  %v16422_v10 = vld [vmem:[#allocation11 + $0x4c0] ss:$8 sps:$4 sm:$0xff]  }
 0x7bb   :  { %12963 = vmatpush1.bf16.msra.mxu0 %v16365_v14  ;;  %v16427_v14 = vld [vmem:[#allocation11 + $0x4d4] ss:$8 sps:$4 sm:$0xff]  }
 0x7bc   :  { %12964 = vmatprep.subr.bf16.mxu0 %v16370_v29  ;;  %v16425_v29 = vld [vmem:[#allocation11 + $0x4d0] ss:$8 sps:$4 sm:$0xff]  }
 0x7bf   :  { %12965 = vmatpush1.bf16.msra.mxu0 %v16368_v24  ;;  %v4764_v24 = vrot.slane %v17356_v34, %v17125_v48 }
 0x7c0   :  { %12966 = vmatprep.subr.bf16.mxu0 %v16373_v32  ;;  %v16430_v32 = vld [vmem:[#allocation11 + $0x4e4] ss:$8 sps:$4 sm:$0xff]  }
 0x7c3   :  { %12967 = vmatpush1.bf16.msra.mxu0 %v16371_v33  ;;  %v4776_v33 = vrot.slane %v17356_v34, %v17167_v25 }
 0x7c4   :  { %12968 = vmatprep.subr.bf16.mxu0 %v16376_v44  ;;  %v16428_v44 = vld [vmem:[#allocation11 + $0x4e0] ss:$8 sps:$4 sm:$0xff]  }
 0x7c7   :  { %12969 = vmatpush1.bf16.msra.mxu0 %v16374_v46  ;;  %v15375_v46 = vadd.f32 %v17315_v4, %v4764_v24  ;;  %v16437_v4 = vld [vmem:[#allocation11 + $0x510] ss:$8 sps:$4 sm:$0xff]  }
 0x7c8   :  { %12970 = vmatprep.subr.bf16.mxu0 %v16379_v15  ;;  %v16433_v15 = vld [vmem:[#allocation11 + $0x4f4] ss:$8 sps:$4 sm:$0xff]   ;;  %v16479_v24 = vld [vmem:[#allocation11 + $0x5f0] ss:$8 sps:$4 sm:$0xff]  }
 0x7c9   :  { %v11249_v40 = vmax.f32 %v15375_v46, 0.0 }
 0x7cb   :  { %12971 = vmatpush1.bf16.msra.mxu0 %v16377_v37  ;;  %v15378_v37 = vadd.f32 %v17337_v43, %v4776_v33  ;;  %v11265_v47 = vpack.c.bf16 %v11249_v40, %v11249_v40  ;;  %v16440_v43 = vld [vmem:[#allocation11 + $0x520] ss:$8 sps:$4 sm:$0xff]   ;;  %v16484_v33 = vld [vmem:[#allocation11 + $0x604] ss:$8 sps:$4 sm:$0xff]   ;;  %v16485_v40 = vld [vmem:[#allocation11 + $0x610] ss:$8 sps:$4 sm:$0xff]  }
 0x7cc   :  { %12972 = vmatprep.subr.bf16.mxu0 %v16382_v42  ;;  %v16436_v42 = vld [vmem:[#allocation11 + $0x504] ss:$8 sps:$4 sm:$0xff]  }
 0x7cd   :  { %v11252_v19 = vmax.f32 %v15378_v37, 0.0  ;;  %v16578_v37 = vld [vmem:[#allocation14 + $0x40] sm:$0xff]  }
 0x7ce   :  { %15288 = vmatprep.subr.bf16.mxu1 %v16578_v37  ;;  %v16544_v37 = vld [vmem:[#allocation11 + $0x744] ss:$8 sps:$4 sm:$0xff]  }
 0x7cf   :  { %12973 = vmatpush1.bf16.msra.mxu0 %v16380_v9  ;;  %v16434_v9 = vld [vmem:[#allocation11 + $0x500] ss:$8 sps:$4 sm:$0xff]   ;;  %v11268_v25 = vpack.c.bf16 %v11252_v19, %v11252_v19  ;;  %v16582_v19 = vld [vmem:[#allocation14 + $0x50] sm:$0xff]  }
 0x7d0   :  { %12974 = vmatprep.subr.bf16.mxu0 %v16385_v36  ;;  %v16439_v36 = vld [vmem:[#allocation11 + $0x514] ss:$8 sps:$4 sm:$0xff]  }
 0x7d3   :  { %12975 = vmatpush1.bf16.msra.mxu0 %v16383_v49  ;;  %v16445_v49 = vld [vmem:[#allocation11 + $0x534] ss:$8 sps:$4 sm:$0xff]  }
 0x7d4   :  { %12985 = vmatprep.subr.bf16.mxu0 %v16388_v52  ;;  %v16448_v52 = vld [vmem:[#allocation11 + $0x544] ss:$8 sps:$4 sm:$0xff]  }
 0x7d6   :  { %12977 = vmatmul.mubr.bf16.vlgmr.msra.gmra.mrb[24].mxu0 %v11263_v13  ;;  %v16449_v13 = vld [vmem:[#allocation11 + $0x550] ss:$8 sps:$4 sm:$0xff]  }
 0x7d7   :  { %12986 = vmatpush1.bf16.msra.mxu0 %v16386_v58  ;;  %13017 = vmatprep.mubr.bf16.mxu0 %v11266_v6  ;;  %v16451_v58 = vld [vmem:[#allocation11 + $0x554] ss:$8 sps:$4 sm:$0xff]   ;;  %v16452_v6 = vld [vmem:[#allocation11 + $0x560] ss:$8 sps:$4 sm:$0xff]  }
 0x7d8   :  { %12987 = vmatprep.subr.bf16.mxu0 %v16391_v3  ;;  %v16454_v3 = vld [vmem:[#allocation11 + $0x564] ss:$8 sps:$4 sm:$0xff]  }
 0x7db   :  { %12988 = vmatpush1.bf16.msra.mxu0 %v16389_v50  ;;  %v16457_v50 = vld [vmem:[#allocation11 + $0x574] ss:$8 sps:$4 sm:$0xff]  }
 0x7dc   :  { %12989 = vmatprep.subr.bf16.mxu0 %v16394_v7 }
 0x7df   :  { %12990 = vmatpush1.bf16.msra.mxu0 %v16392_v11 }
 0x7e0   :  { %12991 = vmatprep.subr.bf16.mxu0 %v16397_v8  ;;  %v16455_v8 = vld [vmem:[#allocation11 + $0x570] ss:$8 sps:$4 sm:$0xff]  }
 0x7e3   :  { %12992 = vmatpush1.bf16.msra.mxu0 %v16395_v56 }
 0x7e4   :  { %12993 = vmatprep.subr.bf16.mxu0 %v16400_v55  ;;  %v16460_v55 = vld [vmem:[#allocation11 + $0x584] ss:$8 sps:$4 sm:$0xff]  }
 0x7e7   :  { %12994 = vmatpush1.bf16.msra.mxu0 %v16398_v5 }
 0x7e8   :  { %12995 = vmatprep.subr.bf16.mxu0 %v16403_v41  ;;  %v16458_v41 = vld [vmem:[#allocation11 + $0x580] ss:$8 sps:$4 sm:$0xff]  }
 0x7eb   :  { %12996 = vmatpush1.bf16.msra.mxu0 %v16401_v2  ;;  %v16463_v2 = vld [vmem:[#allocation11 + $0x594] ss:$8 sps:$4 sm:$0xff]  }
 0x7ec   :  { %12997 = vmatprep.subr.bf16.mxu0 %v16406_v12  ;;  %v16461_v12 = vld [vmem:[#allocation11 + $0x590] ss:$8 sps:$4 sm:$0xff]  }
 0x7ef   :  { %12998 = vmatpush1.bf16.msra.mxu0 %v16404_v31  ;;  %v16466_v31 = vld [vmem:[#allocation11 + $0x5a4] ss:$8 sps:$4 sm:$0xff]  }
 0x7f0   :  { %12999 = vmatprep.subr.bf16.mxu0 %v16409_v1  ;;  %v16464_v1 = vld [vmem:[#allocation11 + $0x5a0] ss:$8 sps:$4 sm:$0xff]  }
 0x7f3   :  { %13000 = vmatpush1.bf16.msra.mxu0 %v16407_v16  ;;  %v16469_v16 = vld [vmem:[#allocation11 + $0x5b4] ss:$8 sps:$4 sm:$0xff]  }
 0x7f4   :  { %13001 = vmatprep.subr.bf16.mxu0 %v16412_v18  ;;  %v16467_v18 = vld [vmem:[#allocation11 + $0x5b0] ss:$8 sps:$4 sm:$0xff]  }
 0x7f7   :  { %13002 = vmatpush1.bf16.msra.mxu0 %v16410_v20  ;;  %v16472_v20 = vld [vmem:[#allocation11 + $0x5c4] ss:$8 sps:$4 sm:$0xff]  }
 0x7f8   :  { %13003 = vmatprep.subr.bf16.mxu0 %v16415_v61  ;;  %v16470_v61 = vld [vmem:[#allocation11 + $0x5c0] ss:$8 sps:$4 sm:$0xff]  }
 0x7fb   :  { %13004 = vmatpush1.bf16.msra.mxu0 %v16413_v0  ;;  %v16475_v0 = vld [vmem:[#allocation11 + $0x5d4] ss:$8 sps:$4 sm:$0xff]  }
 0x7fc   :  { %13005 = vmatprep.subr.bf16.mxu0 %v16418_v23  ;;  %v16473_v23 = vld [vmem:[#allocation11 + $0x5d0] ss:$8 sps:$4 sm:$0xff]  }
 0x7ff   :  { %13006 = vmatpush1.bf16.msra.mxu0 %v16416_v59  ;;  %v4772_v59 = vrot.slane %v17356_v34, %v17164_v22  ;;  %v16482_v22 = vld [vmem:[#allocation11 + $0x600] ss:$8 sps:$4 sm:$0xff]  }
 0x800   :  { %13007 = vmatprep.subr.bf16.mxu0 %v16421_v26  ;;  %v16478_v26 = vld [vmem:[#allocation11 + $0x5e4] ss:$8 sps:$4 sm:$0xff]  }
 0x803   :  { %13008 = vmatpush1.bf16.msra.mxu0 %v16419_v27  ;;  %v4784_v27 = vrot.slane %v17356_v34, %v17161_v21 }
 0x804   :  { %13009 = vmatprep.subr.bf16.mxu0 %v16424_v28  ;;  %v16476_v28 = vld [vmem:[#allocation11 + $0x5e0] ss:$8 sps:$4 sm:$0xff]  }
 0x807   :  { %13010 = vmatpush1.bf16.msra.mxu0 %v16422_v10  ;;  %v15377_v10 = vadd.f32 %v17335_v53, %v4772_v59  ;;  %v16580_v53 = vld [vmem:[#allocation14 + $0x48] sm:$0xff]  }
 0x808   :  { %13011 = vmatprep.subr.bf16.mxu0 %v16427_v14  ;;  %v16481_v14 = vld [vmem:[#allocation11 + $0x5f4] ss:$8 sps:$4 sm:$0xff]   ;;  %v16526_v59 = vld [vmem:[#allocation11 + $0x6e4] ss:$8 sps:$4 sm:$0xff]  }
 0x80b   :  { %13012 = vmatpush1.bf16.msra.mxu0 %v16425_v29  ;;  %v15380_v29 = vadd.f32 %v17354_v39, %v4784_v27  ;;  %v16490_v39 = vld [vmem:[#allocation11 + $0x624] ss:$8 sps:$4 sm:$0xff]   ;;  %v16524_v27 = vld [vmem:[#allocation11 + $0x6e0] ss:$8 sps:$4 sm:$0xff]  }
 0x80c   :  { %13013 = vmatprep.subr.bf16.mxu0 %v16430_v32  ;;  %v11251_v32 = vmax.f32 %v15377_v10, 0.0  ;;  %v16529_v10 = vld [vmem:[#allocation11 + $0x6f4] ss:$8 sps:$4 sm:$0xff]  }
 0x80e   :  { %v11267_v46 = vpack.c.bf16 %v11251_v32, %v11251_v32  ;;  %v16532_v32 = vld [vmem:[#allocation11 + $0x704] ss:$8 sps:$4 sm:$0xff]  }
 0x80f   :  { %13014 = vmatpush1.bf16.msra.mxu0 %v16428_v44  ;;  %v11254_v44 = vmax.f32 %v15380_v29, 0.0  ;;  %v16527_v29 = vld [vmem:[#allocation11 + $0x6f0] ss:$8 sps:$4 sm:$0xff]  }
 0x810   :  { %13015 = vmatprep.subr.bf16.mxu0 %v16433_v15  ;;  %v16487_v15 = vld [vmem:[#allocation11 + $0x614] ss:$8 sps:$4 sm:$0xff]  }
 0x811   :  { %v11270_v21 = vpack.c.bf16 %v11254_v44, %v11254_v44 }
 0x813   :  { %13016 = vmatpush1.bf16.msra.mxu0 %v16431_v45  ;;  %v16579_v45 = vld [vmem:[#allocation14] sm:$0xff]  }
 0x814   :  { %13026 = vmatprep.subr.bf16.mxu0 %v16436_v42  ;;  %15289 = vmatpush3.bf16.msra.mxu1 %v16579_v45  ;;  %v16581_v42 = vld [vmem:[#allocation14 + $0x8] sm:$0xff]  }
 0x815   :  { %15290 = vmatprep.subr.bf16.mxu1 %v16580_v53  ;;  %v16542_v45 = vld [vmem:[#allocation11 + $0x740] ss:$8 sps:$4 sm:$0xff]   ;;  %v16547_v53 = vld [vmem:[#allocation11 + $0x754] ss:$8 sps:$4 sm:$0xff]  }
 0x816   :  { %13018 = vmatmul.mubr.bf16.vlgmr.msra.gmra.mrb[24].mxu0 %v11265_v47  ;;  %v16493_v47 = vld [vmem:[#allocation11 + $0x634] ss:$8 sps:$4 sm:$0xff]  }
 0x817   :  { %13027 = vmatpush1.bf16.msra.mxu0 %v16434_v9  ;;  %13058 = vmatprep.mubr.bf16.mxu0 %v11268_v25  ;;  %v16488_v9 = vld [vmem:[#allocation11 + $0x620] ss:$8 sps:$4 sm:$0xff]  }
 0x818   :  { %13028 = vmatprep.subr.bf16.mxu0 %v16439_v36  ;;  %15291 = vmatpush3.bf16.msra.mxu1 %v16581_v42  ;;  %v16583_v36 = vld [vmem:[#allocation14 + $0x10] sm:$0xff]   ;;  %v16584_v25 = vld [vmem:[#allocation14 + $0x58] sm:$0xff]  }
 0x819   :  { %15292 = vmatprep.subr.bf16.mxu1 %v16582_v19  ;;  %v16548_v42 = vld [vmem:[#allocation11 + $0x760] ss:$8 sps:$4 sm:$0xff]   ;;  %v16553_v19 = vld [vmem:[#allocation11 + $0x774] ss:$8 sps:$4 sm:$0xff]  }
 0x81b   :  { %13029 = vmatpush1.bf16.msra.mxu0 %v16437_v4  ;;  %v16491_v4 = vld [vmem:[#allocation11 + $0x630] ss:$8 sps:$4 sm:$0xff]  }
 0x81c   :  { %13030 = vmatprep.subr.bf16.mxu0 %v16442_v63  ;;  %v16496_v63 = vld [vmem:[#allocation11 + $0x644] ss:$8 sps:$4 sm:$0xff]   ;;  %15293 = vmatpush3.bf16.msra.mxu1 %v16583_v36  ;;  %v16554_v36 = vld [vmem:[#allocation11 + $0x780] ss:$8 sps:$4 sm:$0xff]  }
 0x81d   :  { %15294 = vmatprep.subr.bf16.mxu1 %v16584_v25  ;;  %v16559_v25 = vld [vmem:[#allocation11 + $0x794] ss:$8 sps:$4 sm:$0xff]  }
 0x81f   :  { %13031 = vmatpush1.bf16.msra.mxu0 %v16440_v43  ;;  %v16585_v43 = vld [vmem:[#allocation14 + $0x18] sm:$0xff]  }
 0x820   :  { %13032 = vmatprep.subr.bf16.mxu0 %v16445_v49  ;;  %v16586_v49 = vld [vmem:[#allocation14 + $0x60] sm:$0xff]   ;;  %15295 = vmatpush3.bf16.msra.mxu1 %v16585_v43 }
 0x821   :  { %15296 = vmatprep.subr.bf16.mxu1 %v16586_v49  ;;  %v16560_v43 = vld [vmem:[#allocation11 + $0x7a0] ss:$8 sps:$4 sm:$0xff]   ;;  %v16565_v49 = vld [vmem:[#allocation11 + $0x7b4] ss:$8 sps:$4 sm:$0xff]  }
 0x823   :  { %13033 = vmatpush1.bf16.msra.mxu0 %v16443_v54  ;;  %v16494_v54 = vld [vmem:[#allocation11 + $0x640] ss:$8 sps:$4 sm:$0xff]  }
 0x824   :  { %13034 = vmatprep.subr.bf16.mxu0 %v16448_v52  ;;  %v16499_v52 = vld [vmem:[#allocation11 + $0x654] ss:$8 sps:$4 sm:$0xff]  }
 0x827   :  { %13035 = vmatpush1.bf16.msra.mxu0 %v16446_v57  ;;  %v16587_v57 = vld [vmem:[#allocation14 + $0x20] sm:$0xff]  }
 0x828   :  { %13036 = vmatprep.subr.bf16.mxu0 %v16451_v58  ;;  %v16588_v58 = vld [vmem:[#allocation14 + $0x68] sm:$0xff]   ;;  %15297 = vmatpush3.bf16.msra.mxu1 %v16587_v57 }
 0x829   :  { %15298 = vmatprep.subr.bf16.mxu1 %v16588_v58  ;;  %v16566_v57 = vld [vmem:[#allocation11 + $0x7c0] ss:$8 sps:$4 sm:$0xff]   ;;  %v16571_v58 = vld [vmem:[#allocation11 + $0x7d4] ss:$8 sps:$4 sm:$0xff]  }
 0x82b   :  { %13037 = vmatpush1.bf16.msra.mxu0 %v16449_v13  ;;  %v16497_v13 = vld [vmem:[#allocation11 + $0x650] ss:$8 sps:$4 sm:$0xff]  }
 0x82c   :  { %13038 = vmatprep.subr.bf16.mxu0 %v16454_v3  ;;  %v16502_v3 = vld [vmem:[#allocation11 + $0x664] ss:$8 sps:$4 sm:$0xff]  }
 0x82e   :  { %v17369_v7 = vpop.f32.mrb[36].mxu1 }
 0x82f   :  { %v17371_v11 = vpop.f32.mrb[37].mxu1  ;;  %13039 = vmatpush1.bf16.msra.mxu0 %v16452_v6  ;;  %v16589_v6 = vld [vmem:[#allocation14 + $0x28] sm:$0xff]  }
 0x830   :  { %v11238_v56 = vpop.f32.mrb[38].mxu1  ;;  %13040 = vmatprep.subr.bf16.mxu0 %v16457_v50  ;;  %v16500_v50 = vld [vmem:[#allocation11 + $0x660] ss:$8 sps:$4 sm:$0xff]   ;;  %15299 = vmatpush3.bf16.msra.mxu1 %v16589_v6  ;;  %v16574_v6 = vld [vmem:[#allocation11 + $0x7e4] ss:$8 sps:$4 sm:$0xff]  }
 0x831   :  { %v11239_v5 = vpop.f32.mrb[39].mxu1  ;;  %v16503_v56 = vld [vmem:[#allocation11 + $0x670] ss:$8 sps:$4 sm:$0xff]  }
 0x832   :  { %v16506_v5 = vld [vmem:[#allocation11 + $0x680] ss:$8 sps:$4 sm:$0xff]  }
 0x833   :  { %13041 = vmatpush1.bf16.msra.mxu0 %v16455_v8  ;;  %v16505_v8 = vld [vmem:[#allocation11 + $0x674] ss:$8 sps:$4 sm:$0xff]  }
 0x834   :  { %13042 = vmatprep.subr.bf16.mxu0 %v16460_v55  ;;  %v16508_v55 = vld [vmem:[#allocation11 + $0x684] ss:$8 sps:$4 sm:$0xff]  }
 0x837   :  { %13043 = vmatpush1.bf16.msra.mxu0 %v16458_v41  ;;  %v16511_v41 = vld [vmem:[#allocation11 + $0x694] ss:$8 sps:$4 sm:$0xff]  }
 0x838   :  { %13044 = vmatprep.subr.bf16.mxu0 %v16463_v2  ;;  %v16509_v2 = vld [vmem:[#allocation11 + $0x690] ss:$8 sps:$4 sm:$0xff]  }
 0x83b   :  { %13045 = vmatpush1.bf16.msra.mxu0 %v16461_v12  ;;  %v16514_v12 = vld [vmem:[#allocation11 + $0x6a4] ss:$8 sps:$4 sm:$0xff]  }
 0x83c   :  { %13046 = vmatprep.subr.bf16.mxu0 %v16466_v31  ;;  %v16512_v31 = vld [vmem:[#allocation11 + $0x6a0] ss:$8 sps:$4 sm:$0xff]  }
 0x83f   :  { %13047 = vmatpush1.bf16.msra.mxu0 %v16464_v1  ;;  %v16517_v1 = vld [vmem:[#allocation11 + $0x6b4] ss:$8 sps:$4 sm:$0xff]  }
 0x840   :  { %13048 = vmatprep.subr.bf16.mxu0 %v16469_v16  ;;  %v16515_v16 = vld [vmem:[#allocation11 + $0x6b0] ss:$8 sps:$4 sm:$0xff]  }
 0x843   :  { %13049 = vmatpush1.bf16.msra.mxu0 %v16467_v18  ;;  %v16520_v18 = vld [vmem:[#allocation11 + $0x6c4] ss:$8 sps:$4 sm:$0xff]  }
 0x844   :  { %13050 = vmatprep.subr.bf16.mxu0 %v16472_v20  ;;  %v16518_v20 = vld [vmem:[#allocation11 + $0x6c0] ss:$8 sps:$4 sm:$0xff]  }
 0x847   :  { %13051 = vmatpush1.bf16.msra.mxu0 %v16470_v61  ;;  %v16523_v61 = vld [vmem:[#allocation11 + $0x6d4] ss:$8 sps:$4 sm:$0xff]  }
 0x848   :  { %13052 = vmatprep.subr.bf16.mxu0 %v16475_v0  ;;  %v16521_v0 = vld [vmem:[#allocation11 + $0x6d0] ss:$8 sps:$4 sm:$0xff]  }
 0x84b   :  { %13053 = vmatpush1.bf16.msra.mxu0 %v16473_v23  ;;  %v4780_v23 = vrot.slane %v17356_v34, %v17199_v17  ;;  %v16530_v17 = vld [vmem:[#allocation11 + $0x700] ss:$8 sps:$4 sm:$0xff]  }
 0x84c   :  { %13054 = vmatprep.subr.bf16.mxu0 %v16478_v26  ;;  %v4792_v26 = vrot.slane %v17356_v34, %v17230_v38 }
 0x84f   :  { %13055 = vmatpush1.bf16.msra.mxu0 %v16476_v28  ;;  %v15379_v28 = vadd.f32 %v17352_v62, %v4780_v23  ;;  %v16533_v62 = vld [vmem:[#allocation11 + $0x710] ss:$8 sps:$4 sm:$0xff]  }
 0x850   :  { %13056 = vmatprep.subr.bf16.mxu0 %v16481_v14  ;;  %v15382_v14 = vadd.f32 %v17371_v11, %v4792_v26  ;;  %v16536_v11 = vld [vmem:[#allocation11 + $0x720] ss:$8 sps:$4 sm:$0xff]  }
 0x853   :  { %13057 = vmatpush1.bf16.msra.mxu0 %v16479_v24  ;;  %v11253_v24 = vmax.f32 %v15379_v28, 0.0  ;;  %v16594_v28 = vld [vmem:[#allocation14 + $0x80] sm:$0xff]  }
 0x854   :  { %13067 = vmatprep.subr.bf16.mxu0 %v16484_v33  ;;  %v11256_v33 = vmax.f32 %v15382_v14, 0.0  ;;  %v16595_v14 = vld [vmem:[#allocation14 + $0x88] sm:$0xff]  }
 0x855   :  { %v11269_v44 = vpack.c.bf16 %v11253_v24, %v11253_v24  ;;  %v16599_v24 = vld [vmem:[#allocation14 + $0xa8] sm:$0xff]  }
 0x856   :  { %13059 = vmatmul.mubr.bf16.vlgmr.msra.gmra.mrb[24].mxu0 %v11267_v46  ;;  %v11272_v38 = vpack.c.bf16 %v11256_v33, %v11256_v33  ;;  %v16538_v46 = vld [vmem:[#allocation11 + $0x724] ss:$8 sps:$4 sm:$0xff]   ;;  %v16601_v33 = vld [vmem:[#allocation14 + $0xb8] sm:$0xff]  }
 0x857   :  { %13068 = vmatpush1.bf16.msra.mxu0 %v16482_v22  ;;  %13099 = vmatprep.mubr.bf16.mxu0 %v11270_v21  ;;  %v16535_v22 = vld [vmem:[#allocation11 + $0x714] ss:$8 sps:$4 sm:$0xff]   ;;  %v16539_v21 = vld [vmem:[#allocation11 + $0x730] ss:$8 sps:$4 sm:$0xff]  }
 0x858   :  { %13069 = vmatprep.subr.bf16.mxu0 %v16487_v15  ;;  %v16541_v15 = vld [vmem:[#allocation11 + $0x734] ss:$8 sps:$4 sm:$0xff]  }
 0x85b   :  { %13070 = vmatpush1.bf16.msra.mxu0 %v16485_v40  ;;  %v16545_v40 = vld [vmem:[#allocation11 + $0x750] ss:$8 sps:$4 sm:$0xff]  }
 0x85c   :  { %13071 = vmatprep.subr.bf16.mxu0 %v16490_v39  ;;  %v16550_v39 = vld [vmem:[#allocation11 + $0x764] ss:$8 sps:$4 sm:$0xff]  }
 0x85f   :  { %13072 = vmatpush1.bf16.msra.mxu0 %v16488_v9  ;;  %v16551_v9 = vld [vmem:[#allocation11 + $0x770] ss:$8 sps:$4 sm:$0xff]  }
 0x860   :  { %13073 = vmatprep.subr.bf16.mxu0 %v16493_v47  ;;  %v16556_v47 = vld [vmem:[#allocation11 + $0x784] ss:$8 sps:$4 sm:$0xff]  }
 0x863   :  { %13074 = vmatpush1.bf16.msra.mxu0 %v16491_v4  ;;  %v16557_v4 = vld [vmem:[#allocation11 + $0x790] ss:$8 sps:$4 sm:$0xff]  }
 0x864   :  { %13075 = vmatprep.subr.bf16.mxu0 %v16496_v63  ;;  %v16562_v63 = vld [vmem:[#allocation11 + $0x7a4] ss:$8 sps:$4 sm:$0xff]  }
 0x867   :  { %13076 = vmatpush1.bf16.msra.mxu0 %v16494_v54  ;;  %v16563_v54 = vld [vmem:[#allocation11 + $0x7b0] ss:$8 sps:$4 sm:$0xff]  }
 0x868   :  { %13077 = vmatprep.subr.bf16.mxu0 %v16499_v52  ;;  %v16568_v52 = vld [vmem:[#allocation11 + $0x7c4] ss:$8 sps:$4 sm:$0xff]  }
 0x86b   :  { %13078 = vmatpush1.bf16.msra.mxu0 %v16497_v13  ;;  %v16569_v13 = vld [vmem:[#allocation11 + $0x7d0] ss:$8 sps:$4 sm:$0xff]  }
 0x86c   :  { %13079 = vmatprep.subr.bf16.mxu0 %v16502_v3  ;;  %v4788_v3 = vrot.slane %v17356_v34, %v17227_v35  ;;  %v16592_v35 = vld [vmem:[#allocation14 + $0x78] sm:$0xff]  }
 0x86d   :  { %v16593_v34 = vld [vmem:[#allocation14 + $0x38] sm:$0xff]  }
 0x86f   :  { %13080 = vmatpush1.bf16.msra.mxu0 %v16500_v50  ;;  %v16572_v50 = vld [vmem:[#allocation11 + $0x7e0] ss:$8 sps:$4 sm:$0xff]  }
 0x870   :  { %13081 = vmatprep.subr.bf16.mxu0 %v16505_v8  ;;  %v15381_v8 = vadd.f32 %v17369_v7, %v4788_v3  ;;  %v11529_v7 = vld [vmem:[#allocation13] sm:$0x3] }
 0x873   :  { %13082 = vmatpush1.bf16.msra.mxu0 %v16503_v56  ;;  %v16577_v56 = vld [vmem:[#allocation11 + $0x7f4] ss:$8 sps:$4 sm:$0xff]  }
 0x874   :  { %13083 = vmatprep.subr.bf16.mxu0 %v16508_v55  ;;  %v16575_v55 = vld [vmem:[#allocation11 + $0x7f0] ss:$8 sps:$4 sm:$0xff]  }
 0x877   :  { %13084 = vmatpush1.bf16.msra.mxu0 %v16506_v5  ;;  %v11255_v5 = vmax.f32 %v15381_v8, 0.0 }
 0x878   :  { %13085 = vmatprep.subr.bf16.mxu0 %v16511_v41 }
 0x879   :  { %v11271_v41 = vpack.c.bf16 %v11255_v5, %v11255_v5 }
 0x87b   :  { %13086 = vmatpush1.bf16.msra.mxu0 %v16509_v2  ;;  %v16590_v2 = vld [vmem:[#allocation14 + $0x70] sm:$0xff]  }
 0x87c   :  { %13087 = vmatprep.subr.bf16.mxu0 %v16514_v12  ;;  %v16591_v12 = vld [vmem:[#allocation14 + $0x30] sm:$0xff]   ;;  %15300 = vmatprep.subr.bf16.mxu1 %v16590_v2 }
 0x87d   :  { %15301 = vmatpush3.bf16.msra.mxu1 %v16591_v12 }
 0x87e   :  { %15302 = vmatprep.subr.bf16.mxu1 %v16592_v35 }
 0x87f   :  { %13088 = vmatpush1.bf16.msra.mxu0 %v16512_v31  ;;  %v11534_v31 = vrot.slane %v11529_v7, %v17125_v48  ;;  %v16596_v48 = vld [vmem:[#allocation14 + $0x90] sm:$0xff]  }
 0x880   :  { %13089 = vmatprep.subr.bf16.mxu0 %v16517_v1  ;;  %v11538_v1 = vrot.slane %v11529_v7, %v17130_v51  ;;  %v16597_v51 = vld [vmem:[#allocation14 + $0x98] sm:$0xff]  }
 0x881   :  { %15303 = vmatpush3.bf16.msra.mxu1 %v16593_v34 }
 0x882   :  { %15339 = vmatprep.subr.bf16.mxu1 %v16854_v60 }
 0x883   :  { %13090 = vmatpush1.bf16.msra.mxu0 %v16515_v16 }
 0x884   :  { %13091 = vmatprep.subr.bf16.mxu0 %v16520_v18 }
 0x887   :  { %13092 = vmatpush1.bf16.msra.mxu0 %v16518_v20 }
 0x888   :  { %13093 = vmatprep.subr.bf16.mxu0 %v16523_v61 }
 0x88b   :  { %13094 = vmatpush1.bf16.msra.mxu0 %v16521_v0 }
 0x88c   :  { %13095 = vmatprep.subr.bf16.mxu0 %v16526_v59 }
 0x88f   :  { %13096 = vmatpush1.bf16.msra.mxu0 %v16524_v27 }
 0x890   :  { %13097 = vmatprep.subr.bf16.mxu0 %v16529_v10 }
 0x893   :  { %13098 = vmatpush1.bf16.msra.mxu0 %v16527_v29  ;;  %v16598_v29 = vld [vmem:[#allocation14 + $0xa0] sm:$0xff]  }
 0x894   :  { %13108 = vmatprep.subr.bf16.mxu0 %v16532_v32  ;;  %v16600_v32 = vld [vmem:[#allocation14 + $0xb0] sm:$0xff]  }
 0x896   :  { %13100 = vmatmul.mubr.bf16.vlgmr.msra.gmra.mrb[24].mxu0 %v11269_v44 }
 0x897   :  { %13109 = vmatpush1.bf16.msra.mxu0 %v16530_v17  ;;  %13140 = vmatprep.mubr.bf16.mxu0 %v11272_v38  ;;  %v3699_v17 = vmax.f32 %v17257_v30, 0.0 }
 0x898   :  { %13110 = vmatprep.subr.bf16.mxu0 %v16535_v22 }
 0x899   :  { %v3700_v44 = vpack.c.bf16 %v3699_v17, %v3699_v17 }
 0x89b   :  { %13111 = vmatpush1.bf16.msra.mxu0 %v16533_v62 }
 0x89c   :  { %13112 = vmatprep.subr.bf16.mxu0 %v16538_v46 }
 0x89f   :  { %13113 = vmatpush1.bf16.msra.mxu0 %v16536_v11 }
 0x8a0   :  { %13114 = vmatprep.subr.bf16.mxu0 %v16541_v15  ;;  %v15186_v15 = vld [vmem:[#allocation16] ss:$0 sm:$0xff] }
 0x8a3   :  { %13115 = vmatpush1.bf16.msra.mxu0 %v16539_v21 }
 0x8a4   :  { %13116 = vmatprep.subr.bf16.mxu0 %v16544_v37 }
 0x8a7   :  { %13117 = vmatpush1.bf16.msra.mxu0 %v16542_v45 }
 0x8a8   :  { %13118 = vmatprep.subr.bf16.mxu0 %v16547_v53 }
 0x8ab   :  { %13119 = vmatpush1.bf16.msra.mxu0 %v16545_v40 }
 0x8ac   :  { %13120 = vmatprep.subr.bf16.mxu0 %v16550_v39  ;;  %v15211_v39 = vld [vmem:[#allocation17] ss:$0 sm:$0xff] }
 0x8af   :  { %13121 = vmatpush1.bf16.msra.mxu0 %v16548_v42 }
 0x8b0   :  { %13122 = vmatprep.subr.bf16.mxu0 %v16553_v19 }
 0x8b3   :  { %13123 = vmatpush1.bf16.msra.mxu0 %v16551_v9  ;;  %v15212_v9 = vld [vmem:[#allocation2] ss:$0 sm:$0xff] }
 0x8b4   :  { %13124 = vmatprep.subr.bf16.mxu0 %v16556_v47 }
 0x8b7   :  { %13125 = vmatpush1.bf16.msra.mxu0 %v16554_v36 }
 0x8b8   :  { %13126 = vmatprep.subr.bf16.mxu0 %v16559_v25 }
 0x8bb   :  { %13127 = vmatpush1.bf16.msra.mxu0 %v16557_v4 }
 0x8bc   :  { %13128 = vmatprep.subr.bf16.mxu0 %v16562_v63 }
 0x8bf   :  { %13129 = vmatpush1.bf16.msra.mxu0 %v16560_v43 }
 0x8c0   :  { %13130 = vmatprep.subr.bf16.mxu0 %v16565_v49 }
 0x8c3   :  { %13131 = vmatpush1.bf16.msra.mxu0 %v16563_v54 }
 0x8c4   :  { %13132 = vmatprep.subr.bf16.mxu0 %v16568_v52 }
 0x8c7   :  { %13133 = vmatpush1.bf16.msra.mxu0 %v16566_v57 }
 0x8c8   :  { %13134 = vmatprep.subr.bf16.mxu0 %v16571_v58 }
 0x8cb   :  { %13135 = vmatpush1.bf16.msra.mxu0 %v16569_v13 }
 0x8cc   :  { %13136 = vmatprep.subr.bf16.mxu0 %v16574_v6 }
 0x8cf   :  { %13137 = vmatpush1.bf16.msra.mxu0 %v16572_v50 }
 0x8d0   :  { %13138 = vmatprep.subr.bf16.mxu0 %v16577_v56 }
 0x8d3   :  { %13139 = vmatpush1.bf16.msra.mxu0 %v16575_v55 }
 0x8d6   :  { %13141 = vmatmul.mubr.bf16.vlgmr.msra.gmra.mrb[24].mxu0 %v11271_v41 }
 0x9a9   :  { %v13142_v16 = vpop.f32.mrb[24].mxu0 }
 0x9aa   :  { %v15383_v18 = vadd.f32 %v13142_v16, %v11534_v31  ;;  %v13144_v20 = vpop.f32.mrb[25].mxu0 }
 0x9ab   :  { %v15384_v61 = vadd.f32 %v13144_v20, %v11538_v1  ;;  %v13146_v0 = vpop.f32.mrb[26].mxu0 }
 0x9ac   :  { %v13149_v23 = vmax.f32 %v15383_v18, 0.0  ;;  %v13147_v59 = vpop.f32.mrb[27].mxu0 }
 0x9ad   :  { %v13150_v26 = vmax.f32 %v15384_v61, 0.0 }
 0x9ae   :  { %v13151_v10 = vpack.c.bf16 %v13149_v23, %v13149_v23 }
 0x9af   :  { %v13152_v27 = vpack.c.bf16 %v13150_v26, %v13150_v26 }
 0x9b1   :  { %13384 = vmatprep.mubr.bf16.mxu1 %v13152_v27 }
 0x9b2   :  { %13385 = vmatmul.mubr.bf16.vlgmr.msra.gmra.mrb[40].mxu1 %v13151_v10 }
 0x9b3   :  { %15340 = vmatpush3.bf16.msra.mxu1 %v16594_v28  ;;  %15355 = vmatprep.mubr.msk.bf16.mxu1 %vm16855_vm0, %v16854_v60 }
 0x9b4   :  { %15341 = vmatprep.subr.bf16.mxu1 %v16854_v60 }
 0x9b7   :  { %15342 = vmatpush3.bf16.msra.mxu1 %v16595_v14 }
 0x9b8   :  { %15343 = vmatprep.subr.bf16.mxu1 %v16854_v60 }
 0x9bb   :  { %15344 = vmatpush3.bf16.msra.mxu1 %v16596_v48 }
 0x9bc   :  { %15345 = vmatprep.subr.bf16.mxu1 %v16854_v60 }
 0x9bf   :  { %15346 = vmatpush3.bf16.msra.mxu1 %v16597_v51 }
 0x9c0   :  { %15347 = vmatprep.subr.bf16.mxu1 %v16854_v60 }
 0x9c3   :  { %15348 = vmatpush3.bf16.msra.mxu1 %v16598_v29 }
 0x9c4   :  { %15349 = vmatprep.subr.bf16.mxu1 %v16854_v60 }
 0x9c7   :  { %15350 = vmatpush3.bf16.msra.mxu1 %v16599_v24 }
 0x9c8   :  { %15351 = vmatprep.subr.bf16.mxu1 %v16854_v60 }
 0x9cb   :  { %15352 = vmatpush3.bf16.msra.mxu1 %v16600_v32 }
 0x9cc   :  { %15353 = vmatprep.subr.bf16.mxu1 %v16854_v60 }
 0x9cf   :  { %15354 = vmatpush3.bf16.msra.mxu1 %v16601_v33 }
 0x9d2   :  { %15356 = vmatmul.mubr.bf16.vlgmr.msra.gmra.mrb[44].mxu1 %v3700_v44 }
 0xa85   :  { %v15304_v22 = vpop.f32.mrb[40].mxu1 }
 0xa86   :  { %v15305_v38 = vpop.f32.mrb[41].mxu1 }
 0xa87   :  { %v15306_v62 = vadd.f32 %v15305_v38, %v15304_v22  ;;  %v15307_v46 = vpop.f32.mrb[42].mxu1 }
 0xa88   :  { %v15308_v11 = vpop.f32.mrb[43].mxu1 }
 0xa89   :  { %v13387_v21 = vadd.f32 %v15306_v62, %v15186_v15 }
 0xaa5   :  { %v13426_v37 = vpop.f32.mrb[44].mxu1 }
 0xaa6   :  { %v13427_v45 = vadd.f32 %v13426_v37, %v13387_v21  ;;  %v15357_v53 = vpop.f32.mrb[45].mxu1 }
 0xaa7   :  { %v13429_v40 = vpop.f32.mrb[46].mxu1 }
 0xaa8   :  { %v13432_v42 = vmax.f32 %v13427_v45, 0.0  ;;  %v15358_v19 = vpop.f32.mrb[47].mxu1 }
 0xaaa   :  { %v13440_v30 = vmul.f32 %v15211_v39, %v13432_v42 }
 0xaac   :  { %v13442_v60 = vsel %vm13441_vm1, %v13440_v30, 0.0 }
 0xaad   :  { %13443 = vadd.xlane.f32.xlu0 %v13442_v60 }
 0xb3a   :  { %v13444_v47 = vpop.xlane.xlu0 %13443 }
 0xb3b   :  { %v13452_v36 = vadd.f32 %v15212_v9, %v13444_v47 }
 0xb3d   :  { %13454 = vst.msk [vmem:[%s17417_s13] sm:$0x3] %vm13453_vm2, %v13452_v36 }
 0xb3e   :  { %13459 = vsyncpa [#allocation4], 1 }
 0xb3f   :  { %13460 = vsyncpa [#allocation6], 1 }
 0xb40   :  { %13461 = vsyncpa [#allocation9], 1 }
 0xb41   :  { %13462 = vsyncpa [#allocation12], 1 }
 0xb42   :  { %13463 = vsyncpa [#allocation15], 1 }
 0xb43   :  { %13464 = vsyncpa [#allocation18], 1 }

</bundles_post_ra>
